<compile_context>
chip_gen: v7x
topology: tpu7x:2x2x1
jax: 0.10.0
libtpu: 0.0.40
codegen_flags: <defaults>
</compile_context>

<pallas_src>
import functools

import jax
import jax.numpy as jnp
from jax.experimental import pallas as pl
from jax.experimental.pallas import tpu as pltpu


# ----------------------------------------------------------------- tiling ---

# Tile ceilings. Double-buffered worst case here is only a few MiB, well under
# the default scoped VMEM on v5e/v6e/v7x. (v6e could go larger, e.g. tm=512+;
# keep tiles modest so the same config is safe on v7x's 64 MiB VMEM.)
_TM_MAX = 256      # rows per block (sublane dim)
_TN_MAX = 256      # output channels per block (lane dim, 128-dense)
_K_SINGLE = 1024   # keep K un-tiled (single reduction step) up to this size
_TK = 384          # K tile when tiling the reduction (multiple of 128)


def _round_up(x, m):
    return (x + m - 1) // m * m


# ---------------------------------------------------------------- kernels ---

def _make_matmul_kernel(has_affine, relu, has_skip, sigmoid):
    """Tiled matmul with f32 accumulator and a fused epilogue.

    Epilogue (applied on the last K step): optional per-out-channel affine
    (folded BatchNorm), optional ReLU, optional residual add, optional sigmoid.
    """

    def kernel(*refs):
        a_ref, b_ref = refs[0], refs[1]
        idx = 2
        if has_affine:
            scale_ref, shift_ref = refs[idx], refs[idx + 1]
            idx += 2
        if has_skip:
            skip_ref = refs[idx]
            idx += 1
        o_ref, acc_ref = refs[idx], refs[idx + 1]

        @pl.when(pl.program_id(2) == 0)
        def _init():
            acc_ref[...] = jnp.zeros_like(acc_ref)

        acc_ref[...] += jnp.dot(a_ref[...], b_ref[...],
                                preferred_element_type=jnp.float32)

        @pl.when(pl.program_id(2) == pl.num_programs(2) - 1)
        def _finalize():
            y = acc_ref[...]
            if has_affine:
                y = y * scale_ref[...] + shift_ref[...]
            if relu:
                y = jnp.maximum(y, 0.0)
            if has_skip:
                y = y + skip_ref[...]
            if sigmoid:
                y = jax.nn.sigmoid(y)
            o_ref[...] = y.astype(o_ref.dtype)

    return kernel


def _bn_relu_kernel(x_ref, scale_ref, shift_ref, o_ref):
    y = x_ref[...].astype(jnp.float32) * scale_ref[...] + shift_ref[...]
    o_ref[...] = jnp.maximum(y, 0.0).astype(o_ref.dtype)


# --------------------------------------------------------------- wrappers ---

def fused_matmul(a, b, *, scale=None, shift=None, relu=False, skip=None,
                 sigmoid=False, out_dtype=jnp.float32):
    """(M, K) @ (K, N) on the MXU (bf16 in, f32 acc) with fused epilogue.

    scale/shift: per-output-channel (N,) affine, skip: (M, N) residual.
    """
    M, K = a.shape
    K2, N = b.shape
    assert K == K2
    has_affine = scale is not None
    has_skip = skip is not None

    # Tile sizes / padded shapes.
    tm = min(_round_up(M, 16), _TM_MAX)
    Mp = _round_up(M, tm)
    Np = _round_up(N, 128)                 # lane-dense outputs (unmasked vst)
    tn = min(Np, _TN_MAX)
    if Np % tn:
        tn = 128
    if K <= _K_SINGLE:
        Kp = _round_up(K, 16)              # no 128-padding of the reduction
        tk = Kp
    else:
        tk = _TK if K % _TK == 0 else 512
        Kp = _round_up(K, tk)

    a_p = a.astype(jnp.bfloat16)
    if (Mp, Kp) != (M, K):
        a_p = jnp.pad(a_p, ((0, Mp - M), (0, Kp - K)))
    b_p = b.astype(jnp.bfloat16)
    if (Kp, Np) != (K, N):
        b_p = jnp.pad(b_p, ((0, Kp - K), (0, Np - N)))

    in_specs = [pl.BlockSpec((tm, tk), lambda i, j, k: (i, k)),
                pl.BlockSpec((tk, tn), lambda i, j, k: (k, j))]
    args = [a_p, b_p]
    if has_affine:
        sc = jnp.pad(scale.astype(jnp.float32), (0, Np - N)).reshape(1, Np)
        sh = jnp.pad(shift.astype(jnp.float32), (0, Np - N)).reshape(1, Np)
        in_specs += [pl.BlockSpec((1, tn), lambda i, j, k: (0, j)),
                     pl.BlockSpec((1, tn), lambda i, j, k: (0, j))]
        args += [sc, sh]
    if has_skip:
        sk = skip.astype(jnp.float32)
        if (Mp, Np) != (M, N):
            sk = jnp.pad(sk, ((0, Mp - M), (0, Np - N)))
        in_specs.append(pl.BlockSpec((tm, tn), lambda i, j, k: (i, j)))
        args.append(sk)

    kernel = _make_matmul_kernel(has_affine, relu, has_skip, sigmoid)

    out = pl.pallas_call(
        kernel,
        out_shape=jax.ShapeDtypeStruct((Mp, Np), out_dtype),
        grid_spec=pltpu.PrefetchScalarGridSpec(
            num_scalar_prefetch=0,
            grid=(Mp // tm, Np // tn, Kp // tk),
            in_specs=in_specs,
            out_specs=pl.BlockSpec((tm, tn), lambda i, j, k: (i, j)),
            scratch_shapes=[pltpu.VMEM((tm, tn), jnp.float32)]),
        compiler_params=pltpu.CompilerParams(
            dimension_semantics=("parallel", "parallel", "arbitrary")),
    )(*args)
    return out[:M, :N]


def pallas_bn_relu(x, scale, shift, out_dtype=jnp.bfloat16):
    """x: (N,H,W,C); per-channel y = relu(x * scale + shift), emitted in bf16."""
    N, H, W, C = x.shape
    M = N * H * W
    x2 = x.reshape(M, C)
    Cp = _round_up(C, 128)
    tm = min(_round_up(M, 16), 1024)
    Mp = _round_up(M, tm)
    if (Mp, Cp) != (M, C):
        x2 = jnp.pad(x2, ((0, Mp - M), (0, Cp - C)))
    sc = jnp.pad(scale.astype(jnp.float32), (0, Cp - C)).reshape(1, Cp)
    sh = jnp.pad(shift.astype(jnp.float32), (0, Cp - C)).reshape(1, Cp)
    out = pl.pallas_call(
        _bn_relu_kernel,
        out_shape=jax.ShapeDtypeStruct((Mp, Cp), out_dtype),
        grid=(Mp // tm,),
        in_specs=[pl.BlockSpec((tm, Cp), lambda i: (i, 0)),
                  pl.BlockSpec((1, Cp), lambda i: (0, 0)),
                  pl.BlockSpec((1, Cp), lambda i: (0, 0))],
        out_specs=pl.BlockSpec((tm, Cp), lambda i: (i, 0)),
        compiler_params=pltpu.CompilerParams(
            dimension_semantics=("parallel",)),
    )(x2, sc, sh)
    return out[:M, :C].reshape(N, H, W, C)


# ------------------------------------------------------- conv via im2col ----

def conv3x3_pallas(x, w, stride, **epilogue):
    """x: (N,H,W,Cin) NHWC, w: (3,3,Cin,Cout); padding=1, no bias.

    im2col (bf16) + fused Pallas matmul. Epilogue kwargs forwarded.
    """
    N, H, W, C = x.shape
    Cout = w.shape[-1]
    xp = jnp.pad(x, ((0, 0), (1, 1), (1, 1), (0, 0)))
    Ho = (H + 2 - 3) // stride + 1
    Wo = (W + 2 - 3) // stride + 1
    cols = []
    for ky in range(3):
        for kx in range(3):
            cols.append(
                xp[:, ky:ky + stride * (Ho - 1) + 1:stride,
                      kx:kx + stride * (Wo - 1) + 1:stride, :])
    # (N, Ho, Wo, 9*C), tap-major along channels (matches w.reshape(9*C, Cout))
    patches = jnp.concatenate(cols, axis=-1).astype(jnp.bfloat16)
    patches = patches.reshape(N * Ho * Wo, 9 * C)
    # TODO(synk): the 9x im2col patch tensor is still materialized (in bf16)
    # by XLA glue rather than being accumulated tap-by-tap inside the kernel.
    out = fused_matmul(patches, w.reshape(9 * C, Cout), **epilogue)
    return out.reshape(N, Ho, Wo, Cout)


def conv1x1_pallas(x, w, stride, **epilogue):
    """x: (N,H,W,Cin), w: (1,1,Cin,Cout); no padding, no bias."""
    x = x[:, ::stride, ::stride, :]
    N, Ho, Wo, C = x.shape
    Cout = w.shape[-1]
    out = fused_matmul(x.reshape(N * Ho * Wo, C), w.reshape(C, Cout),
                       **epilogue)
    return out.reshape(N, Ho, Wo, Cout)


def upsample_nearest(x, s):
    return jnp.repeat(jnp.repeat(x, s, axis=1), s, axis=2)


def avg_pool2d(x, s):
    N, H, W, C = x.shape
    return x.reshape(N, H // s, s, W // s, s, C).mean(axis=(2, 4))


# ------------------------------------------------------------ model glue ----

def model_config(in_channels=1, out_channels=1, depth=16, k=4):
    assert (depth - 6) % 10 == 0, "depth should be 10n+6"
    n = (depth - 6) // 10
    stages = [16, 16 * k, 32 * k, 64 * k, 64 * k, 64 * k]
    blocks = []
    enc = [(stages[0], stages[1], 1), (stages[1], stages[2], 2),
           (stages[2], stages[3], 2), (stages[3], stages[4], 2)]
    for in_c, out_c, stride in enc:
        blocks.append((in_c, out_c, stride, 'down'))
        for _ in range(2, n + 1):
            blocks.append((out_c, out_c, 1, 'down'))
    dec = [(stages[4], stages[1], 2), (stages[1], stages[0], 2),
           (stages[0], out_channels, 2)]
    for in_c, out_c, stride in dec:
        blocks.append((in_c, out_c, stride, 'up'))
    return stages, blocks


def init_bn(key, c):
    # BatchNorm2d in inference mode, folded into per-channel scale/shift.
    k1, k2, k3, k4 = jax.random.split(key, 4)
    gamma = jax.random.uniform(k1, (c,), jnp.float32, 0.8, 1.2)
    beta = 0.1 * jax.random.normal(k2, (c,), jnp.float32)
    mean = 0.1 * jax.random.normal(k3, (c,), jnp.float32)
    var = jax.random.uniform(k4, (c,), jnp.float32, 0.8, 1.2)
    scale = gamma / jnp.sqrt(var + 1e-5)
    shift = beta - mean * scale
    return scale, shift


def init_params(key, in_channels=1, out_channels=1, depth=16, k=4):
    stages, blocks = model_config(in_channels, out_channels, depth, k)
    keys = jax.random.split(key, len(blocks) + 1)
    params = {
        'stem': 0.1 * jax.random.normal(keys[0], (3, 3, in_channels, stages[0]),
                                        jnp.float32),
        'blocks': [],
    }
    for bkey, (in_c, out_c, _stride, _direction) in zip(keys[1:], blocks):
        k1, k2, k3, k4, k5 = jax.random.split(bkey, 5)
        bp = {
            'bn1': init_bn(k1, in_c),
            'w1': 0.1 * jax.random.normal(k2, (3, 3, in_c, out_c), jnp.float32),
            'bn2': init_bn(k3, out_c),
            'w2': 0.1 * jax.random.normal(k4, (3, 3, out_c, out_c), jnp.float32),
        }
        if in_c != out_c:
            bp['w_skip'] = 0.1 * jax.random.normal(k5, (1, 1, in_c, out_c),
                                                   jnp.float32)
        params['blocks'].append(bp)
    return params, blocks


def wrn_block(x, bp, in_c, out_c, stride, direction, final_sigmoid=False):
    bn1_scale, bn1_shift = bp['bn1']
    bn2_scale, bn2_shift = bp['bn2']

    # Pre-activation (BN1 + ReLU). Used by conv1 always, and by the 1x1 skip
    # conv when channels change (matches the PyTorch forward).
    x_act = pallas_bn_relu(x, bn1_scale, bn1_shift)

    conv1_stride = stride if direction == 'down' else 1
    # BN2 + ReLU fused into conv1's epilogue. For the 'up' direction the
    # reference applies BN2+ReLU *after* the nearest upsample, but a per-
    # channel affine + ReLU commutes with nearest-neighbour replication, so
    # the fusion is exact.
    out = conv3x3_pallas(x_act, bp['w1'], conv1_stride,
                         scale=bn2_scale, shift=bn2_shift, relu=True,
                         out_dtype=jnp.bfloat16)
    if direction == 'up' and stride > 1:
        out = upsample_nearest(out, stride)
    # dropout p=0.0 -> identity

    # Skip path.
    if in_c != out_c:
        skip_stride = 1 if direction == 'up' else stride
        sc = conv1x1_pallas(x_act, bp['w_skip'], skip_stride,
                            out_dtype=jnp.float32)
        if direction == 'up' and stride > 1:
            sc = upsample_nearest(sc, stride)
    elif stride == 1:
        sc = x
    elif direction == 'up':
        sc = upsample_nearest(x, stride)
    else:
        sc = avg_pool2d(x, stride)

    # conv2 with the residual add (and, for the final block, the model-level
    # sigmoid) fused into its epilogue.
    Nb, Ho, Wo, _ = out.shape
    sc2 = sc.astype(jnp.float32).reshape(Nb * Ho * Wo, out_c)
    y = conv3x3_pallas(out, bp['w2'], 1, skip=sc2, sigmoid=final_sigmoid,
                       out_dtype=jnp.float32)
    return y


def wide_resnet_ae_forward(params, blocks, x_nchw):
    # NCHW (PyTorch) -> NHWC (kernel layout)
    x = jnp.transpose(x_nchw.astype(jnp.float32), (0, 2, 3, 1))
    x = conv3x3_pallas(x, params['stem'], 1, out_dtype=jnp.float32)
    n_blocks = len(blocks)
    for i, (bp, (in_c, out_c, stride, direction)) in enumerate(
            zip(params['blocks'], blocks)):
        x = wrn_block(x, bp, in_c, out_c, stride, direction,
                      final_sigmoid=(i == n_blocks - 1))
    return jnp.transpose(x, (0, 3, 1, 2))  # back to NCHW


# TODO(synk): BatchNorm implemented in inference mode (running stats folded to
# affine); PyTorch training-mode batch statistics are not reproduced.

if __name__ == "__main__":
    key = jax.random.PRNGKey(0)
    pkey, xkey = jax.random.split(key)
    params, blocks = init_params(pkey, in_channels=1, out_channels=1,
                                 depth=16, k=4)
    # Small input consistent with the module (NCHW); spatial 16 so three
    # stride-2 downs (16->8->4->2) and three stride-2 ups (2->4->8->16) work.
    x = jax.random.normal(xkey, (2, 1, 16, 16), jnp.float32)

    fwd = jax.jit(functools.partial(wide_resnet_ae_forward, params, blocks))
    y = fwd(x)
    jax.block_until_ready(y)

    assert y.shape == (2, 1, 16, 16), y.shape
    assert bool(jnp.all(jnp.isfinite(y)))
    assert bool(jnp.all((y >= 0.0) & (y <= 1.0)))
    print("KERNEL_OK")
</pallas_src>

<mosaic_0001>
module attributes {stable_mosaic.version = 11 : i64} {
  func.func @_bn_relu_kernel(%arg0: i32, %arg1: memref<512x128xf32, #tpu.memory_space<vmem>>, %arg2: memref<1x128xf32, #tpu.memory_space<vmem>>, %arg3: memref<1x128xf32, #tpu.memory_space<vmem>>, %arg4: memref<512x128xbf16, #tpu.memory_space<vmem>>) attributes {dimension_semantics = [#tpu.dimension_semantics<parallel>], iteration_bounds = array<i64: 1>, scalar_prefetch = 0 : i64, scratch_operands = 0 : i64, tpu.core_type = #tpu.core_type<tc>, window_params = [{transform_indices = @transform_0, window_bounds = array<i64: 512, 128>}, {pipeline_mode = #tpu.pipeline_mode<synchronous>, transform_indices = @transform_1, window_bounds = array<i64: 1, 128>}, {pipeline_mode = #tpu.pipeline_mode<synchronous>, transform_indices = @transform_2, window_bounds = array<i64: 1, 128>}, {transform_indices = @transform_3, window_bounds = array<i64: 512, 128>}]} {
    %c0 = arith.constant 0 : index
    %c0_0 = arith.constant 0 : index
    %0 = vector.load %arg1[%c0, %c0_0] : memref<512x128xf32, #tpu.memory_space<vmem>>, vector<512x128xf32>
    %c0_1 = arith.constant 0 : index
    %c0_2 = arith.constant 0 : index
    %1 = vector.load %arg2[%c0_1, %c0_2] : memref<1x128xf32, #tpu.memory_space<vmem>>, vector<1x128xf32>
    %2 = vector.broadcast %1 : vector<1x128xf32> to vector<512x128xf32>
    %3 = arith.mulf %0, %2 : vector<512x128xf32>
    %c0_3 = arith.constant 0 : index
    %c0_4 = arith.constant 0 : index
    %4 = vector.load %arg3[%c0_3, %c0_4] : memref<1x128xf32, #tpu.memory_space<vmem>>, vector<1x128xf32>
    %5 = vector.broadcast %4 : vector<1x128xf32> to vector<512x128xf32>
    %6 = arith.addf %3, %5 : vector<512x128xf32>
    %cst = arith.constant 0.000000e+00 : f32
    %7 = vector.broadcast %cst : f32 to vector<512x128xf32>
    %8 = arith.maximumf %6, %7 : vector<512x128xf32>
    %9 = arith.truncf %8 : vector<512x128xf32> to vector<512x128xbf16>
    %c0_5 = arith.constant 0 : index
    %c0_6 = arith.constant 0 : index
    %10 = vector.load %arg4[%c0_5, %c0_6] : memref<512x128xbf16, #tpu.memory_space<vmem>>, vector<512x128xbf16>
    tpu.vector_store %arg4[%c0_5, %c0_6], %9 {strides = array<i32>} : memref<512x128xbf16, #tpu.memory_space<vmem>>, vector<512x128xbf16>,
    return
  }
  func.func @transform_0(%arg0: i32) -> (i32, i32) {
    %c0_i32 = arith.constant 0 : i32
    %c0_i32_0 = arith.constant 0 : i32
    return %arg0, %c0_i32 : i32, i32
  }
  func.func @transform_1(%arg0: i32) -> (i32, i32) {
    %c0_i32 = arith.constant 0 : i32
    %c0_i32_0 = arith.constant 0 : i32
    %c0_i32_1 = arith.constant 0 : i32
    return %c0_i32, %c0_i32_0 : i32, i32
  }
  func.func @transform_2(%arg0: i32) -> (i32, i32) {
    %c0_i32 = arith.constant 0 : i32
    %c0_i32_0 = arith.constant 0 : i32
    %c0_i32_1 = arith.constant 0 : i32
    return %c0_i32, %c0_i32_0 : i32, i32
  }
  func.func @transform_3(%arg0: i32) -> (i32, i32) {
    %c0_i32 = arith.constant 0 : i32
    %c0_i32_0 = arith.constant 0 : i32
    return %arg0, %c0_i32 : i32, i32
  }
}

module attributes {stable_mosaic.version = 11 : i64} {
  func.func @kernel(%arg0: i32, %arg1: i32, %arg2: i32, %arg3: memref<256x16xbf16, #tpu.memory_space<vmem>>, %arg4: memref<16x128xbf16, #tpu.memory_space<vmem>>, %arg5: memref<256x128xf32, #tpu.memory_space<vmem>>, %arg6: memref<256x128xf32, #tpu.memory_space<vmem>>) attributes {dimension_semantics = [#tpu.dimension_semantics<parallel>, #tpu.dimension_semantics<parallel>, #tpu.dimension_semantics<arbitrary>], iteration_bounds = array<i64: 2, 1, 1>, scalar_prefetch = 0 : i64, scratch_operands = 1 : i64, tpu.core_type = #tpu.core_type<tc>, window_params = [{transform_indices = @transform_0, window_bounds = array<i64: 256, 16>}, {transform_indices = @transform_1, window_bounds = array<i64: 16, 128>}, {transform_indices = @transform_2, window_bounds = array<i64: 256, 128>}]} {
    %c0_i32 = arith.constant 0 : i32
    %0 = arith.cmpi eq, %arg2, %c0_i32 : i32
    %1 = arith.extui %0 : i1 to i32
    %c0_i32_0 = arith.constant 0 : i32
    %2 = arith.cmpi ne, %1, %c0_i32_0 : i32
    scf.if %2 {
      %cst_10 = arith.constant 0.000000e+00 : f32
      %12 = vector.broadcast %cst_10 : f32 to vector<256x128xf32>
      %c0_11 = arith.constant 0 : index
      %c0_12 = arith.constant 0 : index
      %13 = vector.load %arg6[%c0_11, %c0_12] : memref<256x128xf32, #tpu.memory_space<vmem>>, vector<256x128xf32>
      tpu.vector_store %arg6[%c0_11, %c0_12], %12 {strides = array<i32>} : memref<256x128xf32, #tpu.memory_space<vmem>>, vector<256x128xf32>,
    } else {
    }
    %c0 = arith.constant 0 : index
    %c0_1 = arith.constant 0 : index
    %3 = vector.load %arg6[%c0, %c0_1] : memref<256x128xf32, #tpu.memory_space<vmem>>, vector<256x128xf32>
    %c0_2 = arith.constant 0 : index
    %c0_3 = arith.constant 0 : index
    %4 = vector.load %arg3[%c0_2, %c0_3] : memref<256x16xbf16, #tpu.memory_space<vmem>>, vector<256x16xbf16>
    %c0_4 = arith.constant 0 : index
    %c0_5 = arith.constant 0 : index
    %5 = vector.load %arg4[%c0_4, %c0_5] : memref<16x128xbf16, #tpu.memory_space<vmem>>, vector<16x128xbf16>
    %cst = arith.constant dense<0.000000e+00> : vector<256x128xf32>
    %6 = tpu.matmul %4, %5, %cst {dimension_numbers = #tpu.dot_dimension_numbers<[1], [0], [0], [1], [0, 0, 1, 1], [], []>} : vector<256x16xbf16>, vector<16x128xbf16>, vector<256x128xf32> -> vector<256x128xf32>
    %7 = arith.addf %3, %6 : vector<256x128xf32>
    %c0_6 = arith.constant 0 : index
    %c0_7 = arith.constant 0 : index
    %8 = vector.load %arg6[%c0_6, %c0_7] : memref<256x128xf32, #tpu.memory_space<vmem>>, vector<256x128xf32>
    tpu.vector_store %arg6[%c0_6, %c0_7], %7 {strides = array<i32>} : memref<256x128xf32, #tpu.memory_space<vmem>>, vector<256x128xf32>,
    %c0_i32_8 = arith.constant 0 : i32
    %9 = arith.cmpi eq, %arg2, %c0_i32_8 : i32
    %10 = arith.extui %9 : i1 to i32
    %c0_i32_9 = arith.constant 0 : i32
    %11 = arith.cmpi ne, %10, %c0_i32_9 : i32
    scf.if %11 {
      %c0_10 = arith.constant 0 : index
      %c0_11 = arith.constant 0 : index
      %12 = vector.load %arg6[%c0_10, %c0_11] : memref<256x128xf32, #tpu.memory_space<vmem>>, vector<256x128xf32>
      %c0_12 = arith.constant 0 : index
      %c0_13 = arith.constant 0 : index
      %13 = vector.load %arg5[%c0_12, %c0_13] : memref<256x128xf32, #tpu.memory_space<vmem>>, vector<256x128xf32>
      tpu.vector_store %arg5[%c0_12, %c0_13], %12 {strides = array<i32>} : memref<256x128xf32, #tpu.memory_space<vmem>>, vector<256x128xf32>,
    } else {
    }
    return
  }
  func.func @transform_0(%arg0: i32, %arg1: i32, %arg2: i32) -> (i32, i32) {
    %c0_i32 = arith.constant 0 : i32
    return %arg0, %arg2 : i32, i32
  }
  func.func @transform_1(%arg0: i32, %arg1: i32, %arg2: i32) -> (i32, i32) {
    %c0_i32 = arith.constant 0 : i32
    return %arg2, %arg1 : i32, i32
  }
  func.func @transform_2(%arg0: i32, %arg1: i32, %arg2: i32) -> (i32, i32) {
    %c0_i32 = arith.constant 0 : i32
    return %arg0, %arg1 : i32, i32
  }
}

module attributes {stable_mosaic.version = 11 : i64} {
  func.func @kernel(%arg0: i32, %arg1: i32, %arg2: i32, %arg3: memref<256x144xbf16, #tpu.memory_space<vmem>>, %arg4: memref<144x128xbf16, #tpu.memory_space<vmem>>, %arg5: memref<1x128xf32, #tpu.memory_space<vmem>>, %arg6: memref<1x128xf32, #tpu.memory_space<vmem>>, %arg7: memref<256x128xbf16, #tpu.memory_space<vmem>>, %arg8: memref<256x128xf32, #tpu.memory_space<vmem>>) attributes {dimension_semantics = [#tpu.dimension_semantics<parallel>, #tpu.dimension_semantics<parallel>, #tpu.dimension_semantics<arbitrary>], iteration_bounds = array<i64: 2, 1, 1>, scalar_prefetch = 0 : i64, scratch_operands = 1 : i64, tpu.core_type = #tpu.core_type<tc>, window_params = [{transform_indices = @transform_0, window_bounds = array<i64: 256, 144>}, {transform_indices = @transform_1, window_bounds = array<i64: 144, 128>}, {transform_indices = @transform_2, window_bounds = array<i64: 1, 128>}, {transform_indices = @transform_3, window_bounds = array<i64: 1, 128>}, {transform_indices = @transform_4, window_bounds = array<i64: 256, 128>}]} {
    %c0_i32 = arith.constant 0 : i32
    %0 = arith.cmpi eq, %arg2, %c0_i32 : i32
    %1 = arith.extui %0 : i1 to i32
    %c0_i32_0 = arith.constant 0 : i32
    %2 = arith.cmpi ne, %1, %c0_i32_0 : i32
    scf.if %2 {
      %cst_10 = arith.constant 0.000000e+00 : f32
      %12 = vector.broadcast %cst_10 : f32 to vector<256x128xf32>
      %c0_11 = arith.constant 0 : index
      %c0_12 = arith.constant 0 : index
      %13 = vector.load %arg8[%c0_11, %c0_12] : memref<256x128xf32, #tpu.memory_space<vmem>>, vector<256x128xf32>
      tpu.vector_store %arg8[%c0_11, %c0_12], %12 {strides = array<i32>} : memref<256x128xf32, #tpu.memory_space<vmem>>, vector<256x128xf32>,
    } else {
    }
    %c0 = arith.constant 0 : index
    %c0_1 = arith.constant 0 : index
    %3 = vector.load %arg8[%c0, %c0_1] : memref<256x128xf32, #tpu.memory_space<vmem>>, vector<256x128xf32>
    %c0_2 = arith.constant 0 : index
    %c0_3 = arith.constant 0 : index
    %4 = vector.load %arg3[%c0_2, %c0_3] : memref<256x144xbf16, #tpu.memory_space<vmem>>, vector<256x144xbf16>
    %c0_4 = arith.constant 0 : index
    %c0_5 = arith.constant 0 : index
    %5 = vector.load %arg4[%c0_4, %c0_5] : memref<144x128xbf16, #tpu.memory_space<vmem>>, vector<144x128xbf16>
    %cst = arith.constant dense<0.000000e+00> : vector<256x128xf32>
    %6 = tpu.matmul %4, %5, %cst {dimension_numbers = #tpu.dot_dimension_numbers<[1], [0], [0], [1], [0, 0, 1, 1], [], []>} : vector<256x144xbf16>, vector<144x128xbf16>, vector<256x128xf32> -> vector<256x128xf32>
    %7 = arith.addf %3, %6 : vector<256x128xf32>
    %c0_6 = arith.constant 0 : index
    %c0_7 = arith.constant 0 : index
    %8 = vector.load %arg8[%c0_6, %c0_7] : memref<256x128xf32, #tpu.memory_space<vmem>>, vector<256x128xf32>
    tpu.vector_store %arg8[%c0_6, %c0_7], %7 {strides = array<i32>} : memref<256x128xf32, #tpu.memory_space<vmem>>, vector<256x128xf32>,
    %c0_i32_8 = arith.constant 0 : i32
    %9 = arith.cmpi eq, %arg2, %c0_i32_8 : i32
    %10 = arith.extui %9 : i1 to i32
    %c0_i32_9 = arith.constant 0 : i32
    %11 = arith.cmpi ne, %10, %c0_i32_9 : i32
    scf.if %11 {
      %c0_10 = arith.constant 0 : index
      %c0_11 = arith.constant 0 : index
      %12 = vector.load %arg8[%c0_10, %c0_11] : memref<256x128xf32, #tpu.memory_space<vmem>>, vector<256x128xf32>
      %c0_12 = arith.constant 0 : index
      %c0_13 = arith.constant 0 : index
      %13 = vector.load %arg5[%c0_12, %c0_13] : memref<1x128xf32, #tpu.memory_space<vmem>>, vector<1x128xf32>
      %14 = vector.broadcast %13 : vector<1x128xf32> to vector<256x128xf32>
      %15 = arith.mulf %12, %14 : vector<256x128xf32>
      %c0_14 = arith.constant 0 : index
      %c0_15 = arith.constant 0 : index
      %16 = vector.load %arg6[%c0_14, %c0_15] : memref<1x128xf32, #tpu.memory_space<vmem>>, vector<1x128xf32>
      %17 = vector.broadcast %16 : vector<1x128xf32> to vector<256x128xf32>
      %18 = arith.addf %15, %17 : vector<256x128xf32>
      %cst_16 = arith.constant 0.000000e+00 : f32
      %19 = vector.broadcast %cst_16 : f32 to vector<256x128xf32>
      %20 = arith.maximumf %18, %19 : vector<256x128xf32>
      %21 = arith.truncf %20 : vector<256x128xf32> to vector<256x128xbf16>
      %c0_17 = arith.constant 0 : index
      %c0_18 = arith.constant 0 : index
      %22 = vector.load %arg7[%c0_17, %c0_18] : memref<256x128xbf16, #tpu.memory_space<vmem>>, vector<256x128xbf16>
      tpu.vector_store %arg7[%c0_17, %c0_18], %21 {strides = array<i32>} : memref<256x128xbf16, #tpu.memory_space<vmem>>, vector<256x128xbf16>,
    } else {
    }
    return
  }
  func.func @transform_0(%arg0: i32, %arg1: i32, %arg2: i32) -> (i32, i32) {
    %c0_i32 = arith.constant 0 : i32
    return %arg0, %arg2 : i32, i32
  }
  func.func @transform_1(%arg0: i32, %arg1: i32, %arg2: i32) -> (i32, i32) {
    %c0_i32 = arith.constant 0 : i32
    return %arg2, %arg1 : i32, i32
  }
  func.func @transform_2(%arg0: i32, %arg1: i32, %arg2: i32) -> (i32, i32) {
    %c0_i32 = arith.constant 0 : i32
    %c0_i32_0 = arith.constant 0 : i32
    return %c0_i32, %arg1 : i32, i32
  }
  func.func @transform_3(%arg0: i32, %arg1: i32, %arg2: i32) -> (i32, i32) {
    %c0_i32 = arith.constant 0 : i32
    %c0_i32_0 = arith.constant 0 : i32
    return %c0_i32, %arg1 : i32, i32
  }
  func.func @transform_4(%arg0: i32, %arg1: i32, %arg2: i32) -> (i32, i32) {
    %c0_i32 = arith.constant 0 : i32
    return %arg0, %arg1 : i32, i32
  }
}

module attributes {stable_mosaic.version = 11 : i64} {
  func.func @kernel(%arg0: i32, %arg1: i32, %arg2: i32, %arg3: memref<256x16xbf16, #tpu.memory_space<vmem>>, %arg4: memref<16x128xbf16, #tpu.memory_space<vmem>>, %arg5: memref<256x128xf32, #tpu.memory_space<vmem>>, %arg6: memref<256x128xf32, #tpu.memory_space<vmem>>) attributes {dimension_semantics = [#tpu.dimension_semantics<parallel>, #tpu.dimension_semantics<parallel>, #tpu.dimension_semantics<arbitrary>], iteration_bounds = array<i64: 2, 1, 1>, scalar_prefetch = 0 : i64, scratch_operands = 1 : i64, tpu.core_type = #tpu.core_type<tc>, window_params = [{transform_indices = @transform_0, window_bounds = array<i64: 256, 16>}, {transform_indices = @transform_1, window_bounds = array<i64: 16, 128>}, {transform_indices = @transform_2, window_bounds = array<i64: 256, 128>}]} {
    %c0_i32 = arith.constant 0 : i32
    %0 = arith.cmpi eq, %arg2, %c0_i32 : i32
    %1 = arith.extui %0 : i1 to i32
    %c0_i32_0 = arith.constant 0 : i32
    %2 = arith.cmpi ne, %1, %c0_i32_0 : i32
    scf.if %2 {
      %cst_10 = arith.constant 0.000000e+00 : f32
      %12 = vector.broadcast %cst_10 : f32 to vector<256x128xf32>
      %c0_11 = arith.constant 0 : index
      %c0_12 = arith.constant 0 : index
      %13 = vector.load %arg6[%c0_11, %c0_12] : memref<256x128xf32, #tpu.memory_space<vmem>>, vector<256x128xf32>
      tpu.vector_store %arg6[%c0_11, %c0_12], %12 {strides = array<i32>} : memref<256x128xf32, #tpu.memory_space<vmem>>, vector<256x128xf32>,
    } else {
    }
    %c0 = arith.constant 0 : index
    %c0_1 = arith.constant 0 : index
    %3 = vector.load %arg6[%c0, %c0_1] : memref<256x128xf32, #tpu.memory_space<vmem>>, vector<256x128xf32>
    %c0_2 = arith.constant 0 : index
    %c0_3 = arith.constant 0 : index
    %4 = vector.load %arg3[%c0_2, %c0_3] : memref<256x16xbf16, #tpu.memory_space<vmem>>, vector<256x16xbf16>
    %c0_4 = arith.constant 0 : index
    %c0_5 = arith.constant 0 : index
    %5 = vector.load %arg4[%c0_4, %c0_5] : memref<16x128xbf16, #tpu.memory_space<vmem>>, vector<16x128xbf16>
    %cst = arith.constant dense<0.000000e+00> : vector<256x128xf32>
    %6 = tpu.matmul %4, %5, %cst {dimension_numbers = #tpu.dot_dimension_numbers<[1], [0], [0], [1], [0, 0, 1, 1], [], []>} : vector<256x16xbf16>, vector<16x128xbf16>, vector<256x128xf32> -> vector<256x128xf32>
    %7 = arith.addf %3, %6 : vector<256x128xf32>
    %c0_6 = arith.constant 0 : index
    %c0_7 = arith.constant 0 : index
    %8 = vector.load %arg6[%c0_6, %c0_7] : memref<256x128xf32, #tpu.memory_space<vmem>>, vector<256x128xf32>
    tpu.vector_store %arg6[%c0_6, %c0_7], %7 {strides = array<i32>} : memref<256x128xf32, #tpu.memory_space<vmem>>, vector<256x128xf32>,
    %c0_i32_8 = arith.constant 0 : i32
    %9 = arith.cmpi eq, %arg2, %c0_i32_8 : i32
    %10 = arith.extui %9 : i1 to i32
    %c0_i32_9 = arith.constant 0 : i32
    %11 = arith.cmpi ne, %10, %c0_i32_9 : i32
    scf.if %11 {
      %c0_10 = arith.constant 0 : index
      %c0_11 = arith.constant 0 : index
      %12 = vector.load %arg6[%c0_10, %c0_11] : memref<256x128xf32, #tpu.memory_space<vmem>>, vector<256x128xf32>
      %c0_12 = arith.constant 0 : index
      %c0_13 = arith.constant 0 : index
      %13 = vector.load %arg5[%c0_12, %c0_13] : memref<256x128xf32, #tpu.memory_space<vmem>>, vector<256x128xf32>
      tpu.vector_store %arg5[%c0_12, %c0_13], %12 {strides = array<i32>} : memref<256x128xf32, #tpu.memory_space<vmem>>, vector<256x128xf32>,
    } else {
    }
    return
  }
  func.func @transform_0(%arg0: i32, %arg1: i32, %arg2: i32) -> (i32, i32) {
    %c0_i32 = arith.constant 0 : i32
    return %arg0, %arg2 : i32, i32
  }
  func.func @transform_1(%arg0: i32, %arg1: i32, %arg2: i32) -> (i32, i32) {
    %c0_i32 = arith.constant 0 : i32
    return %arg2, %arg1 : i32, i32
  }
  func.func @transform_2(%arg0: i32, %arg1: i32, %arg2: i32) -> (i32, i32) {
    %c0_i32 = arith.constant 0 : i32
    return %arg0, %arg1 : i32, i32
  }
}

module attributes {stable_mosaic.version = 11 : i64} {
  func.func @kernel(%arg0: i32, %arg1: i32, %arg2: i32, %arg3: memref<256x576xbf16, #tpu.memory_space<vmem>>, %arg4: memref<576x128xbf16, #tpu.memory_space<vmem>>, %arg5: memref<256x128xf32, #tpu.memory_space<vmem>>, %arg6: memref<256x128xf32, #tpu.memory_space<vmem>>, %arg7: memref<256x128xf32, #tpu.memory_space<vmem>>) attributes {dimension_semantics = [#tpu.dimension_semantics<parallel>, #tpu.dimension_semantics<parallel>, #tpu.dimension_semantics<arbitrary>], iteration_bounds = array<i64: 2, 1, 1>, scalar_prefetch = 0 : i64, scratch_operands = 1 : i64, tpu.core_type = #tpu.core_type<tc>, window_params = [{transform_indices = @transform_0, window_bounds = array<i64: 256, 576>}, {transform_indices = @transform_1, window_bounds = array<i64: 576, 128>}, {transform_indices = @transform_2, window_bounds = array<i64: 256, 128>}, {transform_indices = @transform_3, window_bounds = array<i64: 256, 128>}]} {
    %c0_i32 = arith.constant 0 : i32
    %0 = arith.cmpi eq, %arg2, %c0_i32 : i32
    %1 = arith.extui %0 : i1 to i32
    %c0_i32_0 = arith.constant 0 : i32
    %2 = arith.cmpi ne, %1, %c0_i32_0 : i32
    scf.if %2 {
      %cst_10 = arith.constant 0.000000e+00 : f32
      %12 = vector.broadcast %cst_10 : f32 to vector<256x128xf32>
      %c0_11 = arith.constant 0 : index
      %c0_12 = arith.constant 0 : index
      %13 = vector.load %arg7[%c0_11, %c0_12] : memref<256x128xf32, #tpu.memory_space<vmem>>, vector<256x128xf32>
      tpu.vector_store %arg7[%c0_11, %c0_12], %12 {strides = array<i32>} : memref<256x128xf32, #tpu.memory_space<vmem>>, vector<256x128xf32>,
    } else {
    }
    %c0 = arith.constant 0 : index
    %c0_1 = arith.constant 0 : index
    %3 = vector.load %arg7[%c0, %c0_1] : memref<256x128xf32, #tpu.memory_space<vmem>>, vector<256x128xf32>
    %c0_2 = arith.constant 0 : index
    %c0_3 = arith.constant 0 : index
    %4 = vector.load %arg3[%c0_2, %c0_3] : memref<256x576xbf16, #tpu.memory_space<vmem>>, vector<256x576xbf16>
    %c0_4 = arith.constant 0 : index
    %c0_5 = arith.constant 0 : index
    %5 = vector.load %arg4[%c0_4, %c0_5] : memref<576x128xbf16, #tpu.memory_space<vmem>>, vector<576x128xbf16>
    %cst = arith.constant dense<0.000000e+00> : vector<256x128xf32>
    %6 = tpu.matmul %4, %5, %cst {dimension_numbers = #tpu.dot_dimension_numbers<[1], [0], [0], [1], [0, 0, 1, 1], [], []>} : vector<256x576xbf16>, vector<576x128xbf16>, vector<256x128xf32> -> vector<256x128xf32>
    %7 = arith.addf %3, %6 : vector<256x128xf32>
    %c0_6 = arith.constant 0 : index
    %c0_7 = arith.constant 0 : index
    %8 = vector.load %arg7[%c0_6, %c0_7] : memref<256x128xf32, #tpu.memory_space<vmem>>, vector<256x128xf32>
    tpu.vector_store %arg7[%c0_6, %c0_7], %7 {strides = array<i32>} : memref<256x128xf32, #tpu.memory_space<vmem>>, vector<256x128xf32>,
    %c0_i32_8 = arith.constant 0 : i32
    %9 = arith.cmpi eq, %arg2, %c0_i32_8 : i32
    %10 = arith.extui %9 : i1 to i32
    %c0_i32_9 = arith.constant 0 : i32
    %11 = arith.cmpi ne, %10, %c0_i32_9 : i32
    scf.if %11 {
      %c0_10 = arith.constant 0 : index
      %c0_11 = arith.constant 0 : index
      %12 = vector.load %arg7[%c0_10, %c0_11] : memref<256x128xf32, #tpu.memory_space<vmem>>, vector<256x128xf32>
      %c0_12 = arith.constant 0 : index
      %c0_13 = arith.constant 0 : index
      %13 = vector.load %arg5[%c0_12, %c0_13] : memref<256x128xf32, #tpu.memory_space<vmem>>, vector<256x128xf32>
      %14 = arith.addf %12, %13 : vector<256x128xf32>
      %c0_14 = arith.constant 0 : index
      %c0_15 = arith.constant 0 : index
      %15 = vector.load %arg6[%c0_14, %c0_15] : memref<256x128xf32, #tpu.memory_space<vmem>>, vector<256x128xf32>
      tpu.vector_store %arg6[%c0_14, %c0_15], %14 {strides = array<i32>} : memref<256x128xf32, #tpu.memory_space<vmem>>, vector<256x128xf32>,
    } else {
    }
    return
  }
  func.func @transform_0(%arg0: i32, %arg1: i32, %arg2: i32) -> (i32, i32) {
    %c0_i32 = arith.constant 0 : i32
    return %arg0, %arg2 : i32, i32
  }
  func.func @transform_1(%arg0: i32, %arg1: i32, %arg2: i32) -> (i32, i32) {
    %c0_i32 = arith.constant 0 : i32
    return %arg2, %arg1 : i32, i32
  }
  func.func @transform_2(%arg0: i32, %arg1: i32, %arg2: i32) -> (i32, i32) {
    %c0_i32 = arith.constant 0 : i32
    return %arg0, %arg1 : i32, i32
  }
  func.func @transform_3(%arg0: i32, %arg1: i32, %arg2: i32) -> (i32, i32) {
    %c0_i32 = arith.constant 0 : i32
    return %arg0, %arg1 : i32, i32
  }
}

module attributes {stable_mosaic.version = 11 : i64} {
  func.func @kernel(%arg0: i32, %arg1: i32, %arg2: i32, %arg3: memref<128x576xbf16, #tpu.memory_space<vmem>>, %arg4: memref<576x128xbf16, #tpu.memory_space<vmem>>, %arg5: memref<1x128xf32, #tpu.memory_space<vmem>>, %arg6: memref<1x128xf32, #tpu.memory_space<vmem>>, %arg7: memref<128x128xbf16, #tpu.memory_space<vmem>>, %arg8: memref<128x128xf32, #tpu.memory_space<vmem>>) attributes {dimension_semantics = [#tpu.dimension_semantics<parallel>, #tpu.dimension_semantics<parallel>, #tpu.dimension_semantics<arbitrary>], iteration_bounds = array<i64: 1, 1, 1>, scalar_prefetch = 0 : i64, scratch_operands = 1 : i64, tpu.core_type = #tpu.core_type<tc>, window_params = [{transform_indices = @transform_0, window_bounds = array<i64: 128, 576>}, {transform_indices = @transform_1, window_bounds = array<i64: 576, 128>}, {transform_indices = @transform_2, window_bounds = array<i64: 1, 128>}, {transform_indices = @transform_3, window_bounds = array<i64: 1, 128>}, {transform_indices = @transform_4, window_bounds = array<i64: 128, 128>}]} {
    %c0_i32 = arith.constant 0 : i32
    %0 = arith.cmpi eq, %arg2, %c0_i32 : i32
    %1 = arith.extui %0 : i1 to i32
    %c0_i32_0 = arith.constant 0 : i32
    %2 = arith.cmpi ne, %1, %c0_i32_0 : i32
    scf.if %2 {
      %cst_10 = arith.constant 0.000000e+00 : f32
      %12 = vector.broadcast %cst_10 : f32 to vector<128x128xf32>
      %c0_11 = arith.constant 0 : index
      %c0_12 = arith.constant 0 : index
      %13 = vector.load %arg8[%c0_11, %c0_12] : memref<128x128xf32, #tpu.memory_space<vmem>>, vector<128x128xf32>
      tpu.vector_store %arg8[%c0_11, %c0_12], %12 {strides = array<i32>} : memref<128x128xf32, #tpu.memory_space<vmem>>, vector<128x128xf32>,
    } else {
    }
    %c0 = arith.constant 0 : index
    %c0_1 = arith.constant 0 : index
    %3 = vector.load %arg8[%c0, %c0_1] : memref<128x128xf32, #tpu.memory_space<vmem>>, vector<128x128xf32>
    %c0_2 = arith.constant 0 : index
    %c0_3 = arith.constant 0 : index
    %4 = vector.load %arg3[%c0_2, %c0_3] : memref<128x576xbf16, #tpu.memory_space<vmem>>, vector<128x576xbf16>
    %c0_4 = arith.constant 0 : index
    %c0_5 = arith.constant 0 : index
    %5 = vector.load %arg4[%c0_4, %c0_5] : memref<576x128xbf16, #tpu.memory_space<vmem>>, vector<576x128xbf16>
    %cst = arith.constant dense<0.000000e+00> : vector<128x128xf32>
    %6 = tpu.matmul %4, %5, %cst {dimension_numbers = #tpu.dot_dimension_numbers<[1], [0], [0], [1], [0, 0, 1, 1], [], []>} : vector<128x576xbf16>, vector<576x128xbf16>, vector<128x128xf32> -> vector<128x128xf32>
    %7 = arith.addf %3, %6 : vector<128x128xf32>
    %c0_6 = arith.constant 0 : index
    %c0_7 = arith.constant 0 : index
    %8 = vector.load %arg8[%c0_6, %c0_7] : memref<128x128xf32, #tpu.memory_space<vmem>>, vector<128x128xf32>
    tpu.vector_store %arg8[%c0_6, %c0_7], %7 {strides = array<i32>} : memref<128x128xf32, #tpu.memory_space<vmem>>, vector<128x128xf32>,
    %c0_i32_8 = arith.constant 0 : i32
    %9 = arith.cmpi eq, %arg2, %c0_i32_8 : i32
    %10 = arith.extui %9 : i1 to i32
    %c0_i32_9 = arith.constant 0 : i32
    %11 = arith.cmpi ne, %10, %c0_i32_9 : i32
    scf.if %11 {
      %c0_10 = arith.constant 0 : index
      %c0_11 = arith.constant 0 : index
      %12 = vector.load %arg8[%c0_10, %c0_11] : memref<128x128xf32, #tpu.memory_space<vmem>>, vector<128x128xf32>
      %c0_12 = arith.constant 0 : index
      %c0_13 = arith.constant 0 : index
      %13 = vector.load %arg5[%c0_12, %c0_13] : memref<1x128xf32, #tpu.memory_space<vmem>>, vector<1x128xf32>
      %14 = vector.broadcast %13 : vector<1x128xf32> to vector<128x128xf32>
      %15 = arith.mulf %12, %14 : vector<128x128xf32>
      %c0_14 = arith.constant 0 : index
      %c0_15 = arith.constant 0 : index
      %16 = vector.load %arg6[%c0_14, %c0_15] : memref<1x128xf32, #tpu.memory_space<vmem>>, vector<1x128xf32>
      %17 = vector.broadcast %16 : vector<1x128xf32> to vector<128x128xf32>
      %18 = arith.addf %15, %17 : vector<128x128xf32>
      %cst_16 = arith.constant 0.000000e+00 : f32
      %19 = vector.broadcast %cst_16 : f32 to vector<128x128xf32>
      %20 = arith.maximumf %18, %19 : vector<128x128xf32>
      %21 = arith.truncf %20 : vector<128x128xf32> to vector<128x128xbf16>
      %c0_17 = arith.constant 0 : index
      %c0_18 = arith.constant 0 : index
      %22 = vector.load %arg7[%c0_17, %c0_18] : memref<128x128xbf16, #tpu.memory_space<vmem>>, vector<128x128xbf16>
      tpu.vector_store %arg7[%c0_17, %c0_18], %21 {strides = array<i32>} : memref<128x128xbf16, #tpu.memory_space<vmem>>, vector<128x128xbf16>,
    } else {
    }
    return
  }
  func.func @transform_0(%arg0: i32, %arg1: i32, %arg2: i32) -> (i32, i32) {
    %c0_i32 = arith.constant 0 : i32
    return %arg0, %arg2 : i32, i32
  }
  func.func @transform_1(%arg0: i32, %arg1: i32, %arg2: i32) -> (i32, i32) {
    %c0_i32 = arith.constant 0 : i32
    return %arg2, %arg1 : i32, i32
  }
  func.func @transform_2(%arg0: i32, %arg1: i32, %arg2: i32) -> (i32, i32) {
    %c0_i32 = arith.constant 0 : i32
    %c0_i32_0 = arith.constant 0 : i32
    return %c0_i32, %arg1 : i32, i32
  }
  func.func @transform_3(%arg0: i32, %arg1: i32, %arg2: i32) -> (i32, i32) {
    %c0_i32 = arith.constant 0 : i32
    %c0_i32_0 = arith.constant 0 : i32
    return %c0_i32, %arg1 : i32, i32
  }
  func.func @transform_4(%arg0: i32, %arg1: i32, %arg2: i32) -> (i32, i32) {
    %c0_i32 = arith.constant 0 : i32
    return %arg0, %arg1 : i32, i32
  }
}

module attributes {stable_mosaic.version = 11 : i64} {
  func.func @kernel(%arg0: i32, %arg1: i32, %arg2: i32, %arg3: memref<128x64xbf16, #tpu.memory_space<vmem>>, %arg4: memref<64x128xbf16, #tpu.memory_space<vmem>>, %arg5: memref<128x128xf32, #tpu.memory_space<vmem>>, %arg6: memref<128x128xf32, #tpu.memory_space<vmem>>) attributes {dimension_semantics = [#tpu.dimension_semantics<parallel>, #tpu.dimension_semantics<parallel>, #tpu.dimension_semantics<arbitrary>], iteration_bounds = array<i64: 1, 1, 1>, scalar_prefetch = 0 : i64, scratch_operands = 1 : i64, tpu.core_type = #tpu.core_type<tc>, window_params = [{transform_indices = @transform_0, window_bounds = array<i64: 128, 64>}, {transform_indices = @transform_1, window_bounds = array<i64: 64, 128>}, {transform_indices = @transform_2, window_bounds = array<i64: 128, 128>}]} {
    %c0_i32 = arith.constant 0 : i32
    %0 = arith.cmpi eq, %arg2, %c0_i32 : i32
    %1 = arith.extui %0 : i1 to i32
    %c0_i32_0 = arith.constant 0 : i32
    %2 = arith.cmpi ne, %1, %c0_i32_0 : i32
    scf.if %2 {
      %cst_10 = arith.constant 0.000000e+00 : f32
      %12 = vector.broadcast %cst_10 : f32 to vector<128x128xf32>
      %c0_11 = arith.constant 0 : index
      %c0_12 = arith.constant 0 : index
      %13 = vector.load %arg6[%c0_11, %c0_12] : memref<128x128xf32, #tpu.memory_space<vmem>>, vector<128x128xf32>
      tpu.vector_store %arg6[%c0_11, %c0_12], %12 {strides = array<i32>} : memref<128x128xf32, #tpu.memory_space<vmem>>, vector<128x128xf32>,
    } else {
    }
    %c0 = arith.constant 0 : index
    %c0_1 = arith.constant 0 : index
    %3 = vector.load %arg6[%c0, %c0_1] : memref<128x128xf32, #tpu.memory_space<vmem>>, vector<128x128xf32>
    %c0_2 = arith.constant 0 : index
    %c0_3 = arith.constant 0 : index
    %4 = vector.load %arg3[%c0_2, %c0_3] : memref<128x64xbf16, #tpu.memory_space<vmem>>, vector<128x64xbf16>
    %c0_4 = arith.constant 0 : index
    %c0_5 = arith.constant 0 : index
    %5 = vector.load %arg4[%c0_4, %c0_5] : memref<64x128xbf16, #tpu.memory_space<vmem>>, vector<64x128xbf16>
    %cst = arith.constant dense<0.000000e+00> : vector<128x128xf32>
    %6 = tpu.matmul %4, %5, %cst {dimension_numbers = #tpu.dot_dimension_numbers<[1], [0], [0], [1], [0, 0, 1, 1], [], []>} : vector<128x64xbf16>, vector<64x128xbf16>, vector<128x128xf32> -> vector<128x128xf32>
    %7 = arith.addf %3, %6 : vector<128x128xf32>
    %c0_6 = arith.constant 0 : index
    %c0_7 = arith.constant 0 : index
    %8 = vector.load %arg6[%c0_6, %c0_7] : memref<128x128xf32, #tpu.memory_space<vmem>>, vector<128x128xf32>
    tpu.vector_store %arg6[%c0_6, %c0_7], %7 {strides = array<i32>} : memref<128x128xf32, #tpu.memory_space<vmem>>, vector<128x128xf32>,
    %c0_i32_8 = arith.constant 0 : i32
    %9 = arith.cmpi eq, %arg2, %c0_i32_8 : i32
    %10 = arith.extui %9 : i1 to i32
    %c0_i32_9 = arith.constant 0 : i32
    %11 = arith.cmpi ne, %10, %c0_i32_9 : i32
    scf.if %11 {
      %c0_10 = arith.constant 0 : index
      %c0_11 = arith.constant 0 : index
      %12 = vector.load %arg6[%c0_10, %c0_11] : memref<128x128xf32, #tpu.memory_space<vmem>>, vector<128x128xf32>
      %c0_12 = arith.constant 0 : index
      %c0_13 = arith.constant 0 : index
      %13 = vector.load %arg5[%c0_12, %c0_13] : memref<128x128xf32, #tpu.memory_space<vmem>>, vector<128x128xf32>
      tpu.vector_store %arg5[%c0_12, %c0_13], %12 {strides = array<i32>} : memref<128x128xf32, #tpu.memory_space<vmem>>, vector<128x128xf32>,
    } else {
    }
    return
  }
  func.func @transform_0(%arg0: i32, %arg1: i32, %arg2: i32) -> (i32, i32) {
    %c0_i32 = arith.constant 0 : i32
    return %arg0, %arg2 : i32, i32
  }
  func.func @transform_1(%arg0: i32, %arg1: i32, %arg2: i32) -> (i32, i32) {
    %c0_i32 = arith.constant 0 : i32
    return %arg2, %arg1 : i32, i32
  }
  func.func @transform_2(%arg0: i32, %arg1: i32, %arg2: i32) -> (i32, i32) {
    %c0_i32 = arith.constant 0 : i32
    return %arg0, %arg1 : i32, i32
  }
}

module attributes {stable_mosaic.version = 11 : i64} {
  func.func @kernel(%arg0: i32, %arg1: i32, %arg2: i32, %arg3: memref<128x384xbf16, #tpu.memory_space<vmem>>, %arg4: memref<384x128xbf16, #tpu.memory_space<vmem>>, %arg5: memref<128x128xf32, #tpu.memory_space<vmem>>, %arg6: memref<128x128xf32, #tpu.memory_space<vmem>>, %arg7: memref<128x128xf32, #tpu.memory_space<vmem>>) attributes {dimension_semantics = [#tpu.dimension_semantics<parallel>, #tpu.dimension_semantics<parallel>, #tpu.dimension_semantics<arbitrary>], iteration_bounds = array<i64: 1, 1, 3>, scalar_prefetch = 0 : i64, scratch_operands = 1 : i64, tpu.core_type = #tpu.core_type<tc>, window_params = [{transform_indices = @transform_0, window_bounds = array<i64: 128, 384>}, {transform_indices = @transform_1, window_bounds = array<i64: 384, 128>}, {transform_indices = @transform_2, window_bounds = array<i64: 128, 128>}, {transform_indices = @transform_3, window_bounds = array<i64: 128, 128>}]} {
    %c0_i32 = arith.constant 0 : i32
    %0 = arith.cmpi eq, %arg2, %c0_i32 : i32
    %1 = arith.extui %0 : i1 to i32
    %c0_i32_0 = arith.constant 0 : i32
    %2 = arith.cmpi ne, %1, %c0_i32_0 : i32
    scf.if %2 {
      %cst_9 = arith.constant 0.000000e+00 : f32
      %12 = vector.broadcast %cst_9 : f32 to vector<128x128xf32>
      %c0_10 = arith.constant 0 : index
      %c0_11 = arith.constant 0 : index
      %13 = vector.load %arg7[%c0_10, %c0_11] : memref<128x128xf32, #tpu.memory_space<vmem>>, vector<128x128xf32>
      tpu.vector_store %arg7[%c0_10, %c0_11], %12 {strides = array<i32>} : memref<128x128xf32, #tpu.memory_space<vmem>>, vector<128x128xf32>,
    } else {
    }
    %c0 = arith.constant 0 : index
    %c0_1 = arith.constant 0 : index
    %3 = vector.load %arg7[%c0, %c0_1] : memref<128x128xf32, #tpu.memory_space<vmem>>, vector<128x128xf32>
    %c0_2 = arith.constant 0 : index
    %c0_3 = arith.constant 0 : index
    %4 = vector.load %arg3[%c0_2, %c0_3] : memref<128x384xbf16, #tpu.memory_space<vmem>>, vector<128x384xbf16>
    %c0_4 = arith.constant 0 : index
    %c0_5 = arith.constant 0 : index
    %5 = vector.load %arg4[%c0_4, %c0_5] : memref<384x128xbf16, #tpu.memory_space<vmem>>, vector<384x128xbf16>
    %cst = arith.constant dense<0.000000e+00> : vector<128x128xf32>
    %6 = tpu.matmul %4, %5, %cst {dimension_numbers = #tpu.dot_dimension_numbers<[1], [0], [0], [1], [0, 0, 1, 1], [], []>} : vector<128x384xbf16>, vector<384x128xbf16>, vector<128x128xf32> -> vector<128x128xf32>
    %7 = arith.addf %3, %6 : vector<128x128xf32>
    %c0_6 = arith.constant 0 : index
    %c0_7 = arith.constant 0 : index
    %8 = vector.load %arg7[%c0_6, %c0_7] : memref<128x128xf32, #tpu.memory_space<vmem>>, vector<128x128xf32>
    tpu.vector_store %arg7[%c0_6, %c0_7], %7 {strides = array<i32>} : memref<128x128xf32, #tpu.memory_space<vmem>>, vector<128x128xf32>,
    %c2_i32 = arith.constant 2 : i32
    %9 = arith.cmpi eq, %arg2, %c2_i32 : i32
    %10 = arith.extui %9 : i1 to i32
    %c0_i32_8 = arith.constant 0 : i32
    %11 = arith.cmpi ne, %10, %c0_i32_8 : i32
    scf.if %11 {
      %c0_9 = arith.constant 0 : index
      %c0_10 = arith.constant 0 : index
      %12 = vector.load %arg7[%c0_9, %c0_10] : memref<128x128xf32, #tpu.memory_space<vmem>>, vector<128x128xf32>
      %c0_11 = arith.constant 0 : index
      %c0_12 = arith.constant 0 : index
      %13 = vector.load %arg5[%c0_11, %c0_12] : memref<128x128xf32, #tpu.memory_space<vmem>>, vector<128x128xf32>
      %14 = arith.addf %12, %13 : vector<128x128xf32>
      %c0_13 = arith.constant 0 : index
      %c0_14 = arith.constant 0 : index
      %15 = vector.load %arg6[%c0_13, %c0_14] : memref<128x128xf32, #tpu.memory_space<vmem>>, vector<128x128xf32>
      tpu.vector_store %arg6[%c0_13, %c0_14], %14 {strides = array<i32>} : memref<128x128xf32, #tpu.memory_space<vmem>>, vector<128x128xf32>,
    } else {
    }
    return
  }
  func.func @transform_0(%arg0: i32, %arg1: i32, %arg2: i32) -> (i32, i32) {
    %c0_i32 = arith.constant 0 : i32
    return %arg0, %arg2 : i32, i32
  }
  func.func @transform_1(%arg0: i32, %arg1: i32, %arg2: i32) -> (i32, i32) {
    %c0_i32 = arith.constant 0 : i32
    return %arg2, %arg1 : i32, i32
  }
  func.func @transform_2(%arg0: i32, %arg1: i32, %arg2: i32) -> (i32, i32) {
    %c0_i32 = arith.constant 0 : i32
    return %arg0, %arg1 : i32, i32
  }
  func.func @transform_3(%arg0: i32, %arg1: i32, %arg2: i32) -> (i32, i32) {
    %c0_i32 = arith.constant 0 : i32
    return %arg0, %arg1 : i32, i32
  }
}

module attributes {stable_mosaic.version = 11 : i64} {
  func.func @_bn_relu_kernel(%arg0: i32, %arg1: memref<128x128xf32, #tpu.memory_space<vmem>>, %arg2: memref<1x128xf32, #tpu.memory_space<vmem>>, %arg3: memref<1x128xf32, #tpu.memory_space<vmem>>, %arg4: memref<128x128xbf16, #tpu.memory_space<vmem>>) attributes {dimension_semantics = [#tpu.dimension_semantics<parallel>], iteration_bounds = array<i64: 1>, scalar_prefetch = 0 : i64, scratch_operands = 0 : i64, tpu.core_type = #tpu.core_type<tc>, window_params = [{transform_indices = @transform_0, window_bounds = array<i64: 128, 128>}, {pipeline_mode = #tpu.pipeline_mode<synchronous>, transform_indices = @transform_1, window_bounds = array<i64: 1, 128>}, {pipeline_mode = #tpu.pipeline_mode<synchronous>, transform_indices = @transform_2, window_bounds = array<i64: 1, 128>}, {transform_indices = @transform_3, window_bounds = array<i64: 128, 128>}]} {
    %c0 = arith.constant 0 : index
    %c0_0 = arith.constant 0 : index
    %0 = vector.load %arg1[%c0, %c0_0] : memref<128x128xf32, #tpu.memory_space<vmem>>, vector<128x128xf32>
    %c0_1 = arith.constant 0 : index
    %c0_2 = arith.constant 0 : index
    %1 = vector.load %arg2[%c0_1, %c0_2] : memref<1x128xf32, #tpu.memory_space<vmem>>, vector<1x128xf32>
    %2 = vector.broadcast %1 : vector<1x128xf32> to vector<128x128xf32>
    %3 = arith.mulf %0, %2 : vector<128x128xf32>
    %c0_3 = arith.constant 0 : index
    %c0_4 = arith.constant 0 : index
    %4 = vector.load %arg3[%c0_3, %c0_4] : memref<1x128xf32, #tpu.memory_space<vmem>>, vector<1x128xf32>
    %5 = vector.broadcast %4 : vector<1x128xf32> to vector<128x128xf32>
    %6 = arith.addf %3, %5 : vector<128x128xf32>
    %cst = arith.constant 0.000000e+00 : f32
    %7 = vector.broadcast %cst : f32 to vector<128x128xf32>
    %8 = arith.maximumf %6, %7 : vector<128x128xf32>
    %9 = arith.truncf %8 : vector<128x128xf32> to vector<128x128xbf16>
    %c0_5 = arith.constant 0 : index
    %c0_6 = arith.constant 0 : index
    %10 = vector.load %arg4[%c0_5, %c0_6] : memref<128x128xbf16, #tpu.memory_space<vmem>>, vector<128x128xbf16>
    tpu.vector_store %arg4[%c0_5, %c0_6], %9 {strides = array<i32>} : memref<128x128xbf16, #tpu.memory_space<vmem>>, vector<128x128xbf16>,
    return
  }
  func.func @transform_0(%arg0: i32) -> (i32, i32) {
    %c0_i32 = arith.constant 0 : i32
    %c0_i32_0 = arith.constant 0 : i32
    return %arg0, %c0_i32 : i32, i32
  }
  func.func @transform_1(%arg0: i32) -> (i32, i32) {
    %c0_i32 = arith.constant 0 : i32
    %c0_i32_0 = arith.constant 0 : i32
    %c0_i32_1 = arith.constant 0 : i32
    return %c0_i32, %c0_i32_0 : i32, i32
  }
  func.func @transform_2(%arg0: i32) -> (i32, i32) {
    %c0_i32 = arith.constant 0 : i32
    %c0_i32_0 = arith.constant 0 : i32
    %c0_i32_1 = arith.constant 0 : i32
    return %c0_i32, %c0_i32_0 : i32, i32
  }
  func.func @transform_3(%arg0: i32) -> (i32, i32) {
    %c0_i32 = arith.constant 0 : i32
    %c0_i32_0 = arith.constant 0 : i32
    return %arg0, %c0_i32 : i32, i32
  }
}

module attributes {stable_mosaic.version = 11 : i64} {
  func.func @kernel(%arg0: i32, %arg1: i32, %arg2: i32, %arg3: memref<32x384xbf16, #tpu.memory_space<vmem>>, %arg4: memref<384x256xbf16, #tpu.memory_space<vmem>>, %arg5: memref<1x256xf32, #tpu.memory_space<vmem>>, %arg6: memref<1x256xf32, #tpu.memory_space<vmem>>, %arg7: memref<32x256xbf16, #tpu.memory_space<vmem>>, %arg8: memref<32x256xf32, #tpu.memory_space<vmem>>) attributes {dimension_semantics = [#tpu.dimension_semantics<parallel>, #tpu.dimension_semantics<parallel>, #tpu.dimension_semantics<arbitrary>], iteration_bounds = array<i64: 1, 1, 3>, scalar_prefetch = 0 : i64, scratch_operands = 1 : i64, tpu.core_type = #tpu.core_type<tc>, window_params = [{transform_indices = @transform_0, window_bounds = array<i64: 32, 384>}, {transform_indices = @transform_1, window_bounds = array<i64: 384, 256>}, {transform_indices = @transform_2, window_bounds = array<i64: 1, 256>}, {transform_indices = @transform_3, window_bounds = array<i64: 1, 256>}, {transform_indices = @transform_4, window_bounds = array<i64: 32, 256>}]} {
    %c0_i32 = arith.constant 0 : i32
    %0 = arith.cmpi eq, %arg2, %c0_i32 : i32
    %1 = arith.extui %0 : i1 to i32
    %c0_i32_0 = arith.constant 0 : i32
    %2 = arith.cmpi ne, %1, %c0_i32_0 : i32
    scf.if %2 {
      %cst_9 = arith.constant 0.000000e+00 : f32
      %12 = vector.broadcast %cst_9 : f32 to vector<32x256xf32>
      %c0_10 = arith.constant 0 : index
      %c0_11 = arith.constant 0 : index
      %13 = vector.load %arg8[%c0_10, %c0_11] : memref<32x256xf32, #tpu.memory_space<vmem>>, vector<32x256xf32>
      tpu.vector_store %arg8[%c0_10, %c0_11], %12 {strides = array<i32>} : memref<32x256xf32, #tpu.memory_space<vmem>>, vector<32x256xf32>,
    } else {
    }
    %c0 = arith.constant 0 : index
    %c0_1 = arith.constant 0 : index
    %3 = vector.load %arg8[%c0, %c0_1] : memref<32x256xf32, #tpu.memory_space<vmem>>, vector<32x256xf32>
    %c0_2 = arith.constant 0 : index
    %c0_3 = arith.constant 0 : index
    %4 = vector.load %arg3[%c0_2, %c0_3] : memref<32x384xbf16, #tpu.memory_space<vmem>>, vector<32x384xbf16>
    %c0_4 = arith.constant 0 : index
    %c0_5 = arith.constant 0 : index
    %5 = vector.load %arg4[%c0_4, %c0_5] : memref<384x256xbf16, #tpu.memory_space<vmem>>, vector<384x256xbf16>
    %cst = arith.constant dense<0.000000e+00> : vector<32x256xf32>
    %6 = tpu.matmul %4, %5, %cst {dimension_numbers = #tpu.dot_dimension_numbers<[1], [0], [0], [1], [0, 0, 1, 1], [], []>} : vector<32x384xbf16>, vector<384x256xbf16>, vector<32x256xf32> -> vector<32x256xf32>
    %7 = arith.addf %3, %6 : vector<32x256xf32>
    %c0_6 = arith.constant 0 : index
    %c0_7 = arith.constant 0 : index
    %8 = vector.load %arg8[%c0_6, %c0_7] : memref<32x256xf32, #tpu.memory_space<vmem>>, vector<32x256xf32>
    tpu.vector_store %arg8[%c0_6, %c0_7], %7 {strides = array<i32>} : memref<32x256xf32, #tpu.memory_space<vmem>>, vector<32x256xf32>,
    %c2_i32 = arith.constant 2 : i32
    %9 = arith.cmpi eq, %arg2, %c2_i32 : i32
    %10 = arith.extui %9 : i1 to i32
    %c0_i32_8 = arith.constant 0 : i32
    %11 = arith.cmpi ne, %10, %c0_i32_8 : i32
    scf.if %11 {
      %c0_9 = arith.constant 0 : index
      %c0_10 = arith.constant 0 : index
      %12 = vector.load %arg8[%c0_9, %c0_10] : memref<32x256xf32, #tpu.memory_space<vmem>>, vector<32x256xf32>
      %c0_11 = arith.constant 0 : index
      %c0_12 = arith.constant 0 : index
      %13 = vector.load %arg5[%c0_11, %c0_12] : memref<1x256xf32, #tpu.memory_space<vmem>>, vector<1x256xf32>
      %14 = vector.broadcast %13 : vector<1x256xf32> to vector<32x256xf32>
      %15 = arith.mulf %12, %14 : vector<32x256xf32>
      %c0_13 = arith.constant 0 : index
      %c0_14 = arith.constant 0 : index
      %16 = vector.load %arg6[%c0_13, %c0_14] : memref<1x256xf32, #tpu.memory_space<vmem>>, vector<1x256xf32>
      %17 = vector.broadcast %16 : vector<1x256xf32> to vector<32x256xf32>
      %18 = arith.addf %15, %17 : vector<32x256xf32>
      %cst_15 = arith.constant 0.000000e+00 : f32
      %19 = vector.broadcast %cst_15 : f32 to vector<32x256xf32>
      %20 = arith.maximumf %18, %19 : vector<32x256xf32>
      %21 = arith.truncf %20 : vector<32x256xf32> to vector<32x256xbf16>
      %c0_16 = arith.constant 0 : index
      %c0_17 = arith.constant 0 : index
      %22 = vector.load %arg7[%c0_16, %c0_17] : memref<32x256xbf16, #tpu.memory_space<vmem>>, vector<32x256xbf16>
      tpu.vector_store %arg7[%c0_16, %c0_17], %21 {strides = array<i32>} : memref<32x256xbf16, #tpu.memory_space<vmem>>, vector<32x256xbf16>,
    } else {
    }
    return
  }
  func.func @transform_0(%arg0: i32, %arg1: i32, %arg2: i32) -> (i32, i32) {
    %c0_i32 = arith.constant 0 : i32
    return %arg0, %arg2 : i32, i32
  }
  func.func @transform_1(%arg0: i32, %arg1: i32, %arg2: i32) -> (i32, i32) {
    %c0_i32 = arith.constant 0 : i32
    return %arg2, %arg1 : i32, i32
  }
  func.func @transform_2(%arg0: i32, %arg1: i32, %arg2: i32) -> (i32, i32) {
    %c0_i32 = arith.constant 0 : i32
    %c0_i32_0 = arith.constant 0 : i32
    return %c0_i32, %arg1 : i32, i32
  }
  func.func @transform_3(%arg0: i32, %arg1: i32, %arg2: i32) -> (i32, i32) {
    %c0_i32 = arith.constant 0 : i32
    %c0_i32_0 = arith.constant 0 : i32
    return %c0_i32, %arg1 : i32, i32
  }
  func.func @transform_4(%arg0: i32, %arg1: i32, %arg2: i32) -> (i32, i32) {
    %c0_i32 = arith.constant 0 : i32
    return %arg0, %arg1 : i32, i32
  }
}

module attributes {stable_mosaic.version = 11 : i64} {
  func.func @kernel(%arg0: i32, %arg1: i32, %arg2: i32, %arg3: memref<32x128xbf16, #tpu.memory_space<vmem>>, %arg4: memref<128x256xbf16, #tpu.memory_space<vmem>>, %arg5: memref<32x256xf32, #tpu.memory_space<vmem>>, %arg6: memref<32x256xf32, #tpu.memory_space<vmem>>) attributes {dimension_semantics = [#tpu.dimension_semantics<parallel>, #tpu.dimension_semantics<parallel>, #tpu.dimension_semantics<arbitrary>], iteration_bounds = array<i64: 1, 1, 1>, scalar_prefetch = 0 : i64, scratch_operands = 1 : i64, tpu.core_type = #tpu.core_type<tc>, window_params = [{transform_indices = @transform_0, window_bounds = array<i64: 32, 128>}, {transform_indices = @transform_1, window_bounds = array<i64: 128, 256>}, {transform_indices = @transform_2, window_bounds = array<i64: 32, 256>}]} {
    %c0_i32 = arith.constant 0 : i32
    %0 = arith.cmpi eq, %arg2, %c0_i32 : i32
    %1 = arith.extui %0 : i1 to i32
    %c0_i32_0 = arith.constant 0 : i32
    %2 = arith.cmpi ne, %1, %c0_i32_0 : i32
    scf.if %2 {
      %cst_10 = arith.constant 0.000000e+00 : f32
      %12 = vector.broadcast %cst_10 : f32 to vector<32x256xf32>
      %c0_11 = arith.constant 0 : index
      %c0_12 = arith.constant 0 : index
      %13 = vector.load %arg6[%c0_11, %c0_12] : memref<32x256xf32, #tpu.memory_space<vmem>>, vector<32x256xf32>
      tpu.vector_store %arg6[%c0_11, %c0_12], %12 {strides = array<i32>} : memref<32x256xf32, #tpu.memory_space<vmem>>, vector<32x256xf32>,
    } else {
    }
    %c0 = arith.constant 0 : index
    %c0_1 = arith.constant 0 : index
    %3 = vector.load %arg6[%c0, %c0_1] : memref<32x256xf32, #tpu.memory_space<vmem>>, vector<32x256xf32>
    %c0_2 = arith.constant 0 : index
    %c0_3 = arith.constant 0 : index
    %4 = vector.load %arg3[%c0_2, %c0_3] : memref<32x128xbf16, #tpu.memory_space<vmem>>, vector<32x128xbf16>
    %c0_4 = arith.constant 0 : index
    %c0_5 = arith.constant 0 : index
    %5 = vector.load %arg4[%c0_4, %c0_5] : memref<128x256xbf16, #tpu.memory_space<vmem>>, vector<128x256xbf16>
    %cst = arith.constant dense<0.000000e+00> : vector<32x256xf32>
    %6 = tpu.matmul %4, %5, %cst {dimension_numbers = #tpu.dot_dimension_numbers<[1], [0], [0], [1], [0, 0, 1, 1], [], []>} : vector<32x128xbf16>, vector<128x256xbf16>, vector<32x256xf32> -> vector<32x256xf32>
    %7 = arith.addf %3, %6 : vector<32x256xf32>
    %c0_6 = arith.constant 0 : index
    %c0_7 = arith.constant 0 : index
    %8 = vector.load %arg6[%c0_6, %c0_7] : memref<32x256xf32, #tpu.memory_space<vmem>>, vector<32x256xf32>
    tpu.vector_store %arg6[%c0_6, %c0_7], %7 {strides = array<i32>} : memref<32x256xf32, #tpu.memory_space<vmem>>, vector<32x256xf32>,
    %c0_i32_8 = arith.constant 0 : i32
    %9 = arith.cmpi eq, %arg2, %c0_i32_8 : i32
    %10 = arith.extui %9 : i1 to i32
    %c0_i32_9 = arith.constant 0 : i32
    %11 = arith.cmpi ne, %10, %c0_i32_9 : i32
    scf.if %11 {
      %c0_10 = arith.constant 0 : index
      %c0_11 = arith.constant 0 : index
      %12 = vector.load %arg6[%c0_10, %c0_11] : memref<32x256xf32, #tpu.memory_space<vmem>>, vector<32x256xf32>
      %c0_12 = arith.constant 0 : index
      %c0_13 = arith.constant 0 : index
      %13 = vector.load %arg5[%c0_12, %c0_13] : memref<32x256xf32, #tpu.memory_space<vmem>>, vector<32x256xf32>
      tpu.vector_store %arg5[%c0_12, %c0_13], %12 {strides = array<i32>} : memref<32x256xf32, #tpu.memory_space<vmem>>, vector<32x256xf32>,
    } else {
    }
    return
  }
  func.func @transform_0(%arg0: i32, %arg1: i32, %arg2: i32) -> (i32, i32) {
    %c0_i32 = arith.constant 0 : i32
    return %arg0, %arg2 : i32, i32
  }
  func.func @transform_1(%arg0: i32, %arg1: i32, %arg2: i32) -> (i32, i32) {
    %c0_i32 = arith.constant 0 : i32
    return %arg2, %arg1 : i32, i32
  }
  func.func @transform_2(%arg0: i32, %arg1: i32, %arg2: i32) -> (i32, i32) {
    %c0_i32 = arith.constant 0 : i32
    return %arg0, %arg1 : i32, i32
  }
}

module attributes {stable_mosaic.version = 11 : i64} {
  func.func @kernel(%arg0: i32, %arg1: i32, %arg2: i32, %arg3: memref<32x384xbf16, #tpu.memory_space<vmem>>, %arg4: memref<384x256xbf16, #tpu.memory_space<vmem>>, %arg5: memref<32x256xf32, #tpu.memory_space<vmem>>, %arg6: memref<32x256xf32, #tpu.memory_space<vmem>>, %arg7: memref<32x256xf32, #tpu.memory_space<vmem>>) attributes {dimension_semantics = [#tpu.dimension_semantics<parallel>, #tpu.dimension_semantics<parallel>, #tpu.dimension_semantics<arbitrary>], iteration_bounds = array<i64: 1, 1, 6>, scalar_prefetch = 0 : i64, scratch_operands = 1 : i64, tpu.core_type = #tpu.core_type<tc>, window_params = [{transform_indices = @transform_0, window_bounds = array<i64: 32, 384>}, {transform_indices = @transform_1, window_bounds = array<i64: 384, 256>}, {transform_indices = @transform_2, window_bounds = array<i64: 32, 256>}, {transform_indices = @transform_3, window_bounds = array<i64: 32, 256>}]} {
    %c0_i32 = arith.constant 0 : i32
    %0 = arith.cmpi eq, %arg2, %c0_i32 : i32
    %1 = arith.extui %0 : i1 to i32
    %c0_i32_0 = arith.constant 0 : i32
    %2 = arith.cmpi ne, %1, %c0_i32_0 : i32
    scf.if %2 {
      %cst_9 = arith.constant 0.000000e+00 : f32
      %12 = vector.broadcast %cst_9 : f32 to vector<32x256xf32>
      %c0_10 = arith.constant 0 : index
      %c0_11 = arith.constant 0 : index
      %13 = vector.load %arg7[%c0_10, %c0_11] : memref<32x256xf32, #tpu.memory_space<vmem>>, vector<32x256xf32>
      tpu.vector_store %arg7[%c0_10, %c0_11], %12 {strides = array<i32>} : memref<32x256xf32, #tpu.memory_space<vmem>>, vector<32x256xf32>,
    } else {
    }
    %c0 = arith.constant 0 : index
    %c0_1 = arith.constant 0 : index
    %3 = vector.load %arg7[%c0, %c0_1] : memref<32x256xf32, #tpu.memory_space<vmem>>, vector<32x256xf32>
    %c0_2 = arith.constant 0 : index
    %c0_3 = arith.constant 0 : index
    %4 = vector.load %arg3[%c0_2, %c0_3] : memref<32x384xbf16, #tpu.memory_space<vmem>>, vector<32x384xbf16>
    %c0_4 = arith.constant 0 : index
    %c0_5 = arith.constant 0 : index
    %5 = vector.load %arg4[%c0_4, %c0_5] : memref<384x256xbf16, #tpu.memory_space<vmem>>, vector<384x256xbf16>
    %cst = arith.constant dense<0.000000e+00> : vector<32x256xf32>
    %6 = tpu.matmul %4, %5, %cst {dimension_numbers = #tpu.dot_dimension_numbers<[1], [0], [0], [1], [0, 0, 1, 1], [], []>} : vector<32x384xbf16>, vector<384x256xbf16>, vector<32x256xf32> -> vector<32x256xf32>
    %7 = arith.addf %3, %6 : vector<32x256xf32>
    %c0_6 = arith.constant 0 : index
    %c0_7 = arith.constant 0 : index
    %8 = vector.load %arg7[%c0_6, %c0_7] : memref<32x256xf32, #tpu.memory_space<vmem>>, vector<32x256xf32>
    tpu.vector_store %arg7[%c0_6, %c0_7], %7 {strides = array<i32>} : memref<32x256xf32, #tpu.memory_space<vmem>>, vector<32x256xf32>,
    %c5_i32 = arith.constant 5 : i32
    %9 = arith.cmpi eq, %arg2, %c5_i32 : i32
    %10 = arith.extui %9 : i1 to i32
    %c0_i32_8 = arith.constant 0 : i32
    %11 = arith.cmpi ne, %10, %c0_i32_8 : i32
    scf.if %11 {
      %c0_9 = arith.constant 0 : index
      %c0_10 = arith.constant 0 : index
      %12 = vector.load %arg7[%c0_9, %c0_10] : memref<32x256xf32, #tpu.memory_space<vmem>>, vector<32x256xf32>
      %c0_11 = arith.constant 0 : index
      %c0_12 = arith.constant 0 : index
      %13 = vector.load %arg5[%c0_11, %c0_12] : memref<32x256xf32, #tpu.memory_space<vmem>>, vector<32x256xf32>
      %14 = arith.addf %12, %13 : vector<32x256xf32>
      %c0_13 = arith.constant 0 : index
      %c0_14 = arith.constant 0 : index
      %15 = vector.load %arg6[%c0_13, %c0_14] : memref<32x256xf32, #tpu.memory_space<vmem>>, vector<32x256xf32>
      tpu.vector_store %arg6[%c0_13, %c0_14], %14 {strides = array<i32>} : memref<32x256xf32, #tpu.memory_space<vmem>>, vector<32x256xf32>,
    } else {
    }
    return
  }
  func.func @transform_0(%arg0: i32, %arg1: i32, %arg2: i32) -> (i32, i32) {
    %c0_i32 = arith.constant 0 : i32
    return %arg0, %arg2 : i32, i32
  }
  func.func @transform_1(%arg0: i32, %arg1: i32, %arg2: i32) -> (i32, i32) {
    %c0_i32 = arith.constant 0 : i32
    return %arg2, %arg1 : i32, i32
  }
  func.func @transform_2(%arg0: i32, %arg1: i32, %arg2: i32) -> (i32, i32) {
    %c0_i32 = arith.constant 0 : i32
    return %arg0, %arg1 : i32, i32
  }
  func.func @transform_3(%arg0: i32, %arg1: i32, %arg2: i32) -> (i32, i32) {
    %c0_i32 = arith.constant 0 : i32
    return %arg0, %arg1 : i32, i32
  }
}

module attributes {stable_mosaic.version = 11 : i64} {
  func.func @_bn_relu_kernel(%arg0: i32, %arg1: memref<32x256xf32, #tpu.memory_space<vmem>>, %arg2: memref<1x256xf32, #tpu.memory_space<vmem>>, %arg3: memref<1x256xf32, #tpu.memory_space<vmem>>, %arg4: memref<32x256xbf16, #tpu.memory_space<vmem>>) attributes {dimension_semantics = [#tpu.dimension_semantics<parallel>], iteration_bounds = array<i64: 1>, scalar_prefetch = 0 : i64, scratch_operands = 0 : i64, tpu.core_type = #tpu.core_type<tc>, window_params = [{transform_indices = @transform_0, window_bounds = array<i64: 32, 256>}, {pipeline_mode = #tpu.pipeline_mode<synchronous>, transform_indices = @transform_1, window_bounds = array<i64: 1, 256>}, {pipeline_mode = #tpu.pipeline_mode<synchronous>, transform_indices = @transform_2, window_bounds = array<i64: 1, 256>}, {transform_indices = @transform_3, window_bounds = array<i64: 32, 256>}]} {
    %c0 = arith.constant 0 : index
    %c0_0 = arith.constant 0 : index
    %0 = vector.load %arg1[%c0, %c0_0] : memref<32x256xf32, #tpu.memory_space<vmem>>, vector<32x256xf32>
    %c0_1 = arith.constant 0 : index
    %c0_2 = arith.constant 0 : index
    %1 = vector.load %arg2[%c0_1, %c0_2] : memref<1x256xf32, #tpu.memory_space<vmem>>, vector<1x256xf32>
    %2 = vector.broadcast %1 : vector<1x256xf32> to vector<32x256xf32>
    %3 = arith.mulf %0, %2 : vector<32x256xf32>
    %c0_3 = arith.constant 0 : index
    %c0_4 = arith.constant 0 : index
    %4 = vector.load %arg3[%c0_3, %c0_4] : memref<1x256xf32, #tpu.memory_space<vmem>>, vector<1x256xf32>
    %5 = vector.broadcast %4 : vector<1x256xf32> to vector<32x256xf32>
    %6 = arith.addf %3, %5 : vector<32x256xf32>
    %cst = arith.constant 0.000000e+00 : f32
    %7 = vector.broadcast %cst : f32 to vector<32x256xf32>
    %8 = arith.maximumf %6, %7 : vector<32x256xf32>
    %9 = arith.truncf %8 : vector<32x256xf32> to vector<32x256xbf16>
    %c0_5 = arith.constant 0 : index
    %c0_6 = arith.constant 0 : index
    %10 = vector.load %arg4[%c0_5, %c0_6] : memref<32x256xbf16, #tpu.memory_space<vmem>>, vector<32x256xbf16>
    tpu.vector_store %arg4[%c0_5, %c0_6], %9 {strides = array<i32>} : memref<32x256xbf16, #tpu.memory_space<vmem>>, vector<32x256xbf16>,
    return
  }
  func.func @transform_0(%arg0: i32) -> (i32, i32) {
    %c0_i32 = arith.constant 0 : i32
    %c0_i32_0 = arith.constant 0 : i32
    return %arg0, %c0_i32 : i32, i32
  }
  func.func @transform_1(%arg0: i32) -> (i32, i32) {
    %c0_i32 = arith.constant 0 : i32
    %c0_i32_0 = arith.constant 0 : i32
    %c0_i32_1 = arith.constant 0 : i32
    return %c0_i32, %c0_i32_0 : i32, i32
  }
  func.func @transform_2(%arg0: i32) -> (i32, i32) {
    %c0_i32 = arith.constant 0 : i32
    %c0_i32_0 = arith.constant 0 : i32
    %c0_i32_1 = arith.constant 0 : i32
    return %c0_i32, %c0_i32_0 : i32, i32
  }
  func.func @transform_3(%arg0: i32) -> (i32, i32) {
    %c0_i32 = arith.constant 0 : i32
    %c0_i32_0 = arith.constant 0 : i32
    return %arg0, %c0_i32 : i32, i32
  }
}

module attributes {stable_mosaic.version = 11 : i64} {
  func.func @kernel(%arg0: i32, %arg1: i32, %arg2: i32, %arg3: memref<16x384xbf16, #tpu.memory_space<vmem>>, %arg4: memref<384x256xbf16, #tpu.memory_space<vmem>>, %arg5: memref<1x256xf32, #tpu.memory_space<vmem>>, %arg6: memref<1x256xf32, #tpu.memory_space<vmem>>, %arg7: memref<16x256xbf16, #tpu.memory_space<vmem>>, %arg8: memref<16x256xf32, #tpu.memory_space<vmem>>) attributes {dimension_semantics = [#tpu.dimension_semantics<parallel>, #tpu.dimension_semantics<parallel>, #tpu.dimension_semantics<arbitrary>], iteration_bounds = array<i64: 1, 1, 6>, scalar_prefetch = 0 : i64, scratch_operands = 1 : i64, tpu.core_type = #tpu.core_type<tc>, window_params = [{transform_indices = @transform_0, window_bounds = array<i64: 16, 384>}, {transform_indices = @transform_1, window_bounds = array<i64: 384, 256>}, {transform_indices = @transform_2, window_bounds = array<i64: 1, 256>}, {transform_indices = @transform_3, window_bounds = array<i64: 1, 256>}, {transform_indices = @transform_4, window_bounds = array<i64: 16, 256>}]} {
    %c0_i32 = arith.constant 0 : i32
    %0 = arith.cmpi eq, %arg2, %c0_i32 : i32
    %1 = arith.extui %0 : i1 to i32
    %c0_i32_0 = arith.constant 0 : i32
    %2 = arith.cmpi ne, %1, %c0_i32_0 : i32
    scf.if %2 {
      %cst_9 = arith.constant 0.000000e+00 : f32
      %12 = vector.broadcast %cst_9 : f32 to vector<16x256xf32>
      %c0_10 = arith.constant 0 : index
      %c0_11 = arith.constant 0 : index
      %13 = vector.load %arg8[%c0_10, %c0_11] : memref<16x256xf32, #tpu.memory_space<vmem>>, vector<16x256xf32>
      tpu.vector_store %arg8[%c0_10, %c0_11], %12 {strides = array<i32>} : memref<16x256xf32, #tpu.memory_space<vmem>>, vector<16x256xf32>,
    } else {
    }
    %c0 = arith.constant 0 : index
    %c0_1 = arith.constant 0 : index
    %3 = vector.load %arg8[%c0, %c0_1] : memref<16x256xf32, #tpu.memory_space<vmem>>, vector<16x256xf32>
    %c0_2 = arith.constant 0 : index
    %c0_3 = arith.constant 0 : index
    %4 = vector.load %arg3[%c0_2, %c0_3] : memref<16x384xbf16, #tpu.memory_space<vmem>>, vector<16x384xbf16>
    %c0_4 = arith.constant 0 : index
    %c0_5 = arith.constant 0 : index
    %5 = vector.load %arg4[%c0_4, %c0_5] : memref<384x256xbf16, #tpu.memory_space<vmem>>, vector<384x256xbf16>
    %cst = arith.constant dense<0.000000e+00> : vector<16x256xf32>
    %6 = tpu.matmul %4, %5, %cst {dimension_numbers = #tpu.dot_dimension_numbers<[1], [0], [0], [1], [0, 0, 1, 1], [], []>} : vector<16x384xbf16>, vector<384x256xbf16>, vector<16x256xf32> -> vector<16x256xf32>
    %7 = arith.addf %3, %6 : vector<16x256xf32>
    %c0_6 = arith.constant 0 : index
    %c0_7 = arith.constant 0 : index
    %8 = vector.load %arg8[%c0_6, %c0_7] : memref<16x256xf32, #tpu.memory_space<vmem>>, vector<16x256xf32>
    tpu.vector_store %arg8[%c0_6, %c0_7], %7 {strides = array<i32>} : memref<16x256xf32, #tpu.memory_space<vmem>>, vector<16x256xf32>,
    %c5_i32 = arith.constant 5 : i32
    %9 = arith.cmpi eq, %arg2, %c5_i32 : i32
    %10 = arith.extui %9 : i1 to i32
    %c0_i32_8 = arith.constant 0 : i32
    %11 = arith.cmpi ne, %10, %c0_i32_8 : i32
    scf.if %11 {
      %c0_9 = arith.constant 0 : index
      %c0_10 = arith.constant 0 : index
      %12 = vector.load %arg8[%c0_9, %c0_10] : memref<16x256xf32, #tpu.memory_space<vmem>>, vector<16x256xf32>
      %c0_11 = arith.constant 0 : index
      %c0_12 = arith.constant 0 : index
      %13 = vector.load %arg5[%c0_11, %c0_12] : memref<1x256xf32, #tpu.memory_space<vmem>>, vector<1x256xf32>
      %14 = vector.broadcast %13 : vector<1x256xf32> to vector<16x256xf32>
      %15 = arith.mulf %12, %14 : vector<16x256xf32>
      %c0_13 = arith.constant 0 : index
      %c0_14 = arith.constant 0 : index
      %16 = vector.load %arg6[%c0_13, %c0_14] : memref<1x256xf32, #tpu.memory_space<vmem>>, vector<1x256xf32>
      %17 = vector.broadcast %16 : vector<1x256xf32> to vector<16x256xf32>
      %18 = arith.addf %15, %17 : vector<16x256xf32>
      %cst_15 = arith.constant 0.000000e+00 : f32
      %19 = vector.broadcast %cst_15 : f32 to vector<16x256xf32>
      %20 = arith.maximumf %18, %19 : vector<16x256xf32>
      %21 = arith.truncf %20 : vector<16x256xf32> to vector<16x256xbf16>
      %c0_16 = arith.constant 0 : index
      %c0_17 = arith.constant 0 : index
      %22 = vector.load %arg7[%c0_16, %c0_17] : memref<16x256xbf16, #tpu.memory_space<vmem>>, vector<16x256xbf16>
      tpu.vector_store %arg7[%c0_16, %c0_17], %21 {strides = array<i32>} : memref<16x256xbf16, #tpu.memory_space<vmem>>, vector<16x256xbf16>,
    } else {
    }
    return
  }
  func.func @transform_0(%arg0: i32, %arg1: i32, %arg2: i32) -> (i32, i32) {
    %c0_i32 = arith.constant 0 : i32
    return %arg0, %arg2 : i32, i32
  }
  func.func @transform_1(%arg0: i32, %arg1: i32, %arg2: i32) -> (i32, i32) {
    %c0_i32 = arith.constant 0 : i32
    return %arg2, %arg1 : i32, i32
  }
  func.func @transform_2(%arg0: i32, %arg1: i32, %arg2: i32) -> (i32, i32) {
    %c0_i32 = arith.constant 0 : i32
    %c0_i32_0 = arith.constant 0 : i32
    return %c0_i32, %arg1 : i32, i32
  }
  func.func @transform_3(%arg0: i32, %arg1: i32, %arg2: i32) -> (i32, i32) {
    %c0_i32 = arith.constant 0 : i32
    %c0_i32_0 = arith.constant 0 : i32
    return %c0_i32, %arg1 : i32, i32
  }
  func.func @transform_4(%arg0: i32, %arg1: i32, %arg2: i32) -> (i32, i32) {
    %c0_i32 = arith.constant 0 : i32
    return %arg0, %arg1 : i32, i32
  }
}

module attributes {stable_mosaic.version = 11 : i64} {
  func.func @_bn_relu_kernel(%arg0: i32, %arg1: memref<16x256xf32, #tpu.memory_space<vmem>>, %arg2: memref<1x256xf32, #tpu.memory_space<vmem>>, %arg3: memref<1x256xf32, #tpu.memory_space<vmem>>, %arg4: memref<16x256xbf16, #tpu.memory_space<vmem>>) attributes {dimension_semantics = [#tpu.dimension_semantics<parallel>], iteration_bounds = array<i64: 1>, scalar_prefetch = 0 : i64, scratch_operands = 0 : i64, tpu.core_type = #tpu.core_type<tc>, window_params = [{transform_indices = @transform_0, window_bounds = array<i64: 16, 256>}, {pipeline_mode = #tpu.pipeline_mode<synchronous>, transform_indices = @transform_1, window_bounds = array<i64: 1, 256>}, {pipeline_mode = #tpu.pipeline_mode<synchronous>, transform_indices = @transform_2, window_bounds = array<i64: 1, 256>}, {transform_indices = @transform_3, window_bounds = array<i64: 16, 256>}]} {
    %c0 = arith.constant 0 : index
    %c0_0 = arith.constant 0 : index
    %0 = vector.load %arg1[%c0, %c0_0] : memref<16x256xf32, #tpu.memory_space<vmem>>, vector<16x256xf32>
    %c0_1 = arith.constant 0 : index
    %c0_2 = arith.constant 0 : index
    %1 = vector.load %arg2[%c0_1, %c0_2] : memref<1x256xf32, #tpu.memory_space<vmem>>, vector<1x256xf32>
    %2 = vector.broadcast %1 : vector<1x256xf32> to vector<16x256xf32>
    %3 = arith.mulf %0, %2 : vector<16x256xf32>
    %c0_3 = arith.constant 0 : index
    %c0_4 = arith.constant 0 : index
    %4 = vector.load %arg3[%c0_3, %c0_4] : memref<1x256xf32, #tpu.memory_space<vmem>>, vector<1x256xf32>
    %5 = vector.broadcast %4 : vector<1x256xf32> to vector<16x256xf32>
    %6 = arith.addf %3, %5 : vector<16x256xf32>
    %cst = arith.constant 0.000000e+00 : f32
    %7 = vector.broadcast %cst : f32 to vector<16x256xf32>
    %8 = arith.maximumf %6, %7 : vector<16x256xf32>
    %9 = arith.truncf %8 : vector<16x256xf32> to vector<16x256xbf16>
    %c0_5 = arith.constant 0 : index
    %c0_6 = arith.constant 0 : index
    %10 = vector.load %arg4[%c0_5, %c0_6] : memref<16x256xbf16, #tpu.memory_space<vmem>>, vector<16x256xbf16>
    tpu.vector_store %arg4[%c0_5, %c0_6], %9 {strides = array<i32>} : memref<16x256xbf16, #tpu.memory_space<vmem>>, vector<16x256xbf16>,
    return
  }
  func.func @transform_0(%arg0: i32) -> (i32, i32) {
    %c0_i32 = arith.constant 0 : i32
    %c0_i32_0 = arith.constant 0 : i32
    return %arg0, %c0_i32 : i32, i32
  }
  func.func @transform_1(%arg0: i32) -> (i32, i32) {
    %c0_i32 = arith.constant 0 : i32
    %c0_i32_0 = arith.constant 0 : i32
    %c0_i32_1 = arith.constant 0 : i32
    return %c0_i32, %c0_i32_0 : i32, i32
  }
  func.func @transform_2(%arg0: i32) -> (i32, i32) {
    %c0_i32 = arith.constant 0 : i32
    %c0_i32_0 = arith.constant 0 : i32
    %c0_i32_1 = arith.constant 0 : i32
    return %c0_i32, %c0_i32_0 : i32, i32
  }
  func.func @transform_3(%arg0: i32) -> (i32, i32) {
    %c0_i32 = arith.constant 0 : i32
    %c0_i32_0 = arith.constant 0 : i32
    return %arg0, %c0_i32 : i32, i32
  }
}

module attributes {stable_mosaic.version = 11 : i64} {
  func.func @kernel(%arg0: i32, %arg1: i32, %arg2: i32, %arg3: memref<16x384xbf16, #tpu.memory_space<vmem>>, %arg4: memref<384x128xbf16, #tpu.memory_space<vmem>>, %arg5: memref<1x128xf32, #tpu.memory_space<vmem>>, %arg6: memref<1x128xf32, #tpu.memory_space<vmem>>, %arg7: memref<16x128xbf16, #tpu.memory_space<vmem>>, %arg8: memref<16x128xf32, #tpu.memory_space<vmem>>) attributes {dimension_semantics = [#tpu.dimension_semantics<parallel>, #tpu.dimension_semantics<parallel>, #tpu.dimension_semantics<arbitrary>], iteration_bounds = array<i64: 1, 1, 6>, scalar_prefetch = 0 : i64, scratch_operands = 1 : i64, tpu.core_type = #tpu.core_type<tc>, window_params = [{transform_indices = @transform_0, window_bounds = array<i64: 16, 384>}, {transform_indices = @transform_1, window_bounds = array<i64: 384, 128>}, {transform_indices = @transform_2, window_bounds = array<i64: 1, 128>}, {transform_indices = @transform_3, window_bounds = array<i64: 1, 128>}, {transform_indices = @transform_4, window_bounds = array<i64: 16, 128>}]} {
    %c0_i32 = arith.constant 0 : i32
    %0 = arith.cmpi eq, %arg2, %c0_i32 : i32
    %1 = arith.extui %0 : i1 to i32
    %c0_i32_0 = arith.constant 0 : i32
    %2 = arith.cmpi ne, %1, %c0_i32_0 : i32
    scf.if %2 {
      %cst_9 = arith.constant 0.000000e+00 : f32
      %12 = vector.broadcast %cst_9 : f32 to vector<16x128xf32>
      %c0_10 = arith.constant 0 : index
      %c0_11 = arith.constant 0 : index
      %13 = vector.load %arg8[%c0_10, %c0_11] : memref<16x128xf32, #tpu.memory_space<vmem>>, vector<16x128xf32>
      tpu.vector_store %arg8[%c0_10, %c0_11], %12 {strides = array<i32>} : memref<16x128xf32, #tpu.memory_space<vmem>>, vector<16x128xf32>,
    } else {
    }
    %c0 = arith.constant 0 : index
    %c0_1 = arith.constant 0 : index
    %3 = vector.load %arg8[%c0, %c0_1] : memref<16x128xf32, #tpu.memory_space<vmem>>, vector<16x128xf32>
    %c0_2 = arith.constant 0 : index
    %c0_3 = arith.constant 0 : index
    %4 = vector.load %arg3[%c0_2, %c0_3] : memref<16x384xbf16, #tpu.memory_space<vmem>>, vector<16x384xbf16>
    %c0_4 = arith.constant 0 : index
    %c0_5 = arith.constant 0 : index
    %5 = vector.load %arg4[%c0_4, %c0_5] : memref<384x128xbf16, #tpu.memory_space<vmem>>, vector<384x128xbf16>
    %cst = arith.constant dense<0.000000e+00> : vector<16x128xf32>
    %6 = tpu.matmul %4, %5, %cst {dimension_numbers = #tpu.dot_dimension_numbers<[1], [0], [0], [1], [0, 0, 1, 1], [], []>} : vector<16x384xbf16>, vector<384x128xbf16>, vector<16x128xf32> -> vector<16x128xf32>
    %7 = arith.addf %3, %6 : vector<16x128xf32>
    %c0_6 = arith.constant 0 : index
    %c0_7 = arith.constant 0 : index
    %8 = vector.load %arg8[%c0_6, %c0_7] : memref<16x128xf32, #tpu.memory_space<vmem>>, vector<16x128xf32>
    tpu.vector_store %arg8[%c0_6, %c0_7], %7 {strides = array<i32>} : memref<16x128xf32, #tpu.memory_space<vmem>>, vector<16x128xf32>,
    %c5_i32 = arith.constant 5 : i32
    %9 = arith.cmpi eq, %arg2, %c5_i32 : i32
    %10 = arith.extui %9 : i1 to i32
    %c0_i32_8 = arith.constant 0 : i32
    %11 = arith.cmpi ne, %10, %c0_i32_8 : i32
    scf.if %11 {
      %c0_9 = arith.constant 0 : index
      %c0_10 = arith.constant 0 : index
      %12 = vector.load %arg8[%c0_9, %c0_10] : memref<16x128xf32, #tpu.memory_space<vmem>>, vector<16x128xf32>
      %c0_11 = arith.constant 0 : index
      %c0_12 = arith.constant 0 : index
      %13 = vector.load %arg5[%c0_11, %c0_12] : memref<1x128xf32, #tpu.memory_space<vmem>>, vector<1x128xf32>
      %14 = vector.broadcast %13 : vector<1x128xf32> to vector<16x128xf32>
      %15 = arith.mulf %12, %14 : vector<16x128xf32>
      %c0_13 = arith.constant 0 : index
      %c0_14 = arith.constant 0 : index
      %16 = vector.load %arg6[%c0_13, %c0_14] : memref<1x128xf32, #tpu.memory_space<vmem>>, vector<1x128xf32>
      %17 = vector.broadcast %16 : vector<1x128xf32> to vector<16x128xf32>
      %18 = arith.addf %15, %17 : vector<16x128xf32>
      %cst_15 = arith.constant 0.000000e+00 : f32
      %19 = vector.broadcast %cst_15 : f32 to vector<16x128xf32>
      %20 = arith.maximumf %18, %19 : vector<16x128xf32>
      %21 = arith.truncf %20 : vector<16x128xf32> to vector<16x128xbf16>
      %c0_16 = arith.constant 0 : index
      %c0_17 = arith.constant 0 : index
      %22 = vector.load %arg7[%c0_16, %c0_17] : memref<16x128xbf16, #tpu.memory_space<vmem>>, vector<16x128xbf16>
      tpu.vector_store %arg7[%c0_16, %c0_17], %21 {strides = array<i32>} : memref<16x128xbf16, #tpu.memory_space<vmem>>, vector<16x128xbf16>,
    } else {
    }
    return
  }
  func.func @transform_0(%arg0: i32, %arg1: i32, %arg2: i32) -> (i32, i32) {
    %c0_i32 = arith.constant 0 : i32
    return %arg0, %arg2 : i32, i32
  }
  func.func @transform_1(%arg0: i32, %arg1: i32, %arg2: i32) -> (i32, i32) {
    %c0_i32 = arith.constant 0 : i32
    return %arg2, %arg1 : i32, i32
  }
  func.func @transform_2(%arg0: i32, %arg1: i32, %arg2: i32) -> (i32, i32) {
    %c0_i32 = arith.constant 0 : i32
    %c0_i32_0 = arith.constant 0 : i32
    return %c0_i32, %arg1 : i32, i32
  }
  func.func @transform_3(%arg0: i32, %arg1: i32, %arg2: i32) -> (i32, i32) {
    %c0_i32 = arith.constant 0 : i32
    %c0_i32_0 = arith.constant 0 : i32
    return %c0_i32, %arg1 : i32, i32
  }
  func.func @transform_4(%arg0: i32, %arg1: i32, %arg2: i32) -> (i32, i32) {
    %c0_i32 = arith.constant 0 : i32
    return %arg0, %arg1 : i32, i32
  }
}

module attributes {stable_mosaic.version = 11 : i64} {
  func.func @kernel(%arg0: i32, %arg1: i32, %arg2: i32, %arg3: memref<16x384xbf16, #tpu.memory_space<vmem>>, %arg4: memref<384x256xbf16, #tpu.memory_space<vmem>>, %arg5: memref<16x256xf32, #tpu.memory_space<vmem>>, %arg6: memref<16x256xf32, #tpu.memory_space<vmem>>, %arg7: memref<16x256xf32, #tpu.memory_space<vmem>>) attributes {dimension_semantics = [#tpu.dimension_semantics<parallel>, #tpu.dimension_semantics<parallel>, #tpu.dimension_semantics<arbitrary>], iteration_bounds = array<i64: 1, 1, 6>, scalar_prefetch = 0 : i64, scratch_operands = 1 : i64, tpu.core_type = #tpu.core_type<tc>, window_params = [{transform_indices = @transform_0, window_bounds = array<i64: 16, 384>}, {transform_indices = @transform_1, window_bounds = array<i64: 384, 256>}, {transform_indices = @transform_2, window_bounds = array<i64: 16, 256>}, {transform_indices = @transform_3, window_bounds = array<i64: 16, 256>}]} {
    %c0_i32 = arith.constant 0 : i32
    %0 = arith.cmpi eq, %arg2, %c0_i32 : i32
    %1 = arith.extui %0 : i1 to i32
    %c0_i32_0 = arith.constant 0 : i32
    %2 = arith.cmpi ne, %1, %c0_i32_0 : i32
    scf.if %2 {
      %cst_9 = arith.constant 0.000000e+00 : f32
      %12 = vector.broadcast %cst_9 : f32 to vector<16x256xf32>
      %c0_10 = arith.constant 0 : index
      %c0_11 = arith.constant 0 : index
      %13 = vector.load %arg7[%c0_10, %c0_11] : memref<16x256xf32, #tpu.memory_space<vmem>>, vector<16x256xf32>
      tpu.vector_store %arg7[%c0_10, %c0_11], %12 {strides = array<i32>} : memref<16x256xf32, #tpu.memory_space<vmem>>, vector<16x256xf32>,
    } else {
    }
    %c0 = arith.constant 0 : index
    %c0_1 = arith.constant 0 : index
    %3 = vector.load %arg7[%c0, %c0_1] : memref<16x256xf32, #tpu.memory_space<vmem>>, vector<16x256xf32>
    %c0_2 = arith.constant 0 : index
    %c0_3 = arith.constant 0 : index
    %4 = vector.load %arg3[%c0_2, %c0_3] : memref<16x384xbf16, #tpu.memory_space<vmem>>, vector<16x384xbf16>
    %c0_4 = arith.constant 0 : index
    %c0_5 = arith.constant 0 : index
    %5 = vector.load %arg4[%c0_4, %c0_5] : memref<384x256xbf16, #tpu.memory_space<vmem>>, vector<384x256xbf16>
    %cst = arith.constant dense<0.000000e+00> : vector<16x256xf32>
    %6 = tpu.matmul %4, %5, %cst {dimension_numbers = #tpu.dot_dimension_numbers<[1], [0], [0], [1], [0, 0, 1, 1], [], []>} : vector<16x384xbf16>, vector<384x256xbf16>, vector<16x256xf32> -> vector<16x256xf32>
    %7 = arith.addf %3, %6 : vector<16x256xf32>
    %c0_6 = arith.constant 0 : index
    %c0_7 = arith.constant 0 : index
    %8 = vector.load %arg7[%c0_6, %c0_7] : memref<16x256xf32, #tpu.memory_space<vmem>>, vector<16x256xf32>
    tpu.vector_store %arg7[%c0_6, %c0_7], %7 {strides = array<i32>} : memref<16x256xf32, #tpu.memory_space<vmem>>, vector<16x256xf32>,
    %c5_i32 = arith.constant 5 : i32
    %9 = arith.cmpi eq, %arg2, %c5_i32 : i32
    %10 = arith.extui %9 : i1 to i32
    %c0_i32_8 = arith.constant 0 : i32
    %11 = arith.cmpi ne, %10, %c0_i32_8 : i32
    scf.if %11 {
      %c0_9 = arith.constant 0 : index
      %c0_10 = arith.constant 0 : index
      %12 = vector.load %arg7[%c0_9, %c0_10] : memref<16x256xf32, #tpu.memory_space<vmem>>, vector<16x256xf32>
      %c0_11 = arith.constant 0 : index
      %c0_12 = arith.constant 0 : index
      %13 = vector.load %arg5[%c0_11, %c0_12] : memref<16x256xf32, #tpu.memory_space<vmem>>, vector<16x256xf32>
      %14 = arith.addf %12, %13 : vector<16x256xf32>
      %c0_13 = arith.constant 0 : index
      %c0_14 = arith.constant 0 : index
      %15 = vector.load %arg6[%c0_13, %c0_14] : memref<16x256xf32, #tpu.memory_space<vmem>>, vector<16x256xf32>
      tpu.vector_store %arg6[%c0_13, %c0_14], %14 {strides = array<i32>} : memref<16x256xf32, #tpu.memory_space<vmem>>, vector<16x256xf32>,
    } else {
    }
    return
  }
  func.func @transform_0(%arg0: i32, %arg1: i32, %arg2: i32) -> (i32, i32) {
    %c0_i32 = arith.constant 0 : i32
    return %arg0, %arg2 : i32, i32
  }
  func.func @transform_1(%arg0: i32, %arg1: i32, %arg2: i32) -> (i32, i32) {
    %c0_i32 = arith.constant 0 : i32
    return %arg2, %arg1 : i32, i32
  }
  func.func @transform_2(%arg0: i32, %arg1: i32, %arg2: i32) -> (i32, i32) {
    %c0_i32 = arith.constant 0 : i32
    return %arg0, %arg1 : i32, i32
  }
  func.func @transform_3(%arg0: i32, %arg1: i32, %arg2: i32) -> (i32, i32) {
    %c0_i32 = arith.constant 0 : i32
    return %arg0, %arg1 : i32, i32
  }
}

module attributes {stable_mosaic.version = 11 : i64} {
  func.func @kernel(%arg0: i32, %arg1: i32, %arg2: i32, %arg3: memref<16x256xbf16, #tpu.memory_space<vmem>>, %arg4: memref<256x128xbf16, #tpu.memory_space<vmem>>, %arg5: memref<16x128xf32, #tpu.memory_space<vmem>>, %arg6: memref<16x128xf32, #tpu.memory_space<vmem>>) attributes {dimension_semantics = [#tpu.dimension_semantics<parallel>, #tpu.dimension_semantics<parallel>, #tpu.dimension_semantics<arbitrary>], iteration_bounds = array<i64: 1, 1, 1>, scalar_prefetch = 0 : i64, scratch_operands = 1 : i64, tpu.core_type = #tpu.core_type<tc>, window_params = [{transform_indices = @transform_0, window_bounds = array<i64: 16, 256>}, {transform_indices = @transform_1, window_bounds = array<i64: 256, 128>}, {transform_indices = @transform_2, window_bounds = array<i64: 16, 128>}]} {
    %c0_i32 = arith.constant 0 : i32
    %0 = arith.cmpi eq, %arg2, %c0_i32 : i32
    %1 = arith.extui %0 : i1 to i32
    %c0_i32_0 = arith.constant 0 : i32
    %2 = arith.cmpi ne, %1, %c0_i32_0 : i32
    scf.if %2 {
      %cst_10 = arith.constant 0.000000e+00 : f32
      %12 = vector.broadcast %cst_10 : f32 to vector<16x128xf32>
      %c0_11 = arith.constant 0 : index
      %c0_12 = arith.constant 0 : index
      %13 = vector.load %arg6[%c0_11, %c0_12] : memref<16x128xf32, #tpu.memory_space<vmem>>, vector<16x128xf32>
      tpu.vector_store %arg6[%c0_11, %c0_12], %12 {strides = array<i32>} : memref<16x128xf32, #tpu.memory_space<vmem>>, vector<16x128xf32>,
    } else {
    }
    %c0 = arith.constant 0 : index
    %c0_1 = arith.constant 0 : index
    %3 = vector.load %arg6[%c0, %c0_1] : memref<16x128xf32, #tpu.memory_space<vmem>>, vector<16x128xf32>
    %c0_2 = arith.constant 0 : index
    %c0_3 = arith.constant 0 : index
    %4 = vector.load %arg3[%c0_2, %c0_3] : memref<16x256xbf16, #tpu.memory_space<vmem>>, vector<16x256xbf16>
    %c0_4 = arith.constant 0 : index
    %c0_5 = arith.constant 0 : index
    %5 = vector.load %arg4[%c0_4, %c0_5] : memref<256x128xbf16, #tpu.memory_space<vmem>>, vector<256x128xbf16>
    %cst = arith.constant dense<0.000000e+00> : vector<16x128xf32>
    %6 = tpu.matmul %4, %5, %cst {dimension_numbers = #tpu.dot_dimension_numbers<[1], [0], [0], [1], [0, 0, 1, 1], [], []>} : vector<16x256xbf16>, vector<256x128xbf16>, vector<16x128xf32> -> vector<16x128xf32>
    %7 = arith.addf %3, %6 : vector<16x128xf32>
    %c0_6 = arith.constant 0 : index
    %c0_7 = arith.constant 0 : index
    %8 = vector.load %arg6[%c0_6, %c0_7] : memref<16x128xf32, #tpu.memory_space<vmem>>, vector<16x128xf32>
    tpu.vector_store %arg6[%c0_6, %c0_7], %7 {strides = array<i32>} : memref<16x128xf32, #tpu.memory_space<vmem>>, vector<16x128xf32>,
    %c0_i32_8 = arith.constant 0 : i32
    %9 = arith.cmpi eq, %arg2, %c0_i32_8 : i32
    %10 = arith.extui %9 : i1 to i32
    %c0_i32_9 = arith.constant 0 : i32
    %11 = arith.cmpi ne, %10, %c0_i32_9 : i32
    scf.if %11 {
      %c0_10 = arith.constant 0 : index
      %c0_11 = arith.constant 0 : index
      %12 = vector.load %arg6[%c0_10, %c0_11] : memref<16x128xf32, #tpu.memory_space<vmem>>, vector<16x128xf32>
      %c0_12 = arith.constant 0 : index
      %c0_13 = arith.constant 0 : index
      %13 = vector.load %arg5[%c0_12, %c0_13] : memref<16x128xf32, #tpu.memory_space<vmem>>, vector<16x128xf32>
      tpu.vector_store %arg5[%c0_12, %c0_13], %12 {strides = array<i32>} : memref<16x128xf32, #tpu.memory_space<vmem>>, vector<16x128xf32>,
    } else {
    }
    return
  }
  func.func @transform_0(%arg0: i32, %arg1: i32, %arg2: i32) -> (i32, i32) {
    %c0_i32 = arith.constant 0 : i32
    return %arg0, %arg2 : i32, i32
  }
  func.func @transform_1(%arg0: i32, %arg1: i32, %arg2: i32) -> (i32, i32) {
    %c0_i32 = arith.constant 0 : i32
    return %arg2, %arg1 : i32, i32
  }
  func.func @transform_2(%arg0: i32, %arg1: i32, %arg2: i32) -> (i32, i32) {
    %c0_i32 = arith.constant 0 : i32
    return %arg0, %arg1 : i32, i32
  }
}

module attributes {stable_mosaic.version = 11 : i64} {
  func.func @kernel(%arg0: i32, %arg1: i32, %arg2: i32, %arg3: memref<32x576xbf16, #tpu.memory_space<vmem>>, %arg4: memref<576x128xbf16, #tpu.memory_space<vmem>>, %arg5: memref<32x128xf32, #tpu.memory_space<vmem>>, %arg6: memref<32x128xf32, #tpu.memory_space<vmem>>, %arg7: memref<32x128xf32, #tpu.memory_space<vmem>>) attributes {dimension_semantics = [#tpu.dimension_semantics<parallel>, #tpu.dimension_semantics<parallel>, #tpu.dimension_semantics<arbitrary>], iteration_bounds = array<i64: 1, 1, 1>, scalar_prefetch = 0 : i64, scratch_operands = 1 : i64, tpu.core_type = #tpu.core_type<tc>, window_params = [{transform_indices = @transform_0, window_bounds = array<i64: 32, 576>}, {transform_indices = @transform_1, window_bounds = array<i64: 576, 128>}, {transform_indices = @transform_2, window_bounds = array<i64: 32, 128>}, {transform_indices = @transform_3, window_bounds = array<i64: 32, 128>}]} {
    %c0_i32 = arith.constant 0 : i32
    %0 = arith.cmpi eq, %arg2, %c0_i32 : i32
    %1 = arith.extui %0 : i1 to i32
    %c0_i32_0 = arith.constant 0 : i32
    %2 = arith.cmpi ne, %1, %c0_i32_0 : i32
    scf.if %2 {
      %cst_10 = arith.constant 0.000000e+00 : f32
      %12 = vector.broadcast %cst_10 : f32 to vector<32x128xf32>
      %c0_11 = arith.constant 0 : index
      %c0_12 = arith.constant 0 : index
      %13 = vector.load %arg7[%c0_11, %c0_12] : memref<32x128xf32, #tpu.memory_space<vmem>>, vector<32x128xf32>
      tpu.vector_store %arg7[%c0_11, %c0_12], %12 {strides = array<i32>} : memref<32x128xf32, #tpu.memory_space<vmem>>, vector<32x128xf32>,
    } else {
    }
    %c0 = arith.constant 0 : index
    %c0_1 = arith.constant 0 : index
    %3 = vector.load %arg7[%c0, %c0_1] : memref<32x128xf32, #tpu.memory_space<vmem>>, vector<32x128xf32>
    %c0_2 = arith.constant 0 : index
    %c0_3 = arith.constant 0 : index
    %4 = vector.load %arg3[%c0_2, %c0_3] : memref<32x576xbf16, #tpu.memory_space<vmem>>, vector<32x576xbf16>
    %c0_4 = arith.constant 0 : index
    %c0_5 = arith.constant 0 : index
    %5 = vector.load %arg4[%c0_4, %c0_5] : memref<576x128xbf16, #tpu.memory_space<vmem>>, vector<576x128xbf16>
    %cst = arith.constant dense<0.000000e+00> : vector<32x128xf32>
    %6 = tpu.matmul %4, %5, %cst {dimension_numbers = #tpu.dot_dimension_numbers<[1], [0], [0], [1], [0, 0, 1, 1], [], []>} : vector<32x576xbf16>, vector<576x128xbf16>, vector<32x128xf32> -> vector<32x128xf32>
    %7 = arith.addf %3, %6 : vector<32x128xf32>
    %c0_6 = arith.constant 0 : index
    %c0_7 = arith.constant 0 : index
    %8 = vector.load %arg7[%c0_6, %c0_7] : memref<32x128xf32, #tpu.memory_space<vmem>>, vector<32x128xf32>
    tpu.vector_store %arg7[%c0_6, %c0_7], %7 {strides = array<i32>} : memref<32x128xf32, #tpu.memory_space<vmem>>, vector<32x128xf32>,
    %c0_i32_8 = arith.constant 0 : i32
    %9 = arith.cmpi eq, %arg2, %c0_i32_8 : i32
    %10 = arith.extui %9 : i1 to i32
    %c0_i32_9 = arith.constant 0 : i32
    %11 = arith.cmpi ne, %10, %c0_i32_9 : i32
    scf.if %11 {
      %c0_10 = arith.constant 0 : index
      %c0_11 = arith.constant 0 : index
      %12 = vector.load %arg7[%c0_10, %c0_11] : memref<32x128xf32, #tpu.memory_space<vmem>>, vector<32x128xf32>
      %c0_12 = arith.constant 0 : index
      %c0_13 = arith.constant 0 : index
      %13 = vector.load %arg5[%c0_12, %c0_13] : memref<32x128xf32, #tpu.memory_space<vmem>>, vector<32x128xf32>
      %14 = arith.addf %12, %13 : vector<32x128xf32>
      %c0_14 = arith.constant 0 : index
      %c0_15 = arith.constant 0 : index
      %15 = vector.load %arg6[%c0_14, %c0_15] : memref<32x128xf32, #tpu.memory_space<vmem>>, vector<32x128xf32>
      tpu.vector_store %arg6[%c0_14, %c0_15], %14 {strides = array<i32>} : memref<32x128xf32, #tpu.memory_space<vmem>>, vector<32x128xf32>,
    } else {
    }
    return
  }
  func.func @transform_0(%arg0: i32, %arg1: i32, %arg2: i32) -> (i32, i32) {
    %c0_i32 = arith.constant 0 : i32
    return %arg0, %arg2 : i32, i32
  }
  func.func @transform_1(%arg0: i32, %arg1: i32, %arg2: i32) -> (i32, i32) {
    %c0_i32 = arith.constant 0 : i32
    return %arg2, %arg1 : i32, i32
  }
  func.func @transform_2(%arg0: i32, %arg1: i32, %arg2: i32) -> (i32, i32) {
    %c0_i32 = arith.constant 0 : i32
    return %arg0, %arg1 : i32, i32
  }
  func.func @transform_3(%arg0: i32, %arg1: i32, %arg2: i32) -> (i32, i32) {
    %c0_i32 = arith.constant 0 : i32
    return %arg0, %arg1 : i32, i32
  }
}

module attributes {stable_mosaic.version = 11 : i64} {
  func.func @_bn_relu_kernel(%arg0: i32, %arg1: memref<32x128xf32, #tpu.memory_space<vmem>>, %arg2: memref<1x128xf32, #tpu.memory_space<vmem>>, %arg3: memref<1x128xf32, #tpu.memory_space<vmem>>, %arg4: memref<32x128xbf16, #tpu.memory_space<vmem>>) attributes {dimension_semantics = [#tpu.dimension_semantics<parallel>], iteration_bounds = array<i64: 1>, scalar_prefetch = 0 : i64, scratch_operands = 0 : i64, tpu.core_type = #tpu.core_type<tc>, window_params = [{transform_indices = @transform_0, window_bounds = array<i64: 32, 128>}, {pipeline_mode = #tpu.pipeline_mode<synchronous>, transform_indices = @transform_1, window_bounds = array<i64: 1, 128>}, {pipeline_mode = #tpu.pipeline_mode<synchronous>, transform_indices = @transform_2, window_bounds = array<i64: 1, 128>}, {transform_indices = @transform_3, window_bounds = array<i64: 32, 128>}]} {
    %c0 = arith.constant 0 : index
    %c0_0 = arith.constant 0 : index
    %0 = vector.load %arg1[%c0, %c0_0] : memref<32x128xf32, #tpu.memory_space<vmem>>, vector<32x128xf32>
    %c0_1 = arith.constant 0 : index
    %c0_2 = arith.constant 0 : index
    %1 = vector.load %arg2[%c0_1, %c0_2] : memref<1x128xf32, #tpu.memory_space<vmem>>, vector<1x128xf32>
    %2 = vector.broadcast %1 : vector<1x128xf32> to vector<32x128xf32>
    %3 = arith.mulf %0, %2 : vector<32x128xf32>
    %c0_3 = arith.constant 0 : index
    %c0_4 = arith.constant 0 : index
    %4 = vector.load %arg3[%c0_3, %c0_4] : memref<1x128xf32, #tpu.memory_space<vmem>>, vector<1x128xf32>
    %5 = vector.broadcast %4 : vector<1x128xf32> to vector<32x128xf32>
    %6 = arith.addf %3, %5 : vector<32x128xf32>
    %cst = arith.constant 0.000000e+00 : f32
    %7 = vector.broadcast %cst : f32 to vector<32x128xf32>
    %8 = arith.maximumf %6, %7 : vector<32x128xf32>
    %9 = arith.truncf %8 : vector<32x128xf32> to vector<32x128xbf16>
    %c0_5 = arith.constant 0 : index
    %c0_6 = arith.constant 0 : index
    %10 = vector.load %arg4[%c0_5, %c0_6] : memref<32x128xbf16, #tpu.memory_space<vmem>>, vector<32x128xbf16>
    tpu.vector_store %arg4[%c0_5, %c0_6], %9 {strides = array<i32>} : memref<32x128xbf16, #tpu.memory_space<vmem>>, vector<32x128xbf16>,
    return
  }
  func.func @transform_0(%arg0: i32) -> (i32, i32) {
    %c0_i32 = arith.constant 0 : i32
    %c0_i32_0 = arith.constant 0 : i32
    return %arg0, %c0_i32 : i32, i32
  }
  func.func @transform_1(%arg0: i32) -> (i32, i32) {
    %c0_i32 = arith.constant 0 : i32
    %c0_i32_0 = arith.constant 0 : i32
    %c0_i32_1 = arith.constant 0 : i32
    return %c0_i32, %c0_i32_0 : i32, i32
  }
  func.func @transform_2(%arg0: i32) -> (i32, i32) {
    %c0_i32 = arith.constant 0 : i32
    %c0_i32_0 = arith.constant 0 : i32
    %c0_i32_1 = arith.constant 0 : i32
    return %c0_i32, %c0_i32_0 : i32, i32
  }
  func.func @transform_3(%arg0: i32) -> (i32, i32) {
    %c0_i32 = arith.constant 0 : i32
    %c0_i32_0 = arith.constant 0 : i32
    return %arg0, %c0_i32 : i32, i32
  }
}

module attributes {stable_mosaic.version = 11 : i64} {
  func.func @kernel(%arg0: i32, %arg1: i32, %arg2: i32, %arg3: memref<32x576xbf16, #tpu.memory_space<vmem>>, %arg4: memref<576x128xbf16, #tpu.memory_space<vmem>>, %arg5: memref<1x128xf32, #tpu.memory_space<vmem>>, %arg6: memref<1x128xf32, #tpu.memory_space<vmem>>, %arg7: memref<32x128xbf16, #tpu.memory_space<vmem>>, %arg8: memref<32x128xf32, #tpu.memory_space<vmem>>) attributes {dimension_semantics = [#tpu.dimension_semantics<parallel>, #tpu.dimension_semantics<parallel>, #tpu.dimension_semantics<arbitrary>], iteration_bounds = array<i64: 1, 1, 1>, scalar_prefetch = 0 : i64, scratch_operands = 1 : i64, tpu.core_type = #tpu.core_type<tc>, window_params = [{transform_indices = @transform_0, window_bounds = array<i64: 32, 576>}, {transform_indices = @transform_1, window_bounds = array<i64: 576, 128>}, {transform_indices = @transform_2, window_bounds = array<i64: 1, 128>}, {transform_indices = @transform_3, window_bounds = array<i64: 1, 128>}, {transform_indices = @transform_4, window_bounds = array<i64: 32, 128>}]} {
    %c0_i32 = arith.constant 0 : i32
    %0 = arith.cmpi eq, %arg2, %c0_i32 : i32
    %1 = arith.extui %0 : i1 to i32
    %c0_i32_0 = arith.constant 0 : i32
    %2 = arith.cmpi ne, %1, %c0_i32_0 : i32
    scf.if %2 {
      %cst_10 = arith.constant 0.000000e+00 : f32
      %12 = vector.broadcast %cst_10 : f32 to vector<32x128xf32>
      %c0_11 = arith.constant 0 : index
      %c0_12 = arith.constant 0 : index
      %13 = vector.load %arg8[%c0_11, %c0_12] : memref<32x128xf32, #tpu.memory_space<vmem>>, vector<32x128xf32>
      tpu.vector_store %arg8[%c0_11, %c0_12], %12 {strides = array<i32>} : memref<32x128xf32, #tpu.memory_space<vmem>>, vector<32x128xf32>,
    } else {
    }
    %c0 = arith.constant 0 : index
    %c0_1 = arith.constant 0 : index
    %3 = vector.load %arg8[%c0, %c0_1] : memref<32x128xf32, #tpu.memory_space<vmem>>, vector<32x128xf32>
    %c0_2 = arith.constant 0 : index
    %c0_3 = arith.constant 0 : index
    %4 = vector.load %arg3[%c0_2, %c0_3] : memref<32x576xbf16, #tpu.memory_space<vmem>>, vector<32x576xbf16>
    %c0_4 = arith.constant 0 : index
    %c0_5 = arith.constant 0 : index
    %5 = vector.load %arg4[%c0_4, %c0_5] : memref<576x128xbf16, #tpu.memory_space<vmem>>, vector<576x128xbf16>
    %cst = arith.constant dense<0.000000e+00> : vector<32x128xf32>
    %6 = tpu.matmul %4, %5, %cst {dimension_numbers = #tpu.dot_dimension_numbers<[1], [0], [0], [1], [0, 0, 1, 1], [], []>} : vector<32x576xbf16>, vector<576x128xbf16>, vector<32x128xf32> -> vector<32x128xf32>
    %7 = arith.addf %3, %6 : vector<32x128xf32>
    %c0_6 = arith.constant 0 : index
    %c0_7 = arith.constant 0 : index
    %8 = vector.load %arg8[%c0_6, %c0_7] : memref<32x128xf32, #tpu.memory_space<vmem>>, vector<32x128xf32>
    tpu.vector_store %arg8[%c0_6, %c0_7], %7 {strides = array<i32>} : memref<32x128xf32, #tpu.memory_space<vmem>>, vector<32x128xf32>,
    %c0_i32_8 = arith.constant 0 : i32
    %9 = arith.cmpi eq, %arg2, %c0_i32_8 : i32
    %10 = arith.extui %9 : i1 to i32
    %c0_i32_9 = arith.constant 0 : i32
    %11 = arith.cmpi ne, %10, %c0_i32_9 : i32
    scf.if %11 {
      %c0_10 = arith.constant 0 : index
      %c0_11 = arith.constant 0 : index
      %12 = vector.load %arg8[%c0_10, %c0_11] : memref<32x128xf32, #tpu.memory_space<vmem>>, vector<32x128xf32>
      %c0_12 = arith.constant 0 : index
      %c0_13 = arith.constant 0 : index
      %13 = vector.load %arg5[%c0_12, %c0_13] : memref<1x128xf32, #tpu.memory_space<vmem>>, vector<1x128xf32>
      %14 = vector.broadcast %13 : vector<1x128xf32> to vector<32x128xf32>
      %15 = arith.mulf %12, %14 : vector<32x128xf32>
      %c0_14 = arith.constant 0 : index
      %c0_15 = arith.constant 0 : index
      %16 = vector.load %arg6[%c0_14, %c0_15] : memref<1x128xf32, #tpu.memory_space<vmem>>, vector<1x128xf32>
      %17 = vector.broadcast %16 : vector<1x128xf32> to vector<32x128xf32>
      %18 = arith.addf %15, %17 : vector<32x128xf32>
      %cst_16 = arith.constant 0.000000e+00 : f32
      %19 = vector.broadcast %cst_16 : f32 to vector<32x128xf32>
      %20 = arith.maximumf %18, %19 : vector<32x128xf32>
      %21 = arith.truncf %20 : vector<32x128xf32> to vector<32x128xbf16>
      %c0_17 = arith.constant 0 : index
      %c0_18 = arith.constant 0 : index
      %22 = vector.load %arg7[%c0_17, %c0_18] : memref<32x128xbf16, #tpu.memory_space<vmem>>, vector<32x128xbf16>
      tpu.vector_store %arg7[%c0_17, %c0_18], %21 {strides = array<i32>} : memref<32x128xbf16, #tpu.memory_space<vmem>>, vector<32x128xbf16>,
    } else {
    }
    return
  }
  func.func @transform_0(%arg0: i32, %arg1: i32, %arg2: i32) -> (i32, i32) {
    %c0_i32 = arith.constant 0 : i32
    return %arg0, %arg2 : i32, i32
  }
  func.func @transform_1(%arg0: i32, %arg1: i32, %arg2: i32) -> (i32, i32) {
    %c0_i32 = arith.constant 0 : i32
    return %arg2, %arg1 : i32, i32
  }
  func.func @transform_2(%arg0: i32, %arg1: i32, %arg2: i32) -> (i32, i32) {
    %c0_i32 = arith.constant 0 : i32
    %c0_i32_0 = arith.constant 0 : i32
    return %c0_i32, %arg1 : i32, i32
  }
  func.func @transform_3(%arg0: i32, %arg1: i32, %arg2: i32) -> (i32, i32) {
    %c0_i32 = arith.constant 0 : i32
    %c0_i32_0 = arith.constant 0 : i32
    return %c0_i32, %arg1 : i32, i32
  }
  func.func @transform_4(%arg0: i32, %arg1: i32, %arg2: i32) -> (i32, i32) {
    %c0_i32 = arith.constant 0 : i32
    return %arg0, %arg1 : i32, i32
  }
}

module attributes {stable_mosaic.version = 11 : i64} {
  func.func @kernel(%arg0: i32, %arg1: i32, %arg2: i32, %arg3: memref<32x64xbf16, #tpu.memory_space<vmem>>, %arg4: memref<64x128xbf16, #tpu.memory_space<vmem>>, %arg5: memref<32x128xf32, #tpu.memory_space<vmem>>, %arg6: memref<32x128xf32, #tpu.memory_space<vmem>>) attributes {dimension_semantics = [#tpu.dimension_semantics<parallel>, #tpu.dimension_semantics<parallel>, #tpu.dimension_semantics<arbitrary>], iteration_bounds = array<i64: 1, 1, 1>, scalar_prefetch = 0 : i64, scratch_operands = 1 : i64, tpu.core_type = #tpu.core_type<tc>, window_params = [{transform_indices = @transform_0, window_bounds = array<i64: 32, 64>}, {transform_indices = @transform_1, window_bounds = array<i64: 64, 128>}, {transform_indices = @transform_2, window_bounds = array<i64: 32, 128>}]} {
    %c0_i32 = arith.constant 0 : i32
    %0 = arith.cmpi eq, %arg2, %c0_i32 : i32
    %1 = arith.extui %0 : i1 to i32
    %c0_i32_0 = arith.constant 0 : i32
    %2 = arith.cmpi ne, %1, %c0_i32_0 : i32
    scf.if %2 {
      %cst_10 = arith.constant 0.000000e+00 : f32
      %12 = vector.broadcast %cst_10 : f32 to vector<32x128xf32>
      %c0_11 = arith.constant 0 : index
      %c0_12 = arith.constant 0 : index
      %13 = vector.load %arg6[%c0_11, %c0_12] : memref<32x128xf32, #tpu.memory_space<vmem>>, vector<32x128xf32>
      tpu.vector_store %arg6[%c0_11, %c0_12], %12 {strides = array<i32>} : memref<32x128xf32, #tpu.memory_space<vmem>>, vector<32x128xf32>,
    } else {
    }
    %c0 = arith.constant 0 : index
    %c0_1 = arith.constant 0 : index
    %3 = vector.load %arg6[%c0, %c0_1] : memref<32x128xf32, #tpu.memory_space<vmem>>, vector<32x128xf32>
    %c0_2 = arith.constant 0 : index
    %c0_3 = arith.constant 0 : index
    %4 = vector.load %arg3[%c0_2, %c0_3] : memref<32x64xbf16, #tpu.memory_space<vmem>>, vector<32x64xbf16>
    %c0_4 = arith.constant 0 : index
    %c0_5 = arith.constant 0 : index
    %5 = vector.load %arg4[%c0_4, %c0_5] : memref<64x128xbf16, #tpu.memory_space<vmem>>, vector<64x128xbf16>
    %cst = arith.constant dense<0.000000e+00> : vector<32x128xf32>
    %6 = tpu.matmul %4, %5, %cst {dimension_numbers = #tpu.dot_dimension_numbers<[1], [0], [0], [1], [0, 0, 1, 1], [], []>} : vector<32x64xbf16>, vector<64x128xbf16>, vector<32x128xf32> -> vector<32x128xf32>
    %7 = arith.addf %3, %6 : vector<32x128xf32>
    %c0_6 = arith.constant 0 : index
    %c0_7 = arith.constant 0 : index
    %8 = vector.load %arg6[%c0_6, %c0_7] : memref<32x128xf32, #tpu.memory_space<vmem>>, vector<32x128xf32>
    tpu.vector_store %arg6[%c0_6, %c0_7], %7 {strides = array<i32>} : memref<32x128xf32, #tpu.memory_space<vmem>>, vector<32x128xf32>,
    %c0_i32_8 = arith.constant 0 : i32
    %9 = arith.cmpi eq, %arg2, %c0_i32_8 : i32
    %10 = arith.extui %9 : i1 to i32
    %c0_i32_9 = arith.constant 0 : i32
    %11 = arith.cmpi ne, %10, %c0_i32_9 : i32
    scf.if %11 {
      %c0_10 = arith.constant 0 : index
      %c0_11 = arith.constant 0 : index
      %12 = vector.load %arg6[%c0_10, %c0_11] : memref<32x128xf32, #tpu.memory_space<vmem>>, vector<32x128xf32>
      %c0_12 = arith.constant 0 : index
      %c0_13 = arith.constant 0 : index
      %13 = vector.load %arg5[%c0_12, %c0_13] : memref<32x128xf32, #tpu.memory_space<vmem>>, vector<32x128xf32>
      tpu.vector_store %arg5[%c0_12, %c0_13], %12 {strides = array<i32>} : memref<32x128xf32, #tpu.memory_space<vmem>>, vector<32x128xf32>,
    } else {
    }
    return
  }
  func.func @transform_0(%arg0: i32, %arg1: i32, %arg2: i32) -> (i32, i32) {
    %c0_i32 = arith.constant 0 : i32
    return %arg0, %arg2 : i32, i32
  }
  func.func @transform_1(%arg0: i32, %arg1: i32, %arg2: i32) -> (i32, i32) {
    %c0_i32 = arith.constant 0 : i32
    return %arg2, %arg1 : i32, i32
  }
  func.func @transform_2(%arg0: i32, %arg1: i32, %arg2: i32) -> (i32, i32) {
    %c0_i32 = arith.constant 0 : i32
    return %arg0, %arg1 : i32, i32
  }
}

module attributes {stable_mosaic.version = 11 : i64} {
  func.func @kernel(%arg0: i32, %arg1: i32, %arg2: i32, %arg3: memref<128x144xbf16, #tpu.memory_space<vmem>>, %arg4: memref<144x128xbf16, #tpu.memory_space<vmem>>, %arg5: memref<1x128xf32, #tpu.memory_space<vmem>>, %arg6: memref<1x128xf32, #tpu.memory_space<vmem>>, %arg7: memref<128x128xbf16, #tpu.memory_space<vmem>>, %arg8: memref<128x128xf32, #tpu.memory_space<vmem>>) attributes {dimension_semantics = [#tpu.dimension_semantics<parallel>, #tpu.dimension_semantics<parallel>, #tpu.dimension_semantics<arbitrary>], iteration_bounds = array<i64: 1, 1, 1>, scalar_prefetch = 0 : i64, scratch_operands = 1 : i64, tpu.core_type = #tpu.core_type<tc>, window_params = [{transform_indices = @transform_0, window_bounds = array<i64: 128, 144>}, {transform_indices = @transform_1, window_bounds = array<i64: 144, 128>}, {transform_indices = @transform_2, window_bounds = array<i64: 1, 128>}, {transform_indices = @transform_3, window_bounds = array<i64: 1, 128>}, {transform_indices = @transform_4, window_bounds = array<i64: 128, 128>}]} {
    %c0_i32 = arith.constant 0 : i32
    %0 = arith.cmpi eq, %arg2, %c0_i32 : i32
    %1 = arith.extui %0 : i1 to i32
    %c0_i32_0 = arith.constant 0 : i32
    %2 = arith.cmpi ne, %1, %c0_i32_0 : i32
    scf.if %2 {
      %cst_10 = arith.constant 0.000000e+00 : f32
      %12 = vector.broadcast %cst_10 : f32 to vector<128x128xf32>
      %c0_11 = arith.constant 0 : index
      %c0_12 = arith.constant 0 : index
      %13 = vector.load %arg8[%c0_11, %c0_12] : memref<128x128xf32, #tpu.memory_space<vmem>>, vector<128x128xf32>
      tpu.vector_store %arg8[%c0_11, %c0_12], %12 {strides = array<i32>} : memref<128x128xf32, #tpu.memory_space<vmem>>, vector<128x128xf32>,
    } else {
    }
    %c0 = arith.constant 0 : index
    %c0_1 = arith.constant 0 : index
    %3 = vector.load %arg8[%c0, %c0_1] : memref<128x128xf32, #tpu.memory_space<vmem>>, vector<128x128xf32>
    %c0_2 = arith.constant 0 : index
    %c0_3 = arith.constant 0 : index
    %4 = vector.load %arg3[%c0_2, %c0_3] : memref<128x144xbf16, #tpu.memory_space<vmem>>, vector<128x144xbf16>
    %c0_4 = arith.constant 0 : index
    %c0_5 = arith.constant 0 : index
    %5 = vector.load %arg4[%c0_4, %c0_5] : memref<144x128xbf16, #tpu.memory_space<vmem>>, vector<144x128xbf16>
    %cst = arith.constant dense<0.000000e+00> : vector<128x128xf32>
    %6 = tpu.matmul %4, %5, %cst {dimension_numbers = #tpu.dot_dimension_numbers<[1], [0], [0], [1], [0, 0, 1, 1], [], []>} : vector<128x144xbf16>, vector<144x128xbf16>, vector<128x128xf32> -> vector<128x128xf32>
    %7 = arith.addf %3, %6 : vector<128x128xf32>
    %c0_6 = arith.constant 0 : index
    %c0_7 = arith.constant 0 : index
    %8 = vector.load %arg8[%c0_6, %c0_7] : memref<128x128xf32, #tpu.memory_space<vmem>>, vector<128x128xf32>
    tpu.vector_store %arg8[%c0_6, %c0_7], %7 {strides = array<i32>} : memref<128x128xf32, #tpu.memory_space<vmem>>, vector<128x128xf32>,
    %c0_i32_8 = arith.constant 0 : i32
    %9 = arith.cmpi eq, %arg2, %c0_i32_8 : i32
    %10 = arith.extui %9 : i1 to i32
    %c0_i32_9 = arith.constant 0 : i32
    %11 = arith.cmpi ne, %10, %c0_i32_9 : i32
    scf.if %11 {
      %c0_10 = arith.constant 0 : index
      %c0_11 = arith.constant 0 : index
      %12 = vector.load %arg8[%c0_10, %c0_11] : memref<128x128xf32, #tpu.memory_space<vmem>>, vector<128x128xf32>
      %c0_12 = arith.constant 0 : index
      %c0_13 = arith.constant 0 : index
      %13 = vector.load %arg5[%c0_12, %c0_13] : memref<1x128xf32, #tpu.memory_space<vmem>>, vector<1x128xf32>
      %14 = vector.broadcast %13 : vector<1x128xf32> to vector<128x128xf32>
      %15 = arith.mulf %12, %14 : vector<128x128xf32>
      %c0_14 = arith.constant 0 : index
      %c0_15 = arith.constant 0 : index
      %16 = vector.load %arg6[%c0_14, %c0_15] : memref<1x128xf32, #tpu.memory_space<vmem>>, vector<1x128xf32>
      %17 = vector.broadcast %16 : vector<1x128xf32> to vector<128x128xf32>
      %18 = arith.addf %15, %17 : vector<128x128xf32>
      %cst_16 = arith.constant 0.000000e+00 : f32
      %19 = vector.broadcast %cst_16 : f32 to vector<128x128xf32>
      %20 = arith.maximumf %18, %19 : vector<128x128xf32>
      %21 = arith.truncf %20 : vector<128x128xf32> to vector<128x128xbf16>
      %c0_17 = arith.constant 0 : index
      %c0_18 = arith.constant 0 : index
      %22 = vector.load %arg7[%c0_17, %c0_18] : memref<128x128xbf16, #tpu.memory_space<vmem>>, vector<128x128xbf16>
      tpu.vector_store %arg7[%c0_17, %c0_18], %21 {strides = array<i32>} : memref<128x128xbf16, #tpu.memory_space<vmem>>, vector<128x128xbf16>,
    } else {
    }
    return
  }
  func.func @transform_0(%arg0: i32, %arg1: i32, %arg2: i32) -> (i32, i32) {
    %c0_i32 = arith.constant 0 : i32
    return %arg0, %arg2 : i32, i32
  }
  func.func @transform_1(%arg0: i32, %arg1: i32, %arg2: i32) -> (i32, i32) {
    %c0_i32 = arith.constant 0 : i32
    return %arg2, %arg1 : i32, i32
  }
  func.func @transform_2(%arg0: i32, %arg1: i32, %arg2: i32) -> (i32, i32) {
    %c0_i32 = arith.constant 0 : i32
    %c0_i32_0 = arith.constant 0 : i32
    return %c0_i32, %arg1 : i32, i32
  }
  func.func @transform_3(%arg0: i32, %arg1: i32, %arg2: i32) -> (i32, i32) {
    %c0_i32 = arith.constant 0 : i32
    %c0_i32_0 = arith.constant 0 : i32
    return %c0_i32, %arg1 : i32, i32
  }
  func.func @transform_4(%arg0: i32, %arg1: i32, %arg2: i32) -> (i32, i32) {
    %c0_i32 = arith.constant 0 : i32
    return %arg0, %arg1 : i32, i32
  }
}

module attributes {stable_mosaic.version = 11 : i64} {
  func.func @kernel(%arg0: i32, %arg1: i32, %arg2: i32, %arg3: memref<128x144xbf16, #tpu.memory_space<vmem>>, %arg4: memref<144x128xbf16, #tpu.memory_space<vmem>>, %arg5: memref<128x128xf32, #tpu.memory_space<vmem>>, %arg6: memref<128x128xf32, #tpu.memory_space<vmem>>, %arg7: memref<128x128xf32, #tpu.memory_space<vmem>>) attributes {dimension_semantics = [#tpu.dimension_semantics<parallel>, #tpu.dimension_semantics<parallel>, #tpu.dimension_semantics<arbitrary>], iteration_bounds = array<i64: 1, 1, 1>, scalar_prefetch = 0 : i64, scratch_operands = 1 : i64, tpu.core_type = #tpu.core_type<tc>, window_params = [{transform_indices = @transform_0, window_bounds = array<i64: 128, 144>}, {transform_indices = @transform_1, window_bounds = array<i64: 144, 128>}, {transform_indices = @transform_2, window_bounds = array<i64: 128, 128>}, {transform_indices = @transform_3, window_bounds = array<i64: 128, 128>}]} {
    %c0_i32 = arith.constant 0 : i32
    %0 = arith.cmpi eq, %arg2, %c0_i32 : i32
    %1 = arith.extui %0 : i1 to i32
    %c0_i32_0 = arith.constant 0 : i32
    %2 = arith.cmpi ne, %1, %c0_i32_0 : i32
    scf.if %2 {
      %cst_10 = arith.constant 0.000000e+00 : f32
      %12 = vector.broadcast %cst_10 : f32 to vector<128x128xf32>
      %c0_11 = arith.constant 0 : index
      %c0_12 = arith.constant 0 : index
      %13 = vector.load %arg7[%c0_11, %c0_12] : memref<128x128xf32, #tpu.memory_space<vmem>>, vector<128x128xf32>
      tpu.vector_store %arg7[%c0_11, %c0_12], %12 {strides = array<i32>} : memref<128x128xf32, #tpu.memory_space<vmem>>, vector<128x128xf32>,
    } else {
    }
    %c0 = arith.constant 0 : index
    %c0_1 = arith.constant 0 : index
    %3 = vector.load %arg7[%c0, %c0_1] : memref<128x128xf32, #tpu.memory_space<vmem>>, vector<128x128xf32>
    %c0_2 = arith.constant 0 : index
    %c0_3 = arith.constant 0 : index
    %4 = vector.load %arg3[%c0_2, %c0_3] : memref<128x144xbf16, #tpu.memory_space<vmem>>, vector<128x144xbf16>
    %c0_4 = arith.constant 0 : index
    %c0_5 = arith.constant 0 : index
    %5 = vector.load %arg4[%c0_4, %c0_5] : memref<144x128xbf16, #tpu.memory_space<vmem>>, vector<144x128xbf16>
    %cst = arith.constant dense<0.000000e+00> : vector<128x128xf32>
    %6 = tpu.matmul %4, %5, %cst {dimension_numbers = #tpu.dot_dimension_numbers<[1], [0], [0], [1], [0, 0, 1, 1], [], []>} : vector<128x144xbf16>, vector<144x128xbf16>, vector<128x128xf32> -> vector<128x128xf32>
    %7 = arith.addf %3, %6 : vector<128x128xf32>
    %c0_6 = arith.constant 0 : index
    %c0_7 = arith.constant 0 : index
    %8 = vector.load %arg7[%c0_6, %c0_7] : memref<128x128xf32, #tpu.memory_space<vmem>>, vector<128x128xf32>
    tpu.vector_store %arg7[%c0_6, %c0_7], %7 {strides = array<i32>} : memref<128x128xf32, #tpu.memory_space<vmem>>, vector<128x128xf32>,
    %c0_i32_8 = arith.constant 0 : i32
    %9 = arith.cmpi eq, %arg2, %c0_i32_8 : i32
    %10 = arith.extui %9 : i1 to i32
    %c0_i32_9 = arith.constant 0 : i32
    %11 = arith.cmpi ne, %10, %c0_i32_9 : i32
    scf.if %11 {
      %c0_10 = arith.constant 0 : index
      %c0_11 = arith.constant 0 : index
      %12 = vector.load %arg7[%c0_10, %c0_11] : memref<128x128xf32, #tpu.memory_space<vmem>>, vector<128x128xf32>
      %c0_12 = arith.constant 0 : index
      %c0_13 = arith.constant 0 : index
      %13 = vector.load %arg5[%c0_12, %c0_13] : memref<128x128xf32, #tpu.memory_space<vmem>>, vector<128x128xf32>
      %14 = arith.addf %12, %13 : vector<128x128xf32>
      %c0_14 = arith.constant 0 : index
      %c0_15 = arith.constant 0 : index
      %15 = vector.load %arg6[%c0_14, %c0_15] : memref<128x128xf32, #tpu.memory_space<vmem>>, vector<128x128xf32>
      tpu.vector_store %arg6[%c0_14, %c0_15], %14 {strides = array<i32>} : memref<128x128xf32, #tpu.memory_space<vmem>>, vector<128x128xf32>,
    } else {
    }
    return
  }
  func.func @transform_0(%arg0: i32, %arg1: i32, %arg2: i32) -> (i32, i32) {
    %c0_i32 = arith.constant 0 : i32
    return %arg0, %arg2 : i32, i32
  }
  func.func @transform_1(%arg0: i32, %arg1: i32, %arg2: i32) -> (i32, i32) {
    %c0_i32 = arith.constant 0 : i32
    return %arg2, %arg1 : i32, i32
  }
  func.func @transform_2(%arg0: i32, %arg1: i32, %arg2: i32) -> (i32, i32) {
    %c0_i32 = arith.constant 0 : i32
    return %arg0, %arg1 : i32, i32
  }
  func.func @transform_3(%arg0: i32, %arg1: i32, %arg2: i32) -> (i32, i32) {
    %c0_i32 = arith.constant 0 : i32
    return %arg0, %arg1 : i32, i32
  }
}

module attributes {stable_mosaic.version = 11 : i64} {
  func.func @kernel(%arg0: i32, %arg1: i32, %arg2: i32, %arg3: memref<128x16xbf16, #tpu.memory_space<vmem>>, %arg4: memref<16x128xbf16, #tpu.memory_space<vmem>>, %arg5: memref<128x128xf32, #tpu.memory_space<vmem>>, %arg6: memref<128x128xf32, #tpu.memory_space<vmem>>) attributes {dimension_semantics = [#tpu.dimension_semantics<parallel>, #tpu.dimension_semantics<parallel>, #tpu.dimension_semantics<arbitrary>], iteration_bounds = array<i64: 1, 1, 1>, scalar_prefetch = 0 : i64, scratch_operands = 1 : i64, tpu.core_type = #tpu.core_type<tc>, window_params = [{transform_indices = @transform_0, window_bounds = array<i64: 128, 16>}, {transform_indices = @transform_1, window_bounds = array<i64: 16, 128>}, {transform_indices = @transform_2, window_bounds = array<i64: 128, 128>}]} {
    %c0_i32 = arith.constant 0 : i32
    %0 = arith.cmpi eq, %arg2, %c0_i32 : i32
    %1 = arith.extui %0 : i1 to i32
    %c0_i32_0 = arith.constant 0 : i32
    %2 = arith.cmpi ne, %1, %c0_i32_0 : i32
    scf.if %2 {
      %cst_10 = arith.constant 0.000000e+00 : f32
      %12 = vector.broadcast %cst_10 : f32 to vector<128x128xf32>
      %c0_11 = arith.constant 0 : index
      %c0_12 = arith.constant 0 : index
      %13 = vector.load %arg6[%c0_11, %c0_12] : memref<128x128xf32, #tpu.memory_space<vmem>>, vector<128x128xf32>
      tpu.vector_store %arg6[%c0_11, %c0_12], %12 {strides = array<i32>} : memref<128x128xf32, #tpu.memory_space<vmem>>, vector<128x128xf32>,
    } else {
    }
    %c0 = arith.constant 0 : index
    %c0_1 = arith.constant 0 : index
    %3 = vector.load %arg6[%c0, %c0_1] : memref<128x128xf32, #tpu.memory_space<vmem>>, vector<128x128xf32>
    %c0_2 = arith.constant 0 : index
    %c0_3 = arith.constant 0 : index
    %4 = vector.load %arg3[%c0_2, %c0_3] : memref<128x16xbf16, #tpu.memory_space<vmem>>, vector<128x16xbf16>
    %c0_4 = arith.constant 0 : index
    %c0_5 = arith.constant 0 : index
    %5 = vector.load %arg4[%c0_4, %c0_5] : memref<16x128xbf16, #tpu.memory_space<vmem>>, vector<16x128xbf16>
    %cst = arith.constant dense<0.000000e+00> : vector<128x128xf32>
    %6 = tpu.matmul %4, %5, %cst {dimension_numbers = #tpu.dot_dimension_numbers<[1], [0], [0], [1], [0, 0, 1, 1], [], []>} : vector<128x16xbf16>, vector<16x128xbf16>, vector<128x128xf32> -> vector<128x128xf32>
    %7 = arith.addf %3, %6 : vector<128x128xf32>
    %c0_6 = arith.constant 0 : index
    %c0_7 = arith.constant 0 : index
    %8 = vector.load %arg6[%c0_6, %c0_7] : memref<128x128xf32, #tpu.memory_space<vmem>>, vector<128x128xf32>
    tpu.vector_store %arg6[%c0_6, %c0_7], %7 {strides = array<i32>} : memref<128x128xf32, #tpu.memory_space<vmem>>, vector<128x128xf32>,
    %c0_i32_8 = arith.constant 0 : i32
    %9 = arith.cmpi eq, %arg2, %c0_i32_8 : i32
    %10 = arith.extui %9 : i1 to i32
    %c0_i32_9 = arith.constant 0 : i32
    %11 = arith.cmpi ne, %10, %c0_i32_9 : i32
    scf.if %11 {
      %c0_10 = arith.constant 0 : index
      %c0_11 = arith.constant 0 : index
      %12 = vector.load %arg6[%c0_10, %c0_11] : memref<128x128xf32, #tpu.memory_space<vmem>>, vector<128x128xf32>
      %c0_12 = arith.constant 0 : index
      %c0_13 = arith.constant 0 : index
      %13 = vector.load %arg5[%c0_12, %c0_13] : memref<128x128xf32, #tpu.memory_space<vmem>>, vector<128x128xf32>
      tpu.vector_store %arg5[%c0_12, %c0_13], %12 {strides = array<i32>} : memref<128x128xf32, #tpu.memory_space<vmem>>, vector<128x128xf32>,
    } else {
    }
    return
  }
  func.func @transform_0(%arg0: i32, %arg1: i32, %arg2: i32) -> (i32, i32) {
    %c0_i32 = arith.constant 0 : i32
    return %arg0, %arg2 : i32, i32
  }
  func.func @transform_1(%arg0: i32, %arg1: i32, %arg2: i32) -> (i32, i32) {
    %c0_i32 = arith.constant 0 : i32
    return %arg2, %arg1 : i32, i32
  }
  func.func @transform_2(%arg0: i32, %arg1: i32, %arg2: i32) -> (i32, i32) {
    %c0_i32 = arith.constant 0 : i32
    return %arg0, %arg1 : i32, i32
  }
}

module attributes {stable_mosaic.version = 11 : i64} {
  func.func @kernel(%arg0: i32, %arg1: i32, %arg2: i32, %arg3: memref<256x16xbf16, #tpu.memory_space<vmem>>, %arg4: memref<16x128xbf16, #tpu.memory_space<vmem>>, %arg5: memref<256x128xf32, #tpu.memory_space<vmem>>, %arg6: memref<256x128xf32, #tpu.memory_space<vmem>>, %arg7: memref<256x128xf32, #tpu.memory_space<vmem>>) attributes {dimension_semantics = [#tpu.dimension_semantics<parallel>, #tpu.dimension_semantics<parallel>, #tpu.dimension_semantics<arbitrary>], iteration_bounds = array<i64: 2, 1, 1>, scalar_prefetch = 0 : i64, scratch_operands = 1 : i64, tpu.core_type = #tpu.core_type<tc>, window_params = [{transform_indices = @transform_0, window_bounds = array<i64: 256, 16>}, {transform_indices = @transform_1, window_bounds = array<i64: 16, 128>}, {transform_indices = @transform_2, window_bounds = array<i64: 256, 128>}, {transform_indices = @transform_3, window_bounds = array<i64: 256, 128>}]} {
    %c0_i32 = arith.constant 0 : i32
    %0 = arith.cmpi eq, %arg2, %c0_i32 : i32
    %1 = arith.extui %0 : i1 to i32
    %c0_i32_0 = arith.constant 0 : i32
    %2 = arith.cmpi ne, %1, %c0_i32_0 : i32
    scf.if %2 {
      %cst_10 = arith.constant 0.000000e+00 : f32
      %12 = vector.broadcast %cst_10 : f32 to vector<256x128xf32>
      %c0_11 = arith.constant 0 : index
      %c0_12 = arith.constant 0 : index
      %13 = vector.load %arg7[%c0_11, %c0_12] : memref<256x128xf32, #tpu.memory_space<vmem>>, vector<256x128xf32>
      tpu.vector_store %arg7[%c0_11, %c0_12], %12 {strides = array<i32>} : memref<256x128xf32, #tpu.memory_space<vmem>>, vector<256x128xf32>,
    } else {
    }
    %c0 = arith.constant 0 : index
    %c0_1 = arith.constant 0 : index
    %3 = vector.load %arg7[%c0, %c0_1] : memref<256x128xf32, #tpu.memory_space<vmem>>, vector<256x128xf32>
    %c0_2 = arith.constant 0 : index
    %c0_3 = arith.constant 0 : index
    %4 = vector.load %arg3[%c0_2, %c0_3] : memref<256x16xbf16, #tpu.memory_space<vmem>>, vector<256x16xbf16>
    %c0_4 = arith.constant 0 : index
    %c0_5 = arith.constant 0 : index
    %5 = vector.load %arg4[%c0_4, %c0_5] : memref<16x128xbf16, #tpu.memory_space<vmem>>, vector<16x128xbf16>
    %cst = arith.constant dense<0.000000e+00> : vector<256x128xf32>
    %6 = tpu.matmul %4, %5, %cst {dimension_numbers = #tpu.dot_dimension_numbers<[1], [0], [0], [1], [0, 0, 1, 1], [], []>} : vector<256x16xbf16>, vector<16x128xbf16>, vector<256x128xf32> -> vector<256x128xf32>
    %7 = arith.addf %3, %6 : vector<256x128xf32>
    %c0_6 = arith.constant 0 : index
    %c0_7 = arith.constant 0 : index
    %8 = vector.load %arg7[%c0_6, %c0_7] : memref<256x128xf32, #tpu.memory_space<vmem>>, vector<256x128xf32>
    tpu.vector_store %arg7[%c0_6, %c0_7], %7 {strides = array<i32>} : memref<256x128xf32, #tpu.memory_space<vmem>>, vector<256x128xf32>,
    %c0_i32_8 = arith.constant 0 : i32
    %9 = arith.cmpi eq, %arg2, %c0_i32_8 : i32
    %10 = arith.extui %9 : i1 to i32
    %c0_i32_9 = arith.constant 0 : i32
    %11 = arith.cmpi ne, %10, %c0_i32_9 : i32
    scf.if %11 {
      %c0_10 = arith.constant 0 : index
      %c0_11 = arith.constant 0 : index
      %12 = vector.load %arg7[%c0_10, %c0_11] : memref<256x128xf32, #tpu.memory_space<vmem>>, vector<256x128xf32>
      %c0_12 = arith.constant 0 : index
      %c0_13 = arith.constant 0 : index
      %13 = vector.load %arg5[%c0_12, %c0_13] : memref<256x128xf32, #tpu.memory_space<vmem>>, vector<256x128xf32>
      %14 = arith.addf %12, %13 : vector<256x128xf32>
      %15 = arith.negf %14 : vector<256x128xf32>
      %16 = math.exp %15 : vector<256x128xf32>
      %cst_14 = arith.constant 1.000000e+00 : f32
      %17 = vector.broadcast %cst_14 : f32 to vector<256x128xf32>
      %18 = arith.addf %17, %16 : vector<256x128xf32>
      %19 = arith.divf %17, %18 : vector<256x128xf32>
      %c0_15 = arith.constant 0 : index
      %c0_16 = arith.constant 0 : index
      %20 = vector.load %arg6[%c0_15, %c0_16] : memref<256x128xf32, #tpu.memory_space<vmem>>, vector<256x128xf32>
      tpu.vector_store %arg6[%c0_15, %c0_16], %19 {strides = array<i32>} : memref<256x128xf32, #tpu.memory_space<vmem>>, vector<256x128xf32>,
    } else {
    }
    return
  }
  func.func @transform_0(%arg0: i32, %arg1: i32, %arg2: i32) -> (i32, i32) {
    %c0_i32 = arith.constant 0 : i32
    return %arg0, %arg2 : i32, i32
  }
  func.func @transform_1(%arg0: i32, %arg1: i32, %arg2: i32) -> (i32, i32) {
    %c0_i32 = arith.constant 0 : i32
    return %arg2, %arg1 : i32, i32
  }
  func.func @transform_2(%arg0: i32, %arg1: i32, %arg2: i32) -> (i32, i32) {
    %c0_i32 = arith.constant 0 : i32
    return %arg0, %arg1 : i32, i32
  }
  func.func @transform_3(%arg0: i32, %arg1: i32, %arg2: i32) -> (i32, i32) {
    %c0_i32 = arith.constant 0 : i32
    return %arg0, %arg1 : i32, i32
  }
}

</mosaic_0001>

<bundles_post_ra>
// kernel: wide_resnet_ae_forward.28
= control target key start
LH: loop header
LB: loop body
LE: loop exit
PB: predicated region body
PF: predicated region fallthrough
CT: control target
= control target key end

     0   :  { %7 = vsyncpa [#allocation4], 0  ;;  %s1066_s9 = smov 0   ;;  %s1068_s10 = smov 0   ;;  %s1213_s0 = inlined_call_operand.vmem [shape: bf16[512,16], index: 0, kind: input, shape index: {}]   ;;  %s1214_s1 = inlined_call_operand.hbm [shape: bf16[16,128], index: 1, kind: input, shape index: {}]   ;;  %s1215_s2 = inlined_call_operand.vmem [shape: f32[512,128], index: 2, kind: output, shape index: {}]  }
   0x1   :  { %s1070_s11 = smov 0  }
   0x2 LB: > { %s839_s12 = sadd.s32 4294967295, %s1046_s11   ;;  %s32_s13 = sadd.s32 1, %s1042_s10  ;;  %s1046_s11 = sphi %s1070_s11, %s13_s11   ;;  %s1042_s10 = sphi %s1068_s10, %s1225_s10   ;;  %s1038_s9 = sphi %s1066_s9, %s1224_s9  }
   0x3   : > { %p34_p0 = scmp.ge.s32.totalorder %s32_s13, 2  ;;  %p841_p1 = scmp.ge.s32.totalorder %s1046_s11, 1 }
   0x4   : > { %p121_p2 = scmp.lt.s32.totalorder %s1046_s11, 3  ;;  %p1091_p4 = scmp.eq.s32.totalorder %s839_s12, 0 }
   0x5   : > { %s1227_s13 = smov (%p34_p0, %s32_s13), 0  ;;  %s1048_s16 = smov [#allocation3]  }
   0x6   : > { %p1087_p3 = pnand %p841_p1, %p121_p2  ;;  %s137_s17 = sshll.u32 %s1048_s16, 4  ;;  %s138_s17 = int_to_ptr.vmem [resolvable:$true] %s137_s17 }
   0x7   : > { %s1220_s15 = scalar_select %p1091_p4, 1, 0 }
   0x8   : > { %s1219_s14 = scalar_select %p1087_p3, 1, 0 }
   0x9   : > { %p942_p5 = pneg %p1087_p3  ;;  %s992_s21 = scalar_lea.hbm %s1214_s1, 128 }
   0xa   : > { %p993_p7 = scmp.ne.s32.totalorder %s1214_s1, %s992_s21  ;;  %p999_p11 = scmp.lt.u32.totalorder %s992_s21, %s1214_s1 }
   0xb   : > { %p1099_p6 = pnand %p1091_p4, %p942_p5 }
   0xd   : > { %p994_p8 = pneg %p1099_p6 }
   0xf   : > { %p995_p9 = pnand %p994_p8, %p993_p7 }
  0x11   : > { %p996_p10 = pneg %p995_p9 }
  0x13   : > { %p1001_p12 = pnand %p999_p11, %p996_p10 }
  0x15   : > { %1004 = shalt.err (!%p1001_p12)
}
  0x16   : > { %s1005_s26 = scalar_lea.vmem %s138_s17, 128  ;;  %p1013_p2 = scmp.lt.s32.totalorder %s138_s17, %s138_s17 }
  0x17   : > { %p1006_p13 = scmp.ne.s32.totalorder %s138_s17, %s1005_s26  ;;  %p1014_p5 = scmp.lt.s32.totalorder %s1005_s26, %s1005_s26 }
  0x19   : > { %p1008_p0 = pnand %p1006_p13, %p994_p8  ;;  %p1015_p4 = por %p1014_p5, %p1013_p2 }
  0x1b   : > { %p1009_p1 = pneg %p1008_p0 }
  0x1d   : > { %p1016_p3 = pnand %p1015_p4, %p1009_p1 }
  0x1f   : > { %1019 = shalt.err (!%p1016_p3)
}
  0x20   : > { %s1049_s27 = smov 64   ;;  %s1050_s28 = smov 4  }
  0x21   : > { %945 = dma.hbm_to_vmem [thread:$0]  (!%p1099_p6), %s1214_s1, 128, %s138_s17, [#allocation4], %s1049_s27, %s1049_s27, %s1050_s28  }
  0x22   : > { %p1222_p7 = scmp.ne.s32.totalorder %s1219_s14, 0 }
  0x23   : > { %p1223_p9 = scmp.ne.s32.totalorder (!%p1222_p7), %s1220_s15, 0 }
  0x24   : > { %165 = sbr.rel (%p1222_p7) target bundleno = 293 (0x125), region = 28 }
  0x2b   : > { %1033 = dma.done.wait (%p1223_p9), [#allocation4], 128  }
  0x2c   : > { %1035 = vsyncadd (%p1223_p9), [#allocation4], 4294967168  ;;  %s846_s3 = sshll.u32 %s1038_s9, 5  ;;  %v975_v0 = vld [vmem:[#allocation3] sm:$0xff]   ;;  %vm401_vm0 = vcmask 130048  }
  0x2d   : > { %p194_p3 = scmp.lt.s32.totalorder %s846_s3, 63  ;;  %902 = vmatprep.subr.bf16.mxu0 %v975_v0  ;;  %936 = vmatprep.subr.bf16.mxu1 %v975_v0 }
  0x2e   : > { %903 = vmatpush3.bf16.msra.mxu0 %v975_v0  ;;  %937 = vmatpush3.bf16.msra.mxu1 %v975_v0 }
  0x2f   : > { %s1229_s3 = smov (!%p194_p3, %s846_s3), 63 }
  0x30   : > { %s847_s4 = sshll.u32 %s1229_s3, 2  ;;  %s849_s8 = sshll.u32 %s1229_s3, 3 }
  0x31   : > { %s1132_s7 = scalar_lea.vmem %s1213_s0, %s847_s4  ;;  %s1170_s14 = scalar_lea.vmem %s1215_s2, %s849_s8 }
  0x32   : > { %v976_v1 = vld [vmem:[%s1132_s7] sm:$0xff]   ;;  %v978_v3 = vld [vmem:[%s1132_s7 + $0x8] sm:$0xff]   ;;  %v980_v5 = vld [vmem:[%s1132_s7 + $0x10] sm:$0xff]  }
  0x33   : > { %v977_v2 = vld [vmem:[%s1132_s7 + $0x40] sm:$0xff]   ;;  %904 = vmatprep.mubr.msk.bf16.mxu0 %vm401_vm0, %v976_v1  ;;  %v979_v4 = vld [vmem:[%s1132_s7 + $0x48] sm:$0xff]   ;;  %v981_v6 = vld [vmem:[%s1132_s7 + $0x50] sm:$0xff]  }
  0x34   : > { %920 = vmatprep.mubr.msk.bf16.mxu1 %vm401_vm0, %v977_v2  ;;  %905 = vmatmul.mubr.msk.bf16.vlgmr.msra.gmra.mrb[0].mxu0 %vm401_vm0, %v978_v3  ;;  %v982_v7 = vld [vmem:[%s1132_s7 + $0x18] sm:$0xff]   ;;  %v984_v9 = vld [vmem:[%s1132_s7 + $0x20] sm:$0xff]   ;;  %v986_v11 = vld [vmem:[%s1132_s7 + $0x28] sm:$0xff]  }
  0x35   : > { %921 = vmatmul.mubr.msk.bf16.vlgmr.msra.gmra.mrb[0].mxu1 %vm401_vm0, %v979_v4  ;;  %908 = vmatprep.mubr.msk.bf16.mxu0 %vm401_vm0, %v980_v5  ;;  %v983_v8 = vld [vmem:[%s1132_s7 + $0x58] sm:$0xff]   ;;  %v985_v10 = vld [vmem:[%s1132_s7 + $0x60] sm:$0xff]   ;;  %v987_v12 = vld [vmem:[%s1132_s7 + $0x68] sm:$0xff]  }
  0x36   : > { %924 = vmatprep.mubr.msk.bf16.mxu1 %vm401_vm0, %v981_v6  ;;  %v988_v13 = vld [vmem:[%s1132_s7 + $0x30] sm:$0xff]   ;;  %v990_v15 = vld [vmem:[%s1132_s7 + $0x38] sm:$0xff]  }
  0x37   : > { %v989_v14 = vld [vmem:[%s1132_s7 + $0x70] sm:$0xff]   ;;  %v991_v16 = vld [vmem:[%s1132_s7 + $0x78] sm:$0xff]  }
  0x3c   : > { %909 = vmatmul.mubr.msk.bf16.gmra.mrb[4].mxu0 %vm401_vm0, %v982_v7 }
  0x3d   : > { %925 = vmatmul.mubr.msk.bf16.gmra.mrb[4].mxu1 %vm401_vm0, %v983_v8  ;;  %912 = vmatprep.mubr.msk.bf16.mxu0 %vm401_vm0, %v984_v9 }
  0x3e   : > { %928 = vmatprep.mubr.msk.bf16.mxu1 %vm401_vm0, %v985_v10 }
  0x44   : > { %913 = vmatmul.mubr.msk.bf16.gmra.mrb[8].mxu0 %vm401_vm0, %v986_v11 }
  0x45   : > { %929 = vmatmul.mubr.msk.bf16.gmra.mrb[8].mxu1 %vm401_vm0, %v987_v12  ;;  %916 = vmatprep.mubr.msk.bf16.mxu0 %vm401_vm0, %v988_v13 }
  0x46   : > { %932 = vmatprep.mubr.msk.bf16.mxu1 %vm401_vm0, %v989_v14 }
  0x4c   : > { %917 = vmatmul.mubr.msk.bf16.gmra.mrb[12].mxu0 %vm401_vm0, %v990_v15 }
  0x4d   : > { %933 = vmatmul.mubr.msk.bf16.gmra.mrb[12].mxu1 %vm401_vm0, %v991_v16 }
 0x107   : > { %v906_v17 = vpop.f32.mrb[0].mxu0 }
 0x108   : > { %v922_v18 = vpop.f32.mrb[0].mxu1  ;;  %712 = vst [vmem:[%s1170_s14 + $0x10] sm:$0xff] %v906_v17  ;;  %v484_v19 = vpop.f32.mrb[1].mxu0 }
 0x109   : > { %728 = vst [vmem:[%s1170_s14 + $0x90] sm:$0xff] %v922_v18  ;;  %v548_v20 = vpop.f32.mrb[1].mxu1  ;;  %710 = vst [vmem:[%s1170_s14] sm:$0xff] %v484_v19  ;;  %v907_v21 = vpop.f32.mrb[2].mxu0 }
 0x10a   : > { %726 = vst [vmem:[%s1170_s14 + $0x80] sm:$0xff] %v548_v20  ;;  %v923_v22 = vpop.f32.mrb[2].mxu1  ;;  %713 = vst [vmem:[%s1170_s14 + $0x18] sm:$0xff] %v907_v21  ;;  %v487_v23 = vpop.f32.mrb[3].mxu0 }
 0x10b   : > { %729 = vst [vmem:[%s1170_s14 + $0x98] sm:$0xff] %v923_v22  ;;  %v551_v24 = vpop.f32.mrb[3].mxu1  ;;  %711 = vst [vmem:[%s1170_s14 + $0x8] sm:$0xff] %v487_v23 }
 0x10c   : > { %727 = vst [vmem:[%s1170_s14 + $0x88] sm:$0xff] %v551_v24 }
 0x10f   : > { %v910_v25 = vpop.f32.mrb[4].mxu0 }
 0x110   : > { %v926_v26 = vpop.f32.mrb[4].mxu1  ;;  %716 = vst [vmem:[%s1170_s14 + $0x30] sm:$0xff] %v910_v25  ;;  %v500_v27 = vpop.f32.mrb[5].mxu0 }
 0x111   : > { %732 = vst [vmem:[%s1170_s14 + $0xb0] sm:$0xff] %v926_v26  ;;  %v564_v28 = vpop.f32.mrb[5].mxu1  ;;  %714 = vst [vmem:[%s1170_s14 + $0x20] sm:$0xff] %v500_v27  ;;  %v911_v29 = vpop.f32.mrb[6].mxu0 }
 0x112   : > { %730 = vst [vmem:[%s1170_s14 + $0xa0] sm:$0xff] %v564_v28  ;;  %v927_v30 = vpop.f32.mrb[6].mxu1  ;;  %717 = vst [vmem:[%s1170_s14 + $0x38] sm:$0xff] %v911_v29  ;;  %v503_v31 = vpop.f32.mrb[7].mxu0 }
 0x113   : > { %733 = vst [vmem:[%s1170_s14 + $0xb8] sm:$0xff] %v927_v30  ;;  %v567_v32 = vpop.f32.mrb[7].mxu1  ;;  %715 = vst [vmem:[%s1170_s14 + $0x28] sm:$0xff] %v503_v31 }
 0x114   : > { %731 = vst [vmem:[%s1170_s14 + $0xa8] sm:$0xff] %v567_v32 }
 0x117   : > { %v914_v33 = vpop.f32.mrb[8].mxu0 }
 0x118   : > { %v930_v34 = vpop.f32.mrb[8].mxu1  ;;  %720 = vst [vmem:[%s1170_s14 + $0x50] sm:$0xff] %v914_v33  ;;  %v516_v35 = vpop.f32.mrb[9].mxu0 }
 0x119   : > { %736 = vst [vmem:[%s1170_s14 + $0xd0] sm:$0xff] %v930_v34  ;;  %v580_v36 = vpop.f32.mrb[9].mxu1  ;;  %718 = vst [vmem:[%s1170_s14 + $0x40] sm:$0xff] %v516_v35  ;;  %v915_v37 = vpop.f32.mrb[10].mxu0 }
 0x11a   : > { %734 = vst [vmem:[%s1170_s14 + $0xc0] sm:$0xff] %v580_v36  ;;  %v931_v38 = vpop.f32.mrb[10].mxu1  ;;  %721 = vst [vmem:[%s1170_s14 + $0x58] sm:$0xff] %v915_v37  ;;  %v519_v39 = vpop.f32.mrb[11].mxu0 }
 0x11b   : > { %737 = vst [vmem:[%s1170_s14 + $0xd8] sm:$0xff] %v931_v38  ;;  %v583_v40 = vpop.f32.mrb[11].mxu1  ;;  %719 = vst [vmem:[%s1170_s14 + $0x48] sm:$0xff] %v519_v39 }
 0x11c   : > { %735 = vst [vmem:[%s1170_s14 + $0xc8] sm:$0xff] %v583_v40 }
 0x11f   : > { %v918_v41 = vpop.f32.mrb[12].mxu0 }
 0x120   : > { %v934_v42 = vpop.f32.mrb[12].mxu1  ;;  %724 = vst [vmem:[%s1170_s14 + $0x70] sm:$0xff] %v918_v41  ;;  %v532_v43 = vpop.f32.mrb[13].mxu0 }
 0x121   : > { %740 = vst [vmem:[%s1170_s14 + $0xf0] sm:$0xff] %v934_v42  ;;  %v596_v44 = vpop.f32.mrb[13].mxu1  ;;  %722 = vst [vmem:[%s1170_s14 + $0x60] sm:$0xff] %v532_v43  ;;  %v919_v45 = vpop.f32.mrb[14].mxu0 }
 0x122   : > { %738 = vst [vmem:[%s1170_s14 + $0xe0] sm:$0xff] %v596_v44  ;;  %v935_v46 = vpop.f32.mrb[14].mxu1  ;;  %725 = vst [vmem:[%s1170_s14 + $0x78] sm:$0xff] %v919_v45  ;;  %v535_v47 = vpop.f32.mrb[15].mxu0 }
 0x123   : > { %741 = vst [vmem:[%s1170_s14 + $0xf8] sm:$0xff] %v935_v46  ;;  %v599_v48 = vpop.f32.mrb[15].mxu1  ;;  %723 = vst [vmem:[%s1170_s14 + $0x68] sm:$0xff] %v535_v47 }
 0x124   : > { %739 = vst [vmem:[%s1170_s14 + $0xe8] sm:$0xff] %v599_v48 }
 0x125 PF: > { %s13_s11 = sadd.s32 1, %s1046_s11   ;;  %s1224_s9 = smov %s1042_s10 }
 0x126   : > { %p10_p4 = scmp.ge.s32.totalorder %s13_s11, 4   ;;  %s1225_s10 = smov %s1227_s13 }
 0x128   :  { %12 = sbr.rel (!%p10_p4) target bundleno = 2 (0x2), region = 72 }
 0x12f   :  { %770 = vsyncpa [#allocation4], 1 }
 0x130   :  { %772 = vsyncpa [#allocation4 + $0x1], 1 }

// kernel: wide_resnet_ae_forward.29
= control target key start
LH: loop header
LB: loop body
LE: loop exit
PB: predicated region body
PF: predicated region fallthrough
CT: control target
= control target key end

     0   :  { %s1375_s0 = inlined_call_operand.vmem [shape: f32[512,128], index: 0, kind: input, shape index: {}]   ;;  %s1376_s1 = inlined_call_operand.vmem [shape: f32[1,128], index: 1, kind: input, shape index: {}]   ;;  %s1377_s2 = inlined_call_operand.vmem [shape: f32[1,128], index: 2, kind: input, shape index: {}]   ;;  %s1378_s3 = inlined_call_operand.vmem [shape: bf16[512,128], index: 3, kind: output, shape index: {}]  }
   0x1   :  { %v14_v0 = vld [vmem:[%s1375_s0] sm:$0xff]  ;;  %v15_v1 = vld [vmem:[%s1375_s0 + $0x8] sm:$0xff]  ;;  %v16_v6 = vld [vmem:[%s1375_s0 + $0x10] sm:$0xff] }
   0x2   :  { %v958_v2 = vld [vmem:[%s1376_s1] ss:$0 sm:$0xff]  ;;  %v17_v7 = vld [vmem:[%s1375_s0 + $0x18] sm:$0xff]  ;;  %v19_v11 = vld [vmem:[%s1375_s0 + $0x28] sm:$0xff] }
   0x3   :  { %v85_v3 = vmul.f32 %v958_v2, %v14_v0  ;;  %v86_v4 = vmul.f32 %v958_v2, %v15_v1  ;;  %v965_v5 = vld [vmem:[%s1377_s2] ss:$0 sm:$0xff]  ;;  %v87_v8 = vmul.f32 %v958_v2, %v16_v6  ;;  %v88_v9 = vmul.f32 %v958_v2, %v17_v7  ;;  %v20_v12 = vld [vmem:[%s1375_s0 + $0x30] sm:$0xff]  ;;  %v21_v17 = vld [vmem:[%s1375_s0 + $0x38] sm:$0xff] }
   0x4   :  { %v18_v10 = vld [vmem:[%s1375_s0 + $0x20] sm:$0xff]  ;;  %v90_v16 = vmul.f32 %v958_v2, %v19_v11  ;;  %v91_v20 = vmul.f32 %v958_v2, %v20_v12  ;;  %v92_v21 = vmul.f32 %v958_v2, %v21_v17  ;;  %v23_v27 = vld [vmem:[%s1375_s0 + $0x48] sm:$0xff]  ;;  %v24_v32 = vld [vmem:[%s1375_s0 + $0x50] sm:$0xff] }
   0x5   :  { %v156_v13 = vadd.f32 %v965_v5, %v85_v3  ;;  %v157_v14 = vadd.f32 %v965_v5, %v86_v4  ;;  %v89_v15 = vmul.f32 %v958_v2, %v18_v10  ;;  %v158_v18 = vadd.f32 %v965_v5, %v87_v8  ;;  %v22_v22 = vld [vmem:[%s1375_s0 + $0x40] sm:$0xff]  ;;  %v25_v33 = vld [vmem:[%s1375_s0 + $0x58] sm:$0xff]  ;;  %v27_v39 = vld [vmem:[%s1375_s0 + $0x68] sm:$0xff] }
   0x6   :  { %v159_v19 = vadd.f32 %v965_v5, %v88_v9  ;;  %v161_v26 = vadd.f32 %v965_v5, %v90_v16  ;;  %v162_v30 = vadd.f32 %v965_v5, %v91_v20  ;;  %v163_v31 = vadd.f32 %v965_v5, %v92_v21  ;;  %v26_v38 = vld [vmem:[%s1375_s0 + $0x60] sm:$0xff]  ;;  %v28_v44 = vld [vmem:[%s1375_s0 + $0x70] sm:$0xff]  ;;  %v29_v49 = vld [vmem:[%s1375_s0 + $0x78] sm:$0xff] }
   0x7   :  { %v220_v23 = vmax.f32 %v156_v13, 0.0  ;;  %v221_v24 = vmax.f32 %v157_v14, 0.0  ;;  %v160_v25 = vadd.f32 %v965_v5, %v89_v15  ;;  %v222_v28 = vmax.f32 %v158_v18, 0.0  ;;  %v30_v54 = vld [vmem:[%s1375_s0 + $0x80] sm:$0xff]  ;;  %v31_v63 = vld [vmem:[%s1375_s0 + $0x88] sm:$0xff]  ;;  %v32_v6 = vld [vmem:[%s1375_s0 + $0x90] sm:$0xff] }
   0x8   :  { %v223_v29 = vmax.f32 %v159_v19, 0.0  ;;  %v225_v36 = vmax.f32 %v161_v26, 0.0  ;;  %v93_v37 = vmul.f32 %v958_v2, %v22_v22  ;;  %v226_v41 = vmax.f32 %v162_v30, 0.0  ;;  %v33_v7 = vld [vmem:[%s1375_s0 + $0x98] sm:$0xff]  ;;  %v34_v12 = vld [vmem:[%s1375_s0 + $0xa0] sm:$0xff]  ;;  %v35_v13 = vld [vmem:[%s1375_s0 + $0xa8] sm:$0xff] }
   0x9   :  { %v741_v34 = vpack.c.bf16 %v221_v24, %v220_v23  ;;  %v224_v35 = vmax.f32 %v160_v25, 0.0  ;;  %v227_v42 = vmax.f32 %v163_v31, 0.0  ;;  %v94_v43 = vmul.f32 %v958_v2, %v23_v27  ;;  %v36_v18 = vld [vmem:[%s1375_s0 + $0xb0] sm:$0xff]  ;;  %v37_v23 = vld [vmem:[%s1375_s0 + $0xb8] sm:$0xff] }
   0xa   :  { %v746_v40 = vpack.c.bf16 %v223_v29, %v222_v28  ;;  %v164_v46 = vadd.f32 %v965_v5, %v93_v37  ;;  %v95_v47 = vmul.f32 %v958_v2, %v24_v32  ;;  %v96_v48 = vmul.f32 %v958_v2, %v25_v33  ;;  %v38_v28 = vld [vmem:[%s1375_s0 + $0xc0] sm:$0xff]  ;;  %v39_v37 = vld [vmem:[%s1375_s0 + $0xc8] sm:$0xff] }
   0xb   :  { %742 = vst [vmem:[%s1378_s3] sm:$0xff] %v741_v34   ;;  %v751_v45 = vpack.c.bf16 %v225_v36, %v224_v35  ;;  %v756_v50 = vpack.c.bf16 %v227_v42, %v226_v41  ;;  %v165_v51 = vadd.f32 %v965_v5, %v94_v43  ;;  %v97_v52 = vmul.f32 %v958_v2, %v26_v38  ;;  %v40_v42 = vld [vmem:[%s1375_s0 + $0xd0] sm:$0xff]  ;;  %v41_v43 = vld [vmem:[%s1375_s0 + $0xd8] sm:$0xff] }
   0xc   :  { %898 = vst [vmem:[%s1378_s3 + $0x8] sm:$0xff] %v746_v40   ;;  %v98_v53 = vmul.f32 %v958_v2, %v27_v39  ;;  %v228_v55 = vmax.f32 %v164_v46, 0.0  ;;  %v166_v56 = vadd.f32 %v965_v5, %v95_v47  ;;  %v167_v57 = vadd.f32 %v965_v5, %v96_v48  ;;  %v42_v48 = vld [vmem:[%s1375_s0 + $0xe0] sm:$0xff] }
   0xd   :  { %899 = vst [vmem:[%s1378_s3 + $0x10] sm:$0xff] %v751_v45   ;;  %v99_v58 = vmul.f32 %v958_v2, %v28_v44  ;;  %900 = vst [vmem:[%s1378_s3 + $0x18] sm:$0xff] %v756_v50   ;;  %v229_v59 = vmax.f32 %v165_v51, 0.0  ;;  %v168_v60 = vadd.f32 %v965_v5, %v97_v52  ;;  %v100_v62 = vmul.f32 %v958_v2, %v29_v49  ;;  %v43_v49 = vld [vmem:[%s1375_s0 + $0xe8] sm:$0xff] }
   0xe   :  { %v169_v61 = vadd.f32 %v965_v5, %v98_v53  ;;  %v230_v0 = vmax.f32 %v166_v56, 0.0  ;;  %v231_v1 = vmax.f32 %v167_v57, 0.0  ;;  %v101_v4 = vmul.f32 %v958_v2, %v30_v54  ;;  %v44_v54 = vld [vmem:[%s1375_s0 + $0xf0] sm:$0xff] }
   0xf   :  { %v170_v3 = vadd.f32 %v965_v5, %v99_v58  ;;  %v761_v8 = vpack.c.bf16 %v229_v59, %v228_v55  ;;  %v232_v9 = vmax.f32 %v168_v60, 0.0  ;;  %v171_v11 = vadd.f32 %v965_v5, %v100_v62  ;;  %v45_v59 = vld [vmem:[%s1375_s0 + $0xf8] sm:$0xff] }
  0x10   :  { %v233_v10 = vmax.f32 %v169_v61, 0.0  ;;  %v766_v14 = vpack.c.bf16 %v231_v1, %v230_v0  ;;  %v102_v16 = vmul.f32 %v958_v2, %v31_v63  ;;  %v172_v17 = vadd.f32 %v965_v5, %v101_v4  ;;  %v46_v0 = vld [vmem:[%s1375_s0 + $0x100] sm:$0xff] }
  0x11   :  { %v234_v15 = vmax.f32 %v170_v3, 0.0  ;;  %901 = vst [vmem:[%s1378_s3 + $0x20] sm:$0xff] %v761_v8   ;;  %v235_v20 = vmax.f32 %v171_v11, 0.0  ;;  %v103_v21 = vmul.f32 %v958_v2, %v32_v6  ;;  %v104_v22 = vmul.f32 %v958_v2, %v33_v7  ;;  %v47_v11 = vld [vmem:[%s1375_s0 + $0x108] sm:$0xff] }
  0x12   :  { %v771_v19 = vpack.c.bf16 %v233_v10, %v232_v9  ;;  %902 = vst [vmem:[%s1378_s3 + $0x28] sm:$0xff] %v766_v14   ;;  %v173_v24 = vadd.f32 %v965_v5, %v102_v16  ;;  %v236_v25 = vmax.f32 %v172_v17, 0.0  ;;  %v105_v26 = vmul.f32 %v958_v2, %v34_v12  ;;  %v48_v16 = vld [vmem:[%s1375_s0 + $0x110] sm:$0xff]  ;;  %v49_v17 = vld [vmem:[%s1375_s0 + $0x118] sm:$0xff] }
  0x13   :  { %v106_v27 = vmul.f32 %v958_v2, %v35_v13  ;;  %v776_v29 = vpack.c.bf16 %v235_v20, %v234_v15  ;;  %v174_v30 = vadd.f32 %v965_v5, %v103_v21  ;;  %v175_v31 = vadd.f32 %v965_v5, %v104_v22  ;;  %v50_v22 = vld [vmem:[%s1375_s0 + $0x120] sm:$0xff] }
  0x14   :  { %903 = vst [vmem:[%s1378_s3 + $0x30] sm:$0xff] %v771_v19   ;;  %v107_v32 = vmul.f32 %v958_v2, %v36_v18  ;;  %v237_v33 = vmax.f32 %v173_v24, 0.0  ;;  %v176_v34 = vadd.f32 %v965_v5, %v105_v26  ;;  %v108_v36 = vmul.f32 %v958_v2, %v37_v23  ;;  %v51_v23 = vld [vmem:[%s1375_s0 + $0x128] sm:$0xff] }
  0x15   :  { %v177_v35 = vadd.f32 %v965_v5, %v106_v27  ;;  %904 = vst [vmem:[%s1378_s3 + $0x38] sm:$0xff] %v776_v29   ;;  %v238_v38 = vmax.f32 %v174_v30, 0.0  ;;  %v239_v39 = vmax.f32 %v175_v31, 0.0  ;;  %v109_v41 = vmul.f32 %v958_v2, %v38_v28  ;;  %v52_v28 = vld [vmem:[%s1375_s0 + $0x130] sm:$0xff] }
  0x16   :  { %v178_v40 = vadd.f32 %v965_v5, %v107_v32  ;;  %v781_v44 = vpack.c.bf16 %v237_v33, %v236_v25  ;;  %v240_v45 = vmax.f32 %v176_v34, 0.0  ;;  %v179_v47 = vadd.f32 %v965_v5, %v108_v36  ;;  %v53_v33 = vld [vmem:[%s1375_s0 + $0x138] sm:$0xff] }
  0x17   :  { %v241_v46 = vmax.f32 %v177_v35, 0.0  ;;  %v786_v50 = vpack.c.bf16 %v239_v39, %v238_v38  ;;  %v110_v52 = vmul.f32 %v958_v2, %v39_v37  ;;  %v180_v53 = vadd.f32 %v965_v5, %v109_v41  ;;  %v54_v38 = vld [vmem:[%s1375_s0 + $0x140] sm:$0xff] }
  0x18   :  { %v242_v51 = vmax.f32 %v178_v40, 0.0  ;;  %905 = vst [vmem:[%s1378_s3 + $0x40] sm:$0xff] %v781_v44   ;;  %v243_v56 = vmax.f32 %v179_v47, 0.0  ;;  %v111_v57 = vmul.f32 %v958_v2, %v40_v42  ;;  %v112_v58 = vmul.f32 %v958_v2, %v41_v43  ;;  %v55_v47 = vld [vmem:[%s1375_s0 + $0x148] sm:$0xff] }
  0x19   :  { %v791_v55 = vpack.c.bf16 %v241_v46, %v240_v45  ;;  %906 = vst [vmem:[%s1378_s3 + $0x48] sm:$0xff] %v786_v50   ;;  %v181_v60 = vadd.f32 %v965_v5, %v110_v52  ;;  %v244_v61 = vmax.f32 %v180_v53, 0.0  ;;  %v113_v62 = vmul.f32 %v958_v2, %v42_v48  ;;  %v56_v52 = vld [vmem:[%s1375_s0 + $0x150] sm:$0xff]  ;;  %v57_v53 = vld [vmem:[%s1375_s0 + $0x158] sm:$0xff] }
  0x1a   :  { %v114_v63 = vmul.f32 %v958_v2, %v43_v49  ;;  %v796_v1 = vpack.c.bf16 %v243_v56, %v242_v51  ;;  %v182_v3 = vadd.f32 %v965_v5, %v111_v57  ;;  %v183_v4 = vadd.f32 %v965_v5, %v112_v58  ;;  %v58_v58 = vld [vmem:[%s1375_s0 + $0x160] sm:$0xff] }
  0x1b   :  { %907 = vst [vmem:[%s1378_s3 + $0x50] sm:$0xff] %v791_v55   ;;  %v115_v6 = vmul.f32 %v958_v2, %v44_v54  ;;  %v245_v7 = vmax.f32 %v181_v60, 0.0  ;;  %v184_v8 = vadd.f32 %v965_v5, %v113_v62  ;;  %v116_v10 = vmul.f32 %v958_v2, %v45_v59  ;;  %v59_v59 = vld [vmem:[%s1375_s0 + $0x168] sm:$0xff] }
  0x1c   :  { %v185_v9 = vadd.f32 %v965_v5, %v114_v63  ;;  %908 = vst [vmem:[%s1378_s3 + $0x58] sm:$0xff] %v796_v1   ;;  %v246_v12 = vmax.f32 %v182_v3, 0.0  ;;  %v247_v13 = vmax.f32 %v183_v4, 0.0  ;;  %v117_v15 = vmul.f32 %v958_v2, %v46_v0  ;;  %v60_v0 = vld [vmem:[%s1375_s0 + $0x170] sm:$0xff] }
  0x1d   :  { %v186_v14 = vadd.f32 %v965_v5, %v115_v6  ;;  %v801_v18 = vpack.c.bf16 %v245_v7, %v244_v61  ;;  %v248_v19 = vmax.f32 %v184_v8, 0.0  ;;  %v187_v21 = vadd.f32 %v965_v5, %v116_v10  ;;  %v61_v7 = vld [vmem:[%s1375_s0 + $0x178] sm:$0xff] }
  0x1e   :  { %v249_v20 = vmax.f32 %v185_v9, 0.0  ;;  %v806_v24 = vpack.c.bf16 %v247_v13, %v246_v12  ;;  %v118_v26 = vmul.f32 %v958_v2, %v47_v11  ;;  %v188_v27 = vadd.f32 %v965_v5, %v117_v15  ;;  %v62_v12 = vld [vmem:[%s1375_s0 + $0x180] sm:$0xff] }
  0x1f   :  { %v250_v25 = vmax.f32 %v186_v14, 0.0  ;;  %909 = vst [vmem:[%s1378_s3 + $0x60] sm:$0xff] %v801_v18   ;;  %v251_v30 = vmax.f32 %v187_v21, 0.0  ;;  %v119_v31 = vmul.f32 %v958_v2, %v48_v16  ;;  %v120_v32 = vmul.f32 %v958_v2, %v49_v17  ;;  %v63_v21 = vld [vmem:[%s1375_s0 + $0x188] sm:$0xff] }
  0x20   :  { %v811_v29 = vpack.c.bf16 %v249_v20, %v248_v19  ;;  %910 = vst [vmem:[%s1378_s3 + $0x68] sm:$0xff] %v806_v24   ;;  %v189_v34 = vadd.f32 %v965_v5, %v118_v26  ;;  %v252_v35 = vmax.f32 %v188_v27, 0.0  ;;  %v121_v36 = vmul.f32 %v958_v2, %v50_v22  ;;  %v64_v26 = vld [vmem:[%s1375_s0 + $0x190] sm:$0xff]  ;;  %v65_v27 = vld [vmem:[%s1375_s0 + $0x198] sm:$0xff] }
  0x21   :  { %v122_v37 = vmul.f32 %v958_v2, %v51_v23  ;;  %v816_v39 = vpack.c.bf16 %v251_v30, %v250_v25  ;;  %v190_v40 = vadd.f32 %v965_v5, %v119_v31  ;;  %v191_v41 = vadd.f32 %v965_v5, %v120_v32  ;;  %v66_v32 = vld [vmem:[%s1375_s0 + $0x1a0] sm:$0xff] }
  0x22   :  { %911 = vst [vmem:[%s1378_s3 + $0x70] sm:$0xff] %v811_v29   ;;  %v123_v42 = vmul.f32 %v958_v2, %v52_v28  ;;  %v253_v43 = vmax.f32 %v189_v34, 0.0  ;;  %v192_v44 = vadd.f32 %v965_v5, %v121_v36  ;;  %v124_v46 = vmul.f32 %v958_v2, %v53_v33  ;;  %v67_v33 = vld [vmem:[%s1375_s0 + $0x1a8] sm:$0xff] }
  0x23   :  { %v193_v45 = vadd.f32 %v965_v5, %v122_v37  ;;  %912 = vst [vmem:[%s1378_s3 + $0x78] sm:$0xff] %v816_v39   ;;  %v254_v48 = vmax.f32 %v190_v40, 0.0  ;;  %v255_v49 = vmax.f32 %v191_v41, 0.0  ;;  %v125_v51 = vmul.f32 %v958_v2, %v54_v38  ;;  %v68_v38 = vld [vmem:[%s1375_s0 + $0x1b0] sm:$0xff] }
  0x24   :  { %v194_v50 = vadd.f32 %v965_v5, %v123_v42  ;;  %v821_v54 = vpack.c.bf16 %v253_v43, %v252_v35  ;;  %v256_v55 = vmax.f32 %v192_v44, 0.0  ;;  %v195_v57 = vadd.f32 %v965_v5, %v124_v46  ;;  %v69_v43 = vld [vmem:[%s1375_s0 + $0x1b8] sm:$0xff] }
  0x25   :  { %v257_v56 = vmax.f32 %v193_v45, 0.0  ;;  %v826_v60 = vpack.c.bf16 %v255_v49, %v254_v48  ;;  %v126_v62 = vmul.f32 %v958_v2, %v55_v47  ;;  %v196_v63 = vadd.f32 %v965_v5, %v125_v51  ;;  %v70_v48 = vld [vmem:[%s1375_s0 + $0x1c0] sm:$0xff] }
  0x26   :  { %v258_v61 = vmax.f32 %v194_v50, 0.0  ;;  %913 = vst [vmem:[%s1378_s3 + $0x80] sm:$0xff] %v821_v54   ;;  %v259_v3 = vmax.f32 %v195_v57, 0.0  ;;  %v127_v4 = vmul.f32 %v958_v2, %v56_v52  ;;  %v128_v6 = vmul.f32 %v958_v2, %v57_v53  ;;  %v71_v57 = vld [vmem:[%s1375_s0 + $0x1c8] sm:$0xff] }
  0x27   :  { %v831_v1 = vpack.c.bf16 %v257_v56, %v256_v55  ;;  %914 = vst [vmem:[%s1378_s3 + $0x88] sm:$0xff] %v826_v60   ;;  %v197_v8 = vadd.f32 %v965_v5, %v126_v62  ;;  %v260_v9 = vmax.f32 %v196_v63, 0.0  ;;  %v129_v10 = vmul.f32 %v958_v2, %v58_v58  ;;  %v72_v62 = vld [vmem:[%s1375_s0 + $0x1d0] sm:$0xff]  ;;  %v73_v63 = vld [vmem:[%s1375_s0 + $0x1d8] sm:$0xff] }
  0x28   :  { %v130_v11 = vmul.f32 %v958_v2, %v59_v59  ;;  %v836_v13 = vpack.c.bf16 %v259_v3, %v258_v61  ;;  %v198_v14 = vadd.f32 %v965_v5, %v127_v4  ;;  %v199_v15 = vadd.f32 %v965_v5, %v128_v6  ;;  %v74_v6 = vld [vmem:[%s1375_s0 + $0x1e0] sm:$0xff] }
  0x29   :  { %915 = vst [vmem:[%s1378_s3 + $0x90] sm:$0xff] %v831_v1   ;;  %v131_v16 = vmul.f32 %v958_v2, %v60_v0  ;;  %v261_v17 = vmax.f32 %v197_v8, 0.0  ;;  %v200_v18 = vadd.f32 %v965_v5, %v129_v10  ;;  %v132_v20 = vmul.f32 %v958_v2, %v61_v7  ;;  %v75_v7 = vld [vmem:[%s1375_s0 + $0x1e8] sm:$0xff] }
  0x2a   :  { %v201_v19 = vadd.f32 %v965_v5, %v130_v11  ;;  %916 = vst [vmem:[%s1378_s3 + $0x98] sm:$0xff] %v836_v13   ;;  %v262_v22 = vmax.f32 %v198_v14, 0.0  ;;  %v263_v23 = vmax.f32 %v199_v15, 0.0  ;;  %v133_v25 = vmul.f32 %v958_v2, %v62_v12  ;;  %v76_v12 = vld [vmem:[%s1375_s0 + $0x1f0] sm:$0xff] }
  0x2b   :  { %v202_v24 = vadd.f32 %v965_v5, %v131_v16  ;;  %v841_v28 = vpack.c.bf16 %v261_v17, %v260_v9  ;;  %v264_v29 = vmax.f32 %v200_v18, 0.0  ;;  %v203_v31 = vadd.f32 %v965_v5, %v132_v20  ;;  %v77_v17 = vld [vmem:[%s1375_s0 + $0x1f8] sm:$0xff] }
  0x2c   :  { %v265_v30 = vmax.f32 %v201_v19, 0.0  ;;  %v846_v34 = vpack.c.bf16 %v263_v23, %v262_v22  ;;  %v134_v36 = vmul.f32 %v958_v2, %v63_v21  ;;  %v204_v37 = vadd.f32 %v965_v5, %v133_v25 }
  0x2d   :  { %v266_v35 = vmax.f32 %v202_v24, 0.0  ;;  %917 = vst [vmem:[%s1378_s3 + $0xa0] sm:$0xff] %v841_v28   ;;  %v267_v40 = vmax.f32 %v203_v31, 0.0  ;;  %v135_v41 = vmul.f32 %v958_v2, %v64_v26  ;;  %v136_v42 = vmul.f32 %v958_v2, %v65_v27 }
  0x2e   :  { %v851_v39 = vpack.c.bf16 %v265_v30, %v264_v29  ;;  %918 = vst [vmem:[%s1378_s3 + $0xa8] sm:$0xff] %v846_v34   ;;  %v205_v44 = vadd.f32 %v965_v5, %v134_v36  ;;  %v268_v45 = vmax.f32 %v204_v37, 0.0  ;;  %v137_v46 = vmul.f32 %v958_v2, %v66_v32 }
  0x2f   :  { %v138_v47 = vmul.f32 %v958_v2, %v67_v33  ;;  %v856_v49 = vpack.c.bf16 %v267_v40, %v266_v35  ;;  %v206_v50 = vadd.f32 %v965_v5, %v135_v41  ;;  %v207_v51 = vadd.f32 %v965_v5, %v136_v42 }
  0x30   :  { %919 = vst [vmem:[%s1378_s3 + $0xb0] sm:$0xff] %v851_v39   ;;  %v139_v52 = vmul.f32 %v958_v2, %v68_v38  ;;  %v269_v53 = vmax.f32 %v205_v44, 0.0  ;;  %v208_v54 = vadd.f32 %v965_v5, %v137_v46  ;;  %v140_v56 = vmul.f32 %v958_v2, %v69_v43 }
  0x31   :  { %v209_v55 = vadd.f32 %v965_v5, %v138_v47  ;;  %920 = vst [vmem:[%s1378_s3 + $0xb8] sm:$0xff] %v856_v49   ;;  %v270_v58 = vmax.f32 %v206_v50, 0.0  ;;  %v271_v59 = vmax.f32 %v207_v51, 0.0  ;;  %v141_v61 = vmul.f32 %v958_v2, %v70_v48 }
  0x32   :  { %v210_v60 = vadd.f32 %v965_v5, %v139_v52  ;;  %v861_v0 = vpack.c.bf16 %v269_v53, %v268_v45  ;;  %v272_v1 = vmax.f32 %v208_v54, 0.0  ;;  %v211_v4 = vadd.f32 %v965_v5, %v140_v56 }
  0x33   :  { %v273_v3 = vmax.f32 %v209_v55, 0.0  ;;  %v866_v8 = vpack.c.bf16 %v271_v59, %v270_v58  ;;  %v142_v10 = vmul.f32 %v958_v2, %v71_v57  ;;  %v212_v11 = vadd.f32 %v965_v5, %v141_v61 }
  0x34   :  { %v274_v9 = vmax.f32 %v210_v60, 0.0  ;;  %921 = vst [vmem:[%s1378_s3 + $0xc0] sm:$0xff] %v861_v0   ;;  %v275_v14 = vmax.f32 %v211_v4, 0.0  ;;  %v143_v15 = vmul.f32 %v958_v2, %v72_v62  ;;  %v144_v16 = vmul.f32 %v958_v2, %v73_v63 }
  0x35   :  { %v871_v13 = vpack.c.bf16 %v273_v3, %v272_v1  ;;  %922 = vst [vmem:[%s1378_s3 + $0xc8] sm:$0xff] %v866_v8   ;;  %v213_v18 = vadd.f32 %v965_v5, %v142_v10  ;;  %v276_v19 = vmax.f32 %v212_v11, 0.0  ;;  %v145_v20 = vmul.f32 %v958_v2, %v74_v6 }
  0x36   :  { %v146_v21 = vmul.f32 %v958_v2, %v75_v7  ;;  %v876_v22 = vpack.c.bf16 %v275_v14, %v274_v9  ;;  %v214_v23 = vadd.f32 %v965_v5, %v143_v15  ;;  %v215_v24 = vadd.f32 %v965_v5, %v144_v16 }
  0x37   :  { %923 = vst [vmem:[%s1378_s3 + $0xd0] sm:$0xff] %v871_v13   ;;  %v147_v25 = vmul.f32 %v958_v2, %v76_v12  ;;  %v277_v26 = vmax.f32 %v213_v18, 0.0  ;;  %v216_v27 = vadd.f32 %v965_v5, %v145_v20  ;;  %v148_v29 = vmul.f32 %v958_v2, %v77_v17 }
  0x38   :  { %v217_v28 = vadd.f32 %v965_v5, %v146_v21  ;;  %924 = vst [vmem:[%s1378_s3 + $0xd8] sm:$0xff] %v876_v22   ;;  %v278_v30 = vmax.f32 %v214_v23, 0.0  ;;  %v279_v31 = vmax.f32 %v215_v24, 0.0 }
  0x39   :  { %v218_v32 = vadd.f32 %v965_v5, %v147_v25  ;;  %v881_v33 = vpack.c.bf16 %v277_v26, %v276_v19  ;;  %v280_v34 = vmax.f32 %v216_v27, 0.0  ;;  %v219_v36 = vadd.f32 %v965_v5, %v148_v29 }
  0x3a   :  { %v281_v35 = vmax.f32 %v217_v28, 0.0  ;;  %v886_v37 = vpack.c.bf16 %v279_v31, %v278_v30 }
  0x3b   :  { %v282_v38 = vmax.f32 %v218_v32, 0.0  ;;  %925 = vst [vmem:[%s1378_s3 + $0xe0] sm:$0xff] %v881_v33   ;;  %v283_v39 = vmax.f32 %v219_v36, 0.0 }
  0x3c   :  { %v891_v2 = vpack.c.bf16 %v281_v35, %v280_v34  ;;  %926 = vst [vmem:[%s1378_s3 + $0xe8] sm:$0xff] %v886_v37  }
  0x3d   :  { %v896_v40 = vpack.c.bf16 %v283_v39, %v282_v38 }
  0x3e   :  { %927 = vst [vmem:[%s1378_s3 + $0xf0] sm:$0xff] %v891_v2  }
  0x3f   :  { %928 = vst [vmem:[%s1378_s3 + $0xf8] sm:$0xff] %v896_v40  }

// kernel: wide_resnet_ae_forward.30
= control target key start
LH: loop header
LB: loop body
LE: loop exit
PB: predicated region body
PF: predicated region fallthrough
CT: control target
= control target key end

     0   :  { %s1714_s15 = smov 0   ;;  %s1716_s16 = smov 0   ;;  %s1920_s0 = inlined_call_operand.vmem [shape: bf16[512,144], index: 0, kind: input, shape index: {}]   ;;  %s1921_s1 = inlined_call_operand.vmem [shape: bf16[144,128], index: 1, kind: input, shape index: {}]   ;;  %s1922_s2 = inlined_call_operand.vmem [shape: f32[1,128], index: 2, kind: input, shape index: {}]   ;;  %s1923_s3 = inlined_call_operand.vmem [shape: f32[1,128], index: 3, kind: input, shape index: {}]   ;;  %s1924_s4 = inlined_call_operand.vmem [shape: bf16[512,128], index: 4, kind: output, shape index: {}]  }
   0x1   :  { %s1718_s17 = smov 0  }
   0x2 LB: > { %s33_s18 = sadd.s32 1, %s1682_s16  ;;  %p1337_p0 = scmp.ge.s32.totalorder %s1686_s17, 1  ;;  %s1686_s17 = sphi %s1718_s17, %s14_s17   ;;  %s1682_s16 = sphi %s1716_s16, %s1926_s16   ;;  %s1678_s15 = sphi %s1714_s15, %s1925_s15  }
   0x3   : > { %p35_p1 = scmp.ge.s32.totalorder %s33_s18, 2  ;;  %p224_p2 = scmp.lt.s32.totalorder %s1686_s17, 3 }
   0x5   : > { %s1928_s18 = smov (%p35_p1, %s33_s18), 0  ;;  %p225_p3 = pnand %p1337_p0, %p224_p2 }
   0x6   : > { %v1607_v0 = vld [vmem:[%s1921_s1] sm:$0xff] (!%p225_p3)   ;;  %v1688_v1 = vmov (!%p225_p3), 0   ;;  %s1338_s21 = sshll.u32 (!%p225_p3), %s1678_s15, 5  ;;  %v1608_v2 = vld [vmem:[%s1921_s1 + $0x8] sm:$0xff] (!%p225_p3)   ;;  %v1609_v3 = vld [vmem:[%s1921_s1 + $0x10] sm:$0xff] (!%p225_p3)   ;;  %vm625_vm0 = vcmask (!%p225_p3), 130048  }
   0x7   : > { %228 = sbr.rel (%p225_p3) target bundleno = 323 (0x143), region = 36  ;;  %674 = vmatprep.subr.bf16.mxu0 (!%p225_p3), %v1688_v1  ;;  %1564 = vmatprep.subr.bf16.mxu1 (!%p225_p3), %v1688_v1  ;;  %p274_p4 = scmp.lt.s32.totalorder (!%p225_p3), %s1338_s21, 63  ;;  %v1610_v4 = vld [vmem:[%s1921_s1 + $0x18] sm:$0xff] (!%p225_p3)   ;;  %v1611_v7 = vld [vmem:[%s1921_s1 + $0x20] sm:$0xff] (!%p225_p3)   ;;  %v1612_v8 = vld [vmem:[%s1921_s1 + $0x28] sm:$0xff] (!%p225_p3)  }
   0x8   : > { %675 = vmatpush1.bf16.msra.mxu0 (!%p225_p3), %v1607_v0  ;;  %1573 = vmatpush1.bf16.msra.mxu1 (!%p225_p3), %v1607_v0  ;;  %v1613_v9 = vld [vmem:[%s1921_s1 + $0x30] sm:$0xff] (!%p225_p3)   ;;  %v1614_v10 = vld [vmem:[%s1921_s1 + $0x38] sm:$0xff] (!%p225_p3)   ;;  %v1615_v11 = vld [vmem:[%s1921_s1 + $0x40] sm:$0xff] (!%p225_p3)  }
   0x9   : > { %676 = vmatprep.subr.bf16.mxu0 (!%p225_p3), %v1688_v1  ;;  %1565 = vmatprep.subr.bf16.mxu1 (!%p225_p3), %v1688_v1  ;;  %v1818_v42 = vld [vmem:[%s1922_s2] ss:$0 sm:$0xff] (!%p225_p3) }
   0xa   : > { %v1823_v44 = vld [vmem:[%s1923_s3] ss:$0 sm:$0xff] (!%p225_p3) }
   0xc   : > { %677 = vmatpush1.bf16.msra.mxu0 (!%p225_p3), %v1608_v2  ;;  %1574 = vmatpush1.bf16.msra.mxu1 (!%p225_p3), %v1608_v2 }
   0xd   : > { %678 = vmatprep.subr.bf16.mxu0 (!%p225_p3), %v1688_v1  ;;  %1566 = vmatprep.subr.bf16.mxu1 (!%p225_p3), %v1688_v1 }
   0xe   : > { %s1930_s21 = smov (!%p274_p4, %s1338_s21), 63 }
   0xf   : > { %s1436_s26 = sshll.u32 %s1930_s21, 3  ;;  %s1342_s24 = sshll.u32 %s1930_s21, 2 }
  0x10   : > { %s1747_s29 = scalar_lea.vmem %s1920_s0, %s1436_s26  ;;  %679 = vmatpush1.bf16.msra.mxu0 %v1609_v3  ;;  %1575 = vmatpush1.bf16.msra.mxu1 %v1609_v3  ;;  %s1837_s27 = scalar_lea.vmem %s1924_s4, %s1342_s24 }
  0x11   : > { %v1618_v5 = vld [vmem:[%s1747_s29 + $0x4] ss:$8 sps:$4 sm:$0xff]   ;;  %680 = vmatprep.subr.bf16.mxu0 %v1688_v1  ;;  %1567 = vmatprep.subr.bf16.mxu1 %v1688_v1  ;;  %v1616_v12 = vld [vmem:[%s1747_s29] ss:$8 sps:$4 sm:$0xff]   ;;  %v1622_v14 = vld [vmem:[%s1747_s29 + $0x14] ss:$8 sps:$4 sm:$0xff]  }
  0x12   : > { %v1621_v6 = vld [vmem:[%s1747_s29 + $0x84] ss:$8 sps:$4 sm:$0xff]   ;;  %1384 = vmatprep.mubr.msk.bf16.mxu0 %vm625_vm0, %v1618_v5  ;;  %v1619_v13 = vld [vmem:[%s1747_s29 + $0x80] ss:$8 sps:$4 sm:$0xff]   ;;  %v1624_v15 = vld [vmem:[%s1747_s29 + $0x94] ss:$8 sps:$4 sm:$0xff]  }
  0x13   : > { %1392 = vmatprep.mubr.msk.bf16.mxu1 %vm625_vm0, %v1621_v6  ;;  %v1626_v16 = vld [vmem:[%s1747_s29 + $0x10] ss:$8 sps:$4 sm:$0xff]   ;;  %v1628_v18 = vld [vmem:[%s1747_s29 + $0x24] ss:$8 sps:$4 sm:$0xff]   ;;  %v1632_v20 = vld [vmem:[%s1747_s29 + $0x20] ss:$8 sps:$4 sm:$0xff]  }
  0x14   : > { %681 = vmatpush1.bf16.msra.mxu0 %v1610_v4  ;;  %1576 = vmatpush1.bf16.msra.mxu1 %v1610_v4  ;;  %v1627_v17 = vld [vmem:[%s1747_s29 + $0x90] ss:$8 sps:$4 sm:$0xff]   ;;  %v1630_v19 = vld [vmem:[%s1747_s29 + $0xa4] ss:$8 sps:$4 sm:$0xff]   ;;  %v1633_v21 = vld [vmem:[%s1747_s29 + $0xa0] ss:$8 sps:$4 sm:$0xff]  }
  0x15   : > { %682 = vmatprep.subr.bf16.mxu0 %v1688_v1  ;;  %1568 = vmatprep.subr.bf16.mxu1 %v1688_v1  ;;  %v1634_v22 = vld [vmem:[%s1747_s29 + $0x34] ss:$8 sps:$4 sm:$0xff]   ;;  %v1638_v24 = vld [vmem:[%s1747_s29 + $0x30] ss:$8 sps:$4 sm:$0xff]   ;;  %v1640_v26 = vld [vmem:[%s1747_s29 + $0x44] ss:$8 sps:$4 sm:$0xff]  }
  0x16   : > { %v1636_v23 = vld [vmem:[%s1747_s29 + $0xb4] ss:$8 sps:$4 sm:$0xff]   ;;  %v1639_v25 = vld [vmem:[%s1747_s29 + $0xb0] ss:$8 sps:$4 sm:$0xff]   ;;  %v1642_v27 = vld [vmem:[%s1747_s29 + $0xc4] ss:$8 sps:$4 sm:$0xff]  }
  0x17   : > { %v1644_v28 = vld [vmem:[%s1747_s29 + $0x40] ss:$8 sps:$4 sm:$0xff]   ;;  %v1646_v30 = vld [vmem:[%s1747_s29 + $0x54] ss:$8 sps:$4 sm:$0xff]   ;;  %v1650_v32 = vld [vmem:[%s1747_s29 + $0x50] ss:$8 sps:$4 sm:$0xff]  }
  0x18   : > { %683 = vmatpush1.bf16.msra.mxu0 %v1611_v7  ;;  %1577 = vmatpush1.bf16.msra.mxu1 %v1611_v7  ;;  %v1645_v29 = vld [vmem:[%s1747_s29 + $0xc0] ss:$8 sps:$4 sm:$0xff]   ;;  %v1648_v31 = vld [vmem:[%s1747_s29 + $0xd4] ss:$8 sps:$4 sm:$0xff]   ;;  %v1651_v33 = vld [vmem:[%s1747_s29 + $0xd0] ss:$8 sps:$4 sm:$0xff]  }
  0x19   : > { %684 = vmatprep.subr.bf16.mxu0 %v1688_v1  ;;  %1569 = vmatprep.subr.bf16.mxu1 %v1688_v1  ;;  %v1652_v34 = vld [vmem:[%s1747_s29 + $0x64] ss:$8 sps:$4 sm:$0xff]   ;;  %v1656_v36 = vld [vmem:[%s1747_s29 + $0x60] ss:$8 sps:$4 sm:$0xff]   ;;  %v1658_v38 = vld [vmem:[%s1747_s29 + $0x74] ss:$8 sps:$4 sm:$0xff]  }
  0x1a   : > { %v1654_v35 = vld [vmem:[%s1747_s29 + $0xe4] ss:$8 sps:$4 sm:$0xff]   ;;  %v1657_v37 = vld [vmem:[%s1747_s29 + $0xe0] ss:$8 sps:$4 sm:$0xff]   ;;  %v1660_v39 = vld [vmem:[%s1747_s29 + $0xf4] ss:$8 sps:$4 sm:$0xff]  }
  0x1b   : > { %v1662_v40 = vld [vmem:[%s1747_s29 + $0x70] ss:$8 sps:$4 sm:$0xff]  }
  0x1c   : > { %685 = vmatpush1.bf16.msra.mxu0 %v1612_v8  ;;  %1578 = vmatpush1.bf16.msra.mxu1 %v1612_v8  ;;  %v1663_v41 = vld [vmem:[%s1747_s29 + $0xf0] ss:$8 sps:$4 sm:$0xff]  }
  0x1d   : > { %686 = vmatprep.subr.bf16.mxu0 %v1688_v1  ;;  %1570 = vmatprep.subr.bf16.mxu1 %v1688_v1 }
  0x20   : > { %687 = vmatpush1.bf16.msra.mxu0 %v1613_v9  ;;  %1579 = vmatpush1.bf16.msra.mxu1 %v1613_v9 }
  0x21   : > { %688 = vmatprep.subr.bf16.mxu0 %v1688_v1  ;;  %1571 = vmatprep.subr.bf16.mxu1 %v1688_v1 }
  0x24   : > { %689 = vmatpush1.bf16.msra.mxu0 %v1614_v10  ;;  %1580 = vmatpush1.bf16.msra.mxu1 %v1614_v10 }
  0x25   : > { %690 = vmatprep.subr.bf16.mxu0 %v1688_v1  ;;  %1572 = vmatprep.subr.bf16.mxu1 %v1688_v1 }
  0x28   : > { %691 = vmatpush1.bf16.msra.mxu0 %v1615_v11  ;;  %1581 = vmatpush1.bf16.msra.mxu1 %v1615_v11 }
  0x2b   : > { %707 = vmatmul.mubr.bf16.vlgmr.msra.gmra.mrb[0].mxu0 %v1616_v12  ;;  %771 = vmatmul.mubr.bf16.vlgmr.msra.gmra.mrb[0].mxu1 %v1619_v13 }
  0x2c   : > { %1385 = vmatprep.mubr.msk.bf16.mxu0 %vm625_vm0, %v1622_v14  ;;  %1393 = vmatprep.mubr.msk.bf16.mxu1 %vm625_vm0, %v1624_v15 }
  0x33   : > { %715 = vmatmul.mubr.bf16.gmra.mrb[4].mxu0 %v1626_v16  ;;  %779 = vmatmul.mubr.bf16.gmra.mrb[4].mxu1 %v1627_v17 }
  0x34   : > { %1386 = vmatprep.mubr.msk.bf16.mxu0 %vm625_vm0, %v1628_v18  ;;  %1394 = vmatprep.mubr.msk.bf16.mxu1 %vm625_vm0, %v1630_v19 }
  0x3b   : > { %723 = vmatmul.mubr.bf16.gmra.mrb[8].mxu0 %v1632_v20  ;;  %787 = vmatmul.mubr.bf16.gmra.mrb[8].mxu1 %v1633_v21 }
  0x3c   : > { %1387 = vmatprep.mubr.msk.bf16.mxu0 %vm625_vm0, %v1634_v22  ;;  %1395 = vmatprep.mubr.msk.bf16.mxu1 %vm625_vm0, %v1636_v23 }
  0x43   : > { %731 = vmatmul.mubr.bf16.gmra.mrb[12].mxu0 %v1638_v24  ;;  %795 = vmatmul.mubr.bf16.gmra.mrb[12].mxu1 %v1639_v25 }
  0x44   : > { %1388 = vmatprep.mubr.msk.bf16.mxu0 %vm625_vm0, %v1640_v26  ;;  %1396 = vmatprep.mubr.msk.bf16.mxu1 %vm625_vm0, %v1642_v27 }
  0x4b   : > { %739 = vmatmul.mubr.bf16.gmra.mrb[16].mxu0 %v1644_v28  ;;  %803 = vmatmul.mubr.bf16.gmra.mrb[16].mxu1 %v1645_v29 }
  0x4c   : > { %1389 = vmatprep.mubr.msk.bf16.mxu0 %vm625_vm0, %v1646_v30  ;;  %1397 = vmatprep.mubr.msk.bf16.mxu1 %vm625_vm0, %v1648_v31 }
  0x53   : > { %747 = vmatmul.mubr.bf16.gmra.mrb[20].mxu0 %v1650_v32  ;;  %811 = vmatmul.mubr.bf16.gmra.mrb[20].mxu1 %v1651_v33 }
  0x54   : > { %1390 = vmatprep.mubr.msk.bf16.mxu0 %vm625_vm0, %v1652_v34  ;;  %1398 = vmatprep.mubr.msk.bf16.mxu1 %vm625_vm0, %v1654_v35 }
  0x5b   : > { %755 = vmatmul.mubr.bf16.gmra.mrb[24].mxu0 %v1656_v36  ;;  %819 = vmatmul.mubr.bf16.gmra.mrb[24].mxu1 %v1657_v37 }
  0x5c   : > { %1391 = vmatprep.mubr.msk.bf16.mxu0 %vm625_vm0, %v1658_v38  ;;  %1399 = vmatprep.mubr.msk.bf16.mxu1 %vm625_vm0, %v1660_v39 }
  0x63   : > { %763 = vmatmul.mubr.bf16.gmra.mrb[28].mxu0 %v1662_v40  ;;  %827 = vmatmul.mubr.bf16.gmra.mrb[28].mxu1 %v1663_v41 }
  0xfe   : > { %v708_v43 = vpop.f32.mrb[0].mxu0  ;;  %v772_v45 = vpop.f32.mrb[0].mxu1 }
  0xff   : > { %v941_v46 = vmul.f32 %v1818_v42, %v708_v43  ;;  %v957_v47 = vmul.f32 %v1818_v42, %v772_v45  ;;  %v710_v48 = vpop.f32.mrb[1].mxu0  ;;  %v774_v49 = vpop.f32.mrb[1].mxu1 }
 0x100   : > { %v711_v50 = vpop.f32.mrb[2].mxu0  ;;  %v775_v51 = vpop.f32.mrb[2].mxu1 }
 0x101   : > { %v980_v52 = vadd.f32 %v1823_v44, %v941_v46  ;;  %v996_v53 = vadd.f32 %v1823_v44, %v957_v47  ;;  %v942_v54 = vmul.f32 %v1818_v42, %v711_v50  ;;  %v958_v55 = vmul.f32 %v1818_v42, %v775_v51  ;;  %v713_v56 = vpop.f32.mrb[3].mxu0  ;;  %v777_v57 = vpop.f32.mrb[3].mxu1 }
 0x103   : > { %v981_v58 = vadd.f32 %v1823_v44, %v942_v54  ;;  %v997_v59 = vadd.f32 %v1823_v44, %v958_v55  ;;  %v1012_v60 = vmax.f32 %v980_v52, 0.0  ;;  %v1028_v61 = vmax.f32 %v996_v53, 0.0 }
 0x105   : > { %v1013_v62 = vmax.f32 %v981_v58, 0.0  ;;  %v1029_v63 = vmax.f32 %v997_v59, 0.0 }
 0x106   : > { %v716_v0 = vpop.f32.mrb[4].mxu0  ;;  %v780_v1 = vpop.f32.mrb[4].mxu1 }
 0x107   : > { %v1472_v2 = vpack.c.bf16 %v1013_v62, %v1012_v60  ;;  %v1512_v3 = vpack.c.bf16 %v1029_v63, %v1028_v61  ;;  %v943_v4 = vmul.f32 %v1818_v42, %v716_v0  ;;  %v959_v5 = vmul.f32 %v1818_v42, %v780_v1  ;;  %v718_v6 = vpop.f32.mrb[5].mxu0  ;;  %v782_v7 = vpop.f32.mrb[5].mxu1 }
 0x108   : > { %v719_v8 = vpop.f32.mrb[6].mxu0  ;;  %v783_v9 = vpop.f32.mrb[6].mxu1 }
 0x109   : > { %1473 = vst [vmem:[%s1837_s27] sm:$0xff] %v1472_v2   ;;  %1556 = vst [vmem:[%s1837_s27 + $0x40] sm:$0xff] %v1512_v3   ;;  %v982_v10 = vadd.f32 %v1823_v44, %v943_v4  ;;  %v998_v11 = vadd.f32 %v1823_v44, %v959_v5  ;;  %v944_v12 = vmul.f32 %v1818_v42, %v719_v8  ;;  %v721_v14 = vpop.f32.mrb[7].mxu0  ;;  %v785_v15 = vpop.f32.mrb[7].mxu1 }
 0x10a   : > { %v960_v13 = vmul.f32 %v1818_v42, %v783_v9 }
 0x10b   : > { %v983_v16 = vadd.f32 %v1823_v44, %v944_v12  ;;  %v1014_v18 = vmax.f32 %v982_v10, 0.0  ;;  %v1030_v19 = vmax.f32 %v998_v11, 0.0 }
 0x10c   : > { %v999_v17 = vadd.f32 %v1823_v44, %v960_v13 }
 0x10d   : > { %v1015_v20 = vmax.f32 %v983_v16, 0.0 }
 0x10e   : > { %v1031_v21 = vmax.f32 %v999_v17, 0.0  ;;  %v724_v22 = vpop.f32.mrb[8].mxu0  ;;  %v788_v23 = vpop.f32.mrb[8].mxu1 }
 0x10f   : > { %v1477_v24 = vpack.c.bf16 %v1015_v20, %v1014_v18  ;;  %v945_v26 = vmul.f32 %v1818_v42, %v724_v22  ;;  %v961_v27 = vmul.f32 %v1818_v42, %v788_v23  ;;  %v726_v28 = vpop.f32.mrb[9].mxu0  ;;  %v790_v29 = vpop.f32.mrb[9].mxu1 }
 0x110   : > { %v1517_v25 = vpack.c.bf16 %v1031_v21, %v1030_v19  ;;  %v727_v30 = vpop.f32.mrb[10].mxu0  ;;  %v791_v31 = vpop.f32.mrb[10].mxu1 }
 0x111   : > { %1549 = vst [vmem:[%s1837_s27 + $0x8] sm:$0xff] %v1477_v24   ;;  %v984_v32 = vadd.f32 %v1823_v44, %v945_v26  ;;  %v1000_v33 = vadd.f32 %v1823_v44, %v961_v27  ;;  %v946_v34 = vmul.f32 %v1818_v42, %v727_v30  ;;  %v962_v35 = vmul.f32 %v1818_v42, %v791_v31  ;;  %v729_v36 = vpop.f32.mrb[11].mxu0  ;;  %v793_v37 = vpop.f32.mrb[11].mxu1 }
 0x112   : > { %1557 = vst [vmem:[%s1837_s27 + $0x48] sm:$0xff] %v1517_v25  }
 0x113   : > { %v985_v38 = vadd.f32 %v1823_v44, %v946_v34  ;;  %v1001_v39 = vadd.f32 %v1823_v44, %v962_v35  ;;  %v1016_v40 = vmax.f32 %v984_v32, 0.0  ;;  %v1032_v41 = vmax.f32 %v1000_v33, 0.0 }
 0x115   : > { %v1017_v43 = vmax.f32 %v985_v38, 0.0  ;;  %v1033_v45 = vmax.f32 %v1001_v39, 0.0 }
 0x116   : > { %v732_v46 = vpop.f32.mrb[12].mxu0  ;;  %v796_v47 = vpop.f32.mrb[12].mxu1 }
 0x117   : > { %v1482_v48 = vpack.c.bf16 %v1017_v43, %v1016_v40  ;;  %v1522_v49 = vpack.c.bf16 %v1033_v45, %v1032_v41  ;;  %v947_v50 = vmul.f32 %v1818_v42, %v732_v46  ;;  %v963_v51 = vmul.f32 %v1818_v42, %v796_v47  ;;  %v734_v52 = vpop.f32.mrb[13].mxu0  ;;  %v798_v53 = vpop.f32.mrb[13].mxu1 }
 0x118   : > { %v735_v54 = vpop.f32.mrb[14].mxu0  ;;  %v799_v55 = vpop.f32.mrb[14].mxu1 }
 0x119   : > { %1550 = vst [vmem:[%s1837_s27 + $0x10] sm:$0xff] %v1482_v48   ;;  %1558 = vst [vmem:[%s1837_s27 + $0x50] sm:$0xff] %v1522_v49   ;;  %v986_v56 = vadd.f32 %v1823_v44, %v947_v50  ;;  %v1002_v57 = vadd.f32 %v1823_v44, %v963_v51  ;;  %v948_v58 = vmul.f32 %v1818_v42, %v735_v54  ;;  %v737_v60 = vpop.f32.mrb[15].mxu0  ;;  %v801_v61 = vpop.f32.mrb[15].mxu1 }
 0x11a   : > { %v964_v59 = vmul.f32 %v1818_v42, %v799_v55 }
 0x11b   : > { %v987_v62 = vadd.f32 %v1823_v44, %v948_v58  ;;  %v1018_v0 = vmax.f32 %v986_v56, 0.0  ;;  %v1034_v1 = vmax.f32 %v1002_v57, 0.0 }
 0x11c   : > { %v1003_v63 = vadd.f32 %v1823_v44, %v964_v59 }
 0x11d   : > { %v1019_v2 = vmax.f32 %v987_v62, 0.0 }
 0x11e   : > { %v1035_v3 = vmax.f32 %v1003_v63, 0.0  ;;  %v740_v4 = vpop.f32.mrb[16].mxu0  ;;  %v804_v5 = vpop.f32.mrb[16].mxu1 }
 0x11f   : > { %v1487_v6 = vpack.c.bf16 %v1019_v2, %v1018_v0  ;;  %v949_v8 = vmul.f32 %v1818_v42, %v740_v4  ;;  %v965_v9 = vmul.f32 %v1818_v42, %v804_v5  ;;  %v742_v10 = vpop.f32.mrb[17].mxu0  ;;  %v806_v11 = vpop.f32.mrb[17].mxu1 }
 0x120   : > { %v1527_v7 = vpack.c.bf16 %v1035_v3, %v1034_v1  ;;  %v743_v12 = vpop.f32.mrb[18].mxu0  ;;  %v807_v13 = vpop.f32.mrb[18].mxu1 }
 0x121   : > { %1551 = vst [vmem:[%s1837_s27 + $0x18] sm:$0xff] %v1487_v6   ;;  %v988_v14 = vadd.f32 %v1823_v44, %v949_v8  ;;  %v1004_v15 = vadd.f32 %v1823_v44, %v965_v9  ;;  %v950_v16 = vmul.f32 %v1818_v42, %v743_v12  ;;  %v966_v17 = vmul.f32 %v1818_v42, %v807_v13  ;;  %v745_v18 = vpop.f32.mrb[19].mxu0  ;;  %v809_v19 = vpop.f32.mrb[19].mxu1 }
 0x122   : > { %1559 = vst [vmem:[%s1837_s27 + $0x58] sm:$0xff] %v1527_v7  }
 0x123   : > { %v989_v20 = vadd.f32 %v1823_v44, %v950_v16  ;;  %v1005_v21 = vadd.f32 %v1823_v44, %v966_v17  ;;  %v1020_v22 = vmax.f32 %v988_v14, 0.0  ;;  %v1036_v23 = vmax.f32 %v1004_v15, 0.0 }
 0x125   : > { %v1021_v24 = vmax.f32 %v989_v20, 0.0  ;;  %v1037_v25 = vmax.f32 %v1005_v21, 0.0 }
 0x126   : > { %v748_v26 = vpop.f32.mrb[20].mxu0  ;;  %v812_v27 = vpop.f32.mrb[20].mxu1 }
 0x127   : > { %v1492_v28 = vpack.c.bf16 %v1021_v24, %v1020_v22  ;;  %v1532_v29 = vpack.c.bf16 %v1037_v25, %v1036_v23  ;;  %v951_v30 = vmul.f32 %v1818_v42, %v748_v26  ;;  %v967_v31 = vmul.f32 %v1818_v42, %v812_v27  ;;  %v750_v32 = vpop.f32.mrb[21].mxu0  ;;  %v814_v33 = vpop.f32.mrb[21].mxu1 }
 0x128   : > { %v751_v34 = vpop.f32.mrb[22].mxu0  ;;  %v815_v35 = vpop.f32.mrb[22].mxu1 }
 0x129   : > { %1552 = vst [vmem:[%s1837_s27 + $0x20] sm:$0xff] %v1492_v28   ;;  %1560 = vst [vmem:[%s1837_s27 + $0x60] sm:$0xff] %v1532_v29   ;;  %v990_v36 = vadd.f32 %v1823_v44, %v951_v30  ;;  %v1006_v37 = vadd.f32 %v1823_v44, %v967_v31  ;;  %v952_v38 = vmul.f32 %v1818_v42, %v751_v34  ;;  %v753_v40 = vpop.f32.mrb[23].mxu0  ;;  %v817_v41 = vpop.f32.mrb[23].mxu1 }
 0x12a   : > { %v968_v39 = vmul.f32 %v1818_v42, %v815_v35 }
 0x12b   : > { %v991_v43 = vadd.f32 %v1823_v44, %v952_v38  ;;  %v1022_v46 = vmax.f32 %v990_v36, 0.0  ;;  %v1038_v47 = vmax.f32 %v1006_v37, 0.0 }
 0x12c   : > { %v1007_v45 = vadd.f32 %v1823_v44, %v968_v39 }
 0x12d   : > { %v1023_v48 = vmax.f32 %v991_v43, 0.0 }
 0x12e   : > { %v1039_v49 = vmax.f32 %v1007_v45, 0.0  ;;  %v756_v50 = vpop.f32.mrb[24].mxu0  ;;  %v820_v51 = vpop.f32.mrb[24].mxu1 }
 0x12f   : > { %v1497_v52 = vpack.c.bf16 %v1023_v48, %v1022_v46  ;;  %v953_v54 = vmul.f32 %v1818_v42, %v756_v50  ;;  %v969_v55 = vmul.f32 %v1818_v42, %v820_v51  ;;  %v758_v56 = vpop.f32.mrb[25].mxu0  ;;  %v822_v57 = vpop.f32.mrb[25].mxu1 }
 0x130   : > { %v1537_v53 = vpack.c.bf16 %v1039_v49, %v1038_v47  ;;  %v759_v58 = vpop.f32.mrb[26].mxu0  ;;  %v823_v59 = vpop.f32.mrb[26].mxu1 }
 0x131   : > { %1553 = vst [vmem:[%s1837_s27 + $0x28] sm:$0xff] %v1497_v52   ;;  %v992_v60 = vadd.f32 %v1823_v44, %v953_v54  ;;  %v1008_v61 = vadd.f32 %v1823_v44, %v969_v55  ;;  %v954_v62 = vmul.f32 %v1818_v42, %v759_v58  ;;  %v970_v63 = vmul.f32 %v1818_v42, %v823_v59  ;;  %v761_v0 = vpop.f32.mrb[27].mxu0  ;;  %v825_v1 = vpop.f32.mrb[27].mxu1 }
 0x132   : > { %1561 = vst [vmem:[%s1837_s27 + $0x68] sm:$0xff] %v1537_v53  }
 0x133   : > { %v993_v2 = vadd.f32 %v1823_v44, %v954_v62  ;;  %v1009_v3 = vadd.f32 %v1823_v44, %v970_v63  ;;  %v1024_v4 = vmax.f32 %v992_v60, 0.0  ;;  %v1040_v5 = vmax.f32 %v1008_v61, 0.0 }
 0x135   : > { %v1025_v6 = vmax.f32 %v993_v2, 0.0  ;;  %v1041_v7 = vmax.f32 %v1009_v3, 0.0 }
 0x136   : > { %v764_v8 = vpop.f32.mrb[28].mxu0  ;;  %v828_v9 = vpop.f32.mrb[28].mxu1 }
 0x137   : > { %v1502_v10 = vpack.c.bf16 %v1025_v6, %v1024_v4  ;;  %v1542_v11 = vpack.c.bf16 %v1041_v7, %v1040_v5  ;;  %v955_v12 = vmul.f32 %v1818_v42, %v764_v8  ;;  %v971_v13 = vmul.f32 %v1818_v42, %v828_v9  ;;  %v766_v14 = vpop.f32.mrb[29].mxu0  ;;  %v830_v15 = vpop.f32.mrb[29].mxu1 }
 0x138   : > { %v767_v16 = vpop.f32.mrb[30].mxu0  ;;  %v831_v17 = vpop.f32.mrb[30].mxu1 }
 0x139   : > { %1554 = vst [vmem:[%s1837_s27 + $0x30] sm:$0xff] %v1502_v10   ;;  %1562 = vst [vmem:[%s1837_s27 + $0x70] sm:$0xff] %v1542_v11   ;;  %v994_v18 = vadd.f32 %v1823_v44, %v955_v12  ;;  %v1010_v19 = vadd.f32 %v1823_v44, %v971_v13  ;;  %v956_v20 = vmul.f32 %v1818_v42, %v767_v16  ;;  %v769_v22 = vpop.f32.mrb[31].mxu0  ;;  %v833_v23 = vpop.f32.mrb[31].mxu1 }
 0x13a   : > { %v972_v21 = vmul.f32 %v1818_v42, %v831_v17 }
 0x13b   : > { %v995_v24 = vadd.f32 %v1823_v44, %v956_v20  ;;  %v1026_v26 = vmax.f32 %v994_v18, 0.0  ;;  %v1042_v27 = vmax.f32 %v1010_v19, 0.0 }
 0x13c   : > { %v1011_v25 = vadd.f32 %v1823_v44, %v972_v21 }
 0x13d   : > { %v1027_v28 = vmax.f32 %v995_v24, 0.0 }
 0x13e   : > { %v1043_v29 = vmax.f32 %v1011_v25, 0.0 }
 0x13f   : > { %v1507_v30 = vpack.c.bf16 %v1027_v28, %v1026_v26 }
 0x140   : > { %v1547_v31 = vpack.c.bf16 %v1043_v29, %v1042_v27 }
 0x141   : > { %1555 = vst [vmem:[%s1837_s27 + $0x38] sm:$0xff] %v1507_v30  }
 0x142   : > { %1563 = vst [vmem:[%s1837_s27 + $0x78] sm:$0xff] %v1547_v31  }
 0x143 PF: > { %s14_s17 = sadd.s32 1, %s1686_s17   ;;  %s1925_s15 = smov %s1682_s16 }
 0x144   : > { %p11_p5 = scmp.ge.s32.totalorder %s14_s17, 4   ;;  %s1926_s16 = smov %s1928_s18 }
 0x146   :  { %13 = sbr.rel (!%p11_p5) target bundleno = 2 (0x2), region = 83 }

// kernel: wide_resnet_ae_forward.31
= control target key start
LH: loop header
LB: loop body
LE: loop exit
PB: predicated region body
PF: predicated region fallthrough
CT: control target
= control target key end

     0   :  { %s1025_s9 = smov 0   ;;  %s1027_s10 = smov 0   ;;  %s1133_s0 = inlined_call_operand.vmem [shape: bf16[512,16], index: 0, kind: input, shape index: {}]   ;;  %s1134_s1 = inlined_call_operand.vmem [shape: bf16[16,128], index: 1, kind: input, shape index: {}]   ;;  %s1135_s2 = inlined_call_operand.vmem [shape: f32[512,128], index: 2, kind: output, shape index: {}]  }
   0x1   :  { %s1029_s11 = smov 0  }
   0x2 LB: > { %s31_s12 = sadd.s32 1, %s1004_s10  ;;  %p852_p0 = scmp.ge.s32.totalorder %s1008_s11, 1  ;;  %s1008_s11 = sphi %s1029_s11, %s12_s11   ;;  %s1004_s10 = sphi %s1027_s10, %s1137_s10   ;;  %s1000_s9 = sphi %s1025_s9, %s1136_s9  }
   0x3   : > { %p33_p1 = scmp.ge.s32.totalorder %s31_s12, 2  ;;  %p155_p2 = scmp.lt.s32.totalorder %s1008_s11, 3 }
   0x5   : > { %s1139_s12 = smov (%p33_p1, %s31_s12), 0  ;;  %p156_p3 = pnand %p852_p0, %p155_p2 }
   0x6   : > { %v969_v0 = vld [vmem:[%s1134_s1] sm:$0xff] (!%p156_p3)   ;;  %s853_s15 = sshll.u32 (!%p156_p3), %s1000_s9, 5  ;;  %vm407_vm0 = vcmask (!%p156_p3), 130048  }
   0x7   : > { %159 = sbr.rel (%p156_p3) target bundleno = 260 (0x104), region = 28  ;;  %p192_p4 = scmp.lt.s32.totalorder (!%p156_p3), %s853_s15, 63  ;;  %909 = vmatprep.subr.bf16.mxu0 (!%p156_p3), %v969_v0  ;;  %943 = vmatprep.subr.bf16.mxu1 (!%p156_p3), %v969_v0 }
   0x8   : > { %910 = vmatpush3.bf16.msra.mxu0 (!%p156_p3), %v969_v0  ;;  %944 = vmatpush3.bf16.msra.mxu1 (!%p156_p3), %v969_v0 }
   0xe   : > { %s1141_s15 = smov (!%p192_p4, %s853_s15), 63 }
   0xf   : > { %s854_s16 = sshll.u32 %s1141_s15, 2  ;;  %s856_s20 = sshll.u32 %s1141_s15, 3 }
  0x10   : > { %s1052_s19 = scalar_lea.vmem %s1133_s0, %s854_s16  ;;  %s1090_s23 = scalar_lea.vmem %s1135_s2, %s856_s20 }
  0x11   : > { %v970_v1 = vld [vmem:[%s1052_s19] sm:$0xff]   ;;  %v972_v3 = vld [vmem:[%s1052_s19 + $0x8] sm:$0xff]   ;;  %v974_v5 = vld [vmem:[%s1052_s19 + $0x10] sm:$0xff]  }
  0x12   : > { %v971_v2 = vld [vmem:[%s1052_s19 + $0x40] sm:$0xff]   ;;  %911 = vmatprep.mubr.msk.bf16.mxu0 %vm407_vm0, %v970_v1  ;;  %v973_v4 = vld [vmem:[%s1052_s19 + $0x48] sm:$0xff]   ;;  %v975_v6 = vld [vmem:[%s1052_s19 + $0x50] sm:$0xff]  }
  0x13   : > { %927 = vmatprep.mubr.msk.bf16.mxu1 %vm407_vm0, %v971_v2  ;;  %912 = vmatmul.mubr.msk.bf16.vlgmr.msra.gmra.mrb[0].mxu0 %vm407_vm0, %v972_v3  ;;  %v976_v7 = vld [vmem:[%s1052_s19 + $0x18] sm:$0xff]   ;;  %v978_v9 = vld [vmem:[%s1052_s19 + $0x20] sm:$0xff]   ;;  %v980_v11 = vld [vmem:[%s1052_s19 + $0x28] sm:$0xff]  }
  0x14   : > { %928 = vmatmul.mubr.msk.bf16.vlgmr.msra.gmra.mrb[0].mxu1 %vm407_vm0, %v973_v4  ;;  %915 = vmatprep.mubr.msk.bf16.mxu0 %vm407_vm0, %v974_v5  ;;  %v977_v8 = vld [vmem:[%s1052_s19 + $0x58] sm:$0xff]   ;;  %v979_v10 = vld [vmem:[%s1052_s19 + $0x60] sm:$0xff]   ;;  %v981_v12 = vld [vmem:[%s1052_s19 + $0x68] sm:$0xff]  }
  0x15   : > { %931 = vmatprep.mubr.msk.bf16.mxu1 %vm407_vm0, %v975_v6  ;;  %v982_v13 = vld [vmem:[%s1052_s19 + $0x30] sm:$0xff]   ;;  %v984_v15 = vld [vmem:[%s1052_s19 + $0x38] sm:$0xff]  }
  0x16   : > { %v983_v14 = vld [vmem:[%s1052_s19 + $0x70] sm:$0xff]   ;;  %v985_v16 = vld [vmem:[%s1052_s19 + $0x78] sm:$0xff]  }
  0x1b   : > { %916 = vmatmul.mubr.msk.bf16.gmra.mrb[4].mxu0 %vm407_vm0, %v976_v7 }
  0x1c   : > { %932 = vmatmul.mubr.msk.bf16.gmra.mrb[4].mxu1 %vm407_vm0, %v977_v8  ;;  %919 = vmatprep.mubr.msk.bf16.mxu0 %vm407_vm0, %v978_v9 }
  0x1d   : > { %935 = vmatprep.mubr.msk.bf16.mxu1 %vm407_vm0, %v979_v10 }
  0x23   : > { %920 = vmatmul.mubr.msk.bf16.gmra.mrb[8].mxu0 %vm407_vm0, %v980_v11 }
  0x24   : > { %936 = vmatmul.mubr.msk.bf16.gmra.mrb[8].mxu1 %vm407_vm0, %v981_v12  ;;  %923 = vmatprep.mubr.msk.bf16.mxu0 %vm407_vm0, %v982_v13 }
  0x25   : > { %939 = vmatprep.mubr.msk.bf16.mxu1 %vm407_vm0, %v983_v14 }
  0x2b   : > { %924 = vmatmul.mubr.msk.bf16.gmra.mrb[12].mxu0 %vm407_vm0, %v984_v15 }
  0x2c   : > { %940 = vmatmul.mubr.msk.bf16.gmra.mrb[12].mxu1 %vm407_vm0, %v985_v16 }
  0xe6   : > { %v913_v17 = vpop.f32.mrb[0].mxu0 }
  0xe7   : > { %718 = vst [vmem:[%s1090_s23 + $0x10] sm:$0xff] %v913_v17  ;;  %v929_v18 = vpop.f32.mrb[0].mxu1  ;;  %v490_v19 = vpop.f32.mrb[1].mxu0 }
  0xe8   : > { %734 = vst [vmem:[%s1090_s23 + $0x90] sm:$0xff] %v929_v18  ;;  %716 = vst [vmem:[%s1090_s23] sm:$0xff] %v490_v19  ;;  %v554_v20 = vpop.f32.mrb[1].mxu1  ;;  %v914_v21 = vpop.f32.mrb[2].mxu0 }
  0xe9   : > { %732 = vst [vmem:[%s1090_s23 + $0x80] sm:$0xff] %v554_v20  ;;  %719 = vst [vmem:[%s1090_s23 + $0x18] sm:$0xff] %v914_v21  ;;  %v930_v22 = vpop.f32.mrb[2].mxu1  ;;  %v493_v23 = vpop.f32.mrb[3].mxu0 }
  0xea   : > { %735 = vst [vmem:[%s1090_s23 + $0x98] sm:$0xff] %v930_v22  ;;  %717 = vst [vmem:[%s1090_s23 + $0x8] sm:$0xff] %v493_v23  ;;  %v557_v24 = vpop.f32.mrb[3].mxu1 }
  0xeb   : > { %733 = vst [vmem:[%s1090_s23 + $0x88] sm:$0xff] %v557_v24 }
  0xee   : > { %v917_v25 = vpop.f32.mrb[4].mxu0 }
  0xef   : > { %722 = vst [vmem:[%s1090_s23 + $0x30] sm:$0xff] %v917_v25  ;;  %v933_v26 = vpop.f32.mrb[4].mxu1  ;;  %v506_v27 = vpop.f32.mrb[5].mxu0 }
  0xf0   : > { %738 = vst [vmem:[%s1090_s23 + $0xb0] sm:$0xff] %v933_v26  ;;  %720 = vst [vmem:[%s1090_s23 + $0x20] sm:$0xff] %v506_v27  ;;  %v570_v28 = vpop.f32.mrb[5].mxu1  ;;  %v918_v29 = vpop.f32.mrb[6].mxu0 }
  0xf1   : > { %736 = vst [vmem:[%s1090_s23 + $0xa0] sm:$0xff] %v570_v28  ;;  %723 = vst [vmem:[%s1090_s23 + $0x38] sm:$0xff] %v918_v29  ;;  %v934_v30 = vpop.f32.mrb[6].mxu1  ;;  %v509_v31 = vpop.f32.mrb[7].mxu0 }
  0xf2   : > { %739 = vst [vmem:[%s1090_s23 + $0xb8] sm:$0xff] %v934_v30  ;;  %721 = vst [vmem:[%s1090_s23 + $0x28] sm:$0xff] %v509_v31  ;;  %v573_v32 = vpop.f32.mrb[7].mxu1 }
  0xf3   : > { %737 = vst [vmem:[%s1090_s23 + $0xa8] sm:$0xff] %v573_v32 }
  0xf6   : > { %v921_v33 = vpop.f32.mrb[8].mxu0 }
  0xf7   : > { %726 = vst [vmem:[%s1090_s23 + $0x50] sm:$0xff] %v921_v33  ;;  %v937_v34 = vpop.f32.mrb[8].mxu1  ;;  %v522_v35 = vpop.f32.mrb[9].mxu0 }
  0xf8   : > { %742 = vst [vmem:[%s1090_s23 + $0xd0] sm:$0xff] %v937_v34  ;;  %724 = vst [vmem:[%s1090_s23 + $0x40] sm:$0xff] %v522_v35  ;;  %v586_v36 = vpop.f32.mrb[9].mxu1  ;;  %v922_v37 = vpop.f32.mrb[10].mxu0 }
  0xf9   : > { %740 = vst [vmem:[%s1090_s23 + $0xc0] sm:$0xff] %v586_v36  ;;  %727 = vst [vmem:[%s1090_s23 + $0x58] sm:$0xff] %v922_v37  ;;  %v938_v38 = vpop.f32.mrb[10].mxu1  ;;  %v525_v39 = vpop.f32.mrb[11].mxu0 }
  0xfa   : > { %743 = vst [vmem:[%s1090_s23 + $0xd8] sm:$0xff] %v938_v38  ;;  %725 = vst [vmem:[%s1090_s23 + $0x48] sm:$0xff] %v525_v39  ;;  %v589_v40 = vpop.f32.mrb[11].mxu1 }
  0xfb   : > { %741 = vst [vmem:[%s1090_s23 + $0xc8] sm:$0xff] %v589_v40 }
  0xfe   : > { %v925_v41 = vpop.f32.mrb[12].mxu0 }
  0xff   : > { %730 = vst [vmem:[%s1090_s23 + $0x70] sm:$0xff] %v925_v41  ;;  %v941_v42 = vpop.f32.mrb[12].mxu1  ;;  %v538_v43 = vpop.f32.mrb[13].mxu0 }
 0x100   : > { %746 = vst [vmem:[%s1090_s23 + $0xf0] sm:$0xff] %v941_v42  ;;  %728 = vst [vmem:[%s1090_s23 + $0x60] sm:$0xff] %v538_v43  ;;  %v602_v44 = vpop.f32.mrb[13].mxu1  ;;  %v926_v45 = vpop.f32.mrb[14].mxu0 }
 0x101   : > { %744 = vst [vmem:[%s1090_s23 + $0xe0] sm:$0xff] %v602_v44  ;;  %731 = vst [vmem:[%s1090_s23 + $0x78] sm:$0xff] %v926_v45  ;;  %v942_v46 = vpop.f32.mrb[14].mxu1  ;;  %v541_v47 = vpop.f32.mrb[15].mxu0 }
 0x102   : > { %747 = vst [vmem:[%s1090_s23 + $0xf8] sm:$0xff] %v942_v46  ;;  %729 = vst [vmem:[%s1090_s23 + $0x68] sm:$0xff] %v541_v47  ;;  %v605_v48 = vpop.f32.mrb[15].mxu1 }
 0x103   : > { %745 = vst [vmem:[%s1090_s23 + $0xe8] sm:$0xff] %v605_v48 }
 0x104 PF: > { %s12_s11 = sadd.s32 1, %s1008_s11   ;;  %s1136_s9 = smov %s1004_s10 }
 0x105   : > { %p9_p5 = scmp.ge.s32.totalorder %s12_s11, 4   ;;  %s1137_s10 = smov %s1139_s12 }
 0x107   :  { %11 = sbr.rel (!%p9_p5) target bundleno = 2 (0x2), region = 69 }

// kernel: wide_resnet_ae_forward.32
= control target key start
LH: loop header
LB: loop body
LE: loop exit
PB: predicated region body
PF: predicated region fallthrough
CT: control target
= control target key end

     0   :  { %s2646_s12 = smov 0   ;;  %s2648_s13 = smov 0   ;;  %s3077_s0 = inlined_call_operand.vmem [shape: bf16[512,576], index: 0, kind: input, shape index: {}]   ;;  %s3078_s1 = inlined_call_operand.vmem [shape: bf16[576,128], index: 1, kind: input, shape index: {}]   ;;  %s3079_s2 = inlined_call_operand.vmem [shape: f32[512,128], index: 2, kind: input, shape index: {}]   ;;  %s3080_s3 = inlined_call_operand.vmem [shape: f32[512,128], index: 3, kind: output, shape index: {}]  }
   0x1   :  { %s2650_s14 = smov 0  }
   0x2 LB: > { %s32_s15 = sadd.s32 1, %s2620_s13  ;;  %p1988_p0 = scmp.ge.s32.totalorder %s2624_s14, 1  ;;  %s2624_s14 = sphi %s2650_s14, %s13_s14   ;;  %s2620_s13 = sphi %s2648_s13, %s3082_s13   ;;  %s2616_s12 = sphi %s2646_s12, %s3081_s12  }
   0x3   : > { %p34_p1 = scmp.ge.s32.totalorder %s32_s15, 2  ;;  %p199_p2 = scmp.lt.s32.totalorder %s2624_s14, 3 }
   0x5   : > { %s3084_s15 = smov (%p34_p1, %s32_s15), 0  ;;  %p200_p3 = pnand %p1988_p0, %p199_p2 }
   0x6   : > { %v2454_v0 = vld [vmem:[%s3078_s1 + $0x40] sm:$0xff] (!%p200_p3)   ;;  %s1989_s18 = sshll.u32 (!%p200_p3), %s2616_s12, 5  ;;  %v2456_v2 = vld [vmem:[%s3078_s1 + $0x48] sm:$0xff] (!%p200_p3)   ;;  %v2458_v4 = vld [vmem:[%s3078_s1 + $0x50] sm:$0xff] (!%p200_p3)   ;;  %vm1139_vm0 = vcmask (!%p200_p3), 523264  }
   0x7   : > { %203 = sbr.rel (%p200_p3) target bundleno = 415 (0x19f), region = 32  ;;  %v2455_v1 = vld [vmem:[%s3078_s1] sm:$0xff] (!%p200_p3)   ;;  %2129 = vmatprep.subr.bf16.mxu0 (!%p200_p3), %v2454_v0  ;;  %2413 = vmatprep.subr.bf16.mxu1 (!%p200_p3), %v2454_v0  ;;  %p249_p4 = scmp.lt.s32.totalorder (!%p200_p3), %s1989_s18, 63  ;;  %v2457_v3 = vld [vmem:[%s3078_s1 + $0x8] sm:$0xff] (!%p200_p3)   ;;  %v2459_v5 = vld [vmem:[%s3078_s1 + $0x10] sm:$0xff] (!%p200_p3)  }
   0x8   : > { %2130 = vmatpush3.bf16.msra.mxu0 (!%p200_p3), %v2455_v1  ;;  %2421 = vmatpush3.bf16.msra.mxu1 (!%p200_p3), %v2455_v1  ;;  %v2460_v6 = vld [vmem:[%s3078_s1 + $0x58] sm:$0xff] (!%p200_p3)   ;;  %v2462_v8 = vld [vmem:[%s3078_s1 + $0x60] sm:$0xff] (!%p200_p3)   ;;  %v2464_v10 = vld [vmem:[%s3078_s1 + $0x68] sm:$0xff] (!%p200_p3)  }
   0x9   : > { %2131 = vmatprep.subr.bf16.mxu0 (!%p200_p3), %v2456_v2  ;;  %2414 = vmatprep.subr.bf16.mxu1 (!%p200_p3), %v2456_v2  ;;  %v2461_v7 = vld [vmem:[%s3078_s1 + $0x18] sm:$0xff] (!%p200_p3)   ;;  %v2463_v9 = vld [vmem:[%s3078_s1 + $0x20] sm:$0xff] (!%p200_p3)   ;;  %v2465_v13 = vld [vmem:[%s3078_s1 + $0x28] sm:$0xff] (!%p200_p3)  }
   0xa   : > { %v2466_v14 = vld [vmem:[%s3078_s1 + $0x70] sm:$0xff] (!%p200_p3)   ;;  %v2468_v16 = vld [vmem:[%s3078_s1 + $0x78] sm:$0xff] (!%p200_p3)   ;;  %v2476_v18 = vld [vmem:[%s3078_s1 + $0xc0] sm:$0xff] (!%p200_p3)  }
   0xb   : > { %v2467_v15 = vld [vmem:[%s3078_s1 + $0x30] sm:$0xff] (!%p200_p3)   ;;  %v2469_v17 = vld [vmem:[%s3078_s1 + $0x38] sm:$0xff] (!%p200_p3)   ;;  %v2479_v19 = vld [vmem:[%s3078_s1 + $0x100] sm:$0xff] (!%p200_p3)  }
   0xc   : > { %2132 = vmatpush3.bf16.msra.mxu0 (!%p200_p3), %v2457_v3  ;;  %2422 = vmatpush3.bf16.msra.mxu1 (!%p200_p3), %v2457_v3  ;;  %v2477_v22 = vld [vmem:[%s3078_s1 + $0x80] sm:$0xff] (!%p200_p3)   ;;  %v2478_v23 = vld [vmem:[%s3078_s1 + $0xc8] sm:$0xff] (!%p200_p3)   ;;  %v2487_v28 = vld [vmem:[%s3078_s1 + $0xd0] sm:$0xff] (!%p200_p3)  }
   0xd   : > { %2133 = vmatprep.subr.bf16.mxu0 (!%p200_p3), %v2458_v4  ;;  %2415 = vmatprep.subr.bf16.mxu1 (!%p200_p3), %v2458_v4  ;;  %v2480_v26 = vld [vmem:[%s3078_s1 + $0x88] sm:$0xff] (!%p200_p3)   ;;  %v2488_v30 = vld [vmem:[%s3078_s1 + $0x90] sm:$0xff] (!%p200_p3)   ;;  %v2489_v31 = vld [vmem:[%s3078_s1 + $0xd8] sm:$0xff] (!%p200_p3)  }
   0xe   : > { %s3086_s18 = smov (!%p249_p4, %s1989_s18), 63  ;;  %v2490_v34 = vld [vmem:[%s3078_s1 + $0x98] sm:$0xff]   ;;  %v2510_v35 = vld [vmem:[%s3078_s1 + $0x108] sm:$0xff]   ;;  %v2497_v37 = vld [vmem:[%s3078_s1 + $0xe0] sm:$0xff]  }
   0xf   : > { %s2429_s4 = smul.u32 20, %s3086_s18  ;;  %v2498_v39 = vld [vmem:[%s3078_s1 + $0xa0] sm:$0xff]   ;;  %v2499_v40 = vld [vmem:[%s3078_s1 + $0xe8] sm:$0xff]   ;;  %v2507_v46 = vld [vmem:[%s3078_s1 + $0xf0] sm:$0xff]  }
  0x10   : > { %2134 = vmatpush3.bf16.msra.mxu0 %v2459_v5  ;;  %2423 = vmatpush3.bf16.msra.mxu1 %v2459_v5  ;;  %v2500_v43 = vld [vmem:[%s3078_s1 + $0xa8] sm:$0xff]   ;;  %v2530_v47 = vld [vmem:[%s3078_s1 + $0x110] sm:$0xff]   ;;  %v2509_v49 = vld [vmem:[%s3078_s1 + $0xf8] sm:$0xff]  }
  0x11   : > { %2135 = vmatprep.subr.bf16.mxu0 %v2460_v6  ;;  %2416 = vmatprep.subr.bf16.mxu1 %v2460_v6  ;;  %s2697_s11 = scalar_lea.vmem %s3077_s0, %s2429_s4  ;;  %v2508_v48 = vld [vmem:[%s3078_s1 + $0xb0] sm:$0xff]   ;;  %v2511_v52 = vld [vmem:[%s3078_s1 + $0xb8] sm:$0xff]  }
  0x12   : > { %v2472_v11 = vld [vmem:[%s2697_s11 + $0x4] ss:$20 sps:$4 sm:$0xff]   ;;  %v2470_v20 = vld [vmem:[%s2697_s11] ss:$20 sps:$4 sm:$0xff]   ;;  %v2485_v27 = vld [vmem:[%s2697_s11 + $0x28] ss:$20 sps:$4 sm:$0xff]  }
  0x13   : > { %v2475_v12 = vld [vmem:[%s2697_s11 + $0x1e4] ss:$20 sps:$4 sm:$0xff]   ;;  %1220 = vmatprep.mubr.bf16.mxu0 %v2472_v11  ;;  %v2473_v21 = vld [vmem:[%s2697_s11 + $0x1e0] ss:$20 sps:$4 sm:$0xff]   ;;  %v2486_v29 = vld [vmem:[%s2697_s11 + $0x208] ss:$20 sps:$4 sm:$0xff]  }
  0x14   : > { %2136 = vmatpush3.bf16.msra.mxu0 %v2461_v7  ;;  %2424 = vmatpush3.bf16.msra.mxu1 %v2461_v7  ;;  %v2481_v24 = vld [vmem:[%s2697_s11 + $0x2c] ss:$20 sps:$4 sm:$0xff]   ;;  %v2491_v32 = vld [vmem:[%s2697_s11 + $0x54] ss:$20 sps:$4 sm:$0xff]   ;;  %v2495_v36 = vld [vmem:[%s2697_s11 + $0x50] ss:$20 sps:$4 sm:$0xff]  }
  0x15   : > { %2137 = vmatprep.subr.bf16.mxu0 %v2462_v8  ;;  %2417 = vmatprep.subr.bf16.mxu1 %v2462_v8  ;;  %v2483_v25 = vld [vmem:[%s2697_s11 + $0x20c] ss:$20 sps:$4 sm:$0xff]   ;;  %v2493_v33 = vld [vmem:[%s2697_s11 + $0x234] ss:$20 sps:$4 sm:$0xff]   ;;  %v2496_v38 = vld [vmem:[%s2697_s11 + $0x230] ss:$20 sps:$4 sm:$0xff]  }
  0x16   : > { %1316 = vmatprep.mubr.bf16.mxu1 %v2475_v12  ;;  %v2501_v41 = vld [vmem:[%s2697_s11 + $0x7c] ss:$20 sps:$4 sm:$0xff]   ;;  %v2505_v44 = vld [vmem:[%s2697_s11 + $0x78] ss:$20 sps:$4 sm:$0xff]   ;;  %v2517_v54 = vld [vmem:[%s2697_s11 + $0xa0] ss:$20 sps:$4 sm:$0xff]  }
  0x17   : > { %v2503_v42 = vld [vmem:[%s2697_s11 + $0x25c] ss:$20 sps:$4 sm:$0xff]   ;;  %v2506_v45 = vld [vmem:[%s2697_s11 + $0x258] ss:$20 sps:$4 sm:$0xff]   ;;  %v2520_v57 = vld [vmem:[%s2697_s11 + $0x34] ss:$20 sps:$4 sm:$0xff]  }
  0x18   : > { %2138 = vmatpush3.bf16.msra.mxu0 %v2463_v9  ;;  %2425 = vmatpush3.bf16.msra.mxu1 %v2463_v9  ;;  %v2512_v50 = vld [vmem:[%s2697_s11 + $0xa4] ss:$20 sps:$4 sm:$0xff]   ;;  %v2516_v51 = vld [vmem:[%s2697_s11 + $0xc] ss:$20 sps:$4 sm:$0xff]   ;;  %v2514_v53 = vld [vmem:[%s2697_s11 + $0x8] ss:$20 sps:$4 sm:$0xff]  }
  0x19   : > { %2139 = vmatprep.subr.bf16.mxu0 %v2464_v10  ;;  %2418 = vmatprep.subr.bf16.mxu1 %v2464_v10  ;;  %v2518_v55 = vld [vmem:[%s2697_s11 + $0xcc] ss:$20 sps:$4 sm:$0xff]   ;;  %v2549_v56 = vld [vmem:[%s3078_s1 + $0x118] sm:$0xff]   ;;  %v2523_v59 = vld [vmem:[%s2697_s11 + $0x30] ss:$20 sps:$4 sm:$0xff]  }
  0x1a   : > { %v2522_v58 = vld [vmem:[%s2697_s11 + $0xc8] ss:$20 sps:$4 sm:$0xff]   ;;  %v2528_v62 = vld [vmem:[%s2697_s11 + $0xf0] ss:$20 sps:$4 sm:$0xff]   ;;  %v2529_v63 = vld [vmem:[%s2697_s11 + $0x58] ss:$20 sps:$4 sm:$0xff]  }
  0x1b   : > { %v2524_v60 = vld [vmem:[%s2697_s11 + $0xf4] ss:$20 sps:$4 sm:$0xff]   ;;  %v2526_v61 = vld [vmem:[%s2697_s11 + $0x5c] ss:$20 sps:$4 sm:$0xff]   ;;  %v2533_v1 = vld [vmem:[%s2697_s11 + $0x84] ss:$20 sps:$4 sm:$0xff]  }
  0x1c   : > { %2140 = vmatpush3.bf16.msra.mxu0 %v2465_v13  ;;  %2426 = vmatpush3.bf16.msra.mxu1 %v2465_v13  ;;  %v2531_v0 = vld [vmem:[%s2697_s11 + $0x11c] ss:$20 sps:$4 sm:$0xff]   ;;  %v2535_v2 = vld [vmem:[%s2697_s11 + $0x118] ss:$20 sps:$4 sm:$0xff]   ;;  %v2536_v3 = vld [vmem:[%s2697_s11 + $0x80] ss:$20 sps:$4 sm:$0xff]  }
  0x1d   : > { %2141 = vmatprep.subr.bf16.mxu0 %v2466_v14  ;;  %2419 = vmatprep.subr.bf16.mxu1 %v2466_v14  ;;  %v2537_v4 = vld [vmem:[%s2697_s11 + $0x144] ss:$20 sps:$4 sm:$0xff]   ;;  %v2539_v5 = vld [vmem:[%s2697_s11 + $0xac] ss:$20 sps:$4 sm:$0xff]   ;;  %v2542_v7 = vld [vmem:[%s2697_s11 + $0xa8] ss:$20 sps:$4 sm:$0xff]  }
  0x1e   : > { %v2541_v6 = vld [vmem:[%s2697_s11 + $0x140] ss:$20 sps:$4 sm:$0xff]   ;;  %v2547_v10 = vld [vmem:[%s2697_s11 + $0x168] ss:$20 sps:$4 sm:$0xff]   ;;  %v2548_v11 = vld [vmem:[%s2697_s11 + $0xd0] ss:$20 sps:$4 sm:$0xff]  }
  0x1f   : > { %v2543_v8 = vld [vmem:[%s2697_s11 + $0x16c] ss:$20 sps:$4 sm:$0xff]   ;;  %v2545_v9 = vld [vmem:[%s2697_s11 + $0xd4] ss:$20 sps:$4 sm:$0xff]   ;;  %v2552_v13 = vld [vmem:[%s2697_s11 + $0xfc] ss:$20 sps:$4 sm:$0xff]  }
  0x20   : > { %2142 = vmatpush3.bf16.msra.mxu0 %v2467_v15  ;;  %2427 = vmatpush3.bf16.msra.mxu1 %v2467_v15  ;;  %v2550_v12 = vld [vmem:[%s2697_s11 + $0x194] ss:$20 sps:$4 sm:$0xff]   ;;  %v2554_v14 = vld [vmem:[%s2697_s11 + $0x190] ss:$20 sps:$4 sm:$0xff]   ;;  %v2555_v15 = vld [vmem:[%s2697_s11 + $0xf8] ss:$20 sps:$4 sm:$0xff]  }
  0x21   : > { %2143 = vmatprep.subr.bf16.mxu0 %v2468_v16  ;;  %2420 = vmatprep.subr.bf16.mxu1 %v2468_v16  ;;  %v2556_v16 = vld [vmem:[%s2697_s11 + $0x1bc] ss:$20 sps:$4 sm:$0xff]  }
  0x24   : > { %2144 = vmatpush3.bf16.msra.mxu0 %v2469_v17  ;;  %2428 = vmatpush3.bf16.msra.mxu1 %v2469_v17  ;;  %v2558_v17 = vld [vmem:[%s2697_s11 + $0x124] ss:$20 sps:$4 sm:$0xff]  }
  0x25   : > { %2241 = vmatprep.subr.bf16.mxu1 %v2476_v18  ;;  %2373 = vmatprep.subr.bf16.mxu0 %v2479_v19  ;;  %v2560_v18 = vld [vmem:[%s2697_s11 + $0x1b8] ss:$20 sps:$4 sm:$0xff]  }
  0x27   : > { %1221 = vmatmul.mubr.bf16.vlgmr.msra.gmra.mrb[0].mxu0 %v2470_v20  ;;  %1317 = vmatmul.mubr.bf16.vlgmr.msra.gmra.mrb[0].mxu1 %v2473_v21  ;;  %v2562_v20 = vld [vmem:[%s2697_s11 + $0x14c] ss:$20 sps:$4 sm:$0xff]   ;;  %v2564_v21 = vld [vmem:[%s2697_s11 + $0x10] ss:$20 sps:$4 sm:$0xff]  }
  0x28   : > { %2242 = vmatpush3.bf16.msra.mxu1 %v2477_v22  ;;  %2374 = vmatpush3.bf16.msra.mxu0 %v2479_v19  ;;  %v2561_v19 = vld [vmem:[%s2697_s11 + $0x120] ss:$20 sps:$4 sm:$0xff]   ;;  %v2565_v22 = vld [vmem:[%s2697_s11 + $0x148] ss:$20 sps:$4 sm:$0xff]  }
  0x29   : > { %2243 = vmatprep.subr.bf16.mxu1 %v2478_v23  ;;  %1228 = vmatprep.mubr.bf16.mxu0 %v2481_v24  ;;  %v2566_v23 = vld [vmem:[%s2697_s11 + $0x38] ss:$20 sps:$4 sm:$0xff]   ;;  %v2567_v24 = vld [vmem:[%s2697_s11 + $0x174] ss:$20 sps:$4 sm:$0xff]  }
  0x2a   : > { %1324 = vmatprep.mubr.bf16.mxu1 %v2483_v25  ;;  %2375 = vmatprep.subr.bf16.mxu0 %v2510_v35  ;;  %v2569_v25 = vld [vmem:[%s2697_s11 + $0x60] ss:$20 sps:$4 sm:$0xff]  }
  0x2c   : > { %2244 = vmatpush3.bf16.msra.mxu1 %v2480_v26  ;;  %2376 = vmatpush3.bf16.msra.mxu0 %v2510_v35  ;;  %v2570_v26 = vld [vmem:[%s2697_s11 + $0x170] ss:$20 sps:$4 sm:$0xff]   ;;  %v2581_v35 = vld [vmem:[%s2697_s11 + $0x128] ss:$20 sps:$4 sm:$0xff]  }
  0x2d   : > { %2245 = vmatprep.subr.bf16.mxu1 %v2487_v28  ;;  %2377 = vmatprep.subr.bf16.mxu0 %v2530_v47  ;;  %v2572_v28 = vld [vmem:[%s2697_s11 + $0x19c] ss:$20 sps:$4 sm:$0xff]  }
  0x2f   : > { %1229 = vmatmul.mubr.bf16.gmra.mrb[4].mxu0 %v2485_v27  ;;  %1325 = vmatmul.mubr.bf16.gmra.mrb[4].mxu1 %v2486_v29  ;;  %v2571_v27 = vld [vmem:[%s2697_s11 + $0x88] ss:$20 sps:$4 sm:$0xff]   ;;  %v2574_v29 = vld [vmem:[%s2697_s11 + $0xb0] ss:$20 sps:$4 sm:$0xff]  }
  0x30   : > { %2246 = vmatpush3.bf16.msra.mxu1 %v2488_v30  ;;  %1236 = vmatprep.mubr.bf16.mxu0 %v2491_v32  ;;  %v2575_v30 = vld [vmem:[%s2697_s11 + $0x198] ss:$20 sps:$4 sm:$0xff]  }
  0x31   : > { %2247 = vmatprep.subr.bf16.mxu1 %v2489_v31  ;;  %1332 = vmatprep.mubr.bf16.mxu1 %v2493_v33  ;;  %v2576_v31 = vld [vmem:[%s2697_s11 + $0xd8] ss:$20 sps:$4 sm:$0xff]   ;;  %v2579_v33 = vld [vmem:[%s2697_s11 + $0x100] ss:$20 sps:$4 sm:$0xff]  }
  0x32   : > { %2378 = vmatpush3.bf16.msra.mxu0 %v2530_v47  ;;  %v2577_v32 = vld [vmem:[%s2697_s11 + $0x1c4] ss:$20 sps:$4 sm:$0xff]  }
  0x33   : > { %2379 = vmatprep.subr.bf16.mxu0 %v2549_v56  ;;  %v2596_v47 = vld [vmem:[%s2697_s11 + $0x218] ss:$20 sps:$4 sm:$0xff]  }
  0x34   : > { %2248 = vmatpush3.bf16.msra.mxu1 %v2490_v34  ;;  %v2580_v34 = vld [vmem:[%s2697_s11 + $0x1c0] ss:$20 sps:$4 sm:$0xff]  }
  0x35   : > { %2249 = vmatprep.subr.bf16.mxu1 %v2497_v37  ;;  %v2584_v37 = vld [vmem:[%s2697_s11 + $0x150] ss:$20 sps:$4 sm:$0xff]  }
  0x36   : > { %2380 = vmatpush3.bf16.msra.mxu0 %v2549_v56 }
  0x37   : > { %1237 = vmatmul.mubr.bf16.gmra.mrb[8].mxu0 %v2495_v36  ;;  %1333 = vmatmul.mubr.bf16.gmra.mrb[8].mxu1 %v2496_v38  ;;  %v2582_v36 = vld [vmem:[%s2697_s11 + $0x1ec] ss:$20 sps:$4 sm:$0xff]   ;;  %v2585_v38 = vld [vmem:[%s2697_s11 + $0x1e8] ss:$20 sps:$4 sm:$0xff]  }
  0x38   : > { %2250 = vmatpush3.bf16.msra.mxu1 %v2498_v39  ;;  %1244 = vmatprep.mubr.bf16.mxu0 %v2501_v41  ;;  %v2586_v39 = vld [vmem:[%s2697_s11 + $0x178] ss:$20 sps:$4 sm:$0xff]   ;;  %v2589_v41 = vld [vmem:[%s2697_s11 + $0x1a0] ss:$20 sps:$4 sm:$0xff]  }
  0x39   : > { %2251 = vmatprep.subr.bf16.mxu1 %v2499_v40  ;;  %1340 = vmatprep.mubr.bf16.mxu1 %v2503_v42  ;;  %v2587_v40 = vld [vmem:[%s2697_s11 + $0x214] ss:$20 sps:$4 sm:$0xff]   ;;  %v2590_v42 = vld [vmem:[%s2697_s11 + $0x210] ss:$20 sps:$4 sm:$0xff]  }
  0x3c   : > { %2252 = vmatpush3.bf16.msra.mxu1 %v2500_v43  ;;  %v2591_v43 = vld [vmem:[%s2697_s11 + $0x1c8] ss:$20 sps:$4 sm:$0xff]  }
  0x3d   : > { %2253 = vmatprep.subr.bf16.mxu1 %v2507_v46  ;;  %v2595_v46 = vld [vmem:[%s2697_s11 + $0x238] ss:$20 sps:$4 sm:$0xff]  }
  0x3f   : > { %1245 = vmatmul.mubr.bf16.gmra.mrb[12].mxu0 %v2505_v44  ;;  %1341 = vmatmul.mubr.bf16.gmra.mrb[12].mxu1 %v2506_v45  ;;  %v2592_v44 = vld [vmem:[%s2697_s11 + $0x23c] ss:$20 sps:$4 sm:$0xff]  }
  0x40   : > { %2254 = vmatpush3.bf16.msra.mxu1 %v2508_v48  ;;  %1252 = vmatprep.mubr.bf16.mxu0 %v2512_v50  ;;  %v2594_v45 = vld [vmem:[%s2697_s11 + $0x1f0] ss:$20 sps:$4 sm:$0xff]   ;;  %v2600_v50 = vld [vmem:[%s2697_s11 + $0x260] ss:$20 sps:$4 sm:$0xff]  }
  0x41   : > { %2255 = vmatprep.subr.bf16.mxu1 %v2509_v49  ;;  %1381 = vmatprep.mubr.bf16.mxu1 %v2516_v51  ;;  %v2597_v48 = vld [vmem:[%s2697_s11 + $0x264] ss:$20 sps:$4 sm:$0xff]   ;;  %v2599_v49 = vld [vmem:[%s2697_s11 + $0x240] ss:$20 sps:$4 sm:$0xff]   ;;  %v2601_v51 = vld [vmem:[%s2697_s11 + $0x268] ss:$20 sps:$4 sm:$0xff]  }
  0x42   : > { %s1992_s11 = sshll.u32 %s3086_s18, 3 }
  0x43   : > { %s2945_s28 = scalar_lea.vmem %s3079_s2, %s1992_s11  ;;  %s2955_s30 = scalar_lea.vmem %s3080_s3, %s1992_s11 }
  0x44   : > { %2256 = vmatpush3.bf16.msra.mxu1 %v2511_v52 }
  0x47   : > { %1253 = vmatmul.mubr.bf16.gmra.mrb[16].mxu0 %v2517_v54  ;;  %1382 = vmatmul.mubr.bf16.vlgmr.msra.gmra.mrb[16].mxu1 %v2514_v53 }
  0x48   : > { %1260 = vmatprep.mubr.bf16.mxu0 %v2518_v55  ;;  %1389 = vmatprep.mubr.bf16.mxu1 %v2520_v57 }
  0x4f   : > { %1261 = vmatmul.mubr.bf16.gmra.mrb[20].mxu0 %v2522_v58  ;;  %1390 = vmatmul.mubr.bf16.gmra.mrb[20].mxu1 %v2523_v59 }
  0x50   : > { %1268 = vmatprep.mubr.bf16.mxu0 %v2524_v60  ;;  %1397 = vmatprep.mubr.bf16.mxu1 %v2526_v61 }
  0x57   : > { %1269 = vmatmul.mubr.bf16.gmra.mrb[24].mxu0 %v2528_v62  ;;  %1398 = vmatmul.mubr.bf16.gmra.mrb[24].mxu1 %v2529_v63 }
  0x58   : > { %1276 = vmatprep.mubr.bf16.mxu0 %v2531_v0  ;;  %1405 = vmatprep.mubr.bf16.mxu1 %v2533_v1 }
  0x5f   : > { %1277 = vmatmul.mubr.bf16.gmra.mrb[28].mxu0 %v2535_v2  ;;  %1406 = vmatmul.mubr.bf16.gmra.mrb[28].mxu1 %v2536_v3 }
  0x60   : > { %1284 = vmatprep.mubr.bf16.mxu0 %v2537_v4  ;;  %1413 = vmatprep.mubr.bf16.mxu1 %v2539_v5 }
  0x67   : > { %1285 = vmatmul.mubr.bf16.gmra.mrb[32].mxu0 %v2541_v6  ;;  %1414 = vmatmul.mubr.bf16.gmra.mrb[32].mxu1 %v2542_v7 }
  0x68   : > { %1292 = vmatprep.mubr.bf16.mxu0 %v2543_v8  ;;  %1421 = vmatprep.mubr.bf16.mxu1 %v2545_v9 }
  0x6f   : > { %1293 = vmatmul.mubr.bf16.gmra.mrb[36].mxu0 %v2547_v10  ;;  %1422 = vmatmul.mubr.bf16.gmra.mrb[36].mxu1 %v2548_v11 }
  0x70   : > { %1300 = vmatprep.mubr.bf16.mxu0 %v2550_v12  ;;  %1429 = vmatprep.mubr.bf16.mxu1 %v2552_v13 }
  0x77   : > { %1301 = vmatmul.mubr.bf16.gmra.mrb[40].mxu0 %v2554_v14  ;;  %1430 = vmatmul.mubr.bf16.gmra.mrb[40].mxu1 %v2555_v15 }
  0x78   : > { %1308 = vmatprep.mubr.bf16.mxu0 %v2556_v16  ;;  %1437 = vmatprep.mubr.bf16.mxu1 %v2558_v17 }
  0x7f   : > { %1309 = vmatmul.mubr.bf16.gmra.mrb[44].mxu0 %v2560_v18  ;;  %1438 = vmatmul.mubr.bf16.gmra.mrb[44].mxu1 %v2561_v19 }
  0x80   : > { %1445 = vmatprep.mubr.bf16.mxu1 %v2562_v20  ;;  %2381 = vmatprep.mubr.msk.bf16.mxu0 %vm1139_vm0, %v2564_v21 }
  0x87   : > { %1446 = vmatmul.mubr.bf16.gmra.mrb[48].mxu1 %v2565_v22  ;;  %2382 = vmatmul.mubr.msk.bf16.vlgmr.msra.gmra.mrb[48].mxu0 %vm1139_vm0, %v2566_v23 }
  0x88   : > { %1453 = vmatprep.mubr.bf16.mxu1 %v2567_v24  ;;  %2385 = vmatprep.mubr.msk.bf16.mxu0 %vm1139_vm0, %v2569_v25 }
  0x8f   : > { %1454 = vmatmul.mubr.bf16.gmra.mrb[52].mxu1 %v2570_v26  ;;  %2386 = vmatmul.mubr.msk.bf16.gmra.mrb[52].mxu0 %vm1139_vm0, %v2571_v27 }
  0x90   : > { %1461 = vmatprep.mubr.bf16.mxu1 %v2572_v28  ;;  %2389 = vmatprep.mubr.msk.bf16.mxu0 %vm1139_vm0, %v2574_v29 }
  0x97   : > { %1462 = vmatmul.mubr.bf16.gmra.mrb[56].mxu1 %v2575_v30  ;;  %2390 = vmatmul.mubr.msk.bf16.gmra.mrb[56].mxu0 %vm1139_vm0, %v2576_v31 }
  0x98   : > { %1469 = vmatprep.mubr.bf16.mxu1 %v2577_v32  ;;  %2393 = vmatprep.mubr.msk.bf16.mxu0 %vm1139_vm0, %v2579_v33 }
  0x9f   : > { %1470 = vmatmul.mubr.bf16.gmra.mrb[60].mxu1 %v2580_v34  ;;  %2394 = vmatmul.mubr.msk.bf16.gmra.mrb[60].mxu0 %vm1139_vm0, %v2581_v35 }
  0xa0   : > { %1477 = vmatprep.mubr.bf16.mxu1 %v2582_v36  ;;  %2397 = vmatprep.mubr.msk.bf16.mxu0 %vm1139_vm0, %v2584_v37 }
  0xa7   : > { %1478 = vmatmul.mubr.bf16.gmra.mrb[64].mxu1 %v2585_v38  ;;  %2398 = vmatmul.mubr.msk.bf16.gmra.mrb[64].mxu0 %vm1139_vm0, %v2586_v39 }
  0xa8   : > { %1485 = vmatprep.mubr.bf16.mxu1 %v2587_v40  ;;  %2401 = vmatprep.mubr.msk.bf16.mxu0 %vm1139_vm0, %v2589_v41 }
  0xaf   : > { %1486 = vmatmul.mubr.bf16.gmra.mrb[68].mxu1 %v2590_v42  ;;  %2402 = vmatmul.mubr.msk.bf16.gmra.mrb[68].mxu0 %vm1139_vm0, %v2591_v43 }
  0xb0   : > { %1493 = vmatprep.mubr.bf16.mxu1 %v2592_v44  ;;  %2405 = vmatprep.mubr.msk.bf16.mxu0 %vm1139_vm0, %v2594_v45 }
  0xb7   : > { %1494 = vmatmul.mubr.bf16.gmra.mrb[72].mxu1 %v2595_v46  ;;  %2406 = vmatmul.mubr.msk.bf16.gmra.mrb[72].mxu0 %vm1139_vm0, %v2596_v47 }
  0xb8   : > { %1501 = vmatprep.mubr.bf16.mxu1 %v2597_v48  ;;  %2409 = vmatprep.mubr.msk.bf16.mxu0 %vm1139_vm0, %v2599_v49 }
  0xbf   : > { %1502 = vmatmul.mubr.bf16.gmra.mrb[76].mxu1 %v2600_v50  ;;  %2410 = vmatmul.mubr.msk.bf16.gmra.mrb[76].mxu0 %vm1139_vm0, %v2601_v51 }
  0xfa   : > { %v2217_v52 = vpop.f32.mrb[0].mxu1  ;;  %v2145_v53 = vpop.f32.mrb[0].mxu0 }
  0xfb   : > { %v2218_v54 = vpop.f32.mrb[1].mxu1  ;;  %v2146_v55 = vpop.f32.mrb[1].mxu0 }
  0xfc   : > { %v2876_v56 = vadd.f32 %v2218_v54, %v2217_v52  ;;  %v2220_v57 = vpop.f32.mrb[2].mxu1  ;;  %v2147_v58 = vadd.f32 %v2146_v55, %v2145_v53  ;;  %v2148_v59 = vpop.f32.mrb[2].mxu0 }
  0xfd   : > { %v2221_v60 = vpop.f32.mrb[3].mxu1  ;;  %v2149_v61 = vpop.f32.mrb[3].mxu0 }
  0xfe   : > { %v2878_v62 = vadd.f32 %v2221_v60, %v2220_v57  ;;  %v2150_v63 = vadd.f32 %v2149_v61, %v2148_v59 }
 0x102   : > { %v2223_v0 = vpop.f32.mrb[4].mxu1  ;;  %v2151_v1 = vpop.f32.mrb[4].mxu0 }
 0x103   : > { %v2224_v2 = vpop.f32.mrb[5].mxu1  ;;  %v2152_v3 = vpop.f32.mrb[5].mxu0 }
 0x104   : > { %v2880_v4 = vadd.f32 %v2224_v2, %v2223_v0  ;;  %v2226_v5 = vpop.f32.mrb[6].mxu1  ;;  %v2153_v6 = vadd.f32 %v2152_v3, %v2151_v1  ;;  %v2154_v7 = vpop.f32.mrb[6].mxu0 }
 0x105   : > { %v2227_v8 = vpop.f32.mrb[7].mxu1  ;;  %v2155_v9 = vpop.f32.mrb[7].mxu0 }
 0x106   : > { %v2882_v10 = vadd.f32 %v2227_v8, %v2226_v5  ;;  %v2156_v11 = vadd.f32 %v2155_v9, %v2154_v7 }
 0x10a   : > { %v2229_v12 = vpop.f32.mrb[8].mxu1  ;;  %v2157_v13 = vpop.f32.mrb[8].mxu0 }
 0x10b   : > { %v2230_v14 = vpop.f32.mrb[9].mxu1  ;;  %v2158_v15 = vpop.f32.mrb[9].mxu0 }
 0x10c   : > { %v2884_v16 = vadd.f32 %v2230_v14, %v2229_v12  ;;  %v2232_v17 = vpop.f32.mrb[10].mxu1  ;;  %v2159_v18 = vadd.f32 %v2158_v15, %v2157_v13  ;;  %v2160_v19 = vpop.f32.mrb[10].mxu0 }
 0x10d   : > { %v2233_v20 = vpop.f32.mrb[11].mxu1  ;;  %v2161_v21 = vpop.f32.mrb[11].mxu0 }
 0x10e   : > { %v2886_v22 = vadd.f32 %v2233_v20, %v2232_v17  ;;  %v2162_v23 = vadd.f32 %v2161_v21, %v2160_v19 }
 0x112   : > { %v2235_v24 = vpop.f32.mrb[12].mxu1  ;;  %v2163_v25 = vpop.f32.mrb[12].mxu0 }
 0x113   : > { %v2236_v26 = vpop.f32.mrb[13].mxu1  ;;  %v2164_v27 = vpop.f32.mrb[13].mxu0 }
 0x114   : > { %v2888_v28 = vadd.f32 %v2236_v26, %v2235_v24  ;;  %v2238_v29 = vpop.f32.mrb[14].mxu1  ;;  %v2165_v30 = vadd.f32 %v2164_v27, %v2163_v25  ;;  %v2166_v31 = vpop.f32.mrb[14].mxu0 }
 0x115   : > { %v2239_v32 = vpop.f32.mrb[15].mxu1  ;;  %v2167_v33 = vpop.f32.mrb[15].mxu0 }
 0x116   : > { %v2890_v34 = vadd.f32 %v2239_v32, %v2238_v29  ;;  %v2168_v35 = vadd.f32 %v2167_v33, %v2166_v31 }
 0x11a   : > { %v2257_v36 = vpop.f32.mrb[16].mxu1  ;;  %v2169_v37 = vpop.f32.mrb[16].mxu0 }
 0x11b   : > { %v2258_v38 = vpop.f32.mrb[17].mxu1  ;;  %v2170_v39 = vpop.f32.mrb[17].mxu0 }
 0x11c   : > { %v2259_v40 = vadd.f32 %v2258_v38, %v2257_v36  ;;  %v2260_v41 = vpop.f32.mrb[18].mxu1  ;;  %v2171_v42 = vadd.f32 %v2170_v39, %v2169_v37  ;;  %v2172_v43 = vpop.f32.mrb[18].mxu0 }
 0x11d   : > { %v2261_v44 = vpop.f32.mrb[19].mxu1  ;;  %v2173_v45 = vpop.f32.mrb[19].mxu0 }
 0x11e   : > { %v2262_v46 = vadd.f32 %v2261_v44, %v2260_v41  ;;  %v2174_v47 = vadd.f32 %v2173_v45, %v2172_v43  ;;  %v2892_v48 = vadd.f32 %v2259_v40, %v2147_v58 }
 0x120   : > { %v2894_v49 = vadd.f32 %v2262_v46, %v2150_v63 }
 0x122   : > { %v2263_v50 = vpop.f32.mrb[20].mxu1  ;;  %v2175_v51 = vpop.f32.mrb[20].mxu0 }
 0x123   : > { %v2264_v52 = vpop.f32.mrb[21].mxu1  ;;  %v2176_v53 = vpop.f32.mrb[21].mxu0 }
 0x124   : > { %v2265_v54 = vadd.f32 %v2264_v52, %v2263_v50  ;;  %v2266_v55 = vpop.f32.mrb[22].mxu1  ;;  %v2177_v57 = vadd.f32 %v2176_v53, %v2175_v51  ;;  %v2178_v59 = vpop.f32.mrb[22].mxu0 }
 0x125   : > { %v2267_v60 = vpop.f32.mrb[23].mxu1  ;;  %v2179_v61 = vpop.f32.mrb[23].mxu0 }
 0x126   : > { %v2268_v0 = vadd.f32 %v2267_v60, %v2266_v55  ;;  %v2180_v1 = vadd.f32 %v2179_v61, %v2178_v59  ;;  %v2896_v2 = vadd.f32 %v2265_v54, %v2153_v6 }
 0x128   : > { %v2898_v3 = vadd.f32 %v2268_v0, %v2156_v11 }
 0x12a   : > { %v2269_v58 = vpop.f32.mrb[24].mxu1  ;;  %v2181_v5 = vpop.f32.mrb[24].mxu0 }
 0x12b   : > { %v2270_v63 = vpop.f32.mrb[25].mxu1  ;;  %v2182_v7 = vpop.f32.mrb[25].mxu0 }
 0x12c   : > { %v2271_v8 = vadd.f32 %v2270_v63, %v2269_v58  ;;  %v2272_v9 = vpop.f32.mrb[26].mxu1  ;;  %v2183_v12 = vadd.f32 %v2182_v7, %v2181_v5  ;;  %v2184_v13 = vpop.f32.mrb[26].mxu0 }
 0x12d   : > { %v2273_v14 = vpop.f32.mrb[27].mxu1  ;;  %v2185_v15 = vpop.f32.mrb[27].mxu0 }
 0x12e   : > { %v2274_v17 = vadd.f32 %v2273_v14, %v2272_v9  ;;  %v2186_v19 = vadd.f32 %v2185_v15, %v2184_v13  ;;  %v2900_v20 = vadd.f32 %v2271_v8, %v2159_v18 }
 0x130   : > { %v2902_v21 = vadd.f32 %v2274_v17, %v2162_v23 }
 0x132   : > { %v2275_v6 = vpop.f32.mrb[28].mxu1  ;;  %v2187_v24 = vpop.f32.mrb[28].mxu0 }
 0x133   : > { %v2276_v11 = vpop.f32.mrb[29].mxu1  ;;  %v2188_v25 = vpop.f32.mrb[29].mxu0 }
 0x134   : > { %v2277_v26 = vadd.f32 %v2276_v11, %v2275_v6  ;;  %v2278_v27 = vpop.f32.mrb[30].mxu1  ;;  %v2904_v29 = vadd.f32 %v2188_v25, %v2187_v24  ;;  %v2190_v31 = vpop.f32.mrb[30].mxu0 }
 0x135   : > { %v2279_v32 = vpop.f32.mrb[31].mxu1  ;;  %v2191_v33 = vpop.f32.mrb[31].mxu0 }
 0x136   : > { %v2280_v36 = vadd.f32 %v2279_v32, %v2278_v27  ;;  %v2192_v37 = vadd.f32 %v2191_v33, %v2190_v31  ;;  %v2906_v38 = vadd.f32 %v2277_v26, %v2165_v30 }
 0x138   : > { %v2908_v39 = vadd.f32 %v2280_v36, %v2168_v35 }
 0x13a   : > { %v2281_v18 = vpop.f32.mrb[32].mxu1  ;;  %v2193_v23 = vpop.f32.mrb[32].mxu0 }
 0x13b   : > { %v2282_v40 = vpop.f32.mrb[33].mxu1  ;;  %v2194_v41 = vpop.f32.mrb[33].mxu0 }
 0x13c   : > { %v2283_v43 = vadd.f32 %v2282_v40, %v2281_v18  ;;  %v2284_v44 = vpop.f32.mrb[34].mxu1  ;;  %v2910_v45 = vadd.f32 %v2194_v41, %v2193_v23  ;;  %v2196_v46 = vpop.f32.mrb[34].mxu0 }
 0x13d   : > { %v2285_v50 = vpop.f32.mrb[35].mxu1  ;;  %v2197_v51 = vpop.f32.mrb[35].mxu0 }
 0x13e   : > { %v2286_v52 = vadd.f32 %v2285_v50, %v2284_v44  ;;  %v2912_v53 = vadd.f32 %v2197_v51, %v2196_v46  ;;  %v2914_v54 = vadd.f32 %v2283_v43, %v2171_v42 }
 0x140   : > { %v2916_v30 = vadd.f32 %v2286_v52, %v2174_v47 }
 0x142   : > { %v2287_v35 = vpop.f32.mrb[36].mxu1  ;;  %v2199_v55 = vpop.f32.mrb[36].mxu0 }
 0x143   : > { %v2288_v59 = vpop.f32.mrb[37].mxu1  ;;  %v2200_v60 = vpop.f32.mrb[37].mxu0 }
 0x144   : > { %v2289_v61 = vadd.f32 %v2288_v59, %v2287_v35  ;;  %v2290_v0 = vpop.f32.mrb[38].mxu1  ;;  %v2918_v58 = vadd.f32 %v2200_v60, %v2199_v55  ;;  %v2202_v5 = vpop.f32.mrb[38].mxu0  ;;  %v1772_v59 = vld [vmem:[%s2945_s28 + $0x10] sm:$0xff] }
 0x145   : > { %v2291_v63 = vpop.f32.mrb[39].mxu1  ;;  %v2203_v7 = vpop.f32.mrb[39].mxu0 }
 0x146   : > { %v2292_v8 = vadd.f32 %v2291_v63, %v2290_v0  ;;  %v2920_v9 = vadd.f32 %v2203_v7, %v2202_v5  ;;  %v2922_v13 = vadd.f32 %v2289_v61, %v2177_v57 }
 0x148   : > { %v2924_v42 = vadd.f32 %v2292_v8, %v2180_v1  ;;  %v1773_v8 = vld [vmem:[%s2945_s28 + $0x18] sm:$0xff] }
 0x14a   : > { %v2293_v47 = vpop.f32.mrb[40].mxu1  ;;  %v2205_v14 = vpop.f32.mrb[40].mxu0 }
 0x14b   : > { %v2294_v15 = vpop.f32.mrb[41].mxu1  ;;  %v2206_v17 = vpop.f32.mrb[41].mxu0 }
 0x14c   : > { %v2295_v6 = vadd.f32 %v2294_v15, %v2293_v47  ;;  %v2296_v24 = vpop.f32.mrb[42].mxu1  ;;  %v2926_v11 = vadd.f32 %v2206_v17, %v2205_v14  ;;  %v2208_v25 = vpop.f32.mrb[42].mxu0  ;;  %v1771_v17 = vld [vmem:[%s2945_s28 + $0x8] sm:$0xff] }
 0x14d   : > { %v2297_v26 = vpop.f32.mrb[43].mxu1  ;;  %v2209_v27 = vpop.f32.mrb[43].mxu0 }
 0x14e   : > { %v2298_v31 = vadd.f32 %v2297_v26, %v2296_v24  ;;  %v2928_v32 = vadd.f32 %v2209_v27, %v2208_v25  ;;  %v2930_v33 = vadd.f32 %v2295_v6, %v2183_v12 }
 0x150   : > { %v2932_v57 = vadd.f32 %v2298_v31, %v2186_v19 }
 0x152   : > { %v2299_v1 = vpop.f32.mrb[44].mxu1  ;;  %v2211_v36 = vpop.f32.mrb[44].mxu0 }
 0x153   : > { %v2300_v18 = vpop.f32.mrb[45].mxu1  ;;  %v2212_v23 = vpop.f32.mrb[45].mxu0 }
 0x154   : > { %v2301_v40 = vadd.f32 %v2300_v18, %v2299_v1  ;;  %v2302_v41 = vpop.f32.mrb[46].mxu1  ;;  %v2934_v43 = vadd.f32 %v2212_v23, %v2211_v36  ;;  %v2214_v44 = vpop.f32.mrb[46].mxu0  ;;  %v1776_v36 = vld [vmem:[%s2945_s28 + $0x30] sm:$0xff] }
 0x155   : > { %v2303_v46 = vpop.f32.mrb[47].mxu1  ;;  %v2215_v50 = vpop.f32.mrb[47].mxu0 }
 0x156   : > { %v2304_v51 = vadd.f32 %v2303_v46, %v2302_v41  ;;  %v2937_v52 = vadd.f32 %v2215_v50, %v2214_v44  ;;  %v2940_v12 = vadd.f32 %v2301_v40, %v2904_v29  ;;  %v1770_v29 = vld [vmem:[%s2945_s28] sm:$0xff] }
 0x158   : > { %v2947_v19 = vadd.f32 %v2304_v51, %v2192_v37 }
 0x15a   : > { %v2305_v35 = vpop.f32.mrb[48].mxu1  ;;  %v2383_v55 = vpop.f32.mrb[48].mxu0 }
 0x15b   : > { %v1553_v60 = vadd.f32 %v2383_v55, %v2896_v2  ;;  %v2306_v61 = vpop.f32.mrb[49].mxu1  ;;  %v1544_v0 = vpop.f32.mrb[49].mxu0 }
 0x15c   : > { %v2307_v5 = vadd.f32 %v2306_v61, %v2305_v35  ;;  %v1545_v37 = vadd.f32 %v1544_v0, %v2892_v48  ;;  %v2308_v63 = vpop.f32.mrb[50].mxu1  ;;  %v2384_v7 = vpop.f32.mrb[50].mxu0 }
 0x15d   : > { %v1804_v47 = vadd.f32 %v1772_v59, %v1553_v60  ;;  %v1556_v2 = vadd.f32 %v2384_v7, %v2898_v3  ;;  %v2309_v14 = vpop.f32.mrb[51].mxu1  ;;  %v1547_v15 = vpop.f32.mrb[51].mxu0 }
 0x15e   : > { %v1802_v6 = vadd.f32 %v1770_v29, %v1545_v37  ;;  %v2310_v24 = vadd.f32 %v2309_v14, %v2308_v63  ;;  %v1548_v25 = vadd.f32 %v1547_v15, %v2894_v49  ;;  %v2963_v26 = vadd.f32 %v2307_v5, %v2910_v45  ;;  %v1774_v45 = vld [vmem:[%s2945_s28 + $0x20] sm:$0xff]  ;;  %v1780_v63 = vld [vmem:[%s2945_s28 + $0x50] sm:$0xff] }
 0x15f   : > { %1836 = vst [vmem:[%s2955_s30 + $0x10] sm:$0xff] %v1804_v47  ;;  %v1805_v48 = vadd.f32 %v1773_v8, %v1556_v2 }
 0x160   : > { %1834 = vst [vmem:[%s2955_s30] sm:$0xff] %v1802_v6  ;;  %v1803_v27 = vadd.f32 %v1771_v17, %v1548_v25  ;;  %v2968_v31 = vadd.f32 %v2310_v24, %v2912_v53  ;;  %v1777_v53 = vld [vmem:[%s2945_s28 + $0x38] sm:$0xff] }
 0x161   : > { %1837 = vst [vmem:[%s2955_s30 + $0x18] sm:$0xff] %v1805_v48 }
 0x162   : > { %1835 = vst [vmem:[%s2955_s30 + $0x8] sm:$0xff] %v1803_v27  ;;  %v2311_v3 = vpop.f32.mrb[52].mxu1  ;;  %v2387_v1 = vpop.f32.mrb[52].mxu0 }
 0x163   : > { %v1569_v18 = vadd.f32 %v2387_v1, %v2906_v38  ;;  %v2312_v49 = vpop.f32.mrb[53].mxu1  ;;  %v1560_v23 = vpop.f32.mrb[53].mxu0  ;;  %v1775_v38 = vld [vmem:[%s2945_s28 + $0x28] sm:$0xff] }
 0x164   : > { %v2313_v40 = vadd.f32 %v2312_v49, %v2311_v3  ;;  %v1561_v41 = vadd.f32 %v1560_v23, %v2900_v20  ;;  %v2314_v44 = vpop.f32.mrb[54].mxu1  ;;  %v2388_v46 = vpop.f32.mrb[54].mxu0  ;;  %v1784_v23 = vld [vmem:[%s2945_s28 + $0x70] sm:$0xff] }
 0x165   : > { %v1808_v50 = vadd.f32 %v1776_v36, %v1569_v18  ;;  %v1572_v51 = vadd.f32 %v2388_v46, %v2908_v39  ;;  %v2315_v35 = vpop.f32.mrb[55].mxu1  ;;  %v1563_v55 = vpop.f32.mrb[55].mxu0 }
 0x166   : > { %v1806_v59 = vadd.f32 %v1774_v45, %v1561_v41  ;;  %v2316_v60 = vadd.f32 %v2315_v35, %v2314_v44  ;;  %v1564_v61 = vadd.f32 %v1563_v55, %v2902_v21  ;;  %v2981_v0 = vadd.f32 %v2313_v40, %v2918_v58  ;;  %v1778_v58 = vld [vmem:[%s2945_s28 + $0x40] sm:$0xff] }
 0x167   : > { %1840 = vst [vmem:[%s2955_s30 + $0x30] sm:$0xff] %v1808_v50  ;;  %v1809_v20 = vadd.f32 %v1777_v53, %v1572_v51 }
 0x168   : > { %1838 = vst [vmem:[%s2955_s30 + $0x20] sm:$0xff] %v1806_v59  ;;  %v1807_v29 = vadd.f32 %v1775_v38, %v1564_v61  ;;  %v2986_v5 = vadd.f32 %v2316_v60, %v2920_v9  ;;  %v1781_v9 = vld [vmem:[%s2945_s28 + $0x58] sm:$0xff] }
 0x169   : > { %1841 = vst [vmem:[%s2955_s30 + $0x38] sm:$0xff] %v1809_v20 }
 0x16a   : > { %1839 = vst [vmem:[%s2955_s30 + $0x28] sm:$0xff] %v1807_v29  ;;  %v2317_v39 = vpop.f32.mrb[56].mxu1  ;;  %v2391_v37 = vpop.f32.mrb[56].mxu0 }
 0x16b   : > { %v1585_v7 = vadd.f32 %v2391_v37, %v2922_v13  ;;  %v2318_v21 = vpop.f32.mrb[57].mxu1  ;;  %v1576_v8 = vpop.f32.mrb[57].mxu0  ;;  %v1779_v13 = vld [vmem:[%s2945_s28 + $0x48] sm:$0xff]  ;;  %v1788_v37 = vld [vmem:[%s2945_s28 + $0x90] sm:$0xff] }
 0x16c   : > { %v2319_v47 = vadd.f32 %v2318_v21, %v2317_v39  ;;  %v1577_v2 = vadd.f32 %v1576_v8, %v2914_v54  ;;  %v2320_v14 = vpop.f32.mrb[58].mxu1  ;;  %v2392_v15 = vpop.f32.mrb[58].mxu0 }
 0x16d   : > { %v1812_v17 = vadd.f32 %v1780_v63, %v1585_v7  ;;  %v1588_v6 = vadd.f32 %v2392_v15, %v2924_v42  ;;  %v2321_v24 = vpop.f32.mrb[59].mxu1  ;;  %v1579_v25 = vpop.f32.mrb[59].mxu0 }
 0x16e   : > { %v1810_v48 = vadd.f32 %v1778_v58, %v1577_v2  ;;  %v2322_v27 = vadd.f32 %v2321_v24, %v2320_v14  ;;  %v1580_v3 = vadd.f32 %v1579_v25, %v2916_v30  ;;  %v2999_v1 = vadd.f32 %v2319_v47, %v2926_v11  ;;  %v1782_v11 = vld [vmem:[%s2945_s28 + $0x60] sm:$0xff] }
 0x16f   : > { %1844 = vst [vmem:[%s2955_s30 + $0x50] sm:$0xff] %v1812_v17  ;;  %v1813_v54 = vadd.f32 %v1781_v9, %v1588_v6 }
 0x170   : > { %1842 = vst [vmem:[%s2955_s30 + $0x40] sm:$0xff] %v1810_v48  ;;  %v1811_v36 = vadd.f32 %v1779_v13, %v1580_v3  ;;  %v3004_v18 = vadd.f32 %v2322_v27, %v2928_v32  ;;  %v1785_v32 = vld [vmem:[%s2945_s28 + $0x78] sm:$0xff]  ;;  %v1792_v3 = vld [vmem:[%s2945_s28 + $0xb0] sm:$0xff] }
 0x171   : > { %1845 = vst [vmem:[%s2955_s30 + $0x58] sm:$0xff] %v1813_v54 }
 0x172   : > { %1843 = vst [vmem:[%s2955_s30 + $0x48] sm:$0xff] %v1811_v36  ;;  %v2323_v42 = vpop.f32.mrb[60].mxu1  ;;  %v2395_v49 = vpop.f32.mrb[60].mxu0 }
 0x173   : > { %v1601_v45 = vadd.f32 %v2395_v49, %v2940_v12  ;;  %v2324_v30 = vpop.f32.mrb[61].mxu1  ;;  %v1592_v40 = vpop.f32.mrb[61].mxu0  ;;  %v1783_v12 = vld [vmem:[%s2945_s28 + $0x68] sm:$0xff] }
 0x174   : > { %v2325_v41 = vadd.f32 %v2324_v30, %v2323_v42  ;;  %v1593_v44 = vadd.f32 %v1592_v40, %v2930_v33  ;;  %v2326_v46 = vpop.f32.mrb[62].mxu1  ;;  %v2396_v53 = vpop.f32.mrb[62].mxu0  ;;  %v1793_v30 = vld [vmem:[%s2945_s28 + $0xb8] sm:$0xff] }
 0x175   : > { %v1816_v50 = vadd.f32 %v1784_v23, %v1601_v45  ;;  %v1604_v51 = vadd.f32 %v2396_v53, %v2947_v19  ;;  %v2327_v35 = vpop.f32.mrb[63].mxu1  ;;  %v1595_v55 = vpop.f32.mrb[63].mxu0 }
 0x176   : > { %v1814_v38 = vadd.f32 %v1782_v11, %v1593_v44  ;;  %v2328_v59 = vadd.f32 %v2327_v35, %v2326_v46  ;;  %v1596_v60 = vadd.f32 %v1595_v55, %v2932_v57  ;;  %v1472_v61 = vadd.f32 %v2325_v41, %v2934_v43  ;;  %v1786_v57 = vld [vmem:[%s2945_s28 + $0x80] sm:$0xff]  ;;  %v1791_v44 = vld [vmem:[%s2945_s28 + $0xa8] sm:$0xff] }
 0x177   : > { %1848 = vst [vmem:[%s2955_s30 + $0x70] sm:$0xff] %v1816_v50  ;;  %v1817_v33 = vadd.f32 %v1785_v32, %v1604_v51 }
 0x178   : > { %1846 = vst [vmem:[%s2955_s30 + $0x60] sm:$0xff] %v1814_v38  ;;  %v1815_v20 = vadd.f32 %v1783_v12, %v1596_v60  ;;  %v1475_v29 = vadd.f32 %v2328_v59, %v2937_v52  ;;  %v1789_v52 = vld [vmem:[%s2945_s28 + $0x98] sm:$0xff]  ;;  %v1796_v38 = vld [vmem:[%s2945_s28 + $0xd0] sm:$0xff] }
 0x179   : > { %1849 = vst [vmem:[%s2955_s30 + $0x78] sm:$0xff] %v1817_v33 }
 0x17a   : > { %1847 = vst [vmem:[%s2955_s30 + $0x68] sm:$0xff] %v1815_v20  ;;  %v2329_v19 = vpop.f32.mrb[64].mxu1  ;;  %v2399_v39 = vpop.f32.mrb[64].mxu0 }
 0x17b   : > { %v1617_v63 = vadd.f32 %v2399_v39, %v2981_v0  ;;  %v2330_v7 = vpop.f32.mrb[65].mxu1  ;;  %v1608_v21 = vpop.f32.mrb[65].mxu0  ;;  %v1787_v0 = vld [vmem:[%s2945_s28 + $0x88] sm:$0xff] }
 0x17c   : > { %v2331_v43 = vadd.f32 %v2330_v7, %v2329_v19  ;;  %v1609_v8 = vadd.f32 %v1608_v21, %v2963_v26  ;;  %v2332_v58 = vpop.f32.mrb[66].mxu1  ;;  %v2400_v47 = vpop.f32.mrb[66].mxu0  ;;  %v1797_v19 = vld [vmem:[%s2945_s28 + $0xd8] sm:$0xff]  ;;  %v1795_v7 = vld [vmem:[%s2945_s28 + $0xc8] sm:$0xff] }
 0x17d   : > { %v1820_v2 = vadd.f32 %v1788_v37, %v1617_v63  ;;  %v1620_v14 = vadd.f32 %v2400_v47, %v2986_v5  ;;  %v2333_v15 = vpop.f32.mrb[67].mxu1  ;;  %v1611_v9 = vpop.f32.mrb[67].mxu0 }
 0x17e   : > { %v1818_v17 = vadd.f32 %v1786_v57, %v1609_v8  ;;  %v2334_v6 = vadd.f32 %v2333_v15, %v2332_v58  ;;  %v1612_v24 = vadd.f32 %v1611_v9, %v2968_v31  ;;  %v1480_v25 = vadd.f32 %v2331_v43, %v2876_v56  ;;  %v1790_v31 = vld [vmem:[%s2945_s28 + $0xa0] sm:$0xff] }
 0x17f   : > { %1852 = vst [vmem:[%s2955_s30 + $0x90] sm:$0xff] %v1820_v2  ;;  %v1821_v26 = vadd.f32 %v1789_v52, %v1620_v14 }
 0x180   : > { %1850 = vst [vmem:[%s2955_s30 + $0x80] sm:$0xff] %v1818_v17  ;;  %v1819_v13 = vadd.f32 %v1787_v0, %v1612_v24  ;;  %v1483_v48 = vadd.f32 %v2334_v6, %v2878_v62  ;;  %v1798_v0 = vld [vmem:[%s2945_s28 + $0xe0] sm:$0xff] }
 0x181   : > { %1853 = vst [vmem:[%s2955_s30 + $0x98] sm:$0xff] %v1821_v26 }
 0x182   : > { %1851 = vst [vmem:[%s2955_s30 + $0x88] sm:$0xff] %v1819_v13  ;;  %v2335_v5 = vpop.f32.mrb[68].mxu1  ;;  %v2403_v27 = vpop.f32.mrb[68].mxu0  ;;  %v1799_v13 = vld [vmem:[%s2945_s28 + $0xe8] sm:$0xff] }
 0x183   : > { %v1633_v54 = vadd.f32 %v2403_v27, %v1472_v61  ;;  %v2336_v36 = vpop.f32.mrb[69].mxu1  ;;  %v1624_v42 = vpop.f32.mrb[69].mxu0 }
 0x184   : > { %v2337_v49 = vadd.f32 %v2336_v36, %v2335_v5  ;;  %v1625_v56 = vadd.f32 %v1624_v42, %v2999_v1  ;;  %v2338_v23 = vpop.f32.mrb[70].mxu1  ;;  %v2404_v45 = vpop.f32.mrb[70].mxu0 }
 0x185   : > { %v1824_v62 = vadd.f32 %v1792_v3, %v1633_v54  ;;  %v1636_v40 = vadd.f32 %v2404_v45, %v1475_v29  ;;  %v2339_v11 = vpop.f32.mrb[71].mxu1  ;;  %v1627_v41 = vpop.f32.mrb[71].mxu0  ;;  %v1800_v3 = vld [vmem:[%s2945_s28 + $0xf0] sm:$0xff] }
 0x186   : > { %v1822_v46 = vadd.f32 %v1790_v31, %v1625_v56  ;;  %v2340_v53 = vadd.f32 %v2339_v11, %v2338_v23  ;;  %v1628_v32 = vadd.f32 %v1627_v41, %v3004_v18  ;;  %v1488_v50 = vadd.f32 %v2337_v49, %v2880_v4  ;;  %v1794_v18 = vld [vmem:[%s2945_s28 + $0xc0] sm:$0xff]  ;;  %v1801_v31 = vld [vmem:[%s2945_s28 + $0xf8] sm:$0xff] }
 0x187   : > { %1856 = vst [vmem:[%s2955_s30 + $0xb0] sm:$0xff] %v1824_v62  ;;  %v1825_v1 = vadd.f32 %v1793_v30, %v1636_v40 }
 0x188   : > { %1854 = vst [vmem:[%s2955_s30 + $0xa0] sm:$0xff] %v1822_v46  ;;  %v1823_v51 = vadd.f32 %v1791_v44, %v1628_v32  ;;  %v1491_v35 = vadd.f32 %v2340_v53, %v2882_v10 }
 0x189   : > { %1857 = vst [vmem:[%s2955_s30 + $0xb8] sm:$0xff] %v1825_v1 }
 0x18a   : > { %1855 = vst [vmem:[%s2955_s30 + $0xa8] sm:$0xff] %v1823_v51  ;;  %v2341_v55 = vpop.f32.mrb[72].mxu1  ;;  %v2407_v12 = vpop.f32.mrb[72].mxu0 }
 0x18b   : > { %v1649_v59 = vadd.f32 %v2407_v12, %v1488_v50  ;;  %v2342_v60 = vpop.f32.mrb[73].mxu1  ;;  %v1640_v61 = vpop.f32.mrb[73].mxu0 }
 0x18c   : > { %v2343_v33 = vadd.f32 %v2342_v60, %v2341_v55  ;;  %v1641_v4 = vadd.f32 %v1640_v61, %v1480_v25  ;;  %v2344_v20 = vpop.f32.mrb[74].mxu1  ;;  %v2408_v29 = vpop.f32.mrb[74].mxu0 }
 0x18d   : > { %v1828_v10 = vadd.f32 %v1796_v38, %v1649_v59  ;;  %v1652_v39 = vadd.f32 %v2408_v29, %v1491_v35  ;;  %v2345_v37 = vpop.f32.mrb[75].mxu1  ;;  %v1643_v63 = vpop.f32.mrb[75].mxu0 }
 0x18e   : > { %v1826_v21 = vadd.f32 %v1794_v18, %v1641_v4  ;;  %v2346_v57 = vadd.f32 %v2345_v37, %v2344_v20  ;;  %v1644_v43 = vadd.f32 %v1643_v63, %v1483_v48  ;;  %v1496_v8 = vadd.f32 %v2343_v33, %v2884_v16 }
 0x18f   : > { %1860 = vst [vmem:[%s2955_s30 + $0xd0] sm:$0xff] %v1828_v10  ;;  %v1829_v58 = vadd.f32 %v1797_v19, %v1652_v39 }
 0x190   : > { %1858 = vst [vmem:[%s2955_s30 + $0xc0] sm:$0xff] %v1826_v21  ;;  %v1827_v47 = vadd.f32 %v1795_v7, %v1644_v43  ;;  %v1499_v52 = vadd.f32 %v2346_v57, %v2886_v22 }
 0x191   : > { %1861 = vst [vmem:[%s2955_s30 + $0xd8] sm:$0xff] %v1829_v58 }
 0x192   : > { %1859 = vst [vmem:[%s2955_s30 + $0xc8] sm:$0xff] %v1827_v47  ;;  %v2347_v2 = vpop.f32.mrb[76].mxu1  ;;  %v2411_v14 = vpop.f32.mrb[76].mxu0 }
 0x193   : > { %v2348_v15 = vpop.f32.mrb[77].mxu1  ;;  %v1656_v9 = vpop.f32.mrb[77].mxu0 }
 0x194   : > { %v2349_v17 = vadd.f32 %v2348_v15, %v2347_v2  ;;  %v1657_v6 = vadd.f32 %v1656_v9, %v1496_v8  ;;  %v2350_v16 = vpop.f32.mrb[78].mxu1  ;;  %v2412_v24 = vpop.f32.mrb[78].mxu0 }
 0x195   : > { %v2351_v25 = vpop.f32.mrb[79].mxu1  ;;  %v1659_v26 = vpop.f32.mrb[79].mxu0 }
 0x196   : > { %v1504_v22 = vadd.f32 %v2349_v17, %v2888_v28  ;;  %v1830_v48 = vadd.f32 %v1798_v0, %v1657_v6  ;;  %v2352_v5 = vadd.f32 %v2351_v25, %v2350_v16  ;;  %v1660_v27 = vadd.f32 %v1659_v26, %v1499_v52 }
 0x198   : > { %v1665_v54 = vadd.f32 %v2411_v14, %v1504_v22  ;;  %1862 = vst [vmem:[%s2955_s30 + $0xe0] sm:$0xff] %v1830_v48  ;;  %v1507_v36 = vadd.f32 %v2352_v5, %v2890_v34  ;;  %v1831_v42 = vadd.f32 %v1799_v13, %v1660_v27 }
 0x19a   : > { %v1832_v49 = vadd.f32 %v1800_v3, %v1665_v54  ;;  %v1668_v56 = vadd.f32 %v2412_v24, %v1507_v36  ;;  %1863 = vst [vmem:[%s2955_s30 + $0xe8] sm:$0xff] %v1831_v42 }
 0x19c   : > { %1864 = vst [vmem:[%s2955_s30 + $0xf0] sm:$0xff] %v1832_v49  ;;  %v1833_v23 = vadd.f32 %v1801_v31, %v1668_v56 }
 0x19e   : > { %1865 = vst [vmem:[%s2955_s30 + $0xf8] sm:$0xff] %v1833_v23 }
 0x19f PF: > { %s13_s14 = sadd.s32 1, %s2624_s14   ;;  %s3081_s12 = smov %s2620_s13 }
 0x1a0   : > { %p10_p5 = scmp.ge.s32.totalorder %s13_s14, 4   ;;  %s3082_s13 = smov %s3084_s15 }
 0x1a2   :  { %12 = sbr.rel (!%p10_p5) target bundleno = 2 (0x2), region = 76 }

// kernel: wide_resnet_ae_forward.34
= control target key start
LH: loop header
LB: loop body
LE: loop exit
PB: predicated region body
PF: predicated region fallthrough
CT: control target
= control target key end

     0   :  { %vm590_vm0 = vcmask 523264   ;;  %s1895_s1 = inlined_call_operand.vmem [shape: bf16[576,128], index: 1, kind: input, shape index: {}]   ;;  %s1896_s0 = inlined_call_operand.vmem [shape: bf16[128,576], index: 0, kind: input, shape index: {}]   ;;  %s1897_s2 = inlined_call_operand.vmem [shape: f32[1,128], index: 2, kind: input, shape index: {}]   ;;  %s1898_s3 = inlined_call_operand.vmem [shape: f32[1,128], index: 3, kind: input, shape index: {}]   ;;  %s1899_s4 = inlined_call_operand.vmem [shape: bf16[128,128], index: 4, kind: output, shape index: {}]  }
   0x1   :  { %v1440_v0 = vld [vmem:[%s1895_s1 + $0x40] sm:$0xff]   ;;  %v1444_v4 = vld [vmem:[%s1895_s1 + $0x48] sm:$0xff]   ;;  %v1448_v8 = vld [vmem:[%s1895_s1 + $0x50] sm:$0xff]  }
   0x2   :  { %v1441_v1 = vld [vmem:[%s1895_s1 + $0xc0] sm:$0xff]   ;;  %1268 = vmatprep.subr.bf16.mxu0 %v1440_v0  ;;  %v1445_v5 = vld [vmem:[%s1895_s1 + $0xc8] sm:$0xff]   ;;  %v1449_v9 = vld [vmem:[%s1895_s1 + $0xd0] sm:$0xff]  }
   0x3   :  { %v1442_v2 = vld [vmem:[%s1895_s1] sm:$0xff]   ;;  %1332 = vmatprep.subr.bf16.mxu1 %v1441_v1  ;;  %v1446_v6 = vld [vmem:[%s1895_s1 + $0x8] sm:$0xff]   ;;  %v1450_v10 = vld [vmem:[%s1895_s1 + $0x10] sm:$0xff]  }
   0x4   :  { %v1443_v3 = vld [vmem:[%s1895_s1 + $0x80] sm:$0xff]   ;;  %1269 = vmatpush3.bf16.msra.mxu0 %v1442_v2  ;;  %v1447_v7 = vld [vmem:[%s1895_s1 + $0x88] sm:$0xff]   ;;  %v1451_v11 = vld [vmem:[%s1895_s1 + $0x90] sm:$0xff]  }
   0x5   :  { %1333 = vmatpush3.bf16.msra.mxu1 %v1443_v3  ;;  %1270 = vmatprep.subr.bf16.mxu0 %v1444_v4  ;;  %v1452_v12 = vld [vmem:[%s1895_s1 + $0x58] sm:$0xff]   ;;  %v1456_v16 = vld [vmem:[%s1895_s1 + $0x60] sm:$0xff]   ;;  %v1460_v20 = vld [vmem:[%s1895_s1 + $0x68] sm:$0xff]  }
   0x6   :  { %1334 = vmatprep.subr.bf16.mxu1 %v1445_v5  ;;  %v1453_v13 = vld [vmem:[%s1895_s1 + $0xd8] sm:$0xff]   ;;  %v1457_v17 = vld [vmem:[%s1895_s1 + $0xe0] sm:$0xff]   ;;  %v1461_v21 = vld [vmem:[%s1895_s1 + $0xe8] sm:$0xff]  }
   0x7   :  { %v1454_v14 = vld [vmem:[%s1895_s1 + $0x18] sm:$0xff]   ;;  %v1458_v18 = vld [vmem:[%s1895_s1 + $0x20] sm:$0xff]   ;;  %v1462_v22 = vld [vmem:[%s1895_s1 + $0x28] sm:$0xff]  }
   0x8   :  { %1271 = vmatpush3.bf16.msra.mxu0 %v1446_v6  ;;  %v1455_v15 = vld [vmem:[%s1895_s1 + $0x98] sm:$0xff]   ;;  %v1459_v19 = vld [vmem:[%s1895_s1 + $0xa0] sm:$0xff]   ;;  %v1463_v23 = vld [vmem:[%s1895_s1 + $0xa8] sm:$0xff]  }
   0x9   :  { %1335 = vmatpush3.bf16.msra.mxu1 %v1447_v7  ;;  %1272 = vmatprep.subr.bf16.mxu0 %v1448_v8  ;;  %v1464_v24 = vld [vmem:[%s1895_s1 + $0x70] sm:$0xff]   ;;  %v1468_v28 = vld [vmem:[%s1895_s1 + $0x78] sm:$0xff]   ;;  %v1477_v35 = vld [vmem:[%s1896_s0 + $0xc] ss:$20 sps:$4 sm:$0xff]  }
   0xa   :  { %1336 = vmatprep.subr.bf16.mxu1 %v1449_v9  ;;  %v1465_v25 = vld [vmem:[%s1895_s1 + $0xf0] sm:$0xff]   ;;  %v1469_v29 = vld [vmem:[%s1895_s1 + $0xf8] sm:$0xff]   ;;  %v1478_v36 = vld [vmem:[%s1895_s1 + $0x100] sm:$0xff]   ;;  %744 = vmatprep.mubr.bf16.mxu1 %v1477_v35 }
   0xb   :  { %v1466_v26 = vld [vmem:[%s1895_s1 + $0x30] sm:$0xff]   ;;  %v1470_v30 = vld [vmem:[%s1895_s1 + $0x38] sm:$0xff]   ;;  %v1479_v37 = vld [vmem:[%s1896_s0 + $0x2c] ss:$20 sps:$4 sm:$0xff]  }
   0xc   :  { %1273 = vmatpush3.bf16.msra.mxu0 %v1450_v10  ;;  %v1467_v27 = vld [vmem:[%s1895_s1 + $0xb0] sm:$0xff]   ;;  %v1471_v31 = vld [vmem:[%s1895_s1 + $0xb8] sm:$0xff]   ;;  %v1491_v42 = vld [vmem:[%s1895_s1 + $0x108] sm:$0xff]  }
   0xd   :  { %1337 = vmatpush3.bf16.msra.mxu1 %v1451_v11  ;;  %1274 = vmatprep.subr.bf16.mxu0 %v1452_v12  ;;  %v1472_v32 = vld [vmem:[%s1896_s0] ss:$20 sps:$4 sm:$0xff]   ;;  %v1474_v33 = vld [vmem:[%s1896_s0 + $0x4] ss:$20 sps:$4 sm:$0xff]   ;;  %v1475_v34 = vld [vmem:[%s1896_s0 + $0x8] ss:$20 sps:$4 sm:$0xff]  }
   0xe   :  { %1338 = vmatprep.subr.bf16.mxu1 %v1453_v13  ;;  %647 = vmatprep.mubr.bf16.mxu0 %v1474_v33  ;;  %v1481_v38 = vld [vmem:[%s1896_s0 + $0x34] ss:$20 sps:$4 sm:$0xff]   ;;  %v1484_v40 = vld [vmem:[%s1896_s0 + $0x30] ss:$20 sps:$4 sm:$0xff]   ;;  %v1490_v45 = vld [vmem:[%s1896_s0 + $0x58] ss:$20 sps:$4 sm:$0xff]  }
   0xf   :  { %v1483_v39 = vld [vmem:[%s1896_s0 + $0x28] ss:$20 sps:$4 sm:$0xff]   ;;  %v1489_v44 = vld [vmem:[%s1896_s0 + $0x50] ss:$20 sps:$4 sm:$0xff]   ;;  %v1496_v50 = vld [vmem:[%s1896_s0 + $0x78] ss:$20 sps:$4 sm:$0xff]  }
  0x10   :  { %1275 = vmatpush3.bf16.msra.mxu0 %v1454_v14  ;;  %v1485_v41 = vld [vmem:[%s1896_s0 + $0x54] ss:$20 sps:$4 sm:$0xff]   ;;  %v1487_v43 = vld [vmem:[%s1896_s0 + $0x5c] ss:$20 sps:$4 sm:$0xff]   ;;  %v1494_v48 = vld [vmem:[%s1896_s0 + $0x84] ss:$20 sps:$4 sm:$0xff]  }
  0x11   :  { %1339 = vmatpush3.bf16.msra.mxu1 %v1455_v15  ;;  %1276 = vmatprep.subr.bf16.mxu0 %v1456_v16  ;;  %v1504_v46 = vld [vmem:[%s1895_s1 + $0x110] sm:$0xff]   ;;  %v1517_v49 = vld [vmem:[%s1895_s1 + $0x118] sm:$0xff]   ;;  %v1500_v53 = vld [vmem:[%s1896_s0 + $0xac] ss:$20 sps:$4 sm:$0xff]  }
  0x12   :  { %1340 = vmatprep.subr.bf16.mxu1 %v1457_v17  ;;  %v1492_v47 = vld [vmem:[%s1896_s0 + $0x7c] ss:$20 sps:$4 sm:$0xff]   ;;  %v1497_v51 = vld [vmem:[%s1896_s0 + $0x80] ss:$20 sps:$4 sm:$0xff]   ;;  %v1498_v52 = vld [vmem:[%s1896_s0 + $0xa4] ss:$20 sps:$4 sm:$0xff]  }
  0x13   :  { %v1502_v54 = vld [vmem:[%s1896_s0 + $0xa0] ss:$20 sps:$4 sm:$0xff]   ;;  %v1503_v55 = vld [vmem:[%s1896_s0 + $0xa8] ss:$20 sps:$4 sm:$0xff]   ;;  %v1510_v59 = vld [vmem:[%s1896_s0 + $0xd0] ss:$20 sps:$4 sm:$0xff]  }
  0x14   :  { %1277 = vmatpush3.bf16.msra.mxu0 %v1458_v18  ;;  %v1505_v56 = vld [vmem:[%s1896_s0 + $0xcc] ss:$20 sps:$4 sm:$0xff]   ;;  %v1507_v57 = vld [vmem:[%s1896_s0 + $0xd4] ss:$20 sps:$4 sm:$0xff]   ;;  %v1513_v61 = vld [vmem:[%s1896_s0 + $0xfc] ss:$20 sps:$4 sm:$0xff]  }
  0x15   :  { %1341 = vmatpush3.bf16.msra.mxu1 %v1459_v19  ;;  %1278 = vmatprep.subr.bf16.mxu0 %v1460_v20  ;;  %v1509_v58 = vld [vmem:[%s1896_s0 + $0xc8] ss:$20 sps:$4 sm:$0xff]   ;;  %v1515_v62 = vld [vmem:[%s1896_s0 + $0xf0] ss:$20 sps:$4 sm:$0xff]   ;;  %v1516_v63 = vld [vmem:[%s1896_s0 + $0xf8] ss:$20 sps:$4 sm:$0xff]  }
  0x16   :  { %1342 = vmatprep.subr.bf16.mxu1 %v1461_v21  ;;  %v1511_v60 = vld [vmem:[%s1896_s0 + $0xf4] ss:$20 sps:$4 sm:$0xff]   ;;  %v1518_v0 = vld [vmem:[%s1896_s0 + $0x11c] ss:$20 sps:$4 sm:$0xff]   ;;  %v1520_v1 = vld [vmem:[%s1896_s0 + $0x124] ss:$20 sps:$4 sm:$0xff]  }
  0x17   :  { %v1522_v2 = vld [vmem:[%s1896_s0 + $0x118] ss:$20 sps:$4 sm:$0xff]   ;;  %v1523_v3 = vld [vmem:[%s1896_s0 + $0x120] ss:$20 sps:$4 sm:$0xff]   ;;  %v1524_v4 = vld [vmem:[%s1896_s0 + $0x10] ss:$20 sps:$4 sm:$0xff]  }
  0x18   :  { %1279 = vmatpush3.bf16.msra.mxu0 %v1462_v22  ;;  %v1525_v5 = vld [vmem:[%s1896_s0 + $0xb0] ss:$20 sps:$4 sm:$0xff]   ;;  %v1526_v6 = vld [vmem:[%s1896_s0 + $0x38] ss:$20 sps:$4 sm:$0xff]   ;;  %v1528_v8 = vld [vmem:[%s1896_s0 + $0x60] ss:$20 sps:$4 sm:$0xff]  }
  0x19   :  { %1343 = vmatpush3.bf16.msra.mxu1 %v1463_v23  ;;  %1280 = vmatprep.subr.bf16.mxu0 %v1464_v24  ;;  %v1527_v7 = vld [vmem:[%s1896_s0 + $0xd8] ss:$20 sps:$4 sm:$0xff]   ;;  %v1529_v9 = vld [vmem:[%s1896_s0 + $0x100] ss:$20 sps:$4 sm:$0xff]   ;;  %v1530_v10 = vld [vmem:[%s1896_s0 + $0x88] ss:$20 sps:$4 sm:$0xff]  }
  0x1a   :  { %1344 = vmatprep.subr.bf16.mxu1 %v1465_v25  ;;  %v1531_v11 = vld [vmem:[%s1896_s0 + $0x128] ss:$20 sps:$4 sm:$0xff]  }
  0x1c   :  { %1281 = vmatpush3.bf16.msra.mxu0 %v1466_v26 }
  0x1d   :  { %1345 = vmatpush3.bf16.msra.mxu1 %v1467_v27  ;;  %1282 = vmatprep.subr.bf16.mxu0 %v1468_v28 }
  0x1e   :  { %1346 = vmatprep.subr.bf16.mxu1 %v1469_v29 }
  0x20   :  { %1283 = vmatpush3.bf16.msra.mxu0 %v1470_v30 }
  0x21   :  { %1347 = vmatpush3.bf16.msra.mxu1 %v1471_v31  ;;  %1408 = vmatprep.subr.bf16.mxu0 %v1478_v36 }
  0x22   :  { %1432 = vmatprep.subr.bf16.mxu1 %v1478_v36 }
  0x23   :  { %648 = vmatmul.mubr.bf16.vlgmr.msra.gmra.mrb[0].mxu0 %v1472_v32 }
  0x24   :  { %745 = vmatmul.mubr.bf16.vlgmr.msra.gmra.mrb[0].mxu1 %v1475_v34  ;;  %1409 = vmatpush3.bf16.msra.mxu0 %v1478_v36 }
  0x25   :  { %1436 = vmatpush3.bf16.msra.mxu1 %v1478_v36  ;;  %655 = vmatprep.mubr.bf16.mxu0 %v1479_v37 }
  0x26   :  { %752 = vmatprep.mubr.bf16.mxu1 %v1481_v38  ;;  %1410 = vmatprep.subr.bf16.mxu0 %v1491_v42 }
  0x27   :  { %1433 = vmatprep.subr.bf16.mxu1 %v1491_v42 }
  0x28   :  { %1411 = vmatpush3.bf16.msra.mxu0 %v1491_v42 }
  0x29   :  { %1437 = vmatpush3.bf16.msra.mxu1 %v1491_v42  ;;  %1412 = vmatprep.subr.bf16.mxu0 %v1504_v46 }
  0x2a   :  { %1434 = vmatprep.subr.bf16.mxu1 %v1504_v46 }
  0x2b   :  { %656 = vmatmul.mubr.bf16.gmra.mrb[4].mxu0 %v1483_v39 }
  0x2c   :  { %753 = vmatmul.mubr.bf16.gmra.mrb[4].mxu1 %v1484_v40  ;;  %663 = vmatprep.mubr.bf16.mxu0 %v1485_v41 }
  0x2d   :  { %760 = vmatprep.mubr.bf16.mxu1 %v1487_v43  ;;  %1413 = vmatpush3.bf16.msra.mxu0 %v1504_v46 }
  0x2e   :  { %1438 = vmatpush3.bf16.msra.mxu1 %v1504_v46  ;;  %1414 = vmatprep.subr.bf16.mxu0 %v1517_v49 }
  0x2f   :  { %1435 = vmatprep.subr.bf16.mxu1 %v1517_v49 }
  0x31   :  { %1415 = vmatpush3.bf16.msra.mxu0 %v1517_v49 }
  0x32   :  { %1439 = vmatpush3.bf16.msra.mxu1 %v1517_v49 }
  0x33   :  { %664 = vmatmul.mubr.bf16.gmra.mrb[8].mxu0 %v1489_v44 }
  0x34   :  { %761 = vmatmul.mubr.bf16.gmra.mrb[8].mxu1 %v1490_v45  ;;  %671 = vmatprep.mubr.bf16.mxu0 %v1492_v47 }
  0x35   :  { %768 = vmatprep.mubr.bf16.mxu1 %v1494_v48 }
  0x3b   :  { %672 = vmatmul.mubr.bf16.gmra.mrb[12].mxu0 %v1496_v50 }
  0x3c   :  { %769 = vmatmul.mubr.bf16.gmra.mrb[12].mxu1 %v1497_v51  ;;  %679 = vmatprep.mubr.bf16.mxu0 %v1498_v52 }
  0x3d   :  { %776 = vmatprep.mubr.bf16.mxu1 %v1500_v53 }
  0x43   :  { %680 = vmatmul.mubr.bf16.gmra.mrb[16].mxu0 %v1502_v54 }
  0x44   :  { %777 = vmatmul.mubr.bf16.gmra.mrb[16].mxu1 %v1503_v55  ;;  %687 = vmatprep.mubr.bf16.mxu0 %v1505_v56 }
  0x45   :  { %784 = vmatprep.mubr.bf16.mxu1 %v1507_v57 }
  0x4b   :  { %688 = vmatmul.mubr.bf16.gmra.mrb[20].mxu0 %v1509_v58 }
  0x4c   :  { %785 = vmatmul.mubr.bf16.gmra.mrb[20].mxu1 %v1510_v59  ;;  %695 = vmatprep.mubr.bf16.mxu0 %v1511_v60 }
  0x4d   :  { %792 = vmatprep.mubr.bf16.mxu1 %v1513_v61 }
  0x53   :  { %696 = vmatmul.mubr.bf16.gmra.mrb[24].mxu0 %v1515_v62 }
  0x54   :  { %793 = vmatmul.mubr.bf16.gmra.mrb[24].mxu1 %v1516_v63  ;;  %703 = vmatprep.mubr.bf16.mxu0 %v1518_v0 }
  0x55   :  { %800 = vmatprep.mubr.bf16.mxu1 %v1520_v1 }
  0x5b   :  { %704 = vmatmul.mubr.bf16.gmra.mrb[28].mxu0 %v1522_v2 }
  0x5c   :  { %801 = vmatmul.mubr.bf16.gmra.mrb[28].mxu1 %v1523_v3  ;;  %1416 = vmatprep.mubr.msk.bf16.mxu0 %vm590_vm0, %v1524_v4 }
  0x5d   :  { %1424 = vmatprep.mubr.msk.bf16.mxu1 %vm590_vm0, %v1525_v5 }
  0x63   :  { %1417 = vmatmul.mubr.msk.bf16.vlgmr.msra.gmra.mrb[32].mxu0 %vm590_vm0, %v1526_v6 }
  0x64   :  { %1425 = vmatmul.mubr.msk.bf16.vlgmr.msra.gmra.mrb[32].mxu1 %vm590_vm0, %v1527_v7  ;;  %1420 = vmatprep.mubr.msk.bf16.mxu0 %vm590_vm0, %v1528_v8 }
  0x65   :  { %1428 = vmatprep.mubr.msk.bf16.mxu1 %vm590_vm0, %v1529_v9 }
  0x6b   :  { %1421 = vmatmul.mubr.msk.bf16.gmra.mrb[36].mxu0 %vm590_vm0, %v1530_v10 }
  0x6c   :  { %1429 = vmatmul.mubr.msk.bf16.gmra.mrb[36].mxu1 %vm590_vm0, %v1531_v11 }
  0xf6   :  { %v1284_v12 = vpop.f32.mrb[0].mxu0 }
  0xf7   :  { %v1348_v13 = vpop.f32.mrb[0].mxu1  ;;  %v1285_v14 = vpop.f32.mrb[1].mxu0 }
  0xf8   :  { %v1286_v15 = vadd.f32 %v1285_v14, %v1284_v12  ;;  %v1349_v16 = vpop.f32.mrb[1].mxu1  ;;  %v1287_v17 = vpop.f32.mrb[2].mxu0 }
  0xf9   :  { %v1350_v18 = vadd.f32 %v1349_v16, %v1348_v13  ;;  %v1351_v19 = vpop.f32.mrb[2].mxu1  ;;  %v1288_v20 = vpop.f32.mrb[3].mxu0 }
  0xfa   :  { %v1289_v21 = vadd.f32 %v1288_v20, %v1287_v17  ;;  %v1352_v22 = vpop.f32.mrb[3].mxu1 }
  0xfb   :  { %v1353_v23 = vadd.f32 %v1352_v22, %v1351_v19  ;;  %v1793_v24 = vadd.f32 %v1350_v18, %v1286_v15 }
  0xfd   :  { %v1795_v25 = vadd.f32 %v1353_v23, %v1289_v21 }
  0xfe   :  { %v1290_v26 = vpop.f32.mrb[4].mxu0 }
  0xff   :  { %v1354_v27 = vpop.f32.mrb[4].mxu1  ;;  %v1291_v28 = vpop.f32.mrb[5].mxu0 }
 0x100   :  { %v1292_v29 = vadd.f32 %v1291_v28, %v1290_v26  ;;  %v1355_v30 = vpop.f32.mrb[5].mxu1  ;;  %v1293_v31 = vpop.f32.mrb[6].mxu0 }
 0x101   :  { %v1356_v32 = vadd.f32 %v1355_v30, %v1354_v27  ;;  %v1357_v33 = vpop.f32.mrb[6].mxu1  ;;  %v1294_v34 = vpop.f32.mrb[7].mxu0 }
 0x102   :  { %v1295_v35 = vadd.f32 %v1294_v34, %v1293_v31  ;;  %v1358_v36 = vpop.f32.mrb[7].mxu1 }
 0x103   :  { %v1359_v37 = vadd.f32 %v1358_v36, %v1357_v33  ;;  %v1797_v38 = vadd.f32 %v1356_v32, %v1292_v29 }
 0x105   :  { %v1799_v39 = vadd.f32 %v1359_v37, %v1295_v35 }
 0x106   :  { %v1296_v40 = vpop.f32.mrb[8].mxu0 }
 0x107   :  { %v1360_v41 = vpop.f32.mrb[8].mxu1  ;;  %v1297_v42 = vpop.f32.mrb[9].mxu0 }
 0x108   :  { %v1298_v43 = vadd.f32 %v1297_v42, %v1296_v40  ;;  %v1361_v44 = vpop.f32.mrb[9].mxu1  ;;  %v1299_v45 = vpop.f32.mrb[10].mxu0 }
 0x109   :  { %v1362_v46 = vadd.f32 %v1361_v44, %v1360_v41  ;;  %v1363_v47 = vpop.f32.mrb[10].mxu1  ;;  %v1300_v48 = vpop.f32.mrb[11].mxu0 }
 0x10a   :  { %v1301_v49 = vadd.f32 %v1300_v48, %v1299_v45  ;;  %v1364_v50 = vpop.f32.mrb[11].mxu1 }
 0x10b   :  { %v1365_v51 = vadd.f32 %v1364_v50, %v1363_v47  ;;  %v1801_v52 = vadd.f32 %v1362_v46, %v1298_v43 }
 0x10d   :  { %v1803_v53 = vadd.f32 %v1365_v51, %v1301_v49 }
 0x10e   :  { %v1302_v54 = vpop.f32.mrb[12].mxu0 }
 0x10f   :  { %v1366_v55 = vpop.f32.mrb[12].mxu1  ;;  %v1303_v56 = vpop.f32.mrb[13].mxu0 }
 0x110   :  { %v1304_v57 = vadd.f32 %v1303_v56, %v1302_v54  ;;  %v1367_v58 = vpop.f32.mrb[13].mxu1  ;;  %v1305_v59 = vpop.f32.mrb[14].mxu0 }
 0x111   :  { %v1368_v60 = vadd.f32 %v1367_v58, %v1366_v55  ;;  %v1369_v61 = vpop.f32.mrb[14].mxu1  ;;  %v1306_v62 = vpop.f32.mrb[15].mxu0 }
 0x112   :  { %v1307_v63 = vadd.f32 %v1306_v62, %v1305_v59  ;;  %v1370_v0 = vpop.f32.mrb[15].mxu1 }
 0x113   :  { %v1371_v1 = vadd.f32 %v1370_v0, %v1369_v61  ;;  %v1805_v2 = vadd.f32 %v1368_v60, %v1304_v57 }
 0x115   :  { %v1807_v3 = vadd.f32 %v1371_v1, %v1307_v63 }
 0x116   :  { %v1308_v4 = vpop.f32.mrb[16].mxu0 }
 0x117   :  { %v1372_v5 = vpop.f32.mrb[16].mxu1  ;;  %v1309_v6 = vpop.f32.mrb[17].mxu0 }
 0x118   :  { %v1310_v7 = vadd.f32 %v1309_v6, %v1308_v4  ;;  %v1373_v8 = vpop.f32.mrb[17].mxu1  ;;  %v1311_v9 = vpop.f32.mrb[18].mxu0 }
 0x119   :  { %v1374_v10 = vadd.f32 %v1373_v8, %v1372_v5  ;;  %v1375_v11 = vpop.f32.mrb[18].mxu1  ;;  %v1312_v12 = vpop.f32.mrb[19].mxu0  ;;  %v1820_v5 = vld [vmem:[%s1897_s2] ss:$0 sm:$0xff] }
 0x11a   :  { %v1313_v13 = vadd.f32 %v1312_v12, %v1311_v9  ;;  %v1376_v14 = vpop.f32.mrb[19].mxu1  ;;  %v1826_v9 = vld [vmem:[%s1898_s3] ss:$0 sm:$0xff] }
 0x11b   :  { %v1377_v15 = vadd.f32 %v1376_v14, %v1375_v11  ;;  %v779_v16 = vadd.f32 %v1374_v10, %v1310_v7 }
 0x11d   :  { %v1809_v17 = vadd.f32 %v1377_v15, %v1313_v13 }
 0x11e   :  { %v1314_v18 = vpop.f32.mrb[20].mxu0 }
 0x11f   :  { %v1378_v19 = vpop.f32.mrb[20].mxu1  ;;  %v1315_v20 = vpop.f32.mrb[21].mxu0 }
 0x120   :  { %v1316_v21 = vadd.f32 %v1315_v20, %v1314_v18  ;;  %v1379_v22 = vpop.f32.mrb[21].mxu1  ;;  %v1317_v23 = vpop.f32.mrb[22].mxu0 }
 0x121   :  { %v1380_v26 = vadd.f32 %v1379_v22, %v1378_v19  ;;  %v1381_v27 = vpop.f32.mrb[22].mxu1  ;;  %v1318_v28 = vpop.f32.mrb[23].mxu0 }
 0x122   :  { %v1319_v29 = vadd.f32 %v1318_v28, %v1317_v23  ;;  %v1382_v30 = vpop.f32.mrb[23].mxu1 }
 0x123   :  { %v1383_v31 = vadd.f32 %v1382_v30, %v1381_v27  ;;  %v787_v32 = vadd.f32 %v1380_v26, %v1316_v21 }
 0x125   :  { %v790_v33 = vadd.f32 %v1383_v31, %v1319_v29 }
 0x126   :  { %v1320_v34 = vpop.f32.mrb[24].mxu0 }
 0x127   :  { %v1384_v35 = vpop.f32.mrb[24].mxu1  ;;  %v1321_v36 = vpop.f32.mrb[25].mxu0 }
 0x128   :  { %v1322_v37 = vadd.f32 %v1321_v36, %v1320_v34  ;;  %v1385_v40 = vpop.f32.mrb[25].mxu1  ;;  %v1323_v41 = vpop.f32.mrb[26].mxu0 }
 0x129   :  { %v1386_v42 = vadd.f32 %v1385_v40, %v1384_v35  ;;  %v1387_v43 = vpop.f32.mrb[26].mxu1  ;;  %v1324_v44 = vpop.f32.mrb[27].mxu0 }
 0x12a   :  { %v1325_v45 = vadd.f32 %v1324_v44, %v1323_v41  ;;  %v1388_v46 = vpop.f32.mrb[27].mxu1 }
 0x12b   :  { %v1389_v47 = vadd.f32 %v1388_v46, %v1387_v43  ;;  %v1811_v48 = vadd.f32 %v1386_v42, %v1322_v37 }
 0x12d   :  { %v1813_v49 = vadd.f32 %v1389_v47, %v1325_v45 }
 0x12e   :  { %v1326_v50 = vpop.f32.mrb[28].mxu0 }
 0x12f   :  { %v1390_v51 = vpop.f32.mrb[28].mxu1  ;;  %v1327_v54 = vpop.f32.mrb[29].mxu0 }
 0x130   :  { %v1328_v55 = vadd.f32 %v1327_v54, %v1326_v50  ;;  %v1391_v56 = vpop.f32.mrb[29].mxu1  ;;  %v1329_v57 = vpop.f32.mrb[30].mxu0 }
 0x131   :  { %v1392_v58 = vadd.f32 %v1391_v56, %v1390_v51  ;;  %v1393_v59 = vpop.f32.mrb[30].mxu1  ;;  %v1330_v60 = vpop.f32.mrb[31].mxu0 }
 0x132   :  { %v1331_v61 = vadd.f32 %v1330_v60, %v1329_v57  ;;  %v1394_v62 = vpop.f32.mrb[31].mxu1 }
 0x133   :  { %v1395_v63 = vadd.f32 %v1394_v62, %v1393_v59  ;;  %v803_v0 = vadd.f32 %v1392_v58, %v1328_v55 }
 0x135   :  { %v1815_v1 = vadd.f32 %v1395_v63, %v1331_v61 }
 0x136   :  { %v1418_v4 = vpop.f32.mrb[32].mxu0 }
 0x137   :  { %v852_v6 = vadd.f32 %v1418_v4, %v1797_v38  ;;  %v1426_v7 = vpop.f32.mrb[32].mxu1  ;;  %v843_v8 = vpop.f32.mrb[33].mxu0 }
 0x138   :  { %v884_v10 = vadd.f32 %v1426_v7, %v787_v32  ;;  %v844_v11 = vadd.f32 %v843_v8, %v1793_v24  ;;  %v875_v12 = vpop.f32.mrb[33].mxu1  ;;  %v1419_v13 = vpop.f32.mrb[34].mxu0 }
 0x139   :  { %v966_v14 = vmul.f32 %v1820_v5, %v852_v6  ;;  %v876_v15 = vadd.f32 %v875_v12, %v779_v16  ;;  %v855_v18 = vadd.f32 %v1419_v13, %v1799_v39  ;;  %v1427_v19 = vpop.f32.mrb[34].mxu1  ;;  %v846_v20 = vpop.f32.mrb[35].mxu0 }
 0x13a   :  { %v974_v38 = vmul.f32 %v1820_v5, %v884_v10  ;;  %v964_v21 = vmul.f32 %v1820_v5, %v844_v11  ;;  %v887_v22 = vadd.f32 %v1427_v19, %v790_v33  ;;  %v847_v23 = vadd.f32 %v846_v20, %v1795_v25  ;;  %v878_v26 = vpop.f32.mrb[35].mxu1 }
 0x13b   :  { %v989_v27 = vadd.f32 %v1826_v9, %v966_v14  ;;  %v972_v24 = vmul.f32 %v1820_v5, %v876_v15  ;;  %v967_v28 = vmul.f32 %v1820_v5, %v855_v18  ;;  %v879_v16 = vadd.f32 %v878_v26, %v1809_v17 }
 0x13c   :  { %v997_v39 = vadd.f32 %v1826_v9, %v974_v38  ;;  %v987_v29 = vadd.f32 %v1826_v9, %v964_v21  ;;  %v975_v30 = vmul.f32 %v1820_v5, %v887_v22  ;;  %v965_v31 = vmul.f32 %v1820_v5, %v847_v23 }
 0x13d   :  { %v1005_v32 = vmax.f32 %v989_v27, 0.0  ;;  %v995_v25 = vadd.f32 %v1826_v9, %v972_v24  ;;  %v990_v33 = vadd.f32 %v1826_v9, %v967_v28  ;;  %v973_v34 = vmul.f32 %v1820_v5, %v879_v16 }
 0x13e   :  { %v1013_v35 = vmax.f32 %v997_v39, 0.0  ;;  %v1003_v36 = vmax.f32 %v987_v29, 0.0  ;;  %v998_v37 = vadd.f32 %v1826_v9, %v975_v30  ;;  %v988_v17 = vadd.f32 %v1826_v9, %v965_v31  ;;  %v1422_v40 = vpop.f32.mrb[36].mxu0 }
 0x13f   :  { %v1011_v41 = vmax.f32 %v995_v25, 0.0  ;;  %v1006_v42 = vmax.f32 %v990_v33, 0.0  ;;  %v996_v43 = vadd.f32 %v1826_v9, %v973_v34  ;;  %v868_v44 = vadd.f32 %v1422_v40, %v1805_v2  ;;  %v1430_v45 = vpop.f32.mrb[36].mxu1  ;;  %v859_v46 = vpop.f32.mrb[37].mxu0 }
 0x140   :  { %v1014_v47 = vmax.f32 %v998_v37, 0.0  ;;  %v1004_v50 = vmax.f32 %v988_v17, 0.0  ;;  %v900_v51 = vadd.f32 %v1430_v45, %v803_v0  ;;  %v860_v54 = vadd.f32 %v859_v46, %v1801_v52  ;;  %v891_v55 = vpop.f32.mrb[37].mxu1  ;;  %v1423_v56 = vpop.f32.mrb[38].mxu0 }
 0x141   :  { %v1229_v57 = vpack.c.bf16 %v1006_v42, %v1005_v32  ;;  %v1012_v58 = vmax.f32 %v996_v43, 0.0  ;;  %v970_v59 = vmul.f32 %v1820_v5, %v868_v44  ;;  %v892_v60 = vadd.f32 %v891_v55, %v1811_v48  ;;  %v1431_v61 = vpop.f32.mrb[38].mxu1  ;;  %v862_v62 = vpop.f32.mrb[39].mxu0 }
 0x142   :  { %v1249_v63 = vpack.c.bf16 %v1014_v47, %v1013_v35  ;;  %v1224_v4 = vpack.c.bf16 %v1004_v50, %v1003_v36  ;;  %v978_v2 = vmul.f32 %v1820_v5, %v900_v51  ;;  %v968_v6 = vmul.f32 %v1820_v5, %v860_v54  ;;  %v894_v7 = vpop.f32.mrb[39].mxu1 }
 0x143   :  { %1261 = vst [vmem:[%s1899_s4 + $0x8] sm:$0xff] %v1229_v57   ;;  %v1244_v52 = vpack.c.bf16 %v1012_v58, %v1011_v41  ;;  %v976_v0 = vmul.f32 %v1820_v5, %v892_v60  ;;  %v871_v8 = vadd.f32 %v1423_v56, %v1807_v3  ;;  %v903_v48 = vadd.f32 %v1431_v61, %v1815_v1 }
 0x144   :  { %1265 = vst [vmem:[%s1899_s4 + $0x28] sm:$0xff] %v1249_v63   ;;  %1225 = vst [vmem:[%s1899_s4] sm:$0xff] %v1224_v4   ;;  %v863_v10 = vadd.f32 %v862_v62, %v1803_v53  ;;  %v993_v11 = vadd.f32 %v1826_v9, %v970_v59  ;;  %v895_v12 = vadd.f32 %v894_v7, %v1813_v49 }
 0x145   :  { %1264 = vst [vmem:[%s1899_s4 + $0x20] sm:$0xff] %v1244_v52   ;;  %v971_v3 = vmul.f32 %v1820_v5, %v871_v8  ;;  %v1001_v13 = vadd.f32 %v1826_v9, %v978_v2  ;;  %v991_v14 = vadd.f32 %v1826_v9, %v968_v6  ;;  %v979_v15 = vmul.f32 %v1820_v5, %v903_v48 }
 0x146   :  { %v969_v1 = vmul.f32 %v1820_v5, %v863_v10  ;;  %v999_v53 = vadd.f32 %v1826_v9, %v976_v0  ;;  %v977_v19 = vmul.f32 %v1820_v5, %v895_v12  ;;  %v1009_v21 = vmax.f32 %v993_v11, 0.0 }
 0x147   :  { %v994_v18 = vadd.f32 %v1826_v9, %v971_v3  ;;  %v1002_v20 = vadd.f32 %v1826_v9, %v979_v15  ;;  %v1017_v23 = vmax.f32 %v1001_v13, 0.0  ;;  %v1007_v26 = vmax.f32 %v991_v14, 0.0 }
 0x148   :  { %v992_v38 = vadd.f32 %v1826_v9, %v969_v1  ;;  %v1000_v22 = vadd.f32 %v1826_v9, %v977_v19  ;;  %v1015_v28 = vmax.f32 %v999_v53, 0.0 }
 0x149   :  { %v1010_v49 = vmax.f32 %v994_v18, 0.0  ;;  %v1018_v27 = vmax.f32 %v1002_v20, 0.0 }
 0x14a   :  { %v1008_v24 = vmax.f32 %v992_v38, 0.0  ;;  %v1016_v39 = vmax.f32 %v1000_v22, 0.0 }
 0x14b   :  { %v1239_v16 = vpack.c.bf16 %v1010_v49, %v1009_v21  ;;  %v1259_v29 = vpack.c.bf16 %v1018_v27, %v1017_v23 }
 0x14c   :  { %v1234_v30 = vpack.c.bf16 %v1008_v24, %v1007_v26  ;;  %v1254_v5 = vpack.c.bf16 %v1016_v39, %v1015_v28 }
 0x14d   :  { %1263 = vst [vmem:[%s1899_s4 + $0x18] sm:$0xff] %v1239_v16   ;;  %1267 = vst [vmem:[%s1899_s4 + $0x38] sm:$0xff] %v1259_v29  }
 0x14e   :  { %1262 = vst [vmem:[%s1899_s4 + $0x10] sm:$0xff] %v1234_v30   ;;  %1266 = vst [vmem:[%s1899_s4 + $0x30] sm:$0xff] %v1254_v5  }

// kernel: wide_resnet_ae_forward.37
= control target key start
LH: loop header
LB: loop body
LE: loop exit
PB: predicated region body
PF: predicated region fallthrough
CT: control target
= control target key end

     0   :  { %s391_s0 = inlined_call_operand.vmem [shape: f32[128,128], index: 0, kind: input, shape index: {}]   ;;  %s392_s1 = inlined_call_operand.vmem [shape: f32[1,128], index: 1, kind: input, shape index: {}]   ;;  %s393_s2 = inlined_call_operand.vmem [shape: f32[1,128], index: 2, kind: input, shape index: {}]   ;;  %s394_s3 = inlined_call_operand.vmem [shape: bf16[128,128], index: 3, kind: output, shape index: {}]  }
   0x1   :  { %v14_v0 = vld [vmem:[%s391_s0] sm:$0xff]  ;;  %v15_v1 = vld [vmem:[%s391_s0 + $0x8] sm:$0xff]  ;;  %v16_v6 = vld [vmem:[%s391_s0 + $0x10] sm:$0xff] }
   0x2   :  { %v286_v2 = vld [vmem:[%s392_s1] ss:$0 sm:$0xff]  ;;  %v17_v7 = vld [vmem:[%s391_s0 + $0x18] sm:$0xff]  ;;  %v19_v11 = vld [vmem:[%s391_s0 + $0x28] sm:$0xff] }
   0x3   :  { %v37_v3 = vmul.f32 %v286_v2, %v14_v0  ;;  %v38_v4 = vmul.f32 %v286_v2, %v15_v1  ;;  %v293_v5 = vld [vmem:[%s393_s2] ss:$0 sm:$0xff]  ;;  %v39_v8 = vmul.f32 %v286_v2, %v16_v6  ;;  %v40_v9 = vmul.f32 %v286_v2, %v17_v7  ;;  %v20_v12 = vld [vmem:[%s391_s0 + $0x30] sm:$0xff]  ;;  %v21_v17 = vld [vmem:[%s391_s0 + $0x38] sm:$0xff] }
   0x4   :  { %v18_v10 = vld [vmem:[%s391_s0 + $0x20] sm:$0xff]  ;;  %v42_v16 = vmul.f32 %v286_v2, %v19_v11  ;;  %v43_v20 = vmul.f32 %v286_v2, %v20_v12  ;;  %v44_v21 = vmul.f32 %v286_v2, %v21_v17  ;;  %v23_v27 = vld [vmem:[%s391_s0 + $0x48] sm:$0xff]  ;;  %v24_v32 = vld [vmem:[%s391_s0 + $0x50] sm:$0xff] }
   0x5   :  { %v60_v13 = vadd.f32 %v293_v5, %v37_v3  ;;  %v61_v14 = vadd.f32 %v293_v5, %v38_v4  ;;  %v41_v15 = vmul.f32 %v286_v2, %v18_v10  ;;  %v62_v18 = vadd.f32 %v293_v5, %v39_v8  ;;  %v22_v22 = vld [vmem:[%s391_s0 + $0x40] sm:$0xff]  ;;  %v25_v33 = vld [vmem:[%s391_s0 + $0x58] sm:$0xff]  ;;  %v27_v39 = vld [vmem:[%s391_s0 + $0x68] sm:$0xff] }
   0x6   :  { %v63_v19 = vadd.f32 %v293_v5, %v40_v9  ;;  %v65_v26 = vadd.f32 %v293_v5, %v42_v16  ;;  %v66_v30 = vadd.f32 %v293_v5, %v43_v20  ;;  %v67_v31 = vadd.f32 %v293_v5, %v44_v21  ;;  %v26_v38 = vld [vmem:[%s391_s0 + $0x60] sm:$0xff]  ;;  %v28_v44 = vld [vmem:[%s391_s0 + $0x70] sm:$0xff]  ;;  %v29_v49 = vld [vmem:[%s391_s0 + $0x78] sm:$0xff] }
   0x7   :  { %v76_v23 = vmax.f32 %v60_v13, 0.0  ;;  %v77_v24 = vmax.f32 %v61_v14, 0.0  ;;  %v64_v25 = vadd.f32 %v293_v5, %v41_v15  ;;  %v78_v28 = vmax.f32 %v62_v18, 0.0 }
   0x8   :  { %v79_v29 = vmax.f32 %v63_v19, 0.0  ;;  %v81_v36 = vmax.f32 %v65_v26, 0.0  ;;  %v45_v37 = vmul.f32 %v286_v2, %v22_v22  ;;  %v82_v41 = vmax.f32 %v66_v30, 0.0 }
   0x9   :  { %v213_v34 = vpack.c.bf16 %v77_v24, %v76_v23  ;;  %v80_v35 = vmax.f32 %v64_v25, 0.0  ;;  %v83_v42 = vmax.f32 %v67_v31, 0.0  ;;  %v46_v43 = vmul.f32 %v286_v2, %v23_v27 }
   0xa   :  { %v218_v40 = vpack.c.bf16 %v79_v29, %v78_v28  ;;  %v68_v46 = vadd.f32 %v293_v5, %v45_v37  ;;  %v47_v47 = vmul.f32 %v286_v2, %v24_v32  ;;  %v48_v48 = vmul.f32 %v286_v2, %v25_v33 }
   0xb   :  { %214 = vst [vmem:[%s394_s3] sm:$0xff] %v213_v34   ;;  %v223_v45 = vpack.c.bf16 %v81_v36, %v80_v35  ;;  %v228_v50 = vpack.c.bf16 %v83_v42, %v82_v41  ;;  %v69_v51 = vadd.f32 %v293_v5, %v46_v43  ;;  %v49_v52 = vmul.f32 %v286_v2, %v26_v38 }
   0xc   :  { %250 = vst [vmem:[%s394_s3 + $0x8] sm:$0xff] %v218_v40   ;;  %v50_v53 = vmul.f32 %v286_v2, %v27_v39  ;;  %v84_v54 = vmax.f32 %v68_v46, 0.0  ;;  %v70_v55 = vadd.f32 %v293_v5, %v47_v47  ;;  %v71_v56 = vadd.f32 %v293_v5, %v48_v48 }
   0xd   :  { %251 = vst [vmem:[%s394_s3 + $0x10] sm:$0xff] %v223_v45   ;;  %v51_v57 = vmul.f32 %v286_v2, %v28_v44  ;;  %252 = vst [vmem:[%s394_s3 + $0x18] sm:$0xff] %v228_v50   ;;  %v85_v58 = vmax.f32 %v69_v51, 0.0  ;;  %v72_v59 = vadd.f32 %v293_v5, %v49_v52  ;;  %v52_v61 = vmul.f32 %v286_v2, %v29_v49 }
   0xe   :  { %v73_v60 = vadd.f32 %v293_v5, %v50_v53  ;;  %v86_v62 = vmax.f32 %v70_v55, 0.0  ;;  %v87_v63 = vmax.f32 %v71_v56, 0.0 }
   0xf   :  { %v74_v0 = vadd.f32 %v293_v5, %v51_v57  ;;  %v233_v1 = vpack.c.bf16 %v85_v58, %v84_v54  ;;  %v88_v3 = vmax.f32 %v72_v59, 0.0  ;;  %v75_v6 = vadd.f32 %v293_v5, %v52_v61 }
  0x10   :  { %v89_v4 = vmax.f32 %v73_v60, 0.0  ;;  %v238_v7 = vpack.c.bf16 %v87_v63, %v86_v62 }
  0x11   :  { %v90_v8 = vmax.f32 %v74_v0, 0.0  ;;  %253 = vst [vmem:[%s394_s3 + $0x20] sm:$0xff] %v233_v1   ;;  %v91_v10 = vmax.f32 %v75_v6, 0.0 }
  0x12   :  { %v243_v9 = vpack.c.bf16 %v89_v4, %v88_v3  ;;  %254 = vst [vmem:[%s394_s3 + $0x28] sm:$0xff] %v238_v7  }
  0x13   :  { %v248_v2 = vpack.c.bf16 %v91_v10, %v90_v8 }
  0x14   :  { %255 = vst [vmem:[%s394_s3 + $0x30] sm:$0xff] %v243_v9  }
  0x15   :  { %256 = vst [vmem:[%s394_s3 + $0x38] sm:$0xff] %v248_v2  }

// kernel: wide_resnet_ae_forward.35
= control target key start
LH: loop header
LB: loop body
LE: loop exit
PB: predicated region body
PF: predicated region fallthrough
CT: control target
= control target key end

     0   :  { %vm136_vm0 = vcmask 523264   ;;  %s512_s1 = inlined_call_operand.vmem [shape: bf16[64,128], index: 1, kind: input, shape index: {}]   ;;  %s513_s0 = inlined_call_operand.vmem [shape: bf16[128,64], index: 0, kind: input, shape index: {}]   ;;  %s514_s2 = inlined_call_operand.vmem [shape: f32[128,128], index: 2, kind: output, shape index: {}]  }
   0x1   :  { %v393_v0 = vld [vmem:[%s512_s1] sm:$0xff]   ;;  %v394_v1 = vld [vmem:[%s512_s1 + $0x8] sm:$0xff]   ;;  %v395_v2 = vld [vmem:[%s512_s1 + $0x10] sm:$0xff]  }
   0x2   :  { %361 = vmatprep.subr.bf16.mxu0 %v393_v0  ;;  %385 = vmatprep.subr.bf16.mxu1 %v393_v0  ;;  %v397_v3 = vld [vmem:[%s513_s0] sm:$0xff]   ;;  %v396_v5 = vld [vmem:[%s512_s1 + $0x18] sm:$0xff]   ;;  %v399_v6 = vld [vmem:[%s513_s0 + $0x8] sm:$0xff]  }
   0x3   :  { %362 = vmatpush3.bf16.msra.mxu0 %v393_v0  ;;  %389 = vmatpush3.bf16.msra.mxu1 %v393_v0  ;;  %v398_v4 = vld [vmem:[%s513_s0 + $0x20] sm:$0xff]   ;;  %v400_v7 = vld [vmem:[%s513_s0 + $0x28] sm:$0xff]   ;;  %v401_v8 = vld [vmem:[%s513_s0 + $0x10] sm:$0xff]  }
   0x4   :  { %363 = vmatprep.subr.bf16.mxu0 %v394_v1  ;;  %386 = vmatprep.subr.bf16.mxu1 %v394_v1  ;;  %v402_v9 = vld [vmem:[%s513_s0 + $0x30] sm:$0xff]   ;;  %v403_v10 = vld [vmem:[%s513_s0 + $0x18] sm:$0xff]  }
   0x5   :  { %369 = vmatprep.mubr.msk.bf16.mxu0 %vm136_vm0, %v397_v3  ;;  %377 = vmatprep.mubr.msk.bf16.mxu1 %vm136_vm0, %v398_v4  ;;  %v404_v11 = vld [vmem:[%s513_s0 + $0x38] sm:$0xff]  }
   0x7   :  { %364 = vmatpush3.bf16.msra.mxu0 %v394_v1  ;;  %390 = vmatpush3.bf16.msra.mxu1 %v394_v1 }
   0x8   :  { %365 = vmatprep.subr.bf16.mxu0 %v395_v2  ;;  %387 = vmatprep.subr.bf16.mxu1 %v395_v2 }
   0xb   :  { %366 = vmatpush3.bf16.msra.mxu0 %v395_v2  ;;  %391 = vmatpush3.bf16.msra.mxu1 %v395_v2 }
   0xc   :  { %367 = vmatprep.subr.bf16.mxu0 %v396_v5  ;;  %388 = vmatprep.subr.bf16.mxu1 %v396_v5 }
   0xf   :  { %368 = vmatpush3.bf16.msra.mxu0 %v396_v5  ;;  %392 = vmatpush3.bf16.msra.mxu1 %v396_v5 }
  0x12   :  { %370 = vmatmul.mubr.msk.bf16.vlgmr.msra.gmra.mrb[0].mxu0 %vm136_vm0, %v399_v6  ;;  %378 = vmatmul.mubr.msk.bf16.vlgmr.msra.gmra.mrb[0].mxu1 %vm136_vm0, %v400_v7 }
  0x13   :  { %373 = vmatprep.mubr.msk.bf16.mxu0 %vm136_vm0, %v401_v8  ;;  %381 = vmatprep.mubr.msk.bf16.mxu1 %vm136_vm0, %v402_v9 }
  0x1a   :  { %374 = vmatmul.mubr.msk.bf16.gmra.mrb[4].mxu0 %vm136_vm0, %v403_v10  ;;  %382 = vmatmul.mubr.msk.bf16.gmra.mrb[4].mxu1 %vm136_vm0, %v404_v11 }
  0xe5   :  { %v371_v12 = vpop.f32.mrb[0].mxu0  ;;  %v379_v13 = vpop.f32.mrb[0].mxu1 }
  0xe6   :  { %311 = vst [vmem:[%s514_s2 + $0x10] sm:$0xff] %v371_v12  ;;  %319 = vst [vmem:[%s514_s2 + $0x50] sm:$0xff] %v379_v13  ;;  %v195_v14 = vpop.f32.mrb[1].mxu0  ;;  %v227_v15 = vpop.f32.mrb[1].mxu1 }
  0xe7   :  { %309 = vst [vmem:[%s514_s2] sm:$0xff] %v195_v14  ;;  %317 = vst [vmem:[%s514_s2 + $0x40] sm:$0xff] %v227_v15  ;;  %v372_v16 = vpop.f32.mrb[2].mxu0  ;;  %v380_v17 = vpop.f32.mrb[2].mxu1 }
  0xe8   :  { %312 = vst [vmem:[%s514_s2 + $0x18] sm:$0xff] %v372_v16  ;;  %320 = vst [vmem:[%s514_s2 + $0x58] sm:$0xff] %v380_v17  ;;  %v198_v18 = vpop.f32.mrb[3].mxu0  ;;  %v230_v19 = vpop.f32.mrb[3].mxu1 }
  0xe9   :  { %310 = vst [vmem:[%s514_s2 + $0x8] sm:$0xff] %v198_v18  ;;  %318 = vst [vmem:[%s514_s2 + $0x48] sm:$0xff] %v230_v19 }
  0xed   :  { %v375_v20 = vpop.f32.mrb[4].mxu0  ;;  %v383_v21 = vpop.f32.mrb[4].mxu1 }
  0xee   :  { %315 = vst [vmem:[%s514_s2 + $0x30] sm:$0xff] %v375_v20  ;;  %323 = vst [vmem:[%s514_s2 + $0x70] sm:$0xff] %v383_v21  ;;  %v211_v22 = vpop.f32.mrb[5].mxu0  ;;  %v243_v23 = vpop.f32.mrb[5].mxu1 }
  0xef   :  { %313 = vst [vmem:[%s514_s2 + $0x20] sm:$0xff] %v211_v22  ;;  %321 = vst [vmem:[%s514_s2 + $0x60] sm:$0xff] %v243_v23  ;;  %v376_v24 = vpop.f32.mrb[6].mxu0  ;;  %v384_v25 = vpop.f32.mrb[6].mxu1 }
  0xf0   :  { %316 = vst [vmem:[%s514_s2 + $0x38] sm:$0xff] %v376_v24  ;;  %324 = vst [vmem:[%s514_s2 + $0x78] sm:$0xff] %v384_v25  ;;  %v214_v26 = vpop.f32.mrb[7].mxu0  ;;  %v246_v27 = vpop.f32.mrb[7].mxu1 }
  0xf1   :  { %314 = vst [vmem:[%s514_s2 + $0x28] sm:$0xff] %v214_v26  ;;  %322 = vst [vmem:[%s514_s2 + $0x68] sm:$0xff] %v246_v27 }

// kernel: wide_resnet_ae_forward.36
= control target key start
LH: loop header
LB: loop body
LE: loop exit
PB: predicated region body
PF: predicated region fallthrough
CT: control target
= control target key end

     0   :  { %s1533_s12 = smov 0   ;;  %s1535_s13 = smov 0   ;;  %s1816_s0 = inlined_call_operand.vmem [shape: bf16[128,1152], index: 0, kind: input, shape index: {}]   ;;  %s1817_s1 = inlined_call_operand.vmem [shape: bf16[1152,128], index: 1, kind: input, shape index: {}]   ;;  %s1818_s2 = inlined_call_operand.vmem [shape: f32[128,128], index: 2, kind: input, shape index: {}]   ;;  %s1819_s3 = inlined_call_operand.vmem [shape: f32[128,128], index: 3, kind: output, shape index: {}]  }
   0x1   :  { %s1537_s14 = smov 0   ;;  %s1539_s15 = smov 0  }
   0x2   :  { %s1541_s16 = smov 0  }
   0x3 LB: > { %s25_s17 = sadd.s32 1, %s1506_s15  ;;  %p48_p1 = scmp.ne.s32.totalorder %s1498_s13, %s1494_s12  ;;  %s1510_s16 = sphi %s1541_s16, %s13_s16   ;;  %s1506_s15 = sphi %s1539_s15, %s1823_s15   ;;  %s1502_s14 = sphi %s1537_s14, %s1822_s14   ;;  %s1498_s13 = sphi %s1535_s13, %s1821_s13   ;;  %s1494_s12 = sphi %s1533_s12, %s1820_s12  }
   0x4   : > { %p26_p0 = scmp.ge.s32.totalorder %s25_s17, 3  ;;  %p49_p2 = scmp.eq.s32.totalorder %s1510_s16, 0 }
   0x5   : > { %s41_s19 = sadd.s32 1, %s1498_s13  ;;  %p1170_p5 = scmp.ge.s32.totalorder %s1510_s16, 3 }
   0x6   : > { %s1825_s17 = smov (%p26_p0, %s25_s17), 0  ;;  %p50_p3 = por %p49_p2, %p48_p1 }
   0x7   : > { %s37_s18 = ssub.s32 %s1506_s15, %s1825_s17  ;;  %170 = sbr.rel (%p1170_p5) target bundleno = 37 (0x25), region = 20 }
   0x8   : > { %p39_p4 = scmp.eq.s32.totalorder %s37_s18, 0 }
   0xa   : > { %s1568_s20 = scalar_select %p39_p4, %s1498_s13, %s41_s19  }
   0xe   : > { %173 = sbr.rel (!%p50_p3) target bundleno = 37 (0x25), region = 24  ;;  %s175_s21 = sand.u32 (%p50_p3), 1, %s1498_s13  }
   0xf   : > { %s1260_s22 = smul.u32 (%p50_p3), 12, %s1506_s15 }
  0x10   : > { %s1373_s23 = smul.u32 (%p50_p3), 192, %s175_s21 }
  0x11   : > { %s1576_s26 = scalar_lea.vmem (%p50_p3), %s1816_s0, %s1260_s22 }
  0x12   : > { %v198_v0 = vld [vmem:[%s1576_s26] sm:$0xff] (%p50_p3)  ;;  %v202_v2 = vld [vmem:[%s1576_s26 + $0x48] sm:$0xff] (%p50_p3)  ;;  %s1581_s27 = scalar_lea.vmem (%p50_p3), [#allocation3], %s1373_s23  ;;  %v206_v4 = vld [vmem:[%s1576_s26 + $0x90] sm:$0xff] (%p50_p3) }
  0x13   : > { %v200_v1 = vld [vmem:[%s1576_s26 + $0x24] sm:$0xff] (%p50_p3)  ;;  %199 = vst [vmem:[%s1581_s27] sm:$0xff] (%p50_p3), %v198_v0  ;;  %203 = vst [vmem:[%s1581_s27 + $0x18] sm:$0xff] (%p50_p3), %v202_v2  ;;  %v204_v3 = vld [vmem:[%s1576_s26 + $0x6c] sm:$0xff] (%p50_p3) }
  0x14   : > { %201 = vst [vmem:[%s1581_s27 + $0xc] sm:$0xff] (%p50_p3), %v200_v1  ;;  %v208_v5 = vld [vmem:[%s1576_s26 + $0xb4] sm:$0xff] (%p50_p3)  ;;  %205 = vst [vmem:[%s1581_s27 + $0x24] sm:$0xff] (%p50_p3), %v204_v3  ;;  %v212_v7 = vld [vmem:[%s1576_s26 + $0xfc] sm:$0xff] (%p50_p3) }
  0x15   : > { %207 = vst [vmem:[%s1581_s27 + $0x30] sm:$0xff] %v206_v4  ;;  %209 = vst [vmem:[%s1581_s27 + $0x3c] sm:$0xff] %v208_v5  ;;  %v210_v6 = vld [vmem:[%s1576_s26 + $0xd8] sm:$0xff]  ;;  %v214_v8 = vld [vmem:[%s1576_s26 + $0x120] sm:$0xff] }
  0x16   : > { %211 = vst [vmem:[%s1581_s27 + $0x48] sm:$0xff] %v210_v6  ;;  %213 = vst [vmem:[%s1581_s27 + $0x54] sm:$0xff] %v212_v7  ;;  %v216_v9 = vld [vmem:[%s1576_s26 + $0x144] sm:$0xff]  ;;  %v220_v11 = vld [vmem:[%s1576_s26 + $0x18c] sm:$0xff] }
  0x17   : > { %215 = vst [vmem:[%s1581_s27 + $0x60] sm:$0xff] %v214_v8  ;;  %v218_v10 = vld [vmem:[%s1576_s26 + $0x168] sm:$0xff]  ;;  %217 = vst [vmem:[%s1581_s27 + $0x6c] sm:$0xff] %v216_v9  ;;  %v222_v12 = vld [vmem:[%s1576_s26 + $0x1b0] sm:$0xff] }
  0x18   : > { %219 = vst [vmem:[%s1581_s27 + $0x78] sm:$0xff] %v218_v10  ;;  %221 = vst [vmem:[%s1581_s27 + $0x84] sm:$0xff] %v220_v11  ;;  %v224_v13 = vld [vmem:[%s1576_s26 + $0x1d4] sm:$0xff]  ;;  %v228_v15 = vld [vmem:[%s1576_s26 + $0x21c] sm:$0xff] }
  0x19   : > { %v226_v14 = vld [vmem:[%s1576_s26 + $0x1f8] sm:$0xff]  ;;  %223 = vst [vmem:[%s1581_s27 + $0x90] sm:$0xff] %v222_v12  ;;  %225 = vst [vmem:[%s1581_s27 + $0x9c] sm:$0xff] %v224_v13  ;;  %v1172_v16 = vld [vmem:[%s1576_s26 + $0x8] sm:$0xf] }
  0x1a   : > { %227 = vst [vmem:[%s1581_s27 + $0xa8] sm:$0xff] %v226_v14  ;;  %v1174_v17 = vld [vmem:[%s1576_s26 + $0x2c] sm:$0xf]  ;;  %229 = vst [vmem:[%s1581_s27 + $0xb4] sm:$0xff] %v228_v15  ;;  %v1176_v18 = vld [vmem:[%s1576_s26 + $0x50] sm:$0xf] }
  0x1b   : > { %1173 = vst [vmem:[%s1581_s27 + $0x8] sm:$0xf] %v1172_v16  ;;  %1175 = vst [vmem:[%s1581_s27 + $0x14] sm:$0xf] %v1174_v17  ;;  %v1178_v19 = vld [vmem:[%s1576_s26 + $0x74] sm:$0xf] }
  0x1c   : > { %v1180_v20 = vld [vmem:[%s1576_s26 + $0x98] sm:$0xf]  ;;  %1177 = vst [vmem:[%s1581_s27 + $0x20] sm:$0xf] %v1176_v18  ;;  %1179 = vst [vmem:[%s1581_s27 + $0x2c] sm:$0xf] %v1178_v19 }
  0x1d   : > { %1181 = vst [vmem:[%s1581_s27 + $0x38] sm:$0xf] %v1180_v20  ;;  %v1182_v21 = vld [vmem:[%s1576_s26 + $0xbc] sm:$0xf]  ;;  %v1184_v22 = vld [vmem:[%s1576_s26 + $0xe0] sm:$0xf] }
  0x1e   : > { %v1186_v23 = vld [vmem:[%s1576_s26 + $0x104] sm:$0xf]  ;;  %1183 = vst [vmem:[%s1581_s27 + $0x44] sm:$0xf] %v1182_v21  ;;  %1185 = vst [vmem:[%s1581_s27 + $0x50] sm:$0xf] %v1184_v22 }
  0x1f   : > { %1187 = vst [vmem:[%s1581_s27 + $0x5c] sm:$0xf] %v1186_v23  ;;  %v1188_v24 = vld [vmem:[%s1576_s26 + $0x128] sm:$0xf]  ;;  %v1190_v25 = vld [vmem:[%s1576_s26 + $0x14c] sm:$0xf] }
  0x20   : > { %v1192_v26 = vld [vmem:[%s1576_s26 + $0x170] sm:$0xf]  ;;  %1189 = vst [vmem:[%s1581_s27 + $0x68] sm:$0xf] %v1188_v24  ;;  %1191 = vst [vmem:[%s1581_s27 + $0x74] sm:$0xf] %v1190_v25 }
  0x21   : > { %1193 = vst [vmem:[%s1581_s27 + $0x80] sm:$0xf] %v1192_v26  ;;  %v1194_v27 = vld [vmem:[%s1576_s26 + $0x194] sm:$0xf]  ;;  %v1196_v28 = vld [vmem:[%s1576_s26 + $0x1b8] sm:$0xf] }
  0x22   : > { %v1198_v29 = vld [vmem:[%s1576_s26 + $0x1dc] sm:$0xf]  ;;  %1195 = vst [vmem:[%s1581_s27 + $0x8c] sm:$0xf] %v1194_v27  ;;  %1197 = vst [vmem:[%s1581_s27 + $0x98] sm:$0xf] %v1196_v28 }
  0x23   : > { %1199 = vst [vmem:[%s1581_s27 + $0xa4] sm:$0xf] %v1198_v29  ;;  %v1200_v30 = vld [vmem:[%s1576_s26 + $0x200] sm:$0xf]  ;;  %v1202_v31 = vld [vmem:[%s1576_s26 + $0x224] sm:$0xf] }
  0x24   : > { %1201 = vst [vmem:[%s1581_s27 + $0xb0] sm:$0xf] %v1200_v30  ;;  %1203 = vst [vmem:[%s1581_s27 + $0xbc] sm:$0xf] %v1202_v31 }
  0x25 PF: > { %p1204_p6 = scmp.ge.s32.totalorder %s1510_s16, 1  ;;  %p285_p7 = scmp.lt.s32.totalorder %s1510_s16, 4 }
  0x27   : > { %p286_p8 = pnand %p1204_p6, %p285_p7 }
  0x28   : > { %s292_s28 = sand.u32 (!%p286_p8), 1, %s1494_s12   ;;  %s336_s29 = smul.u32 (!%p286_p8), 48, %s1502_s14 }
  0x29   : > { %289 = sbr.rel (%p286_p8) target bundleno = 379 (0x17b), region = 54  ;;  %p1206_p10 = scmp.ne.s32.totalorder (!%p286_p8), %s1502_s14, 0 }
  0x2a   : > { %s1374_s30 = smul.u32 (!%p286_p8), 192, %s292_s28  ;;  %p337_p9 = scmp.lt.s32.totalorder (!%p286_p8), %s336_s29, 143 }
  0x2c   : > { %s1653_s8 = scalar_lea.vmem (!%p286_p8), [#allocation3], %s1374_s30 }
  0x30   : > { %s1827_s29 = smov (!%p337_p9, %s336_s29), 143  ;;  %367 = sbr.rel (%p1206_p10) target bundleno = 58 (0x3a), region = 62 }
  0x31   : > { %s1205_s4 = sshll.u32 %s1827_s29, 2  ;;  %v1512_v32 = vmov (!%p1206_p10), 0.0  }
  0x32   : > { %s1651_s7 = scalar_lea.vmem %s1817_s1, %s1205_s4  ;;  %368 = vst [vmem:[#allocation2] sm:$0xff] (!%p1206_p10), %v1512_v32  ;;  %369 = vst [vmem:[#allocation2 + $0x8] sm:$0xff] (!%p1206_p10), %v1512_v32 }
  0x33   : > { %370 = vst [vmem:[#allocation2 + $0x10] sm:$0xff] (!%p1206_p10), %v1512_v32  ;;  %371 = vst [vmem:[#allocation2 + $0x18] sm:$0xff] (!%p1206_p10), %v1512_v32 }
  0x34   : > { %372 = vst [vmem:[#allocation2 + $0x20] sm:$0xff] (!%p1206_p10), %v1512_v32  ;;  %373 = vst [vmem:[#allocation2 + $0x28] sm:$0xff] (!%p1206_p10), %v1512_v32 }
  0x35   : > { %374 = vst [vmem:[#allocation2 + $0x30] sm:$0xff] (!%p1206_p10), %v1512_v32  ;;  %375 = vst [vmem:[#allocation2 + $0x38] sm:$0xff] (!%p1206_p10), %v1512_v32 }
  0x36   : > { %376 = vst [vmem:[#allocation2 + $0x40] sm:$0xff] (!%p1206_p10), %v1512_v32  ;;  %377 = vst [vmem:[#allocation2 + $0x48] sm:$0xff] (!%p1206_p10), %v1512_v32 }
  0x37   : > { %378 = vst [vmem:[#allocation2 + $0x50] sm:$0xff] %v1512_v32  ;;  %379 = vst [vmem:[#allocation2 + $0x58] sm:$0xff] %v1512_v32 }
  0x38   : > { %380 = vst [vmem:[#allocation2 + $0x60] sm:$0xff] %v1512_v32  ;;  %381 = vst [vmem:[#allocation2 + $0x68] sm:$0xff] %v1512_v32 }
  0x39   : > { %382 = vst [vmem:[#allocation2 + $0x70] sm:$0xff] %v1512_v32  ;;  %383 = vst [vmem:[#allocation2 + $0x78] sm:$0xff] %v1512_v32 }
  0x3a PF: > { %v1416_v33 = vld [vmem:[%s1651_s7 + $0x40] sm:$0xff]   ;;  %v1419_v36 = vld [vmem:[%s1651_s7 + $0x48] sm:$0xff]   ;;  %v1422_v39 = vld [vmem:[%s1651_s7 + $0x50] sm:$0xff]   ;;  %p1255_p11 = scmp.ne.s32.totalorder %s1502_s14, 2 }
  0x3b   : > { %v1417_v34 = vld [vmem:[%s1651_s7] sm:$0xff]   ;;  %1261 = vmatprep.subr.bf16.mxu0 %v1416_v33  ;;  %v1420_v37 = vld [vmem:[%s1651_s7 + $0x8] sm:$0xff]   ;;  %v1423_v40 = vld [vmem:[%s1651_s7 + $0x10] sm:$0xff]  }
  0x3c   : > { %v1418_v35 = vld [vmem:[%s1651_s7 + $0x80] sm:$0xff]   ;;  %1262 = vmatpush3.bf16.msra.mxu0 %v1417_v34  ;;  %v1421_v38 = vld [vmem:[%s1651_s7 + $0x88] sm:$0xff]   ;;  %v1424_v41 = vld [vmem:[%s1651_s7 + $0x90] sm:$0xff]  }
  0x3d   : > { %1341 = vmatprep.subr.bf16.mxu1 %v1418_v35  ;;  %1263 = vmatprep.subr.bf16.mxu0 %v1419_v36  ;;  %v1425_v42 = vld [vmem:[%s1651_s7 + $0x58] sm:$0xff]   ;;  %v1428_v45 = vld [vmem:[%s1651_s7 + $0x60] sm:$0xff]   ;;  %v1431_v48 = vld [vmem:[%s1651_s7 + $0x68] sm:$0xff]  }
  0x3e   : > { %1342 = vmatpush3.bf16.msra.mxu1 %v1418_v35  ;;  %v1426_v43 = vld [vmem:[%s1651_s7 + $0x18] sm:$0xff]   ;;  %v1430_v46 = vld [vmem:[%s1651_s7 + $0xa0] sm:$0xff]   ;;  %v1433_v49 = vld [vmem:[%s1651_s7 + $0xa8] sm:$0xff]  }
  0x3f   : > { %1343 = vmatprep.subr.bf16.mxu1 %v1421_v38  ;;  %v1427_v44 = vld [vmem:[%s1651_s7 + $0x98] sm:$0xff]   ;;  %v1429_v47 = vld [vmem:[%s1651_s7 + $0x20] sm:$0xff]   ;;  %v1432_v50 = vld [vmem:[%s1651_s7 + $0x28] sm:$0xff]  }
  0x40   : > { %1264 = vmatpush3.bf16.msra.mxu0 %v1420_v37  ;;  %v1434_v51 = vld [vmem:[%s1651_s7 + $0x70] sm:$0xff]   ;;  %v1437_v54 = vld [vmem:[%s1651_s7 + $0x78] sm:$0xff]   ;;  %v1440_v59 = vld [vmem:[%s1653_s8] ss:$12 sps:$4 sm:$0xff]  }
  0x41   : > { %1265 = vmatprep.subr.bf16.mxu0 %v1422_v39  ;;  %v1435_v52 = vld [vmem:[%s1651_s7 + $0x30] sm:$0xff]   ;;  %v1439_v55 = vld [vmem:[%s1651_s7 + $0xb8] sm:$0xff]   ;;  %v1444_v61 = vld [vmem:[%s1653_s8 + $0x20] ss:$12 sps:$4 sm:$0xff]  }
  0x42   : > { %1344 = vmatpush3.bf16.msra.mxu1 %v1421_v38  ;;  %v1436_v53 = vld [vmem:[%s1651_s7 + $0xb0] sm:$0xff]   ;;  %v1438_v58 = vld [vmem:[%s1651_s7 + $0x38] sm:$0xff]   ;;  %v1460_v5 = vld [vmem:[%s1653_s8 + $0x80] ss:$12 sps:$4 sm:$0xff]  }
  0x43   : > { %1345 = vmatprep.subr.bf16.mxu1 %v1424_v41  ;;  %v1442_v56 = vld [vmem:[%s1653_s8 + $0x4] ss:$12 sps:$4 sm:$0xff]   ;;  %v1443_v57 = vld [vmem:[%s1653_s8 + $0x8] ss:$12 sps:$4 sm:$0xff]   ;;  %v1453_v4 = vld [vmem:[%s1653_s8 + $0x4c] ss:$12 sps:$4 sm:$0xff]  }
  0x44   : > { %1266 = vmatpush3.bf16.msra.mxu0 %v1423_v40  ;;  %784 = vmatprep.mubr.bf16.mxu0 %v1442_v56  ;;  %v1445_v60 = vld [vmem:[%s1653_s8 + $0x1c] ss:$12 sps:$4 sm:$0xff]   ;;  %v1451_v62 = vld [vmem:[%s1653_s8 + $0x38] ss:$12 sps:$4 sm:$0xff]   ;;  %v1448_v0 = vld [vmem:[%s1653_s8 + $0x34] ss:$12 sps:$4 sm:$0xff]  }
  0x45   : > { %1267 = vmatprep.subr.bf16.mxu0 %v1425_v42  ;;  %1357 = vmatprep.mubr.bf16.mxu1 %v1443_v57  ;;  %v1447_v63 = vld [vmem:[%s1653_s8 + $0x18] ss:$12 sps:$4 sm:$0xff]   ;;  %v1452_v1 = vld [vmem:[%s1653_s8 + $0x50] ss:$12 sps:$4 sm:$0xff]   ;;  %v1459_v2 = vld [vmem:[%s1653_s8 + $0x68] ss:$12 sps:$4 sm:$0xff]  }
  0x46   : > { %1346 = vmatpush3.bf16.msra.mxu1 %v1424_v41  ;;  %v1450_v3 = vld [vmem:[%s1653_s8 + $0x30] ss:$12 sps:$4 sm:$0xff]   ;;  %v1467_v6 = vld [vmem:[%s1653_s8 + $0x98] ss:$12 sps:$4 sm:$0xff]   ;;  %v1455_v7 = vld [vmem:[%s1653_s8 + $0x48] ss:$12 sps:$4 sm:$0xff]  }
  0x47   : > { %1347 = vmatprep.subr.bf16.mxu1 %v1427_v44  ;;  %v1456_v8 = vld [vmem:[%s1653_s8 + $0x64] ss:$12 sps:$4 sm:$0xff]   ;;  %v1458_v10 = vld [vmem:[%s1653_s8 + $0x60] ss:$12 sps:$4 sm:$0xff]   ;;  %v1461_v11 = vld [vmem:[%s1653_s8 + $0x7c] ss:$12 sps:$4 sm:$0xff]  }
  0x48   : > { %1268 = vmatpush3.bf16.msra.mxu0 %v1426_v43  ;;  %v1468_v9 = vld [vmem:[%s1653_s8 + $0xb0] ss:$12 sps:$4 sm:$0xff]   ;;  %v1463_v12 = vld [vmem:[%s1653_s8 + $0x78] ss:$12 sps:$4 sm:$0xff]   ;;  %v1464_v13 = vld [vmem:[%s1653_s8 + $0x94] ss:$12 sps:$4 sm:$0xff]  }
  0x49   : > { %1269 = vmatprep.subr.bf16.mxu0 %v1428_v45  ;;  %v1466_v14 = vld [vmem:[%s1653_s8 + $0x90] ss:$12 sps:$4 sm:$0xff]   ;;  %v1469_v15 = vld [vmem:[%s1653_s8 + $0xac] ss:$12 sps:$4 sm:$0xff]   ;;  %v1471_v16 = vld [vmem:[%s1653_s8 + $0xa8] ss:$12 sps:$4 sm:$0xff]  }
  0x4a   : > { %1348 = vmatpush3.bf16.msra.mxu1 %v1427_v44  ;;  %v384_v23 = vld [vmem:[#allocation2] sm:$0xff]  ;;  %v385_v28 = vld [vmem:[#allocation2 + $0x8] sm:$0xff]  ;;  %v386_v38 = vld [vmem:[#allocation2 + $0x10] sm:$0xff] }
  0x4b   : > { %1349 = vmatprep.subr.bf16.mxu1 %v1430_v46  ;;  %v387_v44 = vld [vmem:[#allocation2 + $0x18] sm:$0xff] }
  0x4c   : > { %1270 = vmatpush3.bf16.msra.mxu0 %v1429_v47 }
  0x4d   : > { %1271 = vmatprep.subr.bf16.mxu0 %v1431_v48 }
  0x4e   : > { %1350 = vmatpush3.bf16.msra.mxu1 %v1430_v46 }
  0x4f   : > { %1351 = vmatprep.subr.bf16.mxu1 %v1433_v49 }
  0x50   : > { %1272 = vmatpush3.bf16.msra.mxu0 %v1432_v50 }
  0x51   : > { %1273 = vmatprep.subr.bf16.mxu0 %v1434_v51 }
  0x52   : > { %1352 = vmatpush3.bf16.msra.mxu1 %v1433_v49 }
  0x53   : > { %1353 = vmatprep.subr.bf16.mxu1 %v1436_v53 }
  0x54   : > { %1274 = vmatpush3.bf16.msra.mxu0 %v1435_v52 }
  0x55   : > { %1275 = vmatprep.subr.bf16.mxu0 %v1437_v54 }
  0x56   : > { %1354 = vmatpush3.bf16.msra.mxu1 %v1436_v53 }
  0x57   : > { %1355 = vmatprep.subr.bf16.mxu1 %v1439_v55 }
  0x58   : > { %1276 = vmatpush3.bf16.msra.mxu0 %v1438_v58 }
  0x5a   : > { %1356 = vmatpush3.bf16.msra.mxu1 %v1439_v55  ;;  %v388_v55 = vld [vmem:[#allocation2 + $0x20] sm:$0xff] }
  0x5b   : > { %785 = vmatmul.mubr.bf16.vlgmr.msra.gmra.mrb[0].mxu0 %v1440_v59 }
  0x5c   : > { %792 = vmatprep.mubr.bf16.mxu0 %v1445_v60  ;;  %v389_v60 = vld [vmem:[#allocation2 + $0x28] sm:$0xff] }
  0x5d   : > { %1358 = vmatmul.mubr.bf16.vlgmr.msra.gmra.mrb[0].mxu1 %v1444_v61 }
  0x5e   : > { %1361 = vmatprep.mubr.bf16.mxu1 %v1451_v62 }
  0x63   : > { %793 = vmatmul.mubr.bf16.gmra.mrb[4].mxu0 %v1447_v63 }
  0x64   : > { %800 = vmatprep.mubr.bf16.mxu0 %v1448_v0 }
  0x65   : > { %1362 = vmatmul.mubr.bf16.gmra.mrb[4].mxu1 %v1452_v1 }
  0x66   : > { %1365 = vmatprep.mubr.bf16.mxu1 %v1459_v2 }
  0x6b   : > { %801 = vmatmul.mubr.bf16.gmra.mrb[8].mxu0 %v1450_v3 }
  0x6c   : > { %808 = vmatprep.mubr.bf16.mxu0 %v1453_v4 }
  0x6d   : > { %1366 = vmatmul.mubr.bf16.gmra.mrb[8].mxu1 %v1460_v5 }
  0x6e   : > { %1369 = vmatprep.mubr.bf16.mxu1 %v1467_v6  ;;  %v390_v6 = vld [vmem:[#allocation2 + $0x30] sm:$0xff] }
  0x73   : > { %809 = vmatmul.mubr.bf16.gmra.mrb[12].mxu0 %v1455_v7 }
  0x74   : > { %816 = vmatprep.mubr.bf16.mxu0 %v1456_v8 }
  0x75   : > { %1370 = vmatmul.mubr.bf16.gmra.mrb[12].mxu1 %v1468_v9 }
  0x7b   : > { %817 = vmatmul.mubr.bf16.gmra.mrb[16].mxu0 %v1458_v10 }
  0x7c   : > { %824 = vmatprep.mubr.bf16.mxu0 %v1461_v11 }
  0x83   : > { %825 = vmatmul.mubr.bf16.gmra.mrb[20].mxu0 %v1463_v12  ;;  %v391_v12 = vld [vmem:[#allocation2 + $0x38] sm:$0xff] }
  0x84   : > { %832 = vmatprep.mubr.bf16.mxu0 %v1464_v13 }
  0x8b   : > { %833 = vmatmul.mubr.bf16.gmra.mrb[24].mxu0 %v1466_v14 }
  0x8c   : > { %840 = vmatprep.mubr.bf16.mxu0 %v1469_v15 }
  0x93   : > { %841 = vmatmul.mubr.bf16.gmra.mrb[28].mxu0 %v1471_v16 }
 0x12e   : > { %v1277_v17 = vpop.f32.mrb[0].mxu0 }
 0x12f   : > { %v1278_v18 = vpop.f32.mrb[1].mxu0 }
 0x130   : > { %v1279_v19 = vadd.f32 %v1278_v18, %v1277_v17  ;;  %v1280_v20 = vpop.f32.mrb[2].mxu0  ;;  %v1359_v21 = vpop.f32.mrb[0].mxu1 }
 0x131   : > { %v1281_v22 = vpop.f32.mrb[3].mxu0  ;;  %v883_v24 = vpop.f32.mrb[1].mxu1 }
 0x132   : > { %v1282_v25 = vadd.f32 %v1281_v22, %v1280_v20  ;;  %v884_v26 = vadd.f32 %v1279_v19, %v883_v24  ;;  %v1360_v27 = vpop.f32.mrb[2].mxu1  ;;  %v392_v22 = vld [vmem:[#allocation2 + $0x40] sm:$0xff] }
 0x133   : > { %v886_v29 = vpop.f32.mrb[3].mxu1 }
 0x134   : > { %v946_v30 = vadd.f32 %v884_v26, %v384_v23  ;;  %v887_v31 = vadd.f32 %v1282_v25, %v886_v29  ;;  %v393_v25 = vld [vmem:[#allocation2 + $0x48] sm:$0xff] }
 0x136   : > { %962 = vst [vmem:[#allocation2] sm:$0xff] %v946_v30  ;;  %v947_v32 = vadd.f32 %v887_v31, %v385_v28  ;;  %v1283_v33 = vpop.f32.mrb[4].mxu0 }
 0x137   : > { %v1284_v34 = vpop.f32.mrb[5].mxu0 }
 0x138   : > { %963 = vst [vmem:[#allocation2 + $0x8] sm:$0xff] %v947_v32  ;;  %v1285_v35 = vadd.f32 %v1284_v34, %v1283_v33  ;;  %v1286_v36 = vpop.f32.mrb[6].mxu0  ;;  %v1363_v37 = vpop.f32.mrb[4].mxu1  ;;  %v394_v33 = vld [vmem:[#allocation2 + $0x50] sm:$0xff] }
 0x139   : > { %v1287_v39 = vpop.f32.mrb[7].mxu0  ;;  %v899_v40 = vpop.f32.mrb[5].mxu1 }
 0x13a   : > { %v892_v41 = vadd.f32 %v1359_v21, %v1285_v35  ;;  %v1288_v42 = vadd.f32 %v1287_v39, %v1286_v36  ;;  %v1364_v43 = vpop.f32.mrb[6].mxu1 }
 0x13b   : > { %v902_v45 = vpop.f32.mrb[7].mxu1 }
 0x13c   : > { %v948_v46 = vadd.f32 %v892_v41, %v386_v38  ;;  %v895_v47 = vadd.f32 %v1360_v27, %v1288_v42 }
 0x13e   : > { %964 = vst [vmem:[#allocation2 + $0x10] sm:$0xff] %v948_v46  ;;  %v949_v48 = vadd.f32 %v895_v47, %v387_v44  ;;  %v1289_v49 = vpop.f32.mrb[8].mxu0  ;;  %v396_v46 = vld [vmem:[#allocation2 + $0x60] sm:$0xff] }
 0x13f   : > { %v1290_v50 = vpop.f32.mrb[9].mxu0 }
 0x140   : > { %965 = vst [vmem:[#allocation2 + $0x18] sm:$0xff] %v949_v48  ;;  %v1291_v51 = vadd.f32 %v1290_v50, %v1289_v49  ;;  %v1292_v52 = vpop.f32.mrb[10].mxu0  ;;  %v1367_v53 = vpop.f32.mrb[8].mxu1  ;;  %v397_v49 = vld [vmem:[#allocation2 + $0x68] sm:$0xff] }
 0x141   : > { %v1293_v54 = vpop.f32.mrb[11].mxu0  ;;  %v915_v56 = vpop.f32.mrb[9].mxu1 }
 0x142   : > { %v1294_v57 = vadd.f32 %v1293_v54, %v1292_v52  ;;  %v900_v58 = vadd.f32 %v1291_v51, %v899_v40  ;;  %v1368_v59 = vpop.f32.mrb[10].mxu1 }
 0x143   : > { %v918_v61 = vpop.f32.mrb[11].mxu1 }
 0x144   : > { %v950_v62 = vadd.f32 %v900_v58, %v388_v55  ;;  %v903_v63 = vadd.f32 %v1294_v57, %v902_v45  ;;  %v398_v57 = vld [vmem:[#allocation2 + $0x70] sm:$0xff] }
 0x146   : > { %966 = vst [vmem:[#allocation2 + $0x20] sm:$0xff] %v950_v62  ;;  %v951_v0 = vadd.f32 %v903_v63, %v389_v60  ;;  %v1295_v1 = vpop.f32.mrb[12].mxu0 }
 0x147   : > { %v1296_v2 = vpop.f32.mrb[13].mxu0 }
 0x148   : > { %967 = vst [vmem:[#allocation2 + $0x28] sm:$0xff] %v951_v0  ;;  %v1297_v3 = vadd.f32 %v1296_v2, %v1295_v1  ;;  %v1298_v4 = vpop.f32.mrb[14].mxu0  ;;  %v1371_v5 = vpop.f32.mrb[12].mxu1  ;;  %v982_v1 = vld [vmem:[#allocation2] sm:$0xff] (!%p1255_p11) }
 0x149   : > { %v1299_v7 = vpop.f32.mrb[15].mxu0  ;;  %v931_v8 = vpop.f32.mrb[13].mxu1  ;;  %v998_v2 = vld [vmem:[%s1818_s2] sm:$0xff] (!%p1255_p11) }
 0x14a   : > { %v908_v9 = vadd.f32 %v1363_v37, %v1297_v3  ;;  %v1300_v10 = vadd.f32 %v1299_v7, %v1298_v4  ;;  %v1372_v11 = vpop.f32.mrb[14].mxu1  ;;  %v395_v37 = vld [vmem:[#allocation2 + $0x58] sm:$0xff]  ;;  %v983_v3 = vld [vmem:[#allocation2 + $0x8] sm:$0xff] (!%p1255_p11)  ;;  %v1014_v4 = vadd.f32 (!%p1255_p11), %v998_v2, %v982_v1  ;;  %v1000_v7 = vld [vmem:[%s1818_s2 + $0x10] sm:$0xff] (!%p1255_p11) }
 0x14b   : > { %v934_v13 = vpop.f32.mrb[15].mxu1 }
 0x14c   : > { %v952_v14 = vadd.f32 %v908_v9, %v390_v6  ;;  %v911_v15 = vadd.f32 %v1364_v43, %v1300_v10  ;;  %v984_v6 = vld [vmem:[#allocation2 + $0x10] sm:$0xff] (!%p1255_p11)  ;;  %v985_v10 = vld [vmem:[#allocation2 + $0x18] sm:$0xff] (!%p1255_p11)  ;;  %1030 = vst [vmem:[%s1819_s3] sm:$0xff] (!%p1255_p11), %v1014_v4 }
 0x14d   : > { %v1016_v9 = vadd.f32 (!%p1255_p11), %v1000_v7, %v984_v6 }
 0x14e   : > { %968 = vst [vmem:[#allocation2 + $0x30] sm:$0xff] %v952_v14  ;;  %v953_v16 = vadd.f32 %v911_v15, %v391_v12  ;;  %v1301_v17 = vpop.f32.mrb[16].mxu0  ;;  %v986_v12 = vld [vmem:[#allocation2 + $0x20] sm:$0xff] (!%p1255_p11) }
 0x14f   : > { %v1302_v18 = vpop.f32.mrb[17].mxu0  ;;  %v1002_v14 = vld [vmem:[%s1818_s2 + $0x20] sm:$0xff] (!%p1255_p11)  ;;  %v987_v15 = vld [vmem:[#allocation2 + $0x28] sm:$0xff] (!%p1255_p11)  ;;  %1032 = vst [vmem:[%s1819_s3 + $0x10] sm:$0xff] (!%p1255_p11), %v1016_v9 }
 0x150   : > { %969 = vst [vmem:[#allocation2 + $0x38] sm:$0xff] %v953_v16  ;;  %v1303_v19 = vadd.f32 %v1302_v18, %v1301_v17  ;;  %v1304_v20 = vpop.f32.mrb[18].mxu0  ;;  %v1003_v16 = vld [vmem:[%s1818_s2 + $0x28] sm:$0xff] (!%p1255_p11)  ;;  %v1018_v17 = vadd.f32 (!%p1255_p11), %v1002_v14, %v986_v12 }
 0x151   : > { %v1305_v21 = vpop.f32.mrb[19].mxu0  ;;  %v1019_v18 = vadd.f32 (!%p1255_p11), %v1003_v16, %v987_v15 }
 0x152   : > { %v1306_v23 = vadd.f32 %v1305_v21, %v1304_v20  ;;  %v916_v24 = vadd.f32 %v1303_v19, %v915_v56  ;;  %v1004_v20 = vld [vmem:[%s1818_s2 + $0x30] sm:$0xff] (!%p1255_p11)  ;;  %1034 = vst [vmem:[%s1819_s3 + $0x20] sm:$0xff] (!%p1255_p11), %v1018_v17 }
 0x153   : > { %1035 = vst [vmem:[%s1819_s3 + $0x28] sm:$0xff] (!%p1255_p11), %v1019_v18 }
 0x154   : > { %v954_v26 = vadd.f32 %v916_v24, %v392_v22  ;;  %v919_v27 = vadd.f32 %v1306_v23, %v918_v61  ;;  %v399_v61 = vld [vmem:[#allocation2 + $0x78] sm:$0xff] }
 0x155   : > { %v988_v19 = vld [vmem:[#allocation2 + $0x30] sm:$0xff] (!%p1255_p11)  ;;  %v1005_v23 = vld [vmem:[%s1818_s2 + $0x38] sm:$0xff] (!%p1255_p11) }
 0x156   : > { %970 = vst [vmem:[#allocation2 + $0x40] sm:$0xff] %v954_v26  ;;  %v955_v28 = vadd.f32 %v919_v27, %v393_v25  ;;  %v1307_v29 = vpop.f32.mrb[20].mxu0  ;;  %v1020_v22 = vadd.f32 (!%p1255_p11), %v1004_v20, %v988_v19  ;;  %v1006_v25 = vld [vmem:[%s1818_s2 + $0x40] sm:$0xff] (!%p1255_p11) }
 0x157   : > { %v1308_v30 = vpop.f32.mrb[21].mxu0  ;;  %v989_v21 = vld [vmem:[#allocation2 + $0x38] sm:$0xff] (!%p1255_p11) }
 0x158   : > { %971 = vst [vmem:[#allocation2 + $0x48] sm:$0xff] %v955_v28  ;;  %v1309_v31 = vadd.f32 %v1308_v30, %v1307_v29  ;;  %v1310_v32 = vpop.f32.mrb[22].mxu0  ;;  %v1021_v26 = vadd.f32 (!%p1255_p11), %v1005_v23, %v989_v21  ;;  %v1007_v29 = vld [vmem:[%s1818_s2 + $0x48] sm:$0xff] (!%p1255_p11)  ;;  %1036 = vst [vmem:[%s1819_s3 + $0x30] sm:$0xff] (!%p1255_p11), %v1020_v22 }
 0x159   : > { %v1311_v34 = vpop.f32.mrb[23].mxu0 }
 0x15a   : > { %v924_v35 = vadd.f32 %v1367_v53, %v1309_v31  ;;  %v1312_v36 = vadd.f32 %v1311_v34, %v1310_v32  ;;  %v1008_v32 = vld [vmem:[%s1818_s2 + $0x50] sm:$0xff] (!%p1255_p11)  ;;  %v1009_v34 = vld [vmem:[%s1818_s2 + $0x58] sm:$0xff] (!%p1255_p11)  ;;  %1037 = vst [vmem:[%s1819_s3 + $0x38] sm:$0xff] (!%p1255_p11), %v1021_v26 }
 0x15c   : > { %v956_v38 = vadd.f32 %v924_v35, %v394_v33  ;;  %v927_v39 = vadd.f32 %v1368_v59, %v1312_v36 }
 0x15d   : > { %v990_v24 = vld [vmem:[#allocation2 + $0x40] sm:$0xff] (!%p1255_p11) }
 0x15e   : > { %972 = vst [vmem:[#allocation2 + $0x50] sm:$0xff] %v956_v38  ;;  %v957_v40 = vadd.f32 %v927_v39, %v395_v37  ;;  %v1313_v41 = vpop.f32.mrb[24].mxu0  ;;  %v1022_v27 = vadd.f32 (!%p1255_p11), %v1006_v25, %v990_v24  ;;  %v1010_v38 = vld [vmem:[%s1818_s2 + $0x60] sm:$0xff] (!%p1255_p11) }
 0x15f   : > { %v1314_v42 = vpop.f32.mrb[25].mxu0  ;;  %v991_v28 = vld [vmem:[#allocation2 + $0x48] sm:$0xff] (!%p1255_p11) }
 0x160   : > { %973 = vst [vmem:[#allocation2 + $0x58] sm:$0xff] %v957_v40  ;;  %v1315_v43 = vadd.f32 %v1314_v42, %v1313_v41  ;;  %v1316_v44 = vpop.f32.mrb[26].mxu0  ;;  %v1023_v31 = vadd.f32 (!%p1255_p11), %v1007_v29, %v991_v28  ;;  %1038 = vst [vmem:[%s1819_s3 + $0x40] sm:$0xff] (!%p1255_p11), %v1022_v27  ;;  %v1011_v41 = vld [vmem:[%s1818_s2 + $0x68] sm:$0xff] (!%p1255_p11) }
 0x161   : > { %v1317_v45 = vpop.f32.mrb[27].mxu0 }
 0x162   : > { %v1318_v47 = vadd.f32 %v1317_v45, %v1316_v44  ;;  %v932_v48 = vadd.f32 %v1315_v43, %v931_v8  ;;  %1039 = vst [vmem:[%s1819_s3 + $0x48] sm:$0xff] (!%p1255_p11), %v1023_v31  ;;  %v1012_v43 = vld [vmem:[%s1818_s2 + $0x70] sm:$0xff] (!%p1255_p11) }
 0x164   : > { %v958_v50 = vadd.f32 %v932_v48, %v396_v46  ;;  %v935_v51 = vadd.f32 %v1318_v47, %v934_v13  ;;  %v1013_v47 = vld [vmem:[%s1818_s2 + $0x78] sm:$0xff] (!%p1255_p11) }
 0x165   : > { %v992_v30 = vld [vmem:[#allocation2 + $0x50] sm:$0xff] (!%p1255_p11) }
 0x166   : > { %974 = vst [vmem:[#allocation2 + $0x60] sm:$0xff] %v958_v50  ;;  %v959_v52 = vadd.f32 %v935_v51, %v397_v49  ;;  %v1319_v53 = vpop.f32.mrb[28].mxu0  ;;  %v1024_v35 = vadd.f32 (!%p1255_p11), %v1008_v32, %v992_v30 }
 0x167   : > { %v1320_v54 = vpop.f32.mrb[29].mxu0  ;;  %v993_v33 = vld [vmem:[#allocation2 + $0x58] sm:$0xff] (!%p1255_p11) }
 0x168   : > { %975 = vst [vmem:[#allocation2 + $0x68] sm:$0xff] %v959_v52  ;;  %v1321_v55 = vadd.f32 %v1320_v54, %v1319_v53  ;;  %v1322_v56 = vpop.f32.mrb[30].mxu0  ;;  %v1025_v36 = vadd.f32 (!%p1255_p11), %v1009_v34, %v993_v33  ;;  %1040 = vst [vmem:[%s1819_s3 + $0x50] sm:$0xff] (!%p1255_p11), %v1024_v35 }
 0x169   : > { %v1323_v58 = vpop.f32.mrb[31].mxu0 }
 0x16a   : > { %v940_v59 = vadd.f32 %v1371_v5, %v1321_v55  ;;  %v1324_v60 = vadd.f32 %v1323_v58, %v1322_v56  ;;  %981 = sbr.rel (%p1255_p11) target bundleno = 379 (0x17b), region = 66  ;;  %v999_v5 = vld [vmem:[%s1818_s2 + $0x8] sm:$0xff] (!%p1255_p11)  ;;  %1041 = vst [vmem:[%s1819_s3 + $0x58] sm:$0xff] (!%p1255_p11), %v1025_v36 }
 0x16b   : > { %v1015_v8 = vadd.f32 (!%p1255_p11), %v999_v5, %v983_v3 }
 0x16c   : > { %v960_v62 = vadd.f32 %v940_v59, %v398_v57  ;;  %v943_v63 = vadd.f32 %v1372_v11, %v1324_v60  ;;  %v1001_v11 = vld [vmem:[%s1818_s2 + $0x18] sm:$0xff] (!%p1255_p11) }
 0x16d   : > { %v1017_v13 = vadd.f32 (!%p1255_p11), %v1001_v11, %v985_v10  ;;  %1031 = vst [vmem:[%s1819_s3 + $0x8] sm:$0xff] (!%p1255_p11), %v1015_v8  ;;  %v994_v37 = vld [vmem:[#allocation2 + $0x60] sm:$0xff] (!%p1255_p11) }
 0x16e   : > { %976 = vst [vmem:[#allocation2 + $0x70] sm:$0xff] %v960_v62  ;;  %v961_v0 = vadd.f32 %v943_v63, %v399_v61  ;;  %v1026_v40 = vadd.f32 (!%p1255_p11), %v1010_v38, %v994_v37 }
 0x16f   : > { %1033 = vst [vmem:[%s1819_s3 + $0x18] sm:$0xff] (!%p1255_p11), %v1017_v13  ;;  %v995_v39 = vld [vmem:[#allocation2 + $0x68] sm:$0xff] (!%p1255_p11) }
 0x170   : > { %977 = vst [vmem:[#allocation2 + $0x78] sm:$0xff] %v961_v0  ;;  %v1027_v44 = vadd.f32 (!%p1255_p11), %v1011_v41, %v995_v39  ;;  %1042 = vst [vmem:[%s1819_s3 + $0x60] sm:$0xff] (!%p1255_p11), %v1026_v40 }
 0x172   : > { %1043 = vst [vmem:[%s1819_s3 + $0x68] sm:$0xff] %v1027_v44 }
 0x175   : > { %v996_v42 = vld [vmem:[#allocation2 + $0x70] sm:$0xff] }
 0x176   : > { %v1028_v45 = vadd.f32 %v1012_v43, %v996_v42 }
 0x177   : > { %v997_v46 = vld [vmem:[#allocation2 + $0x78] sm:$0xff] }
 0x178   : > { %v1029_v48 = vadd.f32 %v1013_v47, %v997_v46  ;;  %1044 = vst [vmem:[%s1819_s3 + $0x70] sm:$0xff] %v1028_v45 }
 0x17a   : > { %1045 = vst [vmem:[%s1819_s3 + $0x78] sm:$0xff] %v1029_v48 }
 0x17b PF: > { %s13_s16 = sadd.s32 1, %s1510_s16   ;;  %s1820_s12 = smov %s1498_s13 }
 0x17c   : > { %p10_p12 = scmp.ge.s32.totalorder %s13_s16, 5   ;;  %s1821_s13 = smov %s1568_s20 }
 0x17d   : > { %s1822_s14 = smov %s1506_s15  ;;  %s1823_s15 = smov %s1825_s17 }
 0x17e   :  { %12 = sbr.rel (!%p10_p12) target bundleno = 3 (0x3), region = 113 }

// kernel: wide_resnet_ae_forward.38
= control target key start
LH: loop header
LB: loop body
LE: loop exit
PB: predicated region body
PF: predicated region fallthrough
CT: control target
= control target key end

     0   :  { %s1344_s15 = smov 0   ;;  %s1346_s16 = smov 0   ;;  %s1489_s0 = inlined_call_operand.vmem [shape: bf16[32,1152], index: 0, kind: input, shape index: {}]   ;;  %s1490_s1 = inlined_call_operand.vmem [shape: bf16[1152,256], index: 1, kind: input, shape index: {}]   ;;  %s1491_s2 = inlined_call_operand.vmem [shape: f32[1,256], index: 2, kind: input, shape index: {}]   ;;  %s1492_s3 = inlined_call_operand.vmem [shape: f32[1,256], index: 3, kind: input, shape index: {}]   ;;  %s1493_s4 = inlined_call_operand.vmem [shape: bf16[32,256], index: 4, kind: output, shape index: {}]  }
   0x1   :  { %s1348_s17 = smov 0   ;;  %s1350_s18 = smov 0  }
   0x2   :  { %s1352_s19 = smov 0  }
   0x3 LB: > { %s26_s20 = sadd.s32 1, %s1311_s18  ;;  %p49_p1 = scmp.ne.s32.totalorder %s1303_s16, %s1299_s15  ;;  %s1315_s19 = sphi %s1352_s19, %s14_s19   ;;  %s1311_s18 = sphi %s1350_s18, %s1497_s18   ;;  %s1307_s17 = sphi %s1348_s17, %s1496_s17   ;;  %s1303_s16 = sphi %s1346_s16, %s1495_s16   ;;  %s1299_s15 = sphi %s1344_s15, %s1494_s15  }
   0x4   : > { %p27_p0 = scmp.ge.s32.totalorder %s26_s20, 3  ;;  %p50_p2 = scmp.eq.s32.totalorder %s1315_s19, 0 }
   0x5   : > { %s42_s22 = sadd.s32 1, %s1303_s16  ;;  %p1062_p5 = scmp.ge.s32.totalorder %s1315_s19, 3 }
   0x6   : > { %s1499_s20 = smov (%p27_p0, %s26_s20), 0  ;;  %p51_p3 = por %p50_p2, %p49_p1 }
   0x7   : > { %s38_s21 = ssub.s32 %s1311_s18, %s1499_s20  ;;  %199 = sbr.rel (%p1062_p5) target bundleno = 23 (0x17), region = 24 }
   0x8   : > { %p40_p4 = scmp.eq.s32.totalorder %s38_s21, 0 }
   0xa   : > { %s1379_s23 = scalar_select %p40_p4, %s1303_s16, %s42_s22  }
   0xe   : > { %202 = sbr.rel (!%p51_p3) target bundleno = 23 (0x17), region = 28  ;;  %s204_s24 = sand.u32 (%p51_p3), 1, %s1303_s16  }
   0xf   : > { %s1139_s25 = smul.u32 (%p51_p3), 12, %s1311_s18 }
  0x10   : > { %s1153_s26 = smul.u32 (%p51_p3), 48, %s204_s24 }
  0x11   : > { %s212_s29 = scalar_lea.vmem (%p51_p3), %s1489_s0, %s1139_s25 }
  0x12   : > { %v227_v0 = vld [vmem:[%s212_s29] sm:$0xff] (%p51_p3)  ;;  %v231_v2 = vld [vmem:[%s212_s29 + $0x48] sm:$0xff] (%p51_p3)  ;;  %s206_s30 = scalar_lea.vmem (%p51_p3), [#allocation3], %s1153_s26  ;;  %v1068_v6 = vld [vmem:[%s212_s29 + $0x50] sm:$0xf] (%p51_p3) }
  0x13   : > { %v229_v1 = vld [vmem:[%s212_s29 + $0x24] sm:$0xff] (%p51_p3)  ;;  %228 = vst [vmem:[%s206_s30] sm:$0xff] (%p51_p3), %v227_v0  ;;  %232 = vst [vmem:[%s206_s30 + $0x18] sm:$0xff] (%p51_p3), %v231_v2  ;;  %v233_v3 = vld [vmem:[%s212_s29 + $0x6c] sm:$0xff] (%p51_p3) }
  0x14   : > { %230 = vst [vmem:[%s206_s30 + $0xc] sm:$0xff] (%p51_p3), %v229_v1  ;;  %v1064_v4 = vld [vmem:[%s212_s29 + $0x8] sm:$0xf] (%p51_p3)  ;;  %v1066_v5 = vld [vmem:[%s212_s29 + $0x2c] sm:$0xf] (%p51_p3)  ;;  %234 = vst [vmem:[%s206_s30 + $0x24] sm:$0xff] (%p51_p3), %v233_v3 }
  0x15   : > { %1065 = vst [vmem:[%s206_s30 + $0x8] sm:$0xf] %v1064_v4  ;;  %1067 = vst [vmem:[%s206_s30 + $0x14] sm:$0xf] %v1066_v5  ;;  %v1070_v7 = vld [vmem:[%s212_s29 + $0x74] sm:$0xf] }
  0x16   : > { %1069 = vst [vmem:[%s206_s30 + $0x20] sm:$0xf] %v1068_v6  ;;  %1071 = vst [vmem:[%s206_s30 + $0x2c] sm:$0xf] %v1070_v7 }
  0x17 PF: > { %p1072_p6 = scmp.ge.s32.totalorder %s1315_s19, 1  ;;  %p269_p7 = scmp.lt.s32.totalorder %s1315_s19, 4 }
  0x19   : > { %p270_p8 = pnand %p1072_p6, %p269_p7 }
  0x1a   : > { %s276_s5 = sand.u32 (!%p270_p8), 1, %s1299_s15   ;;  %s326_s6 = smul.u32 (!%p270_p8), 48, %s1307_s17 }
  0x1b   : > { %273 = sbr.rel (%p270_p8) target bundleno = 350 (0x15e), region = 58  ;;  %p1075_p10 = scmp.ne.s32.totalorder (!%p270_p8), %s1307_s17, 0 }
  0x1c   : > { %s1154_s7 = smul.u32 (!%p270_p8), 48, %s276_s5  ;;  %p328_p9 = scmp.lt.s32.totalorder (!%p270_p8), %s326_s6, 143 }
  0x1e   : > { %s1396_s12 = scalar_lea.vmem (!%p270_p8), [#allocation3], %s1154_s7 }
  0x22   : > { %s1501_s6 = smov (!%p328_p9, %s326_s6), 143  ;;  %364 = sbr.rel (%p1075_p10) target bundleno = 41 (0x29), region = 66 }
  0x23   : > { %s1140_s8 = sshll.u32 %s1501_s6, 3  ;;  %v1317_v8 = vmov (!%p1075_p10), 0.0  }
  0x24   : > { %s1394_s11 = scalar_lea.vmem %s1490_s1, %s1140_s8  ;;  %365 = vst [vmem:[#allocation2] sm:$0xff] (!%p1075_p10), %v1317_v8  ;;  %366 = vst [vmem:[#allocation2 + $0x8] sm:$0xff] (!%p1075_p10), %v1317_v8 }
  0x25   : > { %367 = vst [vmem:[#allocation2 + $0x10] sm:$0xff] (!%p1075_p10), %v1317_v8  ;;  %368 = vst [vmem:[#allocation2 + $0x18] sm:$0xff] (!%p1075_p10), %v1317_v8 }
  0x26   : > { %369 = vst [vmem:[#allocation2 + $0x20] sm:$0xff] (!%p1075_p10), %v1317_v8  ;;  %370 = vst [vmem:[#allocation2 + $0x28] sm:$0xff] (!%p1075_p10), %v1317_v8 }
  0x27   : > { %371 = vst [vmem:[#allocation2 + $0x30] sm:$0xff] (!%p1075_p10), %v1317_v8  ;;  %372 = vst [vmem:[#allocation2 + $0x38] sm:$0xff] (!%p1075_p10), %v1317_v8 }
  0x29 PF: > { %v1197_v9 = vld [vmem:[%s1394_s11 + $0x4] ss:$8 sps:$4 sm:$0xff]   ;;  %v1199_v10 = vld [vmem:[%s1394_s11] ss:$8 sps:$4 sm:$0xff]   ;;  %v1318_v11 = vmov 0   ;;  %p1130_p11 = scmp.ne.s32.totalorder %s1307_s17, 2 }
  0x2a   : > { %794 = vmatprep.mubr.bf16.mxu0 %v1318_v11  ;;  %709 = vmatprep.subr.bf16.mxu1 %v1197_v9  ;;  %v1200_v12 = vld [vmem:[%s1394_s11 + $0x14] ss:$8 sps:$4 sm:$0xff]   ;;  %v1202_v13 = vld [vmem:[%s1394_s11 + $0x10] ss:$8 sps:$4 sm:$0xff]   ;;  %v1203_v14 = vld [vmem:[%s1394_s11 + $0x24] ss:$8 sps:$4 sm:$0xff]  }
  0x2b   : > { %710 = vmatpush1.bf16.msra.mxu1 %v1199_v10  ;;  %v1205_v15 = vld [vmem:[%s1394_s11 + $0x20] ss:$8 sps:$4 sm:$0xff]   ;;  %v1206_v16 = vld [vmem:[%s1394_s11 + $0x34] ss:$8 sps:$4 sm:$0xff]   ;;  %v1208_v17 = vld [vmem:[%s1394_s11 + $0x30] ss:$8 sps:$4 sm:$0xff]  }
  0x2c   : > { %711 = vmatprep.subr.bf16.mxu1 %v1200_v12  ;;  %v1221_v18 = vld [vmem:[%s1394_s11 + $0x104] ss:$8 sps:$4 sm:$0xff]   ;;  %v1223_v19 = vld [vmem:[%s1394_s11 + $0x100] ss:$8 sps:$4 sm:$0xff]   ;;  %v1227_v21 = vld [vmem:[%s1394_s11 + $0x114] ss:$8 sps:$4 sm:$0xff]  }
  0x2d   : > { %v1209_v20 = vld [vmem:[%s1394_s11 + $0x44] ss:$8 sps:$4 sm:$0xff]   ;;  %762 = vmatprep.subr.bf16.mxu0 %v1221_v18  ;;  %v1229_v22 = vld [vmem:[%s1394_s11 + $0x110] ss:$8 sps:$4 sm:$0xff]   ;;  %v1211_v23 = vld [vmem:[%s1394_s11 + $0x40] ss:$8 sps:$4 sm:$0xff]  }
  0x2e   : > { %763 = vmatpush1.bf16.msra.mxu0 %v1223_v19  ;;  %v1212_v24 = vld [vmem:[%s1394_s11 + $0x54] ss:$8 sps:$4 sm:$0xff]   ;;  %v1233_v25 = vld [vmem:[%s1394_s11 + $0x124] ss:$8 sps:$4 sm:$0xff]   ;;  %v1235_v26 = vld [vmem:[%s1394_s11 + $0x120] ss:$8 sps:$4 sm:$0xff]  }
  0x2f   : > { %712 = vmatpush1.bf16.msra.mxu1 %v1202_v13  ;;  %764 = vmatprep.subr.bf16.mxu0 %v1227_v21  ;;  %v1214_v27 = vld [vmem:[%s1394_s11 + $0x50] ss:$8 sps:$4 sm:$0xff]   ;;  %v1239_v28 = vld [vmem:[%s1394_s11 + $0x134] ss:$8 sps:$4 sm:$0xff]   ;;  %v1215_v29 = vld [vmem:[%s1394_s11 + $0x64] ss:$8 sps:$4 sm:$0xff]  }
  0x30   : > { %713 = vmatprep.subr.bf16.mxu1 %v1203_v14  ;;  %v1241_v30 = vld [vmem:[%s1394_s11 + $0x130] ss:$8 sps:$4 sm:$0xff]   ;;  %v1217_v31 = vld [vmem:[%s1394_s11 + $0x60] ss:$8 sps:$4 sm:$0xff]   ;;  %v1245_v32 = vld [vmem:[%s1394_s11 + $0x144] ss:$8 sps:$4 sm:$0xff]  }
  0x31   : > { %v1218_v33 = vld [vmem:[%s1394_s11 + $0x74] ss:$8 sps:$4 sm:$0xff]   ;;  %v1247_v34 = vld [vmem:[%s1394_s11 + $0x140] ss:$8 sps:$4 sm:$0xff]   ;;  %v1220_v35 = vld [vmem:[%s1394_s11 + $0x70] ss:$8 sps:$4 sm:$0xff]  }
  0x32   : > { %765 = vmatpush1.bf16.msra.mxu0 %v1229_v22  ;;  %v1251_v36 = vld [vmem:[%s1394_s11 + $0x154] ss:$8 sps:$4 sm:$0xff]   ;;  %v1224_v37 = vld [vmem:[%s1394_s11 + $0x84] ss:$8 sps:$4 sm:$0xff]   ;;  %v1253_v38 = vld [vmem:[%s1394_s11 + $0x150] ss:$8 sps:$4 sm:$0xff]  }
  0x33   : > { %714 = vmatpush1.bf16.msra.mxu1 %v1205_v15  ;;  %766 = vmatprep.subr.bf16.mxu0 %v1233_v25  ;;  %v1226_v39 = vld [vmem:[%s1394_s11 + $0x80] ss:$8 sps:$4 sm:$0xff]   ;;  %v1257_v40 = vld [vmem:[%s1394_s11 + $0x164] ss:$8 sps:$4 sm:$0xff]   ;;  %v1230_v41 = vld [vmem:[%s1394_s11 + $0x94] ss:$8 sps:$4 sm:$0xff]  }
  0x34   : > { %715 = vmatprep.subr.bf16.mxu1 %v1206_v16  ;;  %v1232_v42 = vld [vmem:[%s1394_s11 + $0x90] ss:$8 sps:$4 sm:$0xff]   ;;  %v1259_v43 = vld [vmem:[%s1394_s11 + $0x160] ss:$8 sps:$4 sm:$0xff]   ;;  %v1263_v45 = vld [vmem:[%s1394_s11 + $0x174] ss:$8 sps:$4 sm:$0xff]  }
  0x35   : > { %v1272_v44 = vld [vmem:[%s1396_s12 + $0x4] ss:$12 sps:$4 sm:$0xff]   ;;  %v1269_v50 = vld [vmem:[%s1396_s12 + $0x8] ss:$12 sps:$4 sm:$0xff]   ;;  %v1273_v55 = vld [vmem:[%s1396_s12 + $0x20] ss:$12 sps:$4 sm:$0xff]  }
  0x36   : > { %767 = vmatpush1.bf16.msra.mxu0 %v1235_v26  ;;  %v1236_v46 = vld [vmem:[%s1394_s11 + $0xa4] ss:$8 sps:$4 sm:$0xff]   ;;  %741 = vmatprep.mubr.bf16.mxu1 %v1272_v44  ;;  %v1265_v47 = vld [vmem:[%s1394_s11 + $0x170] ss:$8 sps:$4 sm:$0xff]   ;;  %v1238_v48 = vld [vmem:[%s1394_s11 + $0xa0] ss:$8 sps:$4 sm:$0xff]  }
  0x37   : > { %716 = vmatpush1.bf16.msra.mxu1 %v1208_v17  ;;  %768 = vmatprep.subr.bf16.mxu0 %v1239_v28  ;;  %v1242_v49 = vld [vmem:[%s1394_s11 + $0xb4] ss:$8 sps:$4 sm:$0xff]   ;;  %v1244_v51 = vld [vmem:[%s1394_s11 + $0xb0] ss:$8 sps:$4 sm:$0xff]   ;;  %v1248_v52 = vld [vmem:[%s1394_s11 + $0xc4] ss:$8 sps:$4 sm:$0xff]  }
  0x38   : > { %717 = vmatprep.subr.bf16.mxu1 %v1209_v20  ;;  %v1250_v53 = vld [vmem:[%s1394_s11 + $0xc0] ss:$8 sps:$4 sm:$0xff]   ;;  %v1254_v54 = vld [vmem:[%s1394_s11 + $0xd4] ss:$8 sps:$4 sm:$0xff]   ;;  %v1256_v56 = vld [vmem:[%s1394_s11 + $0xd0] ss:$8 sps:$4 sm:$0xff]  }
  0x39   : > { %v1260_v57 = vld [vmem:[%s1394_s11 + $0xe4] ss:$8 sps:$4 sm:$0xff]   ;;  %v1262_v58 = vld [vmem:[%s1394_s11 + $0xe0] ss:$8 sps:$4 sm:$0xff]   ;;  %v1266_v59 = vld [vmem:[%s1394_s11 + $0xf4] ss:$8 sps:$4 sm:$0xff]  }
  0x3a   : > { %769 = vmatpush1.bf16.msra.mxu0 %v1241_v30  ;;  %v1268_v60 = vld [vmem:[%s1394_s11 + $0xf0] ss:$8 sps:$4 sm:$0xff]   ;;  %v373_v8 = vld [vmem:[#allocation2] sm:$0xff] }
  0x3b   : > { %718 = vmatpush1.bf16.msra.mxu1 %v1211_v23  ;;  %770 = vmatprep.subr.bf16.mxu0 %v1245_v32  ;;  %v1270_v61 = vld [vmem:[%s1396_s12] ss:$12 sps:$4 sm:$0xff]   ;;  %v1274_v62 = vld [vmem:[%s1396_s12 + $0x1c] ss:$12 sps:$4 sm:$0xff]   ;;  %v1276_v63 = vld [vmem:[%s1396_s12 + $0x18] ss:$12 sps:$4 sm:$0xff]  }
  0x3c   : > { %719 = vmatprep.subr.bf16.mxu1 %v1212_v24  ;;  %v375_v14 = vld [vmem:[#allocation2 + $0x10] sm:$0xff]  ;;  %v376_v18 = vld [vmem:[#allocation2 + $0x18] sm:$0xff]  ;;  %v377_v24 = vld [vmem:[#allocation2 + $0x20] sm:$0xff] }
  0x3d   : > { %v379_v30 = vld [vmem:[#allocation2 + $0x30] sm:$0xff] }
  0x3e   : > { %771 = vmatpush1.bf16.msra.mxu0 %v1247_v34  ;;  %v380_v34 = vld [vmem:[#allocation2 + $0x38] sm:$0xff] }
  0x3f   : > { %720 = vmatpush1.bf16.msra.mxu1 %v1214_v27  ;;  %772 = vmatprep.subr.bf16.mxu0 %v1251_v36  ;;  %v378_v27 = vld [vmem:[#allocation2 + $0x28] sm:$0xff] }
  0x40   : > { %721 = vmatprep.subr.bf16.mxu1 %v1215_v29 }
  0x42   : > { %773 = vmatpush1.bf16.msra.mxu0 %v1253_v38 }
  0x43   : > { %722 = vmatpush1.bf16.msra.mxu1 %v1217_v31  ;;  %774 = vmatprep.subr.bf16.mxu0 %v1257_v40  ;;  %v845_v40 = vlaneseq (!%p1130_p11) }
  0x44   : > { %723 = vmatprep.subr.bf16.mxu1 %v1218_v33 }
  0x46   : > { %775 = vmatpush1.bf16.msra.mxu0 %v1259_v43  ;;  %v863_v43 = vld [vmem:[%s1492_s3] sm:$0x3] (!%p1130_p11) }
  0x47   : > { %724 = vmatpush1.bf16.msra.mxu1 %v1220_v35  ;;  %776 = vmatprep.subr.bf16.mxu0 %v1263_v45 }
  0x48   : > { %725 = vmatprep.subr.bf16.mxu1 %v1224_v37 }
  0x4a   : > { %777 = vmatpush1.bf16.msra.mxu0 %v1265_v47 }
  0x4b   : > { %726 = vmatpush1.bf16.msra.mxu1 %v1226_v39 }
  0x4c   : > { %727 = vmatprep.subr.bf16.mxu1 %v1230_v41  ;;  %v846_v41 = vshrl.u32 (!%p1130_p11), %v845_v40, 7 }
  0x4d   : > { %795 = vmatmul.mubr.bf16.vlgmr.msra.gmra.mrb[0].mxu0 %v1269_v50 }
  0x4e   : > { %804 = vmatprep.mubr.bf16.mxu0 %v1318_v11  ;;  %v374_v11 = vld [vmem:[#allocation2 + $0x8] sm:$0xff]  ;;  %v851_v47 = vsub.s32 (!%p1130_p11), 1, %v846_v41 }
  0x4f   : > { %728 = vmatpush1.bf16.msra.mxu1 %v1232_v42  ;;  %v843_v42 = vld [vmem:[%s1491_s2] sm:$0x3] (!%p1130_p11) }
  0x50   : > { %729 = vmatprep.subr.bf16.mxu1 %v1236_v46  ;;  %v847_v46 = vsub.s32 (!%p1130_p11), 0, %v846_v41 }
  0x53   : > { %730 = vmatpush1.bf16.msra.mxu1 %v1238_v48 }
  0x54   : > { %731 = vmatprep.subr.bf16.mxu1 %v1242_v49 }
  0x55   : > { %805 = vmatmul.mubr.bf16.gmra.mrb[4].mxu0 %v1273_v55 }
  0x57   : > { %732 = vmatpush1.bf16.msra.mxu1 %v1244_v51  ;;  %v848_v51 = vrot.slane (!%p1130_p11), %v843_v42, %v847_v46 }
  0x58   : > { %733 = vmatprep.subr.bf16.mxu1 %v1248_v52  ;;  %v852_v52 = vrot.slane (!%p1130_p11), %v843_v42, %v851_v47 }
  0x5b   : > { %734 = vmatpush1.bf16.msra.mxu1 %v1250_v53  ;;  %v868_v53 = vrot.slane (!%p1130_p11), %v863_v43, %v847_v46 }
  0x5c   : > { %735 = vmatprep.subr.bf16.mxu1 %v1254_v54  ;;  %v872_v54 = vrot.slane (!%p1130_p11), %v863_v43, %v851_v47 }
  0x5f   : > { %736 = vmatpush1.bf16.msra.mxu1 %v1256_v56 }
  0x60   : > { %737 = vmatprep.subr.bf16.mxu1 %v1260_v57 }
  0x63   : > { %738 = vmatpush1.bf16.msra.mxu1 %v1262_v58 }
  0x64   : > { %739 = vmatprep.subr.bf16.mxu1 %v1266_v59 }
  0x67   : > { %740 = vmatpush1.bf16.msra.mxu1 %v1268_v60 }
  0x6a   : > { %742 = vmatmul.mubr.bf16.vlgmr.msra.gmra.mrb[0].mxu1 %v1270_v61 }
  0x6b   : > { %751 = vmatprep.mubr.bf16.mxu1 %v1274_v62 }
  0x72   : > { %752 = vmatmul.mubr.bf16.gmra.mrb[4].mxu1 %v1276_v63 }
 0x120   : > { %v796_v0 = vpop.f32.mrb[0].mxu0 }
 0x121   : > { %v798_v1 = vpop.f32.mrb[1].mxu0 }
 0x122   : > { %v800_v2 = vpop.f32.mrb[2].mxu0 }
 0x123   : > { %v802_v3 = vpop.f32.mrb[3].mxu0 }
 0x128   : > { %v806_v4 = vpop.f32.mrb[4].mxu0 }
 0x129   : > { %v808_v5 = vpop.f32.mrb[5].mxu0 }
 0x12a   : > { %v810_v6 = vpop.f32.mrb[6].mxu0 }
 0x12b   : > { %v812_v7 = vpop.f32.mrb[7].mxu0 }
 0x13d   : > { %v743_v9 = vpop.f32.mrb[0].mxu1 }
 0x13e   : > { %v797_v10 = vadd.f32 %v796_v0, %v743_v9  ;;  %v745_v12 = vpop.f32.mrb[1].mxu1 }
 0x13f   : > { %v799_v13 = vadd.f32 %v798_v1, %v745_v12  ;;  %v747_v15 = vpop.f32.mrb[2].mxu1 }
 0x140   : > { %v815_v16 = vadd.f32 %v797_v10, %v373_v8  ;;  %v801_v17 = vadd.f32 %v800_v2, %v747_v15  ;;  %v749_v19 = vpop.f32.mrb[3].mxu1 }
 0x141   : > { %v816_v20 = vadd.f32 %v799_v13, %v374_v11  ;;  %v803_v21 = vadd.f32 %v802_v3, %v749_v19 }
 0x142   : > { %823 = vst [vmem:[#allocation2] sm:$0xff] %v815_v16  ;;  %v817_v22 = vadd.f32 %v801_v17, %v375_v14 }
 0x143   : > { %824 = vst [vmem:[#allocation2 + $0x8] sm:$0xff] %v816_v20  ;;  %v818_v23 = vadd.f32 %v803_v21, %v376_v18 }
 0x144   : > { %825 = vst [vmem:[#allocation2 + $0x10] sm:$0xff] %v817_v22 }
 0x145   : > { %826 = vst [vmem:[#allocation2 + $0x18] sm:$0xff] %v818_v23  ;;  %v753_v25 = vpop.f32.mrb[4].mxu1 }
 0x146   : > { %v807_v26 = vadd.f32 %v806_v4, %v753_v25  ;;  %v755_v28 = vpop.f32.mrb[5].mxu1 }
 0x147   : > { %v809_v29 = vadd.f32 %v808_v5, %v755_v28  ;;  %v757_v31 = vpop.f32.mrb[6].mxu1  ;;  %834 = sbr.rel (%p1130_p11) target bundleno = 350 (0x15e), region = 70 }
 0x148   : > { %v819_v32 = vadd.f32 %v807_v26, %v377_v24  ;;  %v811_v33 = vadd.f32 %v810_v6, %v757_v31  ;;  %v759_v35 = vpop.f32.mrb[7].mxu1 }
 0x149   : > { %v820_v36 = vadd.f32 %v809_v29, %v378_v27  ;;  %v813_v37 = vadd.f32 %v812_v7, %v759_v35  ;;  %v835_v44 = vld [vmem:[#allocation2] sm:$0xff] (!%p1130_p11) }
 0x14a   : > { %827 = vst [vmem:[#allocation2 + $0x20] sm:$0xff] %v819_v32  ;;  %v821_v38 = vadd.f32 %v811_v33, %v379_v30  ;;  %v836_v45 = vld [vmem:[#allocation2 + $0x8] sm:$0xff] (!%p1130_p11)  ;;  %v855_v58 = vmul.f32 (!%p1130_p11), %v848_v51, %v835_v44 }
 0x14b   : > { %828 = vst [vmem:[#allocation2 + $0x28] sm:$0xff] %v820_v36  ;;  %v822_v39 = vadd.f32 %v813_v37, %v380_v34  ;;  %v837_v48 = vld [vmem:[#allocation2 + $0x10] sm:$0xff] (!%p1130_p11)  ;;  %v856_v59 = vmul.f32 (!%p1130_p11), %v852_v52, %v836_v45 }
 0x14c   : > { %829 = vst [vmem:[#allocation2 + $0x30] sm:$0xff] %v821_v38  ;;  %v838_v49 = vld [vmem:[#allocation2 + $0x18] sm:$0xff] (!%p1130_p11)  ;;  %v857_v60 = vmul.f32 (!%p1130_p11), %v848_v51, %v837_v48  ;;  %v875_v2 = vadd.f32 (!%p1130_p11), %v868_v53, %v855_v58 }
 0x14d   : > { %830 = vst [vmem:[#allocation2 + $0x38] sm:$0xff] %v822_v39  ;;  %v858_v61 = vmul.f32 (!%p1130_p11), %v852_v52, %v838_v49  ;;  %v876_v3 = vadd.f32 (!%p1130_p11), %v872_v54, %v856_v59 }
 0x14e   : > { %v877_v4 = vadd.f32 %v868_v53, %v857_v60  ;;  %v883_v10 = vmax.f32 %v875_v2, 0.0 }
 0x14f   : > { %v878_v5 = vadd.f32 %v872_v54, %v858_v61  ;;  %v884_v11 = vmax.f32 %v876_v3, 0.0 }
 0x150   : > { %v885_v12 = vmax.f32 %v877_v4, 0.0 }
 0x151   : > { %v839_v50 = vld [vmem:[#allocation2 + $0x20] sm:$0xff]  ;;  %v886_v13 = vmax.f32 %v878_v5, 0.0  ;;  %v1141_v18 = vpack.c.bf16 %v884_v11, %v883_v10 }
 0x152   : > { %v840_v55 = vld [vmem:[#allocation2 + $0x28] sm:$0xff]  ;;  %v859_v62 = vmul.f32 %v848_v51, %v839_v50 }
 0x153   : > { %v841_v56 = vld [vmem:[#allocation2 + $0x30] sm:$0xff]  ;;  %v860_v63 = vmul.f32 %v852_v52, %v840_v55  ;;  %v1142_v19 = vpack.c.bf16 %v886_v13, %v885_v12  ;;  %915 = vst [vmem:[%s1493_s4] sm:$0xff] %v1141_v18 }
 0x154   : > { %v842_v57 = vld [vmem:[#allocation2 + $0x38] sm:$0xff]  ;;  %v861_v0 = vmul.f32 %v848_v51, %v841_v56  ;;  %v879_v6 = vadd.f32 %v868_v53, %v859_v62 }
 0x155   : > { %v862_v1 = vmul.f32 %v852_v52, %v842_v57  ;;  %v880_v7 = vadd.f32 %v872_v54, %v860_v63  ;;  %916 = vst [vmem:[%s1493_s4 + $0x8] sm:$0xff] %v1142_v19 }
 0x156   : > { %v881_v8 = vadd.f32 %v868_v53, %v861_v0  ;;  %v887_v14 = vmax.f32 %v879_v6, 0.0 }
 0x157   : > { %v882_v9 = vadd.f32 %v872_v54, %v862_v1  ;;  %v888_v15 = vmax.f32 %v880_v7, 0.0 }
 0x158   : > { %v889_v16 = vmax.f32 %v881_v8, 0.0 }
 0x159   : > { %v890_v17 = vmax.f32 %v882_v9, 0.0  ;;  %v1143_v20 = vpack.c.bf16 %v888_v15, %v887_v14 }
 0x15b   : > { %v1144_v21 = vpack.c.bf16 %v890_v17, %v889_v16  ;;  %917 = vst [vmem:[%s1493_s4 + $0x10] sm:$0xff] %v1143_v20 }
 0x15d   : > { %918 = vst [vmem:[%s1493_s4 + $0x18] sm:$0xff] %v1144_v21 }
 0x15e PF: > { %s14_s19 = sadd.s32 1, %s1315_s19   ;;  %s1494_s15 = smov %s1303_s16 }
 0x15f   : > { %p11_p12 = scmp.ge.s32.totalorder %s14_s19, 5   ;;  %s1495_s16 = smov %s1379_s23 }
 0x160   : > { %s1496_s17 = smov %s1311_s18  ;;  %s1497_s18 = smov %s1499_s20 }
 0x161   :  { %13 = sbr.rel (!%p11_p12) target bundleno = 3 (0x3), region = 120 }

// kernel: wide_resnet_ae_forward.39
= control target key start
LH: loop header
LB: loop body
LE: loop exit
PB: predicated region body
PF: predicated region fallthrough
CT: control target
= control target key end

     0   :  { %v297_v1 = vmov 0   ;;  %s391_s1 = inlined_call_operand.vmem [shape: bf16[128,256], index: 1, kind: input, shape index: {}]   ;;  %s392_s0 = inlined_call_operand.vmem [shape: bf16[32,128], index: 0, kind: input, shape index: {}]   ;;  %s393_s2 = inlined_call_operand.vmem [shape: f32[32,256], index: 2, kind: output, shape index: {}]  }
   0x1   :  { %v271_v0 = vld [vmem:[%s391_s1 + $0x4] ss:$8 sps:$4 sm:$0xff]   ;;  %176 = vmatprep.mubr.bf16.mxu0 %v297_v1  ;;  %186 = vmatprep.mubr.bf16.mxu1 %v297_v1  ;;  %v273_v2 = vld [vmem:[%s391_s1] ss:$8 sps:$4 sm:$0xff]   ;;  %v274_v3 = vld [vmem:[%s391_s1 + $0x14] ss:$8 sps:$4 sm:$0xff]  }
   0x2   :  { %144 = vmatprep.subr.bf16.mxu0 %v271_v0  ;;  %254 = vmatprep.subr.bf16.mxu1 %v271_v0  ;;  %v276_v4 = vld [vmem:[%s391_s1 + $0x10] ss:$8 sps:$4 sm:$0xff]   ;;  %v277_v5 = vld [vmem:[%s391_s1 + $0x24] ss:$8 sps:$4 sm:$0xff]   ;;  %v279_v6 = vld [vmem:[%s391_s1 + $0x20] ss:$8 sps:$4 sm:$0xff]  }
   0x3   :  { %145 = vmatpush1.bf16.msra.mxu0 %v273_v2  ;;  %262 = vmatpush1.bf16.msra.mxu1 %v273_v2  ;;  %v280_v7 = vld [vmem:[%s391_s1 + $0x34] ss:$8 sps:$4 sm:$0xff]   ;;  %v282_v8 = vld [vmem:[%s391_s1 + $0x30] ss:$8 sps:$4 sm:$0xff]   ;;  %v283_v9 = vld [vmem:[%s391_s1 + $0x44] ss:$8 sps:$4 sm:$0xff]  }
   0x4   :  { %146 = vmatprep.subr.bf16.mxu0 %v274_v3  ;;  %255 = vmatprep.subr.bf16.mxu1 %v274_v3  ;;  %v285_v10 = vld [vmem:[%s391_s1 + $0x40] ss:$8 sps:$4 sm:$0xff]   ;;  %v286_v11 = vld [vmem:[%s391_s1 + $0x54] ss:$8 sps:$4 sm:$0xff]   ;;  %v288_v12 = vld [vmem:[%s391_s1 + $0x50] ss:$8 sps:$4 sm:$0xff]  }
   0x5   :  { %v289_v13 = vld [vmem:[%s391_s1 + $0x64] ss:$8 sps:$4 sm:$0xff]   ;;  %v291_v14 = vld [vmem:[%s391_s1 + $0x60] ss:$8 sps:$4 sm:$0xff]   ;;  %v292_v15 = vld [vmem:[%s391_s1 + $0x74] ss:$8 sps:$4 sm:$0xff]  }
   0x6   :  { %v294_v16 = vld [vmem:[%s391_s1 + $0x70] ss:$8 sps:$4 sm:$0xff]   ;;  %v295_v17 = vld [vmem:[%s392_s0] sm:$0xff]   ;;  %v296_v18 = vld [vmem:[%s392_s0 + $0x8] sm:$0xff]  }
   0x7   :  { %147 = vmatpush1.bf16.msra.mxu0 %v276_v4  ;;  %263 = vmatpush1.bf16.msra.mxu1 %v276_v4 }
   0x8   :  { %148 = vmatprep.subr.bf16.mxu0 %v277_v5  ;;  %256 = vmatprep.subr.bf16.mxu1 %v277_v5 }
   0xb   :  { %149 = vmatpush1.bf16.msra.mxu0 %v279_v6  ;;  %264 = vmatpush1.bf16.msra.mxu1 %v279_v6 }
   0xc   :  { %150 = vmatprep.subr.bf16.mxu0 %v280_v7  ;;  %257 = vmatprep.subr.bf16.mxu1 %v280_v7 }
   0xf   :  { %151 = vmatpush1.bf16.msra.mxu0 %v282_v8  ;;  %265 = vmatpush1.bf16.msra.mxu1 %v282_v8 }
  0x10   :  { %152 = vmatprep.subr.bf16.mxu0 %v283_v9  ;;  %258 = vmatprep.subr.bf16.mxu1 %v283_v9 }
  0x13   :  { %153 = vmatpush1.bf16.msra.mxu0 %v285_v10  ;;  %266 = vmatpush1.bf16.msra.mxu1 %v285_v10 }
  0x14   :  { %154 = vmatprep.subr.bf16.mxu0 %v286_v11  ;;  %259 = vmatprep.subr.bf16.mxu1 %v286_v11 }
  0x17   :  { %155 = vmatpush1.bf16.msra.mxu0 %v288_v12  ;;  %267 = vmatpush1.bf16.msra.mxu1 %v288_v12 }
  0x18   :  { %156 = vmatprep.subr.bf16.mxu0 %v289_v13  ;;  %260 = vmatprep.subr.bf16.mxu1 %v289_v13 }
  0x1b   :  { %157 = vmatpush1.bf16.msra.mxu0 %v291_v14  ;;  %268 = vmatpush1.bf16.msra.mxu1 %v291_v14 }
  0x1c   :  { %158 = vmatprep.subr.bf16.mxu0 %v292_v15  ;;  %261 = vmatprep.subr.bf16.mxu1 %v292_v15 }
  0x1f   :  { %159 = vmatpush1.bf16.msra.mxu0 %v294_v16  ;;  %269 = vmatpush1.bf16.msra.mxu1 %v294_v16 }
  0x22   :  { %177 = vmatmul.mubr.bf16.vlgmr.msra.gmra.mrb[0].mxu0 %v295_v17  ;;  %187 = vmatmul.mubr.bf16.vlgmr.msra.gmra.mrb[0].mxu1 %v296_v18 }
  0xf5   :  { %v178_v19 = vpop.f32.mrb[0].mxu0  ;;  %v188_v20 = vpop.f32.mrb[0].mxu1 }
  0xf6   :  { %224 = vst [vmem:[%s393_s2] sm:$0xff] %v178_v19  ;;  %228 = vst [vmem:[%s393_s2 + $0x20] sm:$0xff] %v188_v20  ;;  %v180_v21 = vpop.f32.mrb[1].mxu0  ;;  %v190_v22 = vpop.f32.mrb[1].mxu1 }
  0xf7   :  { %225 = vst [vmem:[%s393_s2 + $0x8] sm:$0xff] %v180_v21  ;;  %229 = vst [vmem:[%s393_s2 + $0x28] sm:$0xff] %v190_v22  ;;  %v182_v23 = vpop.f32.mrb[2].mxu0  ;;  %v192_v24 = vpop.f32.mrb[2].mxu1 }
  0xf8   :  { %226 = vst [vmem:[%s393_s2 + $0x10] sm:$0xff] %v182_v23  ;;  %230 = vst [vmem:[%s393_s2 + $0x30] sm:$0xff] %v192_v24  ;;  %v184_v25 = vpop.f32.mrb[3].mxu0  ;;  %v194_v26 = vpop.f32.mrb[3].mxu1 }
  0xf9   :  { %227 = vst [vmem:[%s393_s2 + $0x18] sm:$0xff] %v184_v25  ;;  %231 = vst [vmem:[%s393_s2 + $0x38] sm:$0xff] %v194_v26 }

// kernel: wide_resnet_ae_forward.40
= control target key start
LH: loop header
LB: loop body
LE: loop exit
PB: predicated region body
PF: predicated region fallthrough
CT: control target
= control target key end

     0   :  { %s1251_s12 = smov 0   ;;  %s1253_s13 = smov 0   ;;  %s1426_s0 = inlined_call_operand.vmem [shape: bf16[32,2304], index: 0, kind: input, shape index: {}]   ;;  %s1427_s1 = inlined_call_operand.vmem [shape: bf16[2304,256], index: 1, kind: input, shape index: {}]   ;;  %s1428_s2 = inlined_call_operand.vmem [shape: f32[32,256], index: 2, kind: input, shape index: {}]   ;;  %s1429_s3 = inlined_call_operand.vmem [shape: f32[32,256], index: 3, kind: output, shape index: {}]  }
   0x1   :  { %s1255_s14 = smov 0   ;;  %s1257_s15 = smov 0  }
   0x2   :  { %s1259_s16 = smov 0  }
   0x3 LB: > { %s25_s17 = sadd.s32 1, %s1223_s15  ;;  %p48_p1 = scmp.ne.s32.totalorder %s1215_s13, %s1211_s12  ;;  %s1227_s16 = sphi %s1259_s16, %s13_s16   ;;  %s1223_s15 = sphi %s1257_s15, %s1433_s15   ;;  %s1219_s14 = sphi %s1255_s14, %s1432_s14   ;;  %s1215_s13 = sphi %s1253_s13, %s1431_s13   ;;  %s1211_s12 = sphi %s1251_s12, %s1430_s12  }
   0x4   : > { %p26_p0 = scmp.ge.s32.totalorder %s25_s17, 6  ;;  %p49_p2 = scmp.eq.s32.totalorder %s1227_s16, 0 }
   0x5   : > { %s41_s19 = sadd.s32 1, %s1215_s13  ;;  %p982_p5 = scmp.ge.s32.totalorder %s1227_s16, 6 }
   0x6   : > { %s1435_s17 = smov (%p26_p0, %s25_s17), 0  ;;  %p50_p3 = por %p49_p2, %p48_p1 }
   0x7   : > { %s37_s18 = ssub.s32 %s1223_s15, %s1435_s17  ;;  %173 = sbr.rel (%p982_p5) target bundleno = 23 (0x17), region = 20 }
   0x8   : > { %p39_p4 = scmp.eq.s32.totalorder %s37_s18, 0 }
   0xa   : > { %s1286_s20 = scalar_select %p39_p4, %s1215_s13, %s41_s19  }
   0xe   : > { %176 = sbr.rel (!%p50_p3) target bundleno = 23 (0x17), region = 24  ;;  %s178_s21 = sand.u32 (%p50_p3), 1, %s1215_s13  }
   0xf   : > { %s1055_s22 = smul.u32 (%p50_p3), 12, %s1223_s15 }
  0x10   : > { %s1065_s23 = smul.u32 (%p50_p3), 48, %s178_s21 }
  0x11   : > { %s186_s26 = scalar_lea.vmem (%p50_p3), %s1426_s0, %s1055_s22 }
  0x12   : > { %v201_v0 = vld [vmem:[%s186_s26] sm:$0xff] (%p50_p3)  ;;  %v203_v1 = vld [vmem:[%s186_s26 + $0x48] sm:$0xff] (%p50_p3)  ;;  %v205_v2 = vld [vmem:[%s186_s26 + $0x90] sm:$0xff] (%p50_p3)  ;;  %s180_s27 = scalar_lea.vmem (%p50_p3), [#allocation3], %s1065_s23 }
  0x13   : > { %202 = vst [vmem:[%s180_s27] sm:$0xff] (%p50_p3), %v201_v0  ;;  %204 = vst [vmem:[%s180_s27 + $0xc] sm:$0xff] (%p50_p3), %v203_v1  ;;  %v207_v3 = vld [vmem:[%s186_s26 + $0xd8] sm:$0xff] (%p50_p3)  ;;  %v984_v4 = vld [vmem:[%s186_s26 + $0x8] sm:$0xf] (%p50_p3) }
  0x14   : > { %206 = vst [vmem:[%s180_s27 + $0x18] sm:$0xff] (%p50_p3), %v205_v2  ;;  %v986_v5 = vld [vmem:[%s186_s26 + $0x50] sm:$0xf] (%p50_p3)  ;;  %208 = vst [vmem:[%s180_s27 + $0x24] sm:$0xff] (%p50_p3), %v207_v3  ;;  %v988_v6 = vld [vmem:[%s186_s26 + $0x98] sm:$0xf] (%p50_p3) }
  0x15   : > { %985 = vst [vmem:[%s180_s27 + $0x8] sm:$0xf] %v984_v4  ;;  %987 = vst [vmem:[%s180_s27 + $0x14] sm:$0xf] %v986_v5  ;;  %v990_v7 = vld [vmem:[%s186_s26 + $0xe0] sm:$0xf] }
  0x16   : > { %989 = vst [vmem:[%s180_s27 + $0x20] sm:$0xf] %v988_v6  ;;  %991 = vst [vmem:[%s180_s27 + $0x2c] sm:$0xf] %v990_v7 }
  0x17 PF: > { %p992_p6 = scmp.ge.s32.totalorder %s1227_s16, 1  ;;  %p243_p7 = scmp.lt.s32.totalorder %s1227_s16, 7 }
  0x19   : > { %p244_p8 = pnand %p992_p6, %p243_p7 }
  0x1a   : > { %s250_s28 = sand.u32 (!%p244_p8), 1, %s1211_s12   ;;  %s300_s29 = smul.u32 (!%p244_p8), 48, %s1219_s14 }
  0x1b   : > { %247 = sbr.rel (%p244_p8) target bundleno = 344 (0x158), region = 54  ;;  %p995_p10 = scmp.ne.s32.totalorder (!%p244_p8), %s1219_s14, 0 }
  0x1c   : > { %s1066_s30 = smul.u32 (!%p244_p8), 48, %s250_s28  ;;  %p302_p9 = scmp.lt.s32.totalorder (!%p244_p8), %s300_s29, 287 }
  0x1e   : > { %s1303_s8 = scalar_lea.vmem (!%p244_p8), [#allocation3], %s1066_s30 }
  0x22   : > { %s1437_s29 = smov (!%p302_p9, %s300_s29), 287  ;;  %340 = sbr.rel (%p995_p10) target bundleno = 41 (0x29), region = 62 }
  0x23   : > { %s1056_s4 = sshll.u32 %s1437_s29, 3  ;;  %v1229_v8 = vmov (!%p995_p10), 0.0  }
  0x24   : > { %s1301_s7 = scalar_lea.vmem %s1427_s1, %s1056_s4  ;;  %341 = vst [vmem:[#allocation2] sm:$0xff] (!%p995_p10), %v1229_v8  ;;  %342 = vst [vmem:[#allocation2 + $0x8] sm:$0xff] (!%p995_p10), %v1229_v8 }
  0x25   : > { %343 = vst [vmem:[#allocation2 + $0x10] sm:$0xff] (!%p995_p10), %v1229_v8  ;;  %344 = vst [vmem:[#allocation2 + $0x18] sm:$0xff] (!%p995_p10), %v1229_v8 }
  0x26   : > { %345 = vst [vmem:[#allocation2 + $0x20] sm:$0xff] (!%p995_p10), %v1229_v8  ;;  %346 = vst [vmem:[#allocation2 + $0x28] sm:$0xff] (!%p995_p10), %v1229_v8 }
  0x27   : > { %347 = vst [vmem:[#allocation2 + $0x30] sm:$0xff] (!%p995_p10), %v1229_v8  ;;  %348 = vst [vmem:[#allocation2 + $0x38] sm:$0xff] (!%p995_p10), %v1229_v8 }
  0x29 PF: > { %v1109_v9 = vld [vmem:[%s1301_s7 + $0x4] ss:$8 sps:$4 sm:$0xff]   ;;  %v1111_v10 = vld [vmem:[%s1301_s7] ss:$8 sps:$4 sm:$0xff]   ;;  %v1230_v11 = vmov 0   ;;  %p1050_p11 = scmp.ne.s32.totalorder %s1219_s14, 5 }
  0x2a   : > { %770 = vmatprep.mubr.bf16.mxu0 %v1230_v11  ;;  %685 = vmatprep.subr.bf16.mxu1 %v1109_v9  ;;  %v1112_v12 = vld [vmem:[%s1301_s7 + $0x14] ss:$8 sps:$4 sm:$0xff]   ;;  %v1114_v13 = vld [vmem:[%s1301_s7 + $0x10] ss:$8 sps:$4 sm:$0xff]   ;;  %v1115_v14 = vld [vmem:[%s1301_s7 + $0x24] ss:$8 sps:$4 sm:$0xff]  }
  0x2b   : > { %686 = vmatpush1.bf16.msra.mxu1 %v1111_v10  ;;  %v1117_v15 = vld [vmem:[%s1301_s7 + $0x20] ss:$8 sps:$4 sm:$0xff]   ;;  %v1118_v16 = vld [vmem:[%s1301_s7 + $0x34] ss:$8 sps:$4 sm:$0xff]   ;;  %v1120_v17 = vld [vmem:[%s1301_s7 + $0x30] ss:$8 sps:$4 sm:$0xff]  }
  0x2c   : > { %687 = vmatprep.subr.bf16.mxu1 %v1112_v12  ;;  %v1133_v18 = vld [vmem:[%s1301_s7 + $0x104] ss:$8 sps:$4 sm:$0xff]   ;;  %v1135_v19 = vld [vmem:[%s1301_s7 + $0x100] ss:$8 sps:$4 sm:$0xff]   ;;  %v1139_v21 = vld [vmem:[%s1301_s7 + $0x114] ss:$8 sps:$4 sm:$0xff]  }
  0x2d   : > { %v1121_v20 = vld [vmem:[%s1301_s7 + $0x44] ss:$8 sps:$4 sm:$0xff]   ;;  %738 = vmatprep.subr.bf16.mxu0 %v1133_v18  ;;  %v1141_v22 = vld [vmem:[%s1301_s7 + $0x110] ss:$8 sps:$4 sm:$0xff]   ;;  %v1123_v23 = vld [vmem:[%s1301_s7 + $0x40] ss:$8 sps:$4 sm:$0xff]  }
  0x2e   : > { %739 = vmatpush1.bf16.msra.mxu0 %v1135_v19  ;;  %v1124_v24 = vld [vmem:[%s1301_s7 + $0x54] ss:$8 sps:$4 sm:$0xff]   ;;  %v1145_v25 = vld [vmem:[%s1301_s7 + $0x124] ss:$8 sps:$4 sm:$0xff]   ;;  %v1147_v26 = vld [vmem:[%s1301_s7 + $0x120] ss:$8 sps:$4 sm:$0xff]  }
  0x2f   : > { %688 = vmatpush1.bf16.msra.mxu1 %v1114_v13  ;;  %740 = vmatprep.subr.bf16.mxu0 %v1139_v21  ;;  %v1126_v27 = vld [vmem:[%s1301_s7 + $0x50] ss:$8 sps:$4 sm:$0xff]   ;;  %v1151_v28 = vld [vmem:[%s1301_s7 + $0x134] ss:$8 sps:$4 sm:$0xff]   ;;  %v1127_v29 = vld [vmem:[%s1301_s7 + $0x64] ss:$8 sps:$4 sm:$0xff]  }
  0x30   : > { %689 = vmatprep.subr.bf16.mxu1 %v1115_v14  ;;  %v1153_v30 = vld [vmem:[%s1301_s7 + $0x130] ss:$8 sps:$4 sm:$0xff]   ;;  %v1129_v31 = vld [vmem:[%s1301_s7 + $0x60] ss:$8 sps:$4 sm:$0xff]   ;;  %v1157_v32 = vld [vmem:[%s1301_s7 + $0x144] ss:$8 sps:$4 sm:$0xff]  }
  0x31   : > { %v1130_v33 = vld [vmem:[%s1301_s7 + $0x74] ss:$8 sps:$4 sm:$0xff]   ;;  %v1159_v34 = vld [vmem:[%s1301_s7 + $0x140] ss:$8 sps:$4 sm:$0xff]   ;;  %v1132_v35 = vld [vmem:[%s1301_s7 + $0x70] ss:$8 sps:$4 sm:$0xff]  }
  0x32   : > { %741 = vmatpush1.bf16.msra.mxu0 %v1141_v22  ;;  %v1163_v36 = vld [vmem:[%s1301_s7 + $0x154] ss:$8 sps:$4 sm:$0xff]   ;;  %v1136_v37 = vld [vmem:[%s1301_s7 + $0x84] ss:$8 sps:$4 sm:$0xff]   ;;  %v1165_v38 = vld [vmem:[%s1301_s7 + $0x150] ss:$8 sps:$4 sm:$0xff]  }
  0x33   : > { %690 = vmatpush1.bf16.msra.mxu1 %v1117_v15  ;;  %742 = vmatprep.subr.bf16.mxu0 %v1145_v25  ;;  %v1138_v39 = vld [vmem:[%s1301_s7 + $0x80] ss:$8 sps:$4 sm:$0xff]   ;;  %v1169_v40 = vld [vmem:[%s1301_s7 + $0x164] ss:$8 sps:$4 sm:$0xff]   ;;  %v1142_v41 = vld [vmem:[%s1301_s7 + $0x94] ss:$8 sps:$4 sm:$0xff]  }
  0x34   : > { %691 = vmatprep.subr.bf16.mxu1 %v1118_v16  ;;  %v1144_v42 = vld [vmem:[%s1301_s7 + $0x90] ss:$8 sps:$4 sm:$0xff]   ;;  %v1171_v43 = vld [vmem:[%s1301_s7 + $0x160] ss:$8 sps:$4 sm:$0xff]   ;;  %v1175_v45 = vld [vmem:[%s1301_s7 + $0x174] ss:$8 sps:$4 sm:$0xff]  }
  0x35   : > { %v1184_v44 = vld [vmem:[%s1303_s8 + $0x4] ss:$12 sps:$4 sm:$0xff]   ;;  %v1181_v50 = vld [vmem:[%s1303_s8 + $0x8] ss:$12 sps:$4 sm:$0xff]   ;;  %v1185_v55 = vld [vmem:[%s1303_s8 + $0x20] ss:$12 sps:$4 sm:$0xff]  }
  0x36   : > { %743 = vmatpush1.bf16.msra.mxu0 %v1147_v26  ;;  %v1148_v46 = vld [vmem:[%s1301_s7 + $0xa4] ss:$8 sps:$4 sm:$0xff]   ;;  %717 = vmatprep.mubr.bf16.mxu1 %v1184_v44  ;;  %v1177_v47 = vld [vmem:[%s1301_s7 + $0x170] ss:$8 sps:$4 sm:$0xff]   ;;  %v1150_v48 = vld [vmem:[%s1301_s7 + $0xa0] ss:$8 sps:$4 sm:$0xff]  }
  0x37   : > { %692 = vmatpush1.bf16.msra.mxu1 %v1120_v17  ;;  %744 = vmatprep.subr.bf16.mxu0 %v1151_v28  ;;  %v1154_v49 = vld [vmem:[%s1301_s7 + $0xb4] ss:$8 sps:$4 sm:$0xff]   ;;  %v1156_v51 = vld [vmem:[%s1301_s7 + $0xb0] ss:$8 sps:$4 sm:$0xff]   ;;  %v1160_v52 = vld [vmem:[%s1301_s7 + $0xc4] ss:$8 sps:$4 sm:$0xff]  }
  0x38   : > { %693 = vmatprep.subr.bf16.mxu1 %v1121_v20  ;;  %v1162_v53 = vld [vmem:[%s1301_s7 + $0xc0] ss:$8 sps:$4 sm:$0xff]   ;;  %v1166_v54 = vld [vmem:[%s1301_s7 + $0xd4] ss:$8 sps:$4 sm:$0xff]   ;;  %v1168_v56 = vld [vmem:[%s1301_s7 + $0xd0] ss:$8 sps:$4 sm:$0xff]  }
  0x39   : > { %v1172_v57 = vld [vmem:[%s1301_s7 + $0xe4] ss:$8 sps:$4 sm:$0xff]   ;;  %v1174_v58 = vld [vmem:[%s1301_s7 + $0xe0] ss:$8 sps:$4 sm:$0xff]   ;;  %v1178_v59 = vld [vmem:[%s1301_s7 + $0xf4] ss:$8 sps:$4 sm:$0xff]  }
  0x3a   : > { %745 = vmatpush1.bf16.msra.mxu0 %v1153_v30  ;;  %v1180_v60 = vld [vmem:[%s1301_s7 + $0xf0] ss:$8 sps:$4 sm:$0xff]   ;;  %v349_v8 = vld [vmem:[#allocation2] sm:$0xff]  ;;  %v820_v44 = vld [vmem:[%s1428_s2 + $0x8] sm:$0xff] (!%p1050_p11) }
  0x3b   : > { %694 = vmatpush1.bf16.msra.mxu1 %v1123_v23  ;;  %746 = vmatprep.subr.bf16.mxu0 %v1157_v32  ;;  %v1182_v61 = vld [vmem:[%s1303_s8] ss:$12 sps:$4 sm:$0xff]   ;;  %v1186_v62 = vld [vmem:[%s1303_s8 + $0x1c] ss:$12 sps:$4 sm:$0xff]   ;;  %v1188_v63 = vld [vmem:[%s1303_s8 + $0x18] ss:$12 sps:$4 sm:$0xff]  }
  0x3c   : > { %695 = vmatprep.subr.bf16.mxu1 %v1124_v24  ;;  %v351_v14 = vld [vmem:[#allocation2 + $0x10] sm:$0xff]  ;;  %v352_v18 = vld [vmem:[#allocation2 + $0x18] sm:$0xff]  ;;  %v353_v24 = vld [vmem:[#allocation2 + $0x20] sm:$0xff] }
  0x3d   : > { %v355_v30 = vld [vmem:[#allocation2 + $0x30] sm:$0xff] }
  0x3e   : > { %747 = vmatpush1.bf16.msra.mxu0 %v1159_v34  ;;  %v356_v34 = vld [vmem:[#allocation2 + $0x38] sm:$0xff] }
  0x3f   : > { %696 = vmatpush1.bf16.msra.mxu1 %v1126_v27  ;;  %748 = vmatprep.subr.bf16.mxu0 %v1163_v36  ;;  %v354_v27 = vld [vmem:[#allocation2 + $0x28] sm:$0xff] }
  0x40   : > { %697 = vmatprep.subr.bf16.mxu1 %v1127_v29 }
  0x42   : > { %749 = vmatpush1.bf16.msra.mxu0 %v1165_v38 }
  0x43   : > { %698 = vmatpush1.bf16.msra.mxu1 %v1129_v31  ;;  %750 = vmatprep.subr.bf16.mxu0 %v1169_v40 }
  0x44   : > { %699 = vmatprep.subr.bf16.mxu1 %v1130_v33 }
  0x46   : > { %751 = vmatpush1.bf16.msra.mxu0 %v1171_v43 }
  0x47   : > { %700 = vmatpush1.bf16.msra.mxu1 %v1132_v35  ;;  %752 = vmatprep.subr.bf16.mxu0 %v1175_v45 }
  0x48   : > { %701 = vmatprep.subr.bf16.mxu1 %v1136_v37 }
  0x4a   : > { %753 = vmatpush1.bf16.msra.mxu0 %v1177_v47 }
  0x4b   : > { %702 = vmatpush1.bf16.msra.mxu1 %v1138_v39 }
  0x4c   : > { %703 = vmatprep.subr.bf16.mxu1 %v1142_v41  ;;  %v819_v41 = vld [vmem:[%s1428_s2] sm:$0xff] (!%p1050_p11) }
  0x4d   : > { %771 = vmatmul.mubr.bf16.vlgmr.msra.gmra.mrb[0].mxu0 %v1181_v50  ;;  %v822_v50 = vld [vmem:[%s1428_s2 + $0x18] sm:$0xff] (!%p1050_p11) }
  0x4e   : > { %780 = vmatprep.mubr.bf16.mxu0 %v1230_v11  ;;  %v350_v11 = vld [vmem:[#allocation2 + $0x8] sm:$0xff] }
  0x4f   : > { %704 = vmatpush1.bf16.msra.mxu1 %v1144_v42 }
  0x50   : > { %705 = vmatprep.subr.bf16.mxu1 %v1148_v46  ;;  %v821_v46 = vld [vmem:[%s1428_s2 + $0x10] sm:$0xff] (!%p1050_p11) }
  0x53   : > { %706 = vmatpush1.bf16.msra.mxu1 %v1150_v48 }
  0x54   : > { %707 = vmatprep.subr.bf16.mxu1 %v1154_v49 }
  0x55   : > { %781 = vmatmul.mubr.bf16.gmra.mrb[4].mxu0 %v1185_v55  ;;  %v824_v55 = vld [vmem:[%s1428_s2 + $0x28] sm:$0xff] (!%p1050_p11) }
  0x57   : > { %708 = vmatpush1.bf16.msra.mxu1 %v1156_v51 }
  0x58   : > { %709 = vmatprep.subr.bf16.mxu1 %v1160_v52 }
  0x5b   : > { %710 = vmatpush1.bf16.msra.mxu1 %v1162_v53  ;;  %v823_v53 = vld [vmem:[%s1428_s2 + $0x20] sm:$0xff] (!%p1050_p11) }
  0x5c   : > { %711 = vmatprep.subr.bf16.mxu1 %v1166_v54 }
  0x5f   : > { %712 = vmatpush1.bf16.msra.mxu1 %v1168_v56 }
  0x60   : > { %713 = vmatprep.subr.bf16.mxu1 %v1172_v57 }
  0x63   : > { %714 = vmatpush1.bf16.msra.mxu1 %v1174_v58 }
  0x64   : > { %715 = vmatprep.subr.bf16.mxu1 %v1178_v59  ;;  %v825_v59 = vld [vmem:[%s1428_s2 + $0x30] sm:$0xff] (!%p1050_p11) }
  0x67   : > { %716 = vmatpush1.bf16.msra.mxu1 %v1180_v60 }
  0x6a   : > { %718 = vmatmul.mubr.bf16.vlgmr.msra.gmra.mrb[0].mxu1 %v1182_v61 }
  0x6b   : > { %727 = vmatprep.mubr.bf16.mxu1 %v1186_v62  ;;  %v826_v62 = vld [vmem:[%s1428_s2 + $0x38] sm:$0xff] (!%p1050_p11) }
  0x72   : > { %728 = vmatmul.mubr.bf16.gmra.mrb[4].mxu1 %v1188_v63 }
 0x120   : > { %v772_v0 = vpop.f32.mrb[0].mxu0 }
 0x121   : > { %v774_v1 = vpop.f32.mrb[1].mxu0 }
 0x122   : > { %v776_v2 = vpop.f32.mrb[2].mxu0 }
 0x123   : > { %v778_v3 = vpop.f32.mrb[3].mxu0 }
 0x128   : > { %v782_v4 = vpop.f32.mrb[4].mxu0 }
 0x129   : > { %v784_v5 = vpop.f32.mrb[5].mxu0 }
 0x12a   : > { %v786_v6 = vpop.f32.mrb[6].mxu0 }
 0x12b   : > { %v788_v7 = vpop.f32.mrb[7].mxu0 }
 0x13d   : > { %v719_v9 = vpop.f32.mrb[0].mxu1 }
 0x13e   : > { %v773_v10 = vadd.f32 %v772_v0, %v719_v9  ;;  %v721_v12 = vpop.f32.mrb[1].mxu1 }
 0x13f   : > { %v775_v13 = vadd.f32 %v774_v1, %v721_v12  ;;  %v723_v15 = vpop.f32.mrb[2].mxu1 }
 0x140   : > { %v791_v16 = vadd.f32 %v773_v10, %v349_v8  ;;  %v777_v17 = vadd.f32 %v776_v2, %v723_v15  ;;  %v725_v19 = vpop.f32.mrb[3].mxu1 }
 0x141   : > { %v792_v20 = vadd.f32 %v775_v13, %v350_v11  ;;  %v779_v21 = vadd.f32 %v778_v3, %v725_v19 }
 0x142   : > { %799 = vst [vmem:[#allocation2] sm:$0xff] %v791_v16  ;;  %v793_v22 = vadd.f32 %v777_v17, %v351_v14 }
 0x143   : > { %800 = vst [vmem:[#allocation2 + $0x8] sm:$0xff] %v792_v20  ;;  %v794_v23 = vadd.f32 %v779_v21, %v352_v18 }
 0x144   : > { %801 = vst [vmem:[#allocation2 + $0x10] sm:$0xff] %v793_v22 }
 0x145   : > { %802 = vst [vmem:[#allocation2 + $0x18] sm:$0xff] %v794_v23  ;;  %v729_v25 = vpop.f32.mrb[4].mxu1 }
 0x146   : > { %v783_v26 = vadd.f32 %v782_v4, %v729_v25  ;;  %v731_v28 = vpop.f32.mrb[5].mxu1 }
 0x147   : > { %v785_v29 = vadd.f32 %v784_v5, %v731_v28  ;;  %v733_v31 = vpop.f32.mrb[6].mxu1  ;;  %810 = sbr.rel (%p1050_p11) target bundleno = 344 (0x158), region = 66 }
 0x148   : > { %v795_v32 = vadd.f32 %v783_v26, %v353_v24  ;;  %v787_v33 = vadd.f32 %v786_v6, %v733_v31  ;;  %v735_v35 = vpop.f32.mrb[7].mxu1 }
 0x149   : > { %v796_v36 = vadd.f32 %v785_v29, %v354_v27  ;;  %v789_v37 = vadd.f32 %v788_v7, %v735_v35  ;;  %v811_v40 = vld [vmem:[#allocation2] sm:$0xff] (!%p1050_p11) }
 0x14a   : > { %803 = vst [vmem:[#allocation2 + $0x20] sm:$0xff] %v795_v32  ;;  %v797_v38 = vadd.f32 %v787_v33, %v355_v30  ;;  %v812_v42 = vld [vmem:[#allocation2 + $0x8] sm:$0xff] (!%p1050_p11)  ;;  %v827_v43 = vadd.f32 (!%p1050_p11), %v819_v41, %v811_v40 }
 0x14b   : > { %804 = vst [vmem:[#allocation2 + $0x28] sm:$0xff] %v796_v36  ;;  %v798_v39 = vadd.f32 %v789_v37, %v356_v34  ;;  %v813_v45 = vld [vmem:[#allocation2 + $0x10] sm:$0xff] (!%p1050_p11)  ;;  %v828_v47 = vadd.f32 (!%p1050_p11), %v820_v44, %v812_v42 }
 0x14c   : > { %805 = vst [vmem:[#allocation2 + $0x30] sm:$0xff] %v797_v38  ;;  %v829_v48 = vadd.f32 (!%p1050_p11), %v821_v46, %v813_v45  ;;  %v814_v49 = vld [vmem:[#allocation2 + $0x18] sm:$0xff] (!%p1050_p11)  ;;  %835 = vst [vmem:[%s1429_s3] sm:$0xff] (!%p1050_p11), %v827_v43 }
 0x14d   : > { %806 = vst [vmem:[#allocation2 + $0x38] sm:$0xff] %v798_v39  ;;  %v830_v52 = vadd.f32 (!%p1050_p11), %v822_v50, %v814_v49  ;;  %836 = vst [vmem:[%s1429_s3 + $0x8] sm:$0xff] (!%p1050_p11), %v828_v47 }
 0x14e   : > { %837 = vst [vmem:[%s1429_s3 + $0x10] sm:$0xff] %v829_v48 }
 0x14f   : > { %838 = vst [vmem:[%s1429_s3 + $0x18] sm:$0xff] %v830_v52 }
 0x151   : > { %v815_v51 = vld [vmem:[#allocation2 + $0x20] sm:$0xff] }
 0x152   : > { %v816_v54 = vld [vmem:[#allocation2 + $0x28] sm:$0xff]  ;;  %v831_v56 = vadd.f32 %v823_v53, %v815_v51 }
 0x153   : > { %v832_v57 = vadd.f32 %v824_v55, %v816_v54  ;;  %v817_v58 = vld [vmem:[#allocation2 + $0x30] sm:$0xff] }
 0x154   : > { %v818_v60 = vld [vmem:[#allocation2 + $0x38] sm:$0xff]  ;;  %v833_v61 = vadd.f32 %v825_v59, %v817_v58  ;;  %839 = vst [vmem:[%s1429_s3 + $0x20] sm:$0xff] %v831_v56 }
 0x155   : > { %840 = vst [vmem:[%s1429_s3 + $0x28] sm:$0xff] %v832_v57  ;;  %v834_v63 = vadd.f32 %v826_v62, %v818_v60 }
 0x156   : > { %841 = vst [vmem:[%s1429_s3 + $0x30] sm:$0xff] %v833_v61 }
 0x157   : > { %842 = vst [vmem:[%s1429_s3 + $0x38] sm:$0xff] %v834_v63 }
 0x158 PF: > { %s13_s16 = sadd.s32 1, %s1227_s16   ;;  %s1430_s12 = smov %s1215_s13 }
 0x159   : > { %p10_p12 = scmp.ge.s32.totalorder %s13_s16, 8   ;;  %s1431_s13 = smov %s1286_s20 }
 0x15a   : > { %s1432_s14 = smov %s1223_s15  ;;  %s1433_s15 = smov %s1435_s17 }
 0x15b   :  { %12 = sbr.rel (!%p10_p12) target bundleno = 3 (0x3), region = 113 }

// kernel: wide_resnet_ae_forward.41
= control target key start
LH: loop header
LB: loop body
LE: loop exit
PB: predicated region body
PF: predicated region fallthrough
CT: control target
= control target key end

     0   :  { %v24_v0 = vlaneseq  ;;  %s172_s1 = inlined_call_operand.vmem [shape: f32[1,256], index: 1, kind: input, shape index: {}]   ;;  %s173_s2 = inlined_call_operand.vmem [shape: f32[1,256], index: 2, kind: input, shape index: {}]   ;;  %s174_s0 = inlined_call_operand.vmem [shape: f32[32,256], index: 0, kind: input, shape index: {}]   ;;  %s175_s3 = inlined_call_operand.vmem [shape: bf16[32,256], index: 3, kind: output, shape index: {}]  }
   0x1   :  { %v22_v2 = vld [vmem:[%s172_s1] sm:$0x3]  ;;  %v15_v5 = vld [vmem:[%s174_s0 + $0x8] sm:$0xff]  ;;  %v16_v8 = vld [vmem:[%s174_s0 + $0x10] sm:$0xff] }
   0x2   :  { %v25_v1 = vshrl.u32 %v24_v0, 7  ;;  %v42_v3 = vld [vmem:[%s173_s2] sm:$0x3]  ;;  %v17_v9 = vld [vmem:[%s174_s0 + $0x18] sm:$0xff]  ;;  %v19_v15 = vld [vmem:[%s174_s0 + $0x28] sm:$0xff] }
   0x3   :  { %v14_v4 = vld [vmem:[%s174_s0] sm:$0xff]  ;;  %v20_v16 = vld [vmem:[%s174_s0 + $0x30] sm:$0xff]  ;;  %v21_v17 = vld [vmem:[%s174_s0 + $0x38] sm:$0xff] }
   0x4   :  { %v26_v6 = vsub.s32 0, %v25_v1  ;;  %v30_v7 = vsub.s32 1, %v25_v1  ;;  %v18_v10 = vld [vmem:[%s174_s0 + $0x20] sm:$0xff] }
   0x6   :  { %v27_v11 = vrot.slane %v22_v2, %v26_v6  ;;  %v31_v12 = vrot.slane %v22_v2, %v30_v7  ;;  %v47_v13 = vrot.slane %v42_v3, %v26_v6  ;;  %v51_v14 = vrot.slane %v42_v3, %v30_v7 }
   0x8   :  { %v34_v18 = vmul.f32 %v27_v11, %v14_v4  ;;  %v35_v19 = vmul.f32 %v31_v12, %v15_v5  ;;  %v36_v20 = vmul.f32 %v27_v11, %v16_v8  ;;  %v37_v21 = vmul.f32 %v31_v12, %v17_v9 }
   0x9   :  { %v38_v22 = vmul.f32 %v27_v11, %v18_v10  ;;  %v39_v23 = vmul.f32 %v31_v12, %v19_v15  ;;  %v40_v24 = vmul.f32 %v27_v11, %v20_v16  ;;  %v41_v25 = vmul.f32 %v31_v12, %v21_v17 }
   0xa   :  { %v54_v26 = vadd.f32 %v47_v13, %v34_v18  ;;  %v55_v27 = vadd.f32 %v51_v14, %v35_v19  ;;  %v56_v28 = vadd.f32 %v47_v13, %v36_v20  ;;  %v57_v29 = vadd.f32 %v51_v14, %v37_v21 }
   0xb   :  { %v58_v30 = vadd.f32 %v47_v13, %v38_v22  ;;  %v59_v31 = vadd.f32 %v51_v14, %v39_v23  ;;  %v60_v32 = vadd.f32 %v47_v13, %v40_v24  ;;  %v61_v33 = vadd.f32 %v51_v14, %v41_v25 }
   0xc   :  { %v62_v34 = vmax.f32 %v54_v26, 0.0  ;;  %v63_v35 = vmax.f32 %v55_v27, 0.0  ;;  %v64_v36 = vmax.f32 %v56_v28, 0.0  ;;  %v65_v37 = vmax.f32 %v57_v29, 0.0 }
   0xd   :  { %v66_v38 = vmax.f32 %v58_v30, 0.0  ;;  %v67_v39 = vmax.f32 %v59_v31, 0.0  ;;  %v68_v40 = vmax.f32 %v60_v32, 0.0  ;;  %v69_v41 = vmax.f32 %v61_v33, 0.0 }
   0xe   :  { %v106_v42 = vpack.c.bf16 %v63_v35, %v62_v34  ;;  %v107_v43 = vpack.c.bf16 %v65_v37, %v64_v36 }
   0xf   :  { %v108_v44 = vpack.c.bf16 %v67_v39, %v66_v38  ;;  %v109_v45 = vpack.c.bf16 %v69_v41, %v68_v40 }
  0x10   :  { %94 = vst [vmem:[%s175_s3] sm:$0xff] %v106_v42  ;;  %95 = vst [vmem:[%s175_s3 + $0x8] sm:$0xff] %v107_v43 }
  0x11   :  { %96 = vst [vmem:[%s175_s3 + $0x10] sm:$0xff] %v108_v44  ;;  %97 = vst [vmem:[%s175_s3 + $0x18] sm:$0xff] %v109_v45 }

// kernel: wide_resnet_ae_forward.42
= control target key start
LH: loop header
LB: loop body
LE: loop exit
PB: predicated region body
PF: predicated region fallthrough
CT: control target
= control target key end

     0   :  { %s1231_s15 = smov 0   ;;  %s1233_s16 = smov 0   ;;  %s1365_s0 = inlined_call_operand.vmem [shape: bf16[16,2304], index: 0, kind: input, shape index: {}]   ;;  %s1366_s1 = inlined_call_operand.vmem [shape: bf16[2304,256], index: 1, kind: input, shape index: {}]   ;;  %s1367_s2 = inlined_call_operand.vmem [shape: f32[1,256], index: 2, kind: input, shape index: {}]   ;;  %s1368_s3 = inlined_call_operand.vmem [shape: f32[1,256], index: 3, kind: input, shape index: {}]   ;;  %s1369_s4 = inlined_call_operand.vmem [shape: bf16[16,256], index: 4, kind: output, shape index: {}]  }
   0x1   :  { %s1235_s17 = smov 0   ;;  %s1237_s18 = smov 0  }
   0x2   :  { %s1239_s19 = smov 0  }
   0x3 LB: > { %s26_s20 = sadd.s32 1, %s1198_s18  ;;  %p49_p1 = scmp.ne.s32.totalorder %s1190_s16, %s1186_s15  ;;  %s1202_s19 = sphi %s1239_s19, %s14_s19   ;;  %s1198_s18 = sphi %s1237_s18, %s1373_s18   ;;  %s1194_s17 = sphi %s1235_s17, %s1372_s17   ;;  %s1190_s16 = sphi %s1233_s16, %s1371_s16   ;;  %s1186_s15 = sphi %s1231_s15, %s1370_s15  }
   0x4   : > { %p27_p0 = scmp.ge.s32.totalorder %s26_s20, 6  ;;  %p50_p2 = scmp.eq.s32.totalorder %s1202_s19, 0 }
   0x5   : > { %s42_s22 = sadd.s32 1, %s1190_s16  ;;  %p968_p5 = scmp.ge.s32.totalorder %s1202_s19, 6 }
   0x6   : > { %s1375_s20 = smov (%p27_p0, %s26_s20), 0  ;;  %p51_p3 = por %p50_p2, %p49_p1 }
   0x7   : > { %s38_s21 = ssub.s32 %s1198_s18, %s1375_s20  ;;  %199 = sbr.rel (%p968_p5) target bundleno = 21 (0x15), region = 24 }
   0x8   : > { %p40_p4 = scmp.eq.s32.totalorder %s38_s21, 0 }
   0xa   : > { %s1266_s23 = scalar_select %p40_p4, %s1190_s16, %s42_s22  }
   0xe   : > { %202 = sbr.rel (!%p51_p3) target bundleno = 21 (0x15), region = 28  ;;  %s204_s24 = sand.u32 (%p51_p3), 1, %s1190_s16  }
   0xf   : > { %s1036_s25 = smul.u32 (%p51_p3), 12, %s1198_s18 }
  0x10   : > { %s1044_s26 = smul.u32 (%p51_p3), 24, %s204_s24 }
  0x11   : > { %s212_s29 = scalar_lea.vmem (%p51_p3), %s1365_s0, %s1036_s25 }
  0x12   : > { %v227_v0 = vld [vmem:[%s212_s29] sm:$0xff] (%p51_p3)  ;;  %v229_v1 = vld [vmem:[%s212_s29 + $0x48] sm:$0xff] (%p51_p3)  ;;  %s206_s30 = scalar_lea.vmem (%p51_p3), [#allocation3], %s1044_s26  ;;  %v972_v3 = vld [vmem:[%s212_s29 + $0x50] sm:$0xf] (%p51_p3) }
  0x13   : > { %v970_v2 = vld [vmem:[%s212_s29 + $0x8] sm:$0xf] (%p51_p3)  ;;  %228 = vst [vmem:[%s206_s30] sm:$0xff] (%p51_p3), %v227_v0  ;;  %230 = vst [vmem:[%s206_s30 + $0xc] sm:$0xff] (%p51_p3), %v229_v1 }
  0x14   : > { %971 = vst [vmem:[%s206_s30 + $0x8] sm:$0xf] (%p51_p3), %v970_v2  ;;  %973 = vst [vmem:[%s206_s30 + $0x14] sm:$0xf] (%p51_p3), %v972_v3 }
  0x15 PF: > { %p974_p6 = scmp.ge.s32.totalorder %s1202_s19, 1  ;;  %p261_p7 = scmp.lt.s32.totalorder %s1202_s19, 7 }
  0x17   : > { %p262_p8 = pnand %p974_p6, %p261_p7 }
  0x18   : > { %s268_s5 = sand.u32 (!%p262_p8), 1, %s1186_s15   ;;  %s318_s6 = smul.u32 (!%p262_p8), 48, %s1194_s17 }
  0x19   : > { %265 = sbr.rel (%p262_p8) target bundleno = 340 (0x154), region = 58  ;;  %p977_p10 = scmp.ne.s32.totalorder (!%p262_p8), %s1194_s17, 0 }
  0x1a   : > { %s1045_s7 = smul.u32 (!%p262_p8), 24, %s268_s5  ;;  %p320_p9 = scmp.lt.s32.totalorder (!%p262_p8), %s318_s6, 287 }
  0x1c   : > { %s1283_s12 = scalar_lea.vmem (!%p262_p8), [#allocation3], %s1045_s7 }
  0x20   : > { %s1377_s6 = smov (!%p320_p9, %s318_s6), 287  ;;  %356 = sbr.rel (%p977_p10) target bundleno = 39 (0x27), region = 66 }
  0x21   : > { %s1037_s8 = sshll.u32 %s1377_s6, 3  ;;  %v1204_v4 = vmov (!%p977_p10), 0.0  }
  0x22   : > { %s1281_s11 = scalar_lea.vmem %s1366_s1, %s1037_s8  ;;  %357 = vst [vmem:[#allocation2] sm:$0xff] (!%p977_p10), %v1204_v4  ;;  %358 = vst [vmem:[#allocation2 + $0x8] sm:$0xff] (!%p977_p10), %v1204_v4 }
  0x23   : > { %359 = vst [vmem:[#allocation2 + $0x10] sm:$0xff] (!%p977_p10), %v1204_v4  ;;  %360 = vst [vmem:[#allocation2 + $0x18] sm:$0xff] (!%p977_p10), %v1204_v4 }
  0x27 PF: > { %v1088_v5 = vld [vmem:[%s1281_s11 + $0x4] ss:$8 sps:$4 sm:$0xff]   ;;  %v1090_v6 = vld [vmem:[%s1281_s11] ss:$8 sps:$4 sm:$0xff]   ;;  %v1205_v7 = vmov 0   ;;  %p1029_p11 = scmp.ne.s32.totalorder %s1194_s17, 5 }
  0x28   : > { %748 = vmatprep.mubr.bf16.mxu0 %v1205_v7  ;;  %673 = vmatprep.subr.bf16.mxu1 %v1088_v5  ;;  %v1091_v8 = vld [vmem:[%s1281_s11 + $0x14] ss:$8 sps:$4 sm:$0xff]   ;;  %v1093_v9 = vld [vmem:[%s1281_s11 + $0x10] ss:$8 sps:$4 sm:$0xff]   ;;  %v1094_v10 = vld [vmem:[%s1281_s11 + $0x24] ss:$8 sps:$4 sm:$0xff]  }
  0x29   : > { %674 = vmatpush1.bf16.msra.mxu1 %v1090_v6  ;;  %v1096_v11 = vld [vmem:[%s1281_s11 + $0x20] ss:$8 sps:$4 sm:$0xff]   ;;  %v1097_v12 = vld [vmem:[%s1281_s11 + $0x34] ss:$8 sps:$4 sm:$0xff]   ;;  %v1099_v13 = vld [vmem:[%s1281_s11 + $0x30] ss:$8 sps:$4 sm:$0xff]  }
  0x2a   : > { %675 = vmatprep.subr.bf16.mxu1 %v1091_v8  ;;  %v1112_v14 = vld [vmem:[%s1281_s11 + $0x104] ss:$8 sps:$4 sm:$0xff]   ;;  %v1114_v15 = vld [vmem:[%s1281_s11 + $0x100] ss:$8 sps:$4 sm:$0xff]   ;;  %v1118_v17 = vld [vmem:[%s1281_s11 + $0x114] ss:$8 sps:$4 sm:$0xff]  }
  0x2b   : > { %v1100_v16 = vld [vmem:[%s1281_s11 + $0x44] ss:$8 sps:$4 sm:$0xff]   ;;  %716 = vmatprep.subr.bf16.mxu0 %v1112_v14  ;;  %v1120_v18 = vld [vmem:[%s1281_s11 + $0x110] ss:$8 sps:$4 sm:$0xff]   ;;  %v1102_v19 = vld [vmem:[%s1281_s11 + $0x40] ss:$8 sps:$4 sm:$0xff]  }
  0x2c   : > { %717 = vmatpush1.bf16.msra.mxu0 %v1114_v15  ;;  %v1103_v20 = vld [vmem:[%s1281_s11 + $0x54] ss:$8 sps:$4 sm:$0xff]   ;;  %v1124_v21 = vld [vmem:[%s1281_s11 + $0x124] ss:$8 sps:$4 sm:$0xff]   ;;  %v1126_v22 = vld [vmem:[%s1281_s11 + $0x120] ss:$8 sps:$4 sm:$0xff]  }
  0x2d   : > { %676 = vmatpush1.bf16.msra.mxu1 %v1093_v9  ;;  %718 = vmatprep.subr.bf16.mxu0 %v1118_v17  ;;  %v1105_v23 = vld [vmem:[%s1281_s11 + $0x50] ss:$8 sps:$4 sm:$0xff]   ;;  %v1130_v24 = vld [vmem:[%s1281_s11 + $0x134] ss:$8 sps:$4 sm:$0xff]   ;;  %v1106_v25 = vld [vmem:[%s1281_s11 + $0x64] ss:$8 sps:$4 sm:$0xff]  }
  0x2e   : > { %677 = vmatprep.subr.bf16.mxu1 %v1094_v10  ;;  %v1132_v26 = vld [vmem:[%s1281_s11 + $0x130] ss:$8 sps:$4 sm:$0xff]   ;;  %v1108_v27 = vld [vmem:[%s1281_s11 + $0x60] ss:$8 sps:$4 sm:$0xff]   ;;  %v1136_v28 = vld [vmem:[%s1281_s11 + $0x144] ss:$8 sps:$4 sm:$0xff]  }
  0x2f   : > { %v1109_v29 = vld [vmem:[%s1281_s11 + $0x74] ss:$8 sps:$4 sm:$0xff]   ;;  %v1138_v30 = vld [vmem:[%s1281_s11 + $0x140] ss:$8 sps:$4 sm:$0xff]   ;;  %v1111_v31 = vld [vmem:[%s1281_s11 + $0x70] ss:$8 sps:$4 sm:$0xff]  }
  0x30   : > { %719 = vmatpush1.bf16.msra.mxu0 %v1120_v18  ;;  %v1142_v32 = vld [vmem:[%s1281_s11 + $0x154] ss:$8 sps:$4 sm:$0xff]   ;;  %v1115_v33 = vld [vmem:[%s1281_s11 + $0x84] ss:$8 sps:$4 sm:$0xff]   ;;  %v1144_v34 = vld [vmem:[%s1281_s11 + $0x150] ss:$8 sps:$4 sm:$0xff]  }
  0x31   : > { %678 = vmatpush1.bf16.msra.mxu1 %v1096_v11  ;;  %720 = vmatprep.subr.bf16.mxu0 %v1124_v21  ;;  %v1117_v35 = vld [vmem:[%s1281_s11 + $0x80] ss:$8 sps:$4 sm:$0xff]   ;;  %v1148_v36 = vld [vmem:[%s1281_s11 + $0x164] ss:$8 sps:$4 sm:$0xff]   ;;  %v1121_v37 = vld [vmem:[%s1281_s11 + $0x94] ss:$8 sps:$4 sm:$0xff]  }
  0x32   : > { %679 = vmatprep.subr.bf16.mxu1 %v1097_v12  ;;  %v1150_v38 = vld [vmem:[%s1281_s11 + $0x160] ss:$8 sps:$4 sm:$0xff]   ;;  %v1123_v40 = vld [vmem:[%s1281_s11 + $0x90] ss:$8 sps:$4 sm:$0xff]   ;;  %v1154_v41 = vld [vmem:[%s1281_s11 + $0x174] ss:$8 sps:$4 sm:$0xff]  }
  0x33   : > { %v1163_v39 = vld [vmem:[%s1283_s12 + $0x4] ss:$12 sps:$4 sm:$0xff]   ;;  %v1160_v46 = vld [vmem:[%s1283_s12 + $0x8] ss:$12 sps:$4 sm:$0xff]   ;;  %v1161_v56 = vld [vmem:[%s1283_s12] ss:$12 sps:$4 sm:$0xff]  }
  0x34   : > { %721 = vmatpush1.bf16.msra.mxu0 %v1126_v22  ;;  %v1127_v42 = vld [vmem:[%s1281_s11 + $0xa4] ss:$8 sps:$4 sm:$0xff]   ;;  %705 = vmatprep.mubr.bf16.mxu1 %v1163_v39  ;;  %v1156_v43 = vld [vmem:[%s1281_s11 + $0x170] ss:$8 sps:$4 sm:$0xff]   ;;  %v1129_v44 = vld [vmem:[%s1281_s11 + $0xa0] ss:$8 sps:$4 sm:$0xff]  }
  0x35   : > { %680 = vmatpush1.bf16.msra.mxu1 %v1099_v13  ;;  %722 = vmatprep.subr.bf16.mxu0 %v1130_v24  ;;  %v1133_v45 = vld [vmem:[%s1281_s11 + $0xb4] ss:$8 sps:$4 sm:$0xff]   ;;  %v1135_v47 = vld [vmem:[%s1281_s11 + $0xb0] ss:$8 sps:$4 sm:$0xff]   ;;  %v1139_v48 = vld [vmem:[%s1281_s11 + $0xc4] ss:$8 sps:$4 sm:$0xff]   ;;  %v777_v13 = vlaneseq (!%p1029_p11) }
  0x36   : > { %681 = vmatprep.subr.bf16.mxu1 %v1100_v16  ;;  %v1141_v49 = vld [vmem:[%s1281_s11 + $0xc0] ss:$8 sps:$4 sm:$0xff]   ;;  %v1145_v50 = vld [vmem:[%s1281_s11 + $0xd4] ss:$8 sps:$4 sm:$0xff]   ;;  %v1147_v51 = vld [vmem:[%s1281_s11 + $0xd0] ss:$8 sps:$4 sm:$0xff]  }
  0x37   : > { %v1151_v52 = vld [vmem:[%s1281_s11 + $0xe4] ss:$8 sps:$4 sm:$0xff]   ;;  %v1153_v53 = vld [vmem:[%s1281_s11 + $0xe0] ss:$8 sps:$4 sm:$0xff]   ;;  %v1157_v54 = vld [vmem:[%s1281_s11 + $0xf4] ss:$8 sps:$4 sm:$0xff]  }
  0x38   : > { %723 = vmatpush1.bf16.msra.mxu0 %v1132_v26  ;;  %v1159_v55 = vld [vmem:[%s1281_s11 + $0xf0] ss:$8 sps:$4 sm:$0xff]   ;;  %v361_v61 = vld [vmem:[#allocation2] sm:$0xff]  ;;  %v362_v0 = vld [vmem:[#allocation2 + $0x8] sm:$0xff]  ;;  %v778_v14 = vshrl.u32 (!%p1029_p11), %v777_v13, 7 }
  0x39   : > { %682 = vmatpush1.bf16.msra.mxu1 %v1102_v19  ;;  %724 = vmatprep.subr.bf16.mxu0 %v1136_v28  ;;  %v363_v3 = vld [vmem:[#allocation2 + $0x10] sm:$0xff]  ;;  %v364_v7 = vld [vmem:[#allocation2 + $0x18] sm:$0xff]  ;;  %v775_v15 = vld [vmem:[%s1367_s2] sm:$0x3] (!%p1029_p11) }
  0x3a   : > { %683 = vmatprep.subr.bf16.mxu1 %v1103_v20  ;;  %v791_v16 = vld [vmem:[%s1368_s3] sm:$0x3] (!%p1029_p11)  ;;  %v779_v18 = vsub.s32 (!%p1029_p11), 0, %v778_v14  ;;  %v783_v19 = vsub.s32 (!%p1029_p11), 1, %v778_v14 }
  0x3c   : > { %725 = vmatpush1.bf16.msra.mxu0 %v1138_v30  ;;  %v784_v24 = vrot.slane (!%p1029_p11), %v775_v15, %v783_v19  ;;  %v800_v26 = vrot.slane (!%p1029_p11), %v791_v16, %v783_v19 }
  0x3d   : > { %684 = vmatpush1.bf16.msra.mxu1 %v1105_v23  ;;  %726 = vmatprep.subr.bf16.mxu0 %v1142_v32  ;;  %v780_v23 = vrot.slane (!%p1029_p11), %v775_v15, %v779_v18 }
  0x3e   : > { %685 = vmatprep.subr.bf16.mxu1 %v1106_v25  ;;  %v796_v25 = vrot.slane (!%p1029_p11), %v791_v16, %v779_v18 }
  0x40   : > { %727 = vmatpush1.bf16.msra.mxu0 %v1144_v34 }
  0x41   : > { %686 = vmatpush1.bf16.msra.mxu1 %v1108_v27  ;;  %728 = vmatprep.subr.bf16.mxu0 %v1148_v36 }
  0x42   : > { %687 = vmatprep.subr.bf16.mxu1 %v1109_v29 }
  0x44   : > { %729 = vmatpush1.bf16.msra.mxu0 %v1150_v38 }
  0x45   : > { %688 = vmatpush1.bf16.msra.mxu1 %v1111_v31  ;;  %730 = vmatprep.subr.bf16.mxu0 %v1154_v41 }
  0x46   : > { %689 = vmatprep.subr.bf16.mxu1 %v1115_v33 }
  0x48   : > { %731 = vmatpush1.bf16.msra.mxu0 %v1156_v43 }
  0x49   : > { %690 = vmatpush1.bf16.msra.mxu1 %v1117_v35 }
  0x4a   : > { %691 = vmatprep.subr.bf16.mxu1 %v1121_v37 }
  0x4b   : > { %749 = vmatmul.mubr.bf16.vlgmr.msra.gmra.mrb[0].mxu0 %v1160_v46 }
  0x4d   : > { %692 = vmatpush1.bf16.msra.mxu1 %v1123_v40 }
  0x4e   : > { %693 = vmatprep.subr.bf16.mxu1 %v1127_v42 }
  0x51   : > { %694 = vmatpush1.bf16.msra.mxu1 %v1129_v44 }
  0x52   : > { %695 = vmatprep.subr.bf16.mxu1 %v1133_v45 }
  0x55   : > { %696 = vmatpush1.bf16.msra.mxu1 %v1135_v47 }
  0x56   : > { %697 = vmatprep.subr.bf16.mxu1 %v1139_v48 }
  0x59   : > { %698 = vmatpush1.bf16.msra.mxu1 %v1141_v49 }
  0x5a   : > { %699 = vmatprep.subr.bf16.mxu1 %v1145_v50 }
  0x5d   : > { %700 = vmatpush1.bf16.msra.mxu1 %v1147_v51 }
  0x5e   : > { %701 = vmatprep.subr.bf16.mxu1 %v1151_v52 }
  0x61   : > { %702 = vmatpush1.bf16.msra.mxu1 %v1153_v53 }
  0x62   : > { %703 = vmatprep.subr.bf16.mxu1 %v1157_v54 }
  0x65   : > { %704 = vmatpush1.bf16.msra.mxu1 %v1159_v55 }
  0x68   : > { %706 = vmatmul.mubr.bf16.vlgmr.msra.gmra.mrb[0].mxu1 %v1161_v56 }
 0x11e   : > { %v750_v57 = vpop.f32.mrb[0].mxu0 }
 0x11f   : > { %v752_v58 = vpop.f32.mrb[1].mxu0 }
 0x120   : > { %v754_v59 = vpop.f32.mrb[2].mxu0 }
 0x121   : > { %v756_v60 = vpop.f32.mrb[3].mxu0 }
 0x13b   : > { %v707_v62 = vpop.f32.mrb[0].mxu1 }
 0x13c   : > { %v751_v63 = vadd.f32 %v750_v57, %v707_v62  ;;  %v709_v1 = vpop.f32.mrb[1].mxu1 }
 0x13d   : > { %v753_v2 = vadd.f32 %v752_v58, %v709_v1  ;;  %v711_v4 = vpop.f32.mrb[2].mxu1  ;;  %770 = sbr.rel (%p1029_p11) target bundleno = 340 (0x154), region = 70 }
 0x13e   : > { %v759_v5 = vadd.f32 %v751_v63, %v361_v61  ;;  %v755_v6 = vadd.f32 %v754_v59, %v711_v4  ;;  %v713_v8 = vpop.f32.mrb[3].mxu1 }
 0x13f   : > { %v760_v9 = vadd.f32 %v753_v2, %v362_v0  ;;  %v757_v10 = vadd.f32 %v756_v60, %v713_v8 }
 0x140   : > { %763 = vst [vmem:[#allocation2] sm:$0xff] %v759_v5  ;;  %v761_v11 = vadd.f32 %v755_v6, %v363_v3 }
 0x141   : > { %764 = vst [vmem:[#allocation2 + $0x8] sm:$0xff] %v760_v9  ;;  %v762_v12 = vadd.f32 %v757_v10, %v364_v7 }
 0x142   : > { %765 = vst [vmem:[#allocation2 + $0x10] sm:$0xff] %v761_v11 }
 0x143   : > { %766 = vst [vmem:[#allocation2 + $0x18] sm:$0xff] %v762_v12 }
 0x147   : > { %v771_v17 = vld [vmem:[#allocation2] sm:$0xff] }
 0x148   : > { %v772_v20 = vld [vmem:[#allocation2 + $0x8] sm:$0xff]  ;;  %v787_v27 = vmul.f32 %v780_v23, %v771_v17 }
 0x149   : > { %v773_v21 = vld [vmem:[#allocation2 + $0x10] sm:$0xff]  ;;  %v788_v28 = vmul.f32 %v784_v24, %v772_v20 }
 0x14a   : > { %v774_v22 = vld [vmem:[#allocation2 + $0x18] sm:$0xff]  ;;  %v789_v29 = vmul.f32 %v780_v23, %v773_v21  ;;  %v803_v31 = vadd.f32 %v796_v25, %v787_v27 }
 0x14b   : > { %v790_v30 = vmul.f32 %v784_v24, %v774_v22  ;;  %v804_v32 = vadd.f32 %v800_v26, %v788_v28 }
 0x14c   : > { %v805_v33 = vadd.f32 %v796_v25, %v789_v29  ;;  %v807_v35 = vmax.f32 %v803_v31, 0.0 }
 0x14d   : > { %v806_v34 = vadd.f32 %v800_v26, %v790_v30  ;;  %v808_v36 = vmax.f32 %v804_v32, 0.0 }
 0x14e   : > { %v809_v37 = vmax.f32 %v805_v33, 0.0 }
 0x14f   : > { %v810_v38 = vmax.f32 %v806_v34, 0.0  ;;  %v1038_v39 = vpack.c.bf16 %v808_v36, %v807_v35 }
 0x151   : > { %v1039_v40 = vpack.c.bf16 %v810_v38, %v809_v37  ;;  %823 = vst [vmem:[%s1369_s4] sm:$0xff] %v1038_v39 }
 0x153   : > { %824 = vst [vmem:[%s1369_s4 + $0x8] sm:$0xff] %v1039_v40 }
 0x154 PF: > { %s14_s19 = sadd.s32 1, %s1202_s19   ;;  %s1370_s15 = smov %s1190_s16 }
 0x155   : > { %p11_p12 = scmp.ge.s32.totalorder %s14_s19, 8   ;;  %s1371_s16 = smov %s1266_s23 }
 0x156   : > { %s1372_s17 = smov %s1198_s18  ;;  %s1373_s18 = smov %s1375_s20 }
 0x157   :  { %13 = sbr.rel (!%p11_p12) target bundleno = 3 (0x3), region = 120 }

// kernel: wide_resnet_ae_forward.44
= control target key start
LH: loop header
LB: loop body
LE: loop exit
PB: predicated region body
PF: predicated region fallthrough
CT: control target
= control target key end

     0   :  { %v20_v0 = vlaneseq  ;;  %s120_s1 = inlined_call_operand.vmem [shape: f32[1,256], index: 1, kind: input, shape index: {}]   ;;  %s121_s2 = inlined_call_operand.vmem [shape: f32[1,256], index: 2, kind: input, shape index: {}]   ;;  %s122_s0 = inlined_call_operand.vmem [shape: f32[16,256], index: 0, kind: input, shape index: {}]   ;;  %s123_s3 = inlined_call_operand.vmem [shape: bf16[16,256], index: 3, kind: output, shape index: {}]  }
   0x1   :  { %v18_v2 = vld [vmem:[%s120_s1] sm:$0x3]  ;;  %v15_v7 = vld [vmem:[%s122_s0 + $0x8] sm:$0xff]  ;;  %v16_v8 = vld [vmem:[%s122_s0 + $0x10] sm:$0xff] }
   0x2   :  { %v21_v1 = vshrl.u32 %v20_v0, 7  ;;  %v34_v3 = vld [vmem:[%s121_s2] sm:$0x3]  ;;  %v17_v9 = vld [vmem:[%s122_s0 + $0x18] sm:$0xff] }
   0x3   :  { %v14_v4 = vld [vmem:[%s122_s0] sm:$0xff] }
   0x4   :  { %v22_v5 = vsub.s32 0, %v21_v1  ;;  %v26_v6 = vsub.s32 1, %v21_v1 }
   0x6   :  { %v23_v10 = vrot.slane %v18_v2, %v22_v5  ;;  %v27_v11 = vrot.slane %v18_v2, %v26_v6  ;;  %v39_v12 = vrot.slane %v34_v3, %v22_v5  ;;  %v43_v13 = vrot.slane %v34_v3, %v26_v6 }
   0x8   :  { %v30_v14 = vmul.f32 %v23_v10, %v14_v4  ;;  %v31_v15 = vmul.f32 %v27_v11, %v15_v7  ;;  %v32_v16 = vmul.f32 %v23_v10, %v16_v8  ;;  %v33_v17 = vmul.f32 %v27_v11, %v17_v9 }
   0xa   :  { %v46_v18 = vadd.f32 %v39_v12, %v30_v14  ;;  %v47_v19 = vadd.f32 %v43_v13, %v31_v15  ;;  %v48_v20 = vadd.f32 %v39_v12, %v32_v16  ;;  %v49_v21 = vadd.f32 %v43_v13, %v33_v17 }
   0xc   :  { %v50_v22 = vmax.f32 %v46_v18, 0.0  ;;  %v51_v23 = vmax.f32 %v47_v19, 0.0  ;;  %v52_v24 = vmax.f32 %v48_v20, 0.0  ;;  %v53_v25 = vmax.f32 %v49_v21, 0.0 }
   0xe   :  { %v74_v26 = vpack.c.bf16 %v51_v23, %v50_v22  ;;  %v75_v27 = vpack.c.bf16 %v53_v25, %v52_v24 }
  0x10   :  { %66 = vst [vmem:[%s123_s3] sm:$0xff] %v74_v26  ;;  %67 = vst [vmem:[%s123_s3 + $0x8] sm:$0xff] %v75_v27 }

// kernel: wide_resnet_ae_forward.45
= control target key start
LH: loop header
LB: loop body
LE: loop exit
PB: predicated region body
PF: predicated region fallthrough
CT: control target
= control target key end

     0   :  { %s1048_s15 = smov 0   ;;  %s1050_s16 = smov 0   ;;  %s1155_s0 = inlined_call_operand.vmem [shape: bf16[16,2304], index: 0, kind: input, shape index: {}]   ;;  %s1156_s1 = inlined_call_operand.vmem [shape: bf16[2304,128], index: 1, kind: input, shape index: {}]   ;;  %s1157_s2 = inlined_call_operand.vmem [shape: f32[1,128], index: 2, kind: input, shape index: {}]   ;;  %s1158_s3 = inlined_call_operand.vmem [shape: f32[1,128], index: 3, kind: input, shape index: {}]   ;;  %s1159_s4 = inlined_call_operand.vmem [shape: bf16[16,128], index: 4, kind: output, shape index: {}]  }
   0x1   :  { %s1052_s17 = smov 0   ;;  %s1054_s18 = smov 0  }
   0x2   :  { %s1056_s19 = smov 0  }
   0x3 LB: > { %s26_s20 = sadd.s32 1, %s1014_s18  ;;  %p49_p1 = scmp.ne.s32.totalorder %s1006_s16, %s1002_s15  ;;  %s1018_s19 = sphi %s1056_s19, %s14_s19   ;;  %s1014_s18 = sphi %s1054_s18, %s1163_s18   ;;  %s1010_s17 = sphi %s1052_s17, %s1162_s17   ;;  %s1006_s16 = sphi %s1050_s16, %s1161_s16   ;;  %s1002_s15 = sphi %s1048_s15, %s1160_s15  }
   0x4   : > { %p27_p0 = scmp.ge.s32.totalorder %s26_s20, 6  ;;  %p50_p2 = scmp.eq.s32.totalorder %s1018_s19, 0 }
   0x5   : > { %s42_s22 = sadd.s32 1, %s1006_s16  ;;  %p803_p5 = scmp.ge.s32.totalorder %s1018_s19, 6 }
   0x6   : > { %s1165_s20 = smov (%p27_p0, %s26_s20), 0  ;;  %p51_p3 = por %p50_p2, %p49_p1 }
   0x7   : > { %s38_s21 = ssub.s32 %s1014_s18, %s1165_s20  ;;  %195 = sbr.rel (%p803_p5) target bundleno = 21 (0x15), region = 24 }
   0x8   : > { %p40_p4 = scmp.eq.s32.totalorder %s38_s21, 0 }
   0xa   : > { %s1083_s23 = scalar_select %p40_p4, %s1006_s16, %s42_s22  }
   0xe   : > { %198 = sbr.rel (!%p51_p3) target bundleno = 21 (0x15), region = 28  ;;  %s200_s24 = sand.u32 (%p51_p3), 1, %s1006_s16  }
   0xf   : > { %s848_s25 = smul.u32 (%p51_p3), 12, %s1014_s18 }
  0x10   : > { %s907_s26 = smul.u32 (%p51_p3), 24, %s200_s24 }
  0x11   : > { %s208_s29 = scalar_lea.vmem (%p51_p3), %s1155_s0, %s848_s25 }
  0x12   : > { %v223_v0 = vld [vmem:[%s208_s29] sm:$0xff] (%p51_p3)  ;;  %v225_v1 = vld [vmem:[%s208_s29 + $0x48] sm:$0xff] (%p51_p3)  ;;  %s202_s30 = scalar_lea.vmem (%p51_p3), [#allocation3], %s907_s26  ;;  %v807_v3 = vld [vmem:[%s208_s29 + $0x50] sm:$0xf] (%p51_p3) }
  0x13   : > { %v805_v2 = vld [vmem:[%s208_s29 + $0x8] sm:$0xf] (%p51_p3)  ;;  %224 = vst [vmem:[%s202_s30] sm:$0xff] (%p51_p3), %v223_v0  ;;  %226 = vst [vmem:[%s202_s30 + $0xc] sm:$0xff] (%p51_p3), %v225_v1 }
  0x14   : > { %806 = vst [vmem:[%s202_s30 + $0x8] sm:$0xf] (%p51_p3), %v805_v2  ;;  %808 = vst [vmem:[%s202_s30 + $0x14] sm:$0xf] (%p51_p3), %v807_v3 }
  0x15 PF: > { %p809_p6 = scmp.ge.s32.totalorder %s1018_s19, 1  ;;  %p254_p7 = scmp.lt.s32.totalorder %s1018_s19, 7 }
  0x17   : > { %p255_p8 = pnand %p809_p6, %p254_p7 }
  0x18   : > { %s261_s5 = sand.u32 (!%p255_p8), 1, %s1002_s15   ;;  %s305_s6 = smul.u32 (!%p255_p8), 48, %s1010_s17 }
  0x19   : > { %258 = sbr.rel (%p255_p8) target bundleno = 310 (0x136), region = 58  ;;  %p811_p10 = scmp.ne.s32.totalorder (!%p255_p8), %s1010_s17, 0 }
  0x1a   : > { %s908_s7 = smul.u32 (!%p255_p8), 24, %s261_s5  ;;  %p306_p9 = scmp.lt.s32.totalorder (!%p255_p8), %s305_s6, 287 }
  0x1c   : > { %s1100_s12 = scalar_lea.vmem (!%p255_p8), [#allocation3], %s908_s7 }
  0x20   : > { %s1167_s6 = smov (!%p306_p9, %s305_s6), 287  ;;  %333 = sbr.rel (%p811_p10) target bundleno = 39 (0x27), region = 66 }
  0x21   : > { %s810_s8 = sshll.u32 %s1167_s6, 2  ;;  %v1020_v4 = vmov (!%p811_p10), 0.0  }
  0x22   : > { %s1098_s11 = scalar_lea.vmem %s1156_s1, %s810_s8  ;;  %334 = vst [vmem:[#allocation2] sm:$0xff] (!%p811_p10), %v1020_v4  ;;  %335 = vst [vmem:[#allocation2 + $0x8] sm:$0xff] (!%p811_p10), %v1020_v4 }
  0x27 PF: > { %v952_v5 = vld [vmem:[%s1098_s11 + $0x40] sm:$0xff]   ;;  %v1021_v6 = vmov 0.0   ;;  %vm1022_vm0 = vmmov 0   ;;  %v955_v9 = vld [vmem:[%s1098_s11 + $0x48] sm:$0xff]   ;;  %v958_v12 = vld [vmem:[%s1098_s11 + $0x50] sm:$0xff]   ;;  %p839_p11 = scmp.ne.s32.totalorder %s1010_s17, 5 }
  0x28   : > { %887 = vmatprep.subr.bf16.mxu1 %v1021_v6  ;;  %v953_v7 = vld [vmem:[%s1098_s11] sm:$0xff]   ;;  %856 = vmatprep.subr.bf16.mxu0 %v952_v5  ;;  %v956_v10 = vld [vmem:[%s1098_s11 + $0x8] sm:$0xff]   ;;  %v959_v13 = vld [vmem:[%s1098_s11 + $0x10] sm:$0xff]  }
  0x29   : > { %v954_v8 = vld [vmem:[%s1098_s11 + $0x80] sm:$0xff]   ;;  %903 = vmatprep.mubr.msk.bf16.mxu1 %vm1022_vm0, %v1021_v6  ;;  %857 = vmatpush3.bf16.msra.mxu0 %v953_v7  ;;  %v957_v11 = vld [vmem:[%s1098_s11 + $0x88] sm:$0xff]   ;;  %v960_v14 = vld [vmem:[%s1098_s11 + $0x90] sm:$0xff]  }
  0x2a   : > { %888 = vmatpush3.bf16.msra.mxu1 %v954_v8  ;;  %858 = vmatprep.subr.bf16.mxu0 %v955_v9  ;;  %v961_v15 = vld [vmem:[%s1098_s11 + $0x58] sm:$0xff]   ;;  %v964_v18 = vld [vmem:[%s1098_s11 + $0x60] sm:$0xff]   ;;  %v967_v21 = vld [vmem:[%s1098_s11 + $0x68] sm:$0xff]  }
  0x2b   : > { %889 = vmatprep.subr.bf16.mxu1 %v1021_v6  ;;  %v962_v16 = vld [vmem:[%s1098_s11 + $0x18] sm:$0xff]   ;;  %v965_v19 = vld [vmem:[%s1098_s11 + $0x20] sm:$0xff]   ;;  %v968_v22 = vld [vmem:[%s1098_s11 + $0x28] sm:$0xff]  }
  0x2c   : > { %v963_v17 = vld [vmem:[%s1098_s11 + $0x98] sm:$0xff]   ;;  %v966_v20 = vld [vmem:[%s1098_s11 + $0xa0] sm:$0xff]   ;;  %v969_v23 = vld [vmem:[%s1098_s11 + $0xa8] sm:$0xff]  }
  0x2d   : > { %859 = vmatpush3.bf16.msra.mxu0 %v956_v10  ;;  %v970_v24 = vld [vmem:[%s1098_s11 + $0x70] sm:$0xff]   ;;  %v973_v27 = vld [vmem:[%s1098_s11 + $0x78] sm:$0xff]   ;;  %v336_v39 = vld [vmem:[#allocation2] sm:$0xff] }
  0x2e   : > { %890 = vmatpush3.bf16.msra.mxu1 %v957_v11  ;;  %860 = vmatprep.subr.bf16.mxu0 %v958_v12  ;;  %v971_v25 = vld [vmem:[%s1098_s11 + $0x30] sm:$0xff]   ;;  %v974_v29 = vld [vmem:[%s1098_s11 + $0x38] sm:$0xff]   ;;  %v337_v45 = vld [vmem:[#allocation2 + $0x8] sm:$0xff] }
  0x2f   : > { %891 = vmatprep.subr.bf16.mxu1 %v1021_v6  ;;  %v972_v26 = vld [vmem:[%s1098_s11 + $0xb0] sm:$0xff]   ;;  %v975_v30 = vld [vmem:[%s1098_s11 + $0xb8] sm:$0xff]   ;;  %v840_v51 = vld [vmem:[%s1157_s2] ss:$0 sm:$0xff] (!%p839_p11) }
  0x30   : > { %v978_v28 = vld [vmem:[%s1100_s12 + $0x4] ss:$12 sps:$4 sm:$0xff]   ;;  %v976_v31 = vld [vmem:[%s1100_s12] ss:$12 sps:$4 sm:$0xff]   ;;  %v979_v32 = vld [vmem:[%s1100_s12 + $0x8] ss:$12 sps:$4 sm:$0xff]  }
  0x31   : > { %861 = vmatpush3.bf16.msra.mxu0 %v959_v13  ;;  %582 = vmatprep.mubr.bf16.mxu0 %v978_v28  ;;  %v841_v54 = vld [vmem:[%s1158_s3] ss:$0 sm:$0xff] (!%p839_p11) }
  0x32   : > { %892 = vmatpush3.bf16.msra.mxu1 %v960_v14  ;;  %862 = vmatprep.subr.bf16.mxu0 %v961_v15 }
  0x33   : > { %893 = vmatprep.subr.bf16.mxu1 %v1021_v6 }
  0x35   : > { %863 = vmatpush3.bf16.msra.mxu0 %v962_v16 }
  0x36   : > { %894 = vmatpush3.bf16.msra.mxu1 %v963_v17  ;;  %864 = vmatprep.subr.bf16.mxu0 %v964_v18 }
  0x37   : > { %895 = vmatprep.subr.bf16.mxu1 %v1021_v6 }
  0x39   : > { %865 = vmatpush3.bf16.msra.mxu0 %v965_v19 }
  0x3a   : > { %896 = vmatpush3.bf16.msra.mxu1 %v966_v20  ;;  %866 = vmatprep.subr.bf16.mxu0 %v967_v21 }
  0x3b   : > { %897 = vmatprep.subr.bf16.mxu1 %v1021_v6 }
  0x3d   : > { %867 = vmatpush3.bf16.msra.mxu0 %v968_v22 }
  0x3e   : > { %898 = vmatpush3.bf16.msra.mxu1 %v969_v23  ;;  %868 = vmatprep.subr.bf16.mxu0 %v970_v24 }
  0x3f   : > { %899 = vmatprep.subr.bf16.mxu1 %v1021_v6 }
  0x41   : > { %869 = vmatpush3.bf16.msra.mxu0 %v971_v25 }
  0x42   : > { %900 = vmatpush3.bf16.msra.mxu1 %v972_v26  ;;  %870 = vmatprep.subr.bf16.mxu0 %v973_v27 }
  0x43   : > { %901 = vmatprep.subr.bf16.mxu1 %v1021_v6 }
  0x45   : > { %871 = vmatpush3.bf16.msra.mxu0 %v974_v29 }
  0x46   : > { %902 = vmatpush3.bf16.msra.mxu1 %v975_v30 }
  0x48   : > { %583 = vmatmul.mubr.bf16.vlgmr.msra.gmra.mrb[0].mxu0 %v976_v31 }
  0x49   : > { %904 = vmatmul.mubr.bf16.vlgmr.msra.gmra.mrb[0].mxu1 %v979_v32 }
 0x11b   : > { %v872_v33 = vpop.f32.mrb[0].mxu0 }
 0x11c   : > { %v625_v34 = vpop.f32.mrb[0].mxu1  ;;  %v873_v35 = vpop.f32.mrb[1].mxu0 }
 0x11d   : > { %v874_v36 = vadd.f32 %v873_v35, %v872_v33  ;;  %v905_v37 = vpop.f32.mrb[1].mxu1  ;;  %v875_v38 = vpop.f32.mrb[2].mxu0 }
 0x11e   : > { %v628_v40 = vpop.f32.mrb[2].mxu1  ;;  %v876_v41 = vpop.f32.mrb[3].mxu0 }
 0x11f   : > { %v626_v42 = vadd.f32 %v874_v36, %v625_v34  ;;  %v877_v43 = vadd.f32 %v876_v41, %v875_v38  ;;  %v906_v44 = vpop.f32.mrb[3].mxu1  ;;  %639 = sbr.rel (%p839_p11) target bundleno = 310 (0x136), region = 70 }
 0x121   : > { %v632_v46 = vadd.f32 %v626_v42, %v336_v39  ;;  %v629_v47 = vadd.f32 %v877_v43, %v628_v40 }
 0x123   : > { %634 = vst [vmem:[#allocation2] sm:$0xff] %v632_v46  ;;  %v633_v48 = vadd.f32 %v629_v47, %v337_v45 }
 0x125   : > { %635 = vst [vmem:[#allocation2 + $0x8] sm:$0xff] %v633_v48 }
 0x12a   : > { %v640_v49 = vld [vmem:[#allocation2] sm:$0xff] }
 0x12b   : > { %v649_v52 = vmul.f32 %v840_v51, %v640_v49 }
 0x12c   : > { %v641_v50 = vld [vmem:[#allocation2 + $0x8] sm:$0xff] }
 0x12d   : > { %v650_v53 = vmul.f32 %v840_v51, %v641_v50  ;;  %v658_v55 = vadd.f32 %v841_v54, %v649_v52 }
 0x12f   : > { %v659_v56 = vadd.f32 %v841_v54, %v650_v53  ;;  %v660_v57 = vmax.f32 %v658_v55, 0.0 }
 0x131   : > { %v661_v58 = vmax.f32 %v659_v56, 0.0 }
 0x133   : > { %v854_v59 = vpack.c.bf16 %v661_v58, %v660_v57 }
 0x135   : > { %855 = vst [vmem:[%s1159_s4] sm:$0xff] %v854_v59  }
 0x136 PF: > { %s14_s19 = sadd.s32 1, %s1018_s19   ;;  %s1160_s15 = smov %s1006_s16 }
 0x137   : > { %p11_p12 = scmp.ge.s32.totalorder %s14_s19, 8   ;;  %s1161_s16 = smov %s1083_s23 }
 0x138   : > { %s1162_s17 = smov %s1014_s18  ;;  %s1163_s18 = smov %s1165_s20 }
 0x139   :  { %13 = sbr.rel (!%p11_p12) target bundleno = 3 (0x3), region = 120 }

// kernel: wide_resnet_ae_forward.43
= control target key start
LH: loop header
LB: loop body
LE: loop exit
PB: predicated region body
PF: predicated region fallthrough
CT: control target
= control target key end

     0   :  { %s1156_s12 = smov 0   ;;  %s1158_s13 = smov 0   ;;  %s1302_s0 = inlined_call_operand.vmem [shape: bf16[16,2304], index: 0, kind: input, shape index: {}]   ;;  %s1303_s1 = inlined_call_operand.vmem [shape: bf16[2304,256], index: 1, kind: input, shape index: {}]   ;;  %s1304_s2 = inlined_call_operand.vmem [shape: f32[16,256], index: 2, kind: input, shape index: {}]   ;;  %s1305_s3 = inlined_call_operand.vmem [shape: f32[16,256], index: 3, kind: output, shape index: {}]  }
   0x1   :  { %s1160_s14 = smov 0   ;;  %s1162_s15 = smov 0  }
   0x2   :  { %s1164_s16 = smov 0  }
   0x3 LB: > { %s25_s17 = sadd.s32 1, %s1128_s15  ;;  %p48_p1 = scmp.ne.s32.totalorder %s1120_s13, %s1116_s12  ;;  %s1132_s16 = sphi %s1164_s16, %s13_s16   ;;  %s1128_s15 = sphi %s1162_s15, %s1309_s15   ;;  %s1124_s14 = sphi %s1160_s14, %s1308_s14   ;;  %s1120_s13 = sphi %s1158_s13, %s1307_s13   ;;  %s1116_s12 = sphi %s1156_s12, %s1306_s12  }
   0x4   : > { %p26_p0 = scmp.ge.s32.totalorder %s25_s17, 6  ;;  %p49_p2 = scmp.eq.s32.totalorder %s1132_s16, 0 }
   0x5   : > { %s41_s19 = sadd.s32 1, %s1120_s13  ;;  %p902_p5 = scmp.ge.s32.totalorder %s1132_s16, 6 }
   0x6   : > { %s1311_s17 = smov (%p26_p0, %s25_s17), 0  ;;  %p50_p3 = por %p49_p2, %p48_p1 }
   0x7   : > { %s37_s18 = ssub.s32 %s1128_s15, %s1311_s17  ;;  %173 = sbr.rel (%p902_p5) target bundleno = 21 (0x15), region = 20 }
   0x8   : > { %p39_p4 = scmp.eq.s32.totalorder %s37_s18, 0 }
   0xa   : > { %s1191_s20 = scalar_select %p39_p4, %s1120_s13, %s41_s19  }
   0xe   : > { %176 = sbr.rel (!%p50_p3) target bundleno = 21 (0x15), region = 24  ;;  %s178_s21 = sand.u32 (%p50_p3), 1, %s1120_s13  }
   0xf   : > { %s968_s22 = smul.u32 (%p50_p3), 12, %s1128_s15 }
  0x10   : > { %s974_s23 = smul.u32 (%p50_p3), 24, %s178_s21 }
  0x11   : > { %s186_s26 = scalar_lea.vmem (%p50_p3), %s1302_s0, %s968_s22 }
  0x12   : > { %v201_v0 = vld [vmem:[%s186_s26] sm:$0xff] (%p50_p3)  ;;  %v203_v1 = vld [vmem:[%s186_s26 + $0x48] sm:$0xff] (%p50_p3)  ;;  %s180_s27 = scalar_lea.vmem (%p50_p3), [#allocation3], %s974_s23  ;;  %v906_v3 = vld [vmem:[%s186_s26 + $0x50] sm:$0xf] (%p50_p3) }
  0x13   : > { %v904_v2 = vld [vmem:[%s186_s26 + $0x8] sm:$0xf] (%p50_p3)  ;;  %202 = vst [vmem:[%s180_s27] sm:$0xff] (%p50_p3), %v201_v0  ;;  %204 = vst [vmem:[%s180_s27 + $0xc] sm:$0xff] (%p50_p3), %v203_v1 }
  0x14   : > { %905 = vst [vmem:[%s180_s27 + $0x8] sm:$0xf] (%p50_p3), %v904_v2  ;;  %907 = vst [vmem:[%s180_s27 + $0x14] sm:$0xf] (%p50_p3), %v906_v3 }
  0x15 PF: > { %p908_p6 = scmp.ge.s32.totalorder %s1132_s16, 1  ;;  %p235_p7 = scmp.lt.s32.totalorder %s1132_s16, 7 }
  0x17   : > { %p236_p8 = pnand %p908_p6, %p235_p7 }
  0x18   : > { %s242_s28 = sand.u32 (!%p236_p8), 1, %s1116_s12   ;;  %s292_s29 = smul.u32 (!%p236_p8), 48, %s1124_s14 }
  0x19   : > { %239 = sbr.rel (%p236_p8) target bundleno = 334 (0x14e), region = 54  ;;  %p911_p10 = scmp.ne.s32.totalorder (!%p236_p8), %s1124_s14, 0 }
  0x1a   : > { %s975_s30 = smul.u32 (!%p236_p8), 24, %s242_s28  ;;  %p294_p9 = scmp.lt.s32.totalorder (!%p236_p8), %s292_s29, 287 }
  0x1c   : > { %s1208_s8 = scalar_lea.vmem (!%p236_p8), [#allocation3], %s975_s30 }
  0x20   : > { %s1313_s29 = smov (!%p294_p9, %s292_s29), 287  ;;  %332 = sbr.rel (%p911_p10) target bundleno = 39 (0x27), region = 62 }
  0x21   : > { %s969_s4 = sshll.u32 %s1313_s29, 3  ;;  %v1134_v4 = vmov (!%p911_p10), 0.0  }
  0x22   : > { %s1206_s7 = scalar_lea.vmem %s1303_s1, %s969_s4  ;;  %333 = vst [vmem:[#allocation2] sm:$0xff] (!%p911_p10), %v1134_v4  ;;  %334 = vst [vmem:[#allocation2 + $0x8] sm:$0xff] (!%p911_p10), %v1134_v4 }
  0x23   : > { %335 = vst [vmem:[#allocation2 + $0x10] sm:$0xff] (!%p911_p10), %v1134_v4  ;;  %336 = vst [vmem:[#allocation2 + $0x18] sm:$0xff] (!%p911_p10), %v1134_v4 }
  0x27 PF: > { %v1018_v5 = vld [vmem:[%s1206_s7 + $0x4] ss:$8 sps:$4 sm:$0xff]   ;;  %v1020_v6 = vld [vmem:[%s1206_s7] ss:$8 sps:$4 sm:$0xff]   ;;  %v1135_v7 = vmov 0   ;;  %p963_p11 = scmp.ne.s32.totalorder %s1124_s14, 5 }
  0x28   : > { %724 = vmatprep.mubr.bf16.mxu0 %v1135_v7  ;;  %649 = vmatprep.subr.bf16.mxu1 %v1018_v5  ;;  %v1021_v8 = vld [vmem:[%s1206_s7 + $0x14] ss:$8 sps:$4 sm:$0xff]   ;;  %v1023_v9 = vld [vmem:[%s1206_s7 + $0x10] ss:$8 sps:$4 sm:$0xff]   ;;  %v1024_v10 = vld [vmem:[%s1206_s7 + $0x24] ss:$8 sps:$4 sm:$0xff]  }
  0x29   : > { %650 = vmatpush1.bf16.msra.mxu1 %v1020_v6  ;;  %v1026_v11 = vld [vmem:[%s1206_s7 + $0x20] ss:$8 sps:$4 sm:$0xff]   ;;  %v1027_v12 = vld [vmem:[%s1206_s7 + $0x34] ss:$8 sps:$4 sm:$0xff]   ;;  %v1029_v13 = vld [vmem:[%s1206_s7 + $0x30] ss:$8 sps:$4 sm:$0xff]  }
  0x2a   : > { %651 = vmatprep.subr.bf16.mxu1 %v1021_v8  ;;  %v1042_v14 = vld [vmem:[%s1206_s7 + $0x104] ss:$8 sps:$4 sm:$0xff]   ;;  %v1044_v15 = vld [vmem:[%s1206_s7 + $0x100] ss:$8 sps:$4 sm:$0xff]   ;;  %v1048_v17 = vld [vmem:[%s1206_s7 + $0x114] ss:$8 sps:$4 sm:$0xff]  }
  0x2b   : > { %v1030_v16 = vld [vmem:[%s1206_s7 + $0x44] ss:$8 sps:$4 sm:$0xff]   ;;  %692 = vmatprep.subr.bf16.mxu0 %v1042_v14  ;;  %v1050_v18 = vld [vmem:[%s1206_s7 + $0x110] ss:$8 sps:$4 sm:$0xff]   ;;  %v1032_v19 = vld [vmem:[%s1206_s7 + $0x40] ss:$8 sps:$4 sm:$0xff]  }
  0x2c   : > { %693 = vmatpush1.bf16.msra.mxu0 %v1044_v15  ;;  %v1033_v20 = vld [vmem:[%s1206_s7 + $0x54] ss:$8 sps:$4 sm:$0xff]   ;;  %v1054_v21 = vld [vmem:[%s1206_s7 + $0x124] ss:$8 sps:$4 sm:$0xff]   ;;  %v1056_v22 = vld [vmem:[%s1206_s7 + $0x120] ss:$8 sps:$4 sm:$0xff]  }
  0x2d   : > { %652 = vmatpush1.bf16.msra.mxu1 %v1023_v9  ;;  %694 = vmatprep.subr.bf16.mxu0 %v1048_v17  ;;  %v1035_v23 = vld [vmem:[%s1206_s7 + $0x50] ss:$8 sps:$4 sm:$0xff]   ;;  %v1060_v24 = vld [vmem:[%s1206_s7 + $0x134] ss:$8 sps:$4 sm:$0xff]   ;;  %v1036_v25 = vld [vmem:[%s1206_s7 + $0x64] ss:$8 sps:$4 sm:$0xff]  }
  0x2e   : > { %653 = vmatprep.subr.bf16.mxu1 %v1024_v10  ;;  %v1062_v26 = vld [vmem:[%s1206_s7 + $0x130] ss:$8 sps:$4 sm:$0xff]   ;;  %v1038_v27 = vld [vmem:[%s1206_s7 + $0x60] ss:$8 sps:$4 sm:$0xff]   ;;  %v1066_v28 = vld [vmem:[%s1206_s7 + $0x144] ss:$8 sps:$4 sm:$0xff]  }
  0x2f   : > { %v1039_v29 = vld [vmem:[%s1206_s7 + $0x74] ss:$8 sps:$4 sm:$0xff]   ;;  %v1068_v30 = vld [vmem:[%s1206_s7 + $0x140] ss:$8 sps:$4 sm:$0xff]   ;;  %v1041_v31 = vld [vmem:[%s1206_s7 + $0x70] ss:$8 sps:$4 sm:$0xff]  }
  0x30   : > { %695 = vmatpush1.bf16.msra.mxu0 %v1050_v18  ;;  %v1072_v32 = vld [vmem:[%s1206_s7 + $0x154] ss:$8 sps:$4 sm:$0xff]   ;;  %v1045_v33 = vld [vmem:[%s1206_s7 + $0x84] ss:$8 sps:$4 sm:$0xff]   ;;  %v1074_v34 = vld [vmem:[%s1206_s7 + $0x150] ss:$8 sps:$4 sm:$0xff]  }
  0x31   : > { %654 = vmatpush1.bf16.msra.mxu1 %v1026_v11  ;;  %696 = vmatprep.subr.bf16.mxu0 %v1054_v21  ;;  %v1047_v35 = vld [vmem:[%s1206_s7 + $0x80] ss:$8 sps:$4 sm:$0xff]   ;;  %v1078_v36 = vld [vmem:[%s1206_s7 + $0x164] ss:$8 sps:$4 sm:$0xff]   ;;  %v1051_v37 = vld [vmem:[%s1206_s7 + $0x94] ss:$8 sps:$4 sm:$0xff]  }
  0x32   : > { %655 = vmatprep.subr.bf16.mxu1 %v1027_v12  ;;  %v1080_v38 = vld [vmem:[%s1206_s7 + $0x160] ss:$8 sps:$4 sm:$0xff]   ;;  %v1053_v40 = vld [vmem:[%s1206_s7 + $0x90] ss:$8 sps:$4 sm:$0xff]   ;;  %v1084_v41 = vld [vmem:[%s1206_s7 + $0x174] ss:$8 sps:$4 sm:$0xff]  }
  0x33   : > { %v1093_v39 = vld [vmem:[%s1208_s8 + $0x4] ss:$12 sps:$4 sm:$0xff]   ;;  %v1090_v46 = vld [vmem:[%s1208_s8 + $0x8] ss:$12 sps:$4 sm:$0xff]   ;;  %v1091_v56 = vld [vmem:[%s1208_s8] ss:$12 sps:$4 sm:$0xff]  }
  0x34   : > { %697 = vmatpush1.bf16.msra.mxu0 %v1056_v22  ;;  %v1057_v42 = vld [vmem:[%s1206_s7 + $0xa4] ss:$8 sps:$4 sm:$0xff]   ;;  %681 = vmatprep.mubr.bf16.mxu1 %v1093_v39  ;;  %v1086_v43 = vld [vmem:[%s1206_s7 + $0x170] ss:$8 sps:$4 sm:$0xff]   ;;  %v1059_v44 = vld [vmem:[%s1206_s7 + $0xa0] ss:$8 sps:$4 sm:$0xff]  }
  0x35   : > { %656 = vmatpush1.bf16.msra.mxu1 %v1029_v13  ;;  %698 = vmatprep.subr.bf16.mxu0 %v1060_v24  ;;  %v1063_v45 = vld [vmem:[%s1206_s7 + $0xb4] ss:$8 sps:$4 sm:$0xff]   ;;  %v1065_v47 = vld [vmem:[%s1206_s7 + $0xb0] ss:$8 sps:$4 sm:$0xff]   ;;  %v1069_v48 = vld [vmem:[%s1206_s7 + $0xc4] ss:$8 sps:$4 sm:$0xff]  }
  0x36   : > { %657 = vmatprep.subr.bf16.mxu1 %v1030_v16  ;;  %v1071_v49 = vld [vmem:[%s1206_s7 + $0xc0] ss:$8 sps:$4 sm:$0xff]   ;;  %v1075_v50 = vld [vmem:[%s1206_s7 + $0xd4] ss:$8 sps:$4 sm:$0xff]   ;;  %v1077_v51 = vld [vmem:[%s1206_s7 + $0xd0] ss:$8 sps:$4 sm:$0xff]  }
  0x37   : > { %v1081_v52 = vld [vmem:[%s1206_s7 + $0xe4] ss:$8 sps:$4 sm:$0xff]   ;;  %v1083_v53 = vld [vmem:[%s1206_s7 + $0xe0] ss:$8 sps:$4 sm:$0xff]   ;;  %v1087_v54 = vld [vmem:[%s1206_s7 + $0xf4] ss:$8 sps:$4 sm:$0xff]  }
  0x38   : > { %699 = vmatpush1.bf16.msra.mxu0 %v1062_v26  ;;  %v1089_v55 = vld [vmem:[%s1206_s7 + $0xf0] ss:$8 sps:$4 sm:$0xff]   ;;  %v337_v61 = vld [vmem:[#allocation2] sm:$0xff]  ;;  %v338_v0 = vld [vmem:[#allocation2 + $0x8] sm:$0xff] }
  0x39   : > { %658 = vmatpush1.bf16.msra.mxu1 %v1032_v19  ;;  %700 = vmatprep.subr.bf16.mxu0 %v1066_v28  ;;  %v339_v3 = vld [vmem:[#allocation2 + $0x10] sm:$0xff]  ;;  %v340_v7 = vld [vmem:[#allocation2 + $0x18] sm:$0xff]  ;;  %v751_v14 = vld [vmem:[%s1304_s2] sm:$0xff] (!%p963_p11) }
  0x3a   : > { %659 = vmatprep.subr.bf16.mxu1 %v1033_v20  ;;  %v752_v17 = vld [vmem:[%s1304_s2 + $0x8] sm:$0xff] (!%p963_p11)  ;;  %v753_v19 = vld [vmem:[%s1304_s2 + $0x10] sm:$0xff] (!%p963_p11) }
  0x3c   : > { %701 = vmatpush1.bf16.msra.mxu0 %v1068_v30 }
  0x3d   : > { %660 = vmatpush1.bf16.msra.mxu1 %v1035_v23  ;;  %702 = vmatprep.subr.bf16.mxu0 %v1072_v32  ;;  %v754_v23 = vld [vmem:[%s1304_s2 + $0x18] sm:$0xff] (!%p963_p11) }
  0x3e   : > { %661 = vmatprep.subr.bf16.mxu1 %v1036_v25 }
  0x40   : > { %703 = vmatpush1.bf16.msra.mxu0 %v1074_v34 }
  0x41   : > { %662 = vmatpush1.bf16.msra.mxu1 %v1038_v27  ;;  %704 = vmatprep.subr.bf16.mxu0 %v1078_v36 }
  0x42   : > { %663 = vmatprep.subr.bf16.mxu1 %v1039_v29 }
  0x44   : > { %705 = vmatpush1.bf16.msra.mxu0 %v1080_v38 }
  0x45   : > { %664 = vmatpush1.bf16.msra.mxu1 %v1041_v31  ;;  %706 = vmatprep.subr.bf16.mxu0 %v1084_v41 }
  0x46   : > { %665 = vmatprep.subr.bf16.mxu1 %v1045_v33 }
  0x48   : > { %707 = vmatpush1.bf16.msra.mxu0 %v1086_v43 }
  0x49   : > { %666 = vmatpush1.bf16.msra.mxu1 %v1047_v35 }
  0x4a   : > { %667 = vmatprep.subr.bf16.mxu1 %v1051_v37 }
  0x4b   : > { %725 = vmatmul.mubr.bf16.vlgmr.msra.gmra.mrb[0].mxu0 %v1090_v46 }
  0x4d   : > { %668 = vmatpush1.bf16.msra.mxu1 %v1053_v40 }
  0x4e   : > { %669 = vmatprep.subr.bf16.mxu1 %v1057_v42 }
  0x51   : > { %670 = vmatpush1.bf16.msra.mxu1 %v1059_v44 }
  0x52   : > { %671 = vmatprep.subr.bf16.mxu1 %v1063_v45 }
  0x55   : > { %672 = vmatpush1.bf16.msra.mxu1 %v1065_v47 }
  0x56   : > { %673 = vmatprep.subr.bf16.mxu1 %v1069_v48 }
  0x59   : > { %674 = vmatpush1.bf16.msra.mxu1 %v1071_v49 }
  0x5a   : > { %675 = vmatprep.subr.bf16.mxu1 %v1075_v50 }
  0x5d   : > { %676 = vmatpush1.bf16.msra.mxu1 %v1077_v51 }
  0x5e   : > { %677 = vmatprep.subr.bf16.mxu1 %v1081_v52 }
  0x61   : > { %678 = vmatpush1.bf16.msra.mxu1 %v1083_v53 }
  0x62   : > { %679 = vmatprep.subr.bf16.mxu1 %v1087_v54 }
  0x65   : > { %680 = vmatpush1.bf16.msra.mxu1 %v1089_v55 }
  0x68   : > { %682 = vmatmul.mubr.bf16.vlgmr.msra.gmra.mrb[0].mxu1 %v1091_v56 }
 0x11e   : > { %v726_v57 = vpop.f32.mrb[0].mxu0 }
 0x11f   : > { %v728_v58 = vpop.f32.mrb[1].mxu0 }
 0x120   : > { %v730_v59 = vpop.f32.mrb[2].mxu0 }
 0x121   : > { %v732_v60 = vpop.f32.mrb[3].mxu0 }
 0x13b   : > { %v683_v62 = vpop.f32.mrb[0].mxu1 }
 0x13c   : > { %v727_v63 = vadd.f32 %v726_v57, %v683_v62  ;;  %v685_v1 = vpop.f32.mrb[1].mxu1 }
 0x13d   : > { %v729_v2 = vadd.f32 %v728_v58, %v685_v1  ;;  %v687_v4 = vpop.f32.mrb[2].mxu1  ;;  %746 = sbr.rel (%p963_p11) target bundleno = 334 (0x14e), region = 66 }
 0x13e   : > { %v735_v5 = vadd.f32 %v727_v63, %v337_v61  ;;  %v731_v6 = vadd.f32 %v730_v59, %v687_v4  ;;  %v689_v8 = vpop.f32.mrb[3].mxu1 }
 0x13f   : > { %v736_v9 = vadd.f32 %v729_v2, %v338_v0  ;;  %v733_v10 = vadd.f32 %v732_v60, %v689_v8 }
 0x140   : > { %739 = vst [vmem:[#allocation2] sm:$0xff] %v735_v5  ;;  %v737_v11 = vadd.f32 %v731_v6, %v339_v3 }
 0x141   : > { %740 = vst [vmem:[#allocation2 + $0x8] sm:$0xff] %v736_v9  ;;  %v738_v12 = vadd.f32 %v733_v10, %v340_v7 }
 0x142   : > { %741 = vst [vmem:[#allocation2 + $0x10] sm:$0xff] %v737_v11 }
 0x143   : > { %742 = vst [vmem:[#allocation2 + $0x18] sm:$0xff] %v738_v12 }
 0x147   : > { %v747_v13 = vld [vmem:[#allocation2] sm:$0xff] }
 0x148   : > { %v748_v15 = vld [vmem:[#allocation2 + $0x8] sm:$0xff]  ;;  %v755_v16 = vadd.f32 %v751_v14, %v747_v13 }
 0x149   : > { %v749_v18 = vld [vmem:[#allocation2 + $0x10] sm:$0xff]  ;;  %v756_v20 = vadd.f32 %v752_v17, %v748_v15 }
 0x14a   : > { %v757_v21 = vadd.f32 %v753_v19, %v749_v18  ;;  %v750_v22 = vld [vmem:[#allocation2 + $0x18] sm:$0xff]  ;;  %759 = vst [vmem:[%s1305_s3] sm:$0xff] %v755_v16 }
 0x14b   : > { %v758_v24 = vadd.f32 %v754_v23, %v750_v22  ;;  %760 = vst [vmem:[%s1305_s3 + $0x8] sm:$0xff] %v756_v20 }
 0x14c   : > { %761 = vst [vmem:[%s1305_s3 + $0x10] sm:$0xff] %v757_v21 }
 0x14d   : > { %762 = vst [vmem:[%s1305_s3 + $0x18] sm:$0xff] %v758_v24 }
 0x14e PF: > { %s13_s16 = sadd.s32 1, %s1132_s16   ;;  %s1306_s12 = smov %s1120_s13 }
 0x14f   : > { %p10_p12 = scmp.ge.s32.totalorder %s13_s16, 8   ;;  %s1307_s13 = smov %s1191_s20 }
 0x150   : > { %s1308_s14 = smov %s1128_s15  ;;  %s1309_s15 = smov %s1311_s17 }
 0x151   :  { %12 = sbr.rel (!%p10_p12) target bundleno = 3 (0x3), region = 113 }

// kernel: wide_resnet_ae_forward.46
= control target key start
LH: loop header
LB: loop body
LE: loop exit
PB: predicated region body
PF: predicated region fallthrough
CT: control target
= control target key end

     0   :  { %s350_s1 = inlined_call_operand.vmem [shape: bf16[256,128], index: 1, kind: input, shape index: {}]   ;;  %s351_s0 = inlined_call_operand.vmem [shape: bf16[16,256], index: 0, kind: input, shape index: {}]   ;;  %s352_s2 = inlined_call_operand.vmem [shape: f32[16,128], index: 2, kind: output, shape index: {}]  }
   0x1   :  { %v256_v0 = vld [vmem:[%s350_s1 + $0x40] sm:$0xff]   ;;  %v258_v2 = vld [vmem:[%s350_s1 + $0x48] sm:$0xff]   ;;  %v260_v4 = vld [vmem:[%s350_s1 + $0x50] sm:$0xff]  }
   0x2   :  { %v257_v1 = vld [vmem:[%s350_s1] sm:$0xff]   ;;  %234 = vmatprep.subr.bf16.mxu0 %v256_v0  ;;  %v259_v3 = vld [vmem:[%s350_s1 + $0x8] sm:$0xff]   ;;  %v261_v5 = vld [vmem:[%s350_s1 + $0x10] sm:$0xff]  }
   0x3   :  { %235 = vmatpush3.bf16.msra.mxu0 %v257_v1  ;;  %v262_v6 = vld [vmem:[%s350_s1 + $0x58] sm:$0xff]   ;;  %v264_v8 = vld [vmem:[%s350_s1 + $0x60] sm:$0xff]   ;;  %v266_v10 = vld [vmem:[%s350_s1 + $0x68] sm:$0xff]  }
   0x4   :  { %236 = vmatprep.subr.bf16.mxu0 %v258_v2  ;;  %v263_v7 = vld [vmem:[%s350_s1 + $0x18] sm:$0xff]   ;;  %v265_v9 = vld [vmem:[%s350_s1 + $0x20] sm:$0xff]   ;;  %v267_v12 = vld [vmem:[%s350_s1 + $0x28] sm:$0xff]  }
   0x5   :  { %v274_v11 = vld [vmem:[%s351_s0 + $0x4] ss:$8 sps:$4 sm:$0xff]   ;;  %v268_v13 = vld [vmem:[%s350_s1 + $0x70] sm:$0xff]   ;;  %v270_v15 = vld [vmem:[%s350_s1 + $0x78] sm:$0xff]  }
   0x6   :  { %192 = vmatprep.mubr.bf16.mxu0 %v274_v11  ;;  %v269_v14 = vld [vmem:[%s350_s1 + $0x30] sm:$0xff]   ;;  %v271_v16 = vld [vmem:[%s350_s1 + $0x38] sm:$0xff]   ;;  %v272_v17 = vld [vmem:[%s351_s0] ss:$8 sps:$4 sm:$0xff]  }
   0x7   :  { %237 = vmatpush3.bf16.msra.mxu0 %v259_v3 }
   0x8   :  { %238 = vmatprep.subr.bf16.mxu0 %v260_v4 }
   0xb   :  { %239 = vmatpush3.bf16.msra.mxu0 %v261_v5 }
   0xc   :  { %240 = vmatprep.subr.bf16.mxu0 %v262_v6 }
   0xf   :  { %241 = vmatpush3.bf16.msra.mxu0 %v263_v7 }
  0x10   :  { %242 = vmatprep.subr.bf16.mxu0 %v264_v8 }
  0x13   :  { %243 = vmatpush3.bf16.msra.mxu0 %v265_v9 }
  0x14   :  { %244 = vmatprep.subr.bf16.mxu0 %v266_v10 }
  0x17   :  { %245 = vmatpush3.bf16.msra.mxu0 %v267_v12 }
  0x18   :  { %246 = vmatprep.subr.bf16.mxu0 %v268_v13 }
  0x1b   :  { %247 = vmatpush3.bf16.msra.mxu0 %v269_v14 }
  0x1c   :  { %248 = vmatprep.subr.bf16.mxu0 %v270_v15 }
  0x1f   :  { %249 = vmatpush3.bf16.msra.mxu0 %v271_v16 }
  0x22   :  { %193 = vmatmul.mubr.bf16.vlgmr.msra.gmra.mrb[0].mxu0 %v272_v17 }
  0xf5   :  { %v250_v18 = vpop.f32.mrb[0].mxu0 }
  0xf6   :  { %v251_v19 = vpop.f32.mrb[1].mxu0 }
  0xf7   :  { %v252_v20 = vadd.f32 %v251_v19, %v250_v18  ;;  %v253_v21 = vpop.f32.mrb[2].mxu0 }
  0xf8   :  { %v254_v22 = vpop.f32.mrb[3].mxu0 }
  0xf9   :  { %210 = vst [vmem:[%s352_s2] sm:$0xff] %v252_v20  ;;  %v255_v23 = vadd.f32 %v254_v22, %v253_v21 }
  0xfb   :  { %211 = vst [vmem:[%s352_s2 + $0x8] sm:$0xff] %v255_v23 }

// kernel: wide_resnet_ae_forward.48
= control target key start
LH: loop header
LB: loop body
LE: loop exit
PB: predicated region body
PF: predicated region fallthrough
CT: control target
= control target key end

     0   :  { %s133_s0 = inlined_call_operand.vmem [shape: f32[32,128], index: 0, kind: input, shape index: {}]   ;;  %s134_s1 = inlined_call_operand.vmem [shape: f32[1,128], index: 1, kind: input, shape index: {}]   ;;  %s135_s2 = inlined_call_operand.vmem [shape: f32[1,128], index: 2, kind: input, shape index: {}]   ;;  %s136_s3 = inlined_call_operand.vmem [shape: bf16[32,128], index: 3, kind: output, shape index: {}]  }
   0x1   :  { %v14_v0 = vld [vmem:[%s133_s0] sm:$0xff]  ;;  %v15_v1 = vld [vmem:[%s133_s0 + $0x8] sm:$0xff]  ;;  %v16_v6 = vld [vmem:[%s133_s0 + $0x10] sm:$0xff] }
   0x2   :  { %v68_v2 = vld [vmem:[%s134_s1] ss:$0 sm:$0xff]  ;;  %v17_v7 = vld [vmem:[%s133_s0 + $0x18] sm:$0xff] }
   0x3   :  { %v25_v3 = vmul.f32 %v68_v2, %v14_v0  ;;  %v26_v4 = vmul.f32 %v68_v2, %v15_v1  ;;  %v69_v5 = vld [vmem:[%s135_s2] ss:$0 sm:$0xff]  ;;  %v27_v8 = vmul.f32 %v68_v2, %v16_v6  ;;  %v28_v9 = vmul.f32 %v68_v2, %v17_v7 }
   0x5   :  { %v36_v10 = vadd.f32 %v69_v5, %v25_v3  ;;  %v37_v11 = vadd.f32 %v69_v5, %v26_v4  ;;  %v38_v12 = vadd.f32 %v69_v5, %v27_v8  ;;  %v39_v13 = vadd.f32 %v69_v5, %v28_v9 }
   0x7   :  { %v40_v14 = vmax.f32 %v36_v10, 0.0  ;;  %v41_v15 = vmax.f32 %v37_v11, 0.0  ;;  %v42_v16 = vmax.f32 %v38_v12, 0.0  ;;  %v43_v17 = vmax.f32 %v39_v13, 0.0 }
   0x9   :  { %v81_v18 = vpack.c.bf16 %v41_v15, %v40_v14  ;;  %v86_v19 = vpack.c.bf16 %v43_v17, %v42_v16 }
   0xb   :  { %82 = vst [vmem:[%s136_s3] sm:$0xff] %v81_v18   ;;  %88 = vst [vmem:[%s136_s3 + $0x8] sm:$0xff] %v86_v19  }

// kernel: wide_resnet_ae_forward.47
= control target key start
LH: loop header
LB: loop body
LE: loop exit
PB: predicated region body
PF: predicated region fallthrough
CT: control target
= control target key end

     0   :  { %vm377_vm0 = vcmask 523264   ;;  %s916_s1 = inlined_call_operand.vmem [shape: bf16[576,128], index: 1, kind: input, shape index: {}]   ;;  %s917_s0 = inlined_call_operand.vmem [shape: bf16[32,576], index: 0, kind: input, shape index: {}]   ;;  %s918_s2 = inlined_call_operand.vmem [shape: f32[32,128], index: 2, kind: input, shape index: {}]   ;;  %s919_s3 = inlined_call_operand.vmem [shape: f32[32,128], index: 3, kind: output, shape index: {}]  }
   0x1   :  { %v684_v0 = vld [vmem:[%s916_s1 + $0x40] sm:$0xff]   ;;  %v688_v4 = vld [vmem:[%s916_s1 + $0x48] sm:$0xff]   ;;  %v692_v8 = vld [vmem:[%s916_s1 + $0x50] sm:$0xff]  }
   0x2   :  { %v685_v1 = vld [vmem:[%s916_s1 + $0xc0] sm:$0xff]   ;;  %610 = vmatprep.subr.bf16.mxu0 %v684_v0  ;;  %v689_v5 = vld [vmem:[%s916_s1 + $0xc8] sm:$0xff]   ;;  %v693_v9 = vld [vmem:[%s916_s1 + $0xd0] sm:$0xff]  }
   0x3   :  { %v686_v2 = vld [vmem:[%s916_s1] sm:$0xff]   ;;  %638 = vmatprep.subr.bf16.mxu1 %v685_v1  ;;  %v690_v6 = vld [vmem:[%s916_s1 + $0x8] sm:$0xff]   ;;  %v694_v10 = vld [vmem:[%s916_s1 + $0x10] sm:$0xff]  }
   0x4   :  { %v687_v3 = vld [vmem:[%s916_s1 + $0x80] sm:$0xff]   ;;  %611 = vmatpush3.bf16.msra.mxu0 %v686_v2  ;;  %v691_v7 = vld [vmem:[%s916_s1 + $0x88] sm:$0xff]   ;;  %v695_v11 = vld [vmem:[%s916_s1 + $0x90] sm:$0xff]  }
   0x5   :  { %639 = vmatpush3.bf16.msra.mxu1 %v687_v3  ;;  %612 = vmatprep.subr.bf16.mxu0 %v688_v4  ;;  %v696_v12 = vld [vmem:[%s916_s1 + $0x58] sm:$0xff]   ;;  %v700_v16 = vld [vmem:[%s916_s1 + $0x60] sm:$0xff]   ;;  %v704_v20 = vld [vmem:[%s916_s1 + $0x68] sm:$0xff]  }
   0x6   :  { %640 = vmatprep.subr.bf16.mxu1 %v689_v5  ;;  %v697_v13 = vld [vmem:[%s916_s1 + $0xd8] sm:$0xff]   ;;  %v701_v17 = vld [vmem:[%s916_s1 + $0xe0] sm:$0xff]   ;;  %v705_v21 = vld [vmem:[%s916_s1 + $0xe8] sm:$0xff]  }
   0x7   :  { %v698_v14 = vld [vmem:[%s916_s1 + $0x18] sm:$0xff]   ;;  %v702_v18 = vld [vmem:[%s916_s1 + $0x20] sm:$0xff]   ;;  %v706_v22 = vld [vmem:[%s916_s1 + $0x28] sm:$0xff]  }
   0x8   :  { %613 = vmatpush3.bf16.msra.mxu0 %v690_v6  ;;  %v699_v15 = vld [vmem:[%s916_s1 + $0x98] sm:$0xff]   ;;  %v703_v19 = vld [vmem:[%s916_s1 + $0xa0] sm:$0xff]   ;;  %v707_v23 = vld [vmem:[%s916_s1 + $0xa8] sm:$0xff]  }
   0x9   :  { %641 = vmatpush3.bf16.msra.mxu1 %v691_v7  ;;  %614 = vmatprep.subr.bf16.mxu0 %v692_v8  ;;  %v708_v24 = vld [vmem:[%s916_s1 + $0x70] sm:$0xff]   ;;  %v712_v28 = vld [vmem:[%s916_s1 + $0x78] sm:$0xff]   ;;  %v721_v35 = vld [vmem:[%s917_s0 + $0xc] ss:$20 sps:$4 sm:$0xff]  }
   0xa   :  { %642 = vmatprep.subr.bf16.mxu1 %v693_v9  ;;  %v709_v25 = vld [vmem:[%s916_s1 + $0xf0] sm:$0xff]   ;;  %v713_v29 = vld [vmem:[%s916_s1 + $0xf8] sm:$0xff]   ;;  %v722_v36 = vld [vmem:[%s916_s1 + $0x100] sm:$0xff]   ;;  %465 = vmatprep.mubr.bf16.mxu1 %v721_v35 }
   0xb   :  { %v710_v26 = vld [vmem:[%s916_s1 + $0x30] sm:$0xff]   ;;  %v714_v30 = vld [vmem:[%s916_s1 + $0x38] sm:$0xff]   ;;  %v723_v37 = vld [vmem:[%s916_s1 + $0x108] sm:$0xff]  }
   0xc   :  { %615 = vmatpush3.bf16.msra.mxu0 %v694_v10  ;;  %v711_v27 = vld [vmem:[%s916_s1 + $0xb0] sm:$0xff]   ;;  %v715_v31 = vld [vmem:[%s916_s1 + $0xb8] sm:$0xff]   ;;  %v724_v38 = vld [vmem:[%s917_s0 + $0x2c] ss:$20 sps:$4 sm:$0xff]  }
   0xd   :  { %643 = vmatpush3.bf16.msra.mxu1 %v695_v11  ;;  %616 = vmatprep.subr.bf16.mxu0 %v696_v12  ;;  %v716_v32 = vld [vmem:[%s917_s0] ss:$20 sps:$4 sm:$0xff]   ;;  %v718_v33 = vld [vmem:[%s917_s0 + $0x4] ss:$20 sps:$4 sm:$0xff]   ;;  %v719_v34 = vld [vmem:[%s917_s0 + $0x8] ss:$20 sps:$4 sm:$0xff]  }
   0xe   :  { %644 = vmatprep.subr.bf16.mxu1 %v697_v13  ;;  %416 = vmatprep.mubr.bf16.mxu0 %v718_v33  ;;  %v726_v39 = vld [vmem:[%s917_s0 + $0x34] ss:$20 sps:$4 sm:$0xff]   ;;  %v729_v42 = vld [vmem:[%s917_s0 + $0x30] ss:$20 sps:$4 sm:$0xff]   ;;  %v731_v44 = vld [vmem:[%s916_s1 + $0x118] sm:$0xff]  }
   0xf   :  { %v728_v40 = vld [vmem:[%s917_s0 + $0x28] ss:$20 sps:$4 sm:$0xff]   ;;  %v730_v41 = vld [vmem:[%s916_s1 + $0x110] sm:$0xff]   ;;  %v733_v45 = vld [vmem:[%s917_s0 + $0x38] ss:$20 sps:$4 sm:$0xff]  }
  0x10   :  { %617 = vmatpush3.bf16.msra.mxu0 %v698_v14  ;;  %v732_v43 = vld [vmem:[%s917_s0 + $0x10] ss:$20 sps:$4 sm:$0xff]  }
  0x11   :  { %645 = vmatpush3.bf16.msra.mxu1 %v699_v15  ;;  %618 = vmatprep.subr.bf16.mxu0 %v700_v16  ;;  %v548_v11 = vld [vmem:[%s918_s2 + $0x10] sm:$0xff]  ;;  %v546_v14 = vld [vmem:[%s918_s2] sm:$0xff] }
  0x12   :  { %646 = vmatprep.subr.bf16.mxu1 %v701_v17  ;;  %v549_v17 = vld [vmem:[%s918_s2 + $0x18] sm:$0xff] }
  0x14   :  { %619 = vmatpush3.bf16.msra.mxu0 %v702_v18 }
  0x15   :  { %647 = vmatpush3.bf16.msra.mxu1 %v703_v19  ;;  %620 = vmatprep.subr.bf16.mxu0 %v704_v20 }
  0x16   :  { %648 = vmatprep.subr.bf16.mxu1 %v705_v21  ;;  %v547_v21 = vld [vmem:[%s918_s2 + $0x8] sm:$0xff] }
  0x18   :  { %621 = vmatpush3.bf16.msra.mxu0 %v706_v22 }
  0x19   :  { %649 = vmatpush3.bf16.msra.mxu1 %v707_v23  ;;  %622 = vmatprep.subr.bf16.mxu0 %v708_v24 }
  0x1a   :  { %650 = vmatprep.subr.bf16.mxu1 %v709_v25 }
  0x1c   :  { %623 = vmatpush3.bf16.msra.mxu0 %v710_v26 }
  0x1d   :  { %651 = vmatpush3.bf16.msra.mxu1 %v711_v27  ;;  %624 = vmatprep.subr.bf16.mxu0 %v712_v28 }
  0x1e   :  { %652 = vmatprep.subr.bf16.mxu1 %v713_v29 }
  0x20   :  { %625 = vmatpush3.bf16.msra.mxu0 %v714_v30 }
  0x21   :  { %653 = vmatpush3.bf16.msra.mxu1 %v715_v31  ;;  %672 = vmatprep.subr.bf16.mxu0 %v722_v36 }
  0x23   :  { %417 = vmatmul.mubr.bf16.vlgmr.msra.gmra.mrb[0].mxu0 %v716_v32 }
  0x24   :  { %466 = vmatmul.mubr.bf16.vlgmr.msra.gmra.mrb[0].mxu1 %v719_v34  ;;  %673 = vmatpush3.bf16.msra.mxu0 %v722_v36 }
  0x25   :  { %674 = vmatprep.subr.bf16.mxu0 %v723_v37  ;;  %424 = vmatprep.mubr.bf16.mxu0 %v724_v38 }
  0x26   :  { %473 = vmatprep.mubr.bf16.mxu1 %v726_v39 }
  0x28   :  { %675 = vmatpush3.bf16.msra.mxu0 %v723_v37 }
  0x29   :  { %676 = vmatprep.subr.bf16.mxu0 %v730_v41 }
  0x2b   :  { %425 = vmatmul.mubr.bf16.gmra.mrb[4].mxu0 %v728_v40 }
  0x2c   :  { %474 = vmatmul.mubr.bf16.gmra.mrb[4].mxu1 %v729_v42  ;;  %680 = vmatprep.mubr.msk.bf16.mxu0 %vm377_vm0, %v732_v43 }
  0x2d   :  { %677 = vmatpush3.bf16.msra.mxu0 %v730_v41 }
  0x2e   :  { %678 = vmatprep.subr.bf16.mxu0 %v731_v44 }
  0x31   :  { %679 = vmatpush3.bf16.msra.mxu0 %v731_v44 }
  0x34   :  { %681 = vmatmul.mubr.msk.bf16.vlgmr.msra.gmra.mrb[8].mxu0 %vm377_vm0, %v733_v45 }
  0xf6   :  { %v626_v46 = vpop.f32.mrb[0].mxu0 }
  0xf7   :  { %v654_v47 = vpop.f32.mrb[0].mxu1  ;;  %v627_v48 = vpop.f32.mrb[1].mxu0 }
  0xf8   :  { %v628_v49 = vadd.f32 %v627_v48, %v626_v46  ;;  %v655_v50 = vpop.f32.mrb[1].mxu1  ;;  %v629_v51 = vpop.f32.mrb[2].mxu0 }
  0xf9   :  { %v656_v52 = vadd.f32 %v655_v50, %v654_v47  ;;  %v657_v53 = vpop.f32.mrb[2].mxu1  ;;  %v630_v54 = vpop.f32.mrb[3].mxu0 }
  0xfa   :  { %v631_v55 = vadd.f32 %v630_v54, %v629_v51  ;;  %v658_v56 = vpop.f32.mrb[3].mxu1 }
  0xfb   :  { %v659_v57 = vadd.f32 %v658_v56, %v657_v53  ;;  %v468_v58 = vadd.f32 %v656_v52, %v628_v49 }
  0xfd   :  { %v471_v59 = vadd.f32 %v659_v57, %v631_v55 }
  0xfe   :  { %v632_v60 = vpop.f32.mrb[4].mxu0 }
  0xff   :  { %v660_v61 = vpop.f32.mrb[4].mxu1  ;;  %v633_v62 = vpop.f32.mrb[5].mxu0 }
 0x100   :  { %v634_v63 = vadd.f32 %v633_v62, %v632_v60  ;;  %v661_v0 = vpop.f32.mrb[5].mxu1  ;;  %v635_v1 = vpop.f32.mrb[6].mxu0 }
 0x101   :  { %v662_v2 = vadd.f32 %v661_v0, %v660_v61  ;;  %v663_v3 = vpop.f32.mrb[6].mxu1  ;;  %v636_v4 = vpop.f32.mrb[7].mxu0 }
 0x102   :  { %v637_v5 = vadd.f32 %v636_v4, %v635_v1  ;;  %v664_v6 = vpop.f32.mrb[7].mxu1 }
 0x103   :  { %v665_v7 = vadd.f32 %v664_v6, %v663_v3  ;;  %v476_v8 = vadd.f32 %v662_v2, %v634_v63 }
 0x105   :  { %v479_v9 = vadd.f32 %v665_v7, %v637_v5 }
 0x107   :  { %v682_v10 = vpop.f32.mrb[8].mxu0 }
 0x108   :  { %v525_v12 = vadd.f32 %v682_v10, %v476_v8  ;;  %v516_v13 = vpop.f32.mrb[9].mxu0 }
 0x109   :  { %v517_v15 = vadd.f32 %v516_v13, %v468_v58  ;;  %v683_v16 = vpop.f32.mrb[10].mxu0 }
 0x10a   :  { %v552_v18 = vadd.f32 %v548_v11, %v525_v12  ;;  %v528_v19 = vadd.f32 %v683_v16, %v479_v9  ;;  %v519_v20 = vpop.f32.mrb[11].mxu0 }
 0x10b   :  { %v550_v22 = vadd.f32 %v546_v14, %v517_v15  ;;  %v520_v23 = vadd.f32 %v519_v20, %v471_v59 }
 0x10c   :  { %556 = vst [vmem:[%s919_s3 + $0x10] sm:$0xff] %v552_v18  ;;  %v553_v24 = vadd.f32 %v549_v17, %v528_v19 }
 0x10d   :  { %554 = vst [vmem:[%s919_s3] sm:$0xff] %v550_v22  ;;  %v551_v25 = vadd.f32 %v547_v21, %v520_v23 }
 0x10e   :  { %557 = vst [vmem:[%s919_s3 + $0x18] sm:$0xff] %v553_v24 }
 0x10f   :  { %555 = vst [vmem:[%s919_s3 + $0x8] sm:$0xff] %v551_v25 }

// kernel: wide_resnet_ae_forward.49
= control target key start
LH: loop header
LB: loop body
LE: loop exit
PB: predicated region body
PF: predicated region fallthrough
CT: control target
= control target key end

     0   :  { %vm380_vm0 = vcmask 523264   ;;  %s967_s1 = inlined_call_operand.vmem [shape: bf16[576,128], index: 1, kind: input, shape index: {}]   ;;  %s968_s0 = inlined_call_operand.vmem [shape: bf16[32,576], index: 0, kind: input, shape index: {}]   ;;  %s969_s2 = inlined_call_operand.vmem [shape: f32[1,128], index: 2, kind: input, shape index: {}]   ;;  %s970_s3 = inlined_call_operand.vmem [shape: f32[1,128], index: 3, kind: input, shape index: {}]   ;;  %s971_s4 = inlined_call_operand.vmem [shape: bf16[32,128], index: 4, kind: output, shape index: {}]  }
   0x1   :  { %v742_v0 = vld [vmem:[%s967_s1 + $0x40] sm:$0xff]   ;;  %v746_v4 = vld [vmem:[%s967_s1 + $0x48] sm:$0xff]   ;;  %v750_v8 = vld [vmem:[%s967_s1 + $0x50] sm:$0xff]  }
   0x2   :  { %v743_v1 = vld [vmem:[%s967_s1 + $0xc0] sm:$0xff]   ;;  %668 = vmatprep.subr.bf16.mxu0 %v742_v0  ;;  %v747_v5 = vld [vmem:[%s967_s1 + $0xc8] sm:$0xff]   ;;  %v751_v9 = vld [vmem:[%s967_s1 + $0xd0] sm:$0xff]  }
   0x3   :  { %v744_v2 = vld [vmem:[%s967_s1] sm:$0xff]   ;;  %696 = vmatprep.subr.bf16.mxu1 %v743_v1  ;;  %v748_v6 = vld [vmem:[%s967_s1 + $0x8] sm:$0xff]   ;;  %v752_v10 = vld [vmem:[%s967_s1 + $0x10] sm:$0xff]  }
   0x4   :  { %v745_v3 = vld [vmem:[%s967_s1 + $0x80] sm:$0xff]   ;;  %669 = vmatpush3.bf16.msra.mxu0 %v744_v2  ;;  %v749_v7 = vld [vmem:[%s967_s1 + $0x88] sm:$0xff]   ;;  %v753_v11 = vld [vmem:[%s967_s1 + $0x90] sm:$0xff]  }
   0x5   :  { %697 = vmatpush3.bf16.msra.mxu1 %v745_v3  ;;  %670 = vmatprep.subr.bf16.mxu0 %v746_v4  ;;  %v754_v12 = vld [vmem:[%s967_s1 + $0x58] sm:$0xff]   ;;  %v758_v16 = vld [vmem:[%s967_s1 + $0x60] sm:$0xff]   ;;  %v762_v20 = vld [vmem:[%s967_s1 + $0x68] sm:$0xff]  }
   0x6   :  { %698 = vmatprep.subr.bf16.mxu1 %v747_v5  ;;  %v755_v13 = vld [vmem:[%s967_s1 + $0xd8] sm:$0xff]   ;;  %v759_v17 = vld [vmem:[%s967_s1 + $0xe0] sm:$0xff]   ;;  %v763_v21 = vld [vmem:[%s967_s1 + $0xe8] sm:$0xff]  }
   0x7   :  { %v756_v14 = vld [vmem:[%s967_s1 + $0x18] sm:$0xff]   ;;  %v760_v18 = vld [vmem:[%s967_s1 + $0x20] sm:$0xff]   ;;  %v764_v22 = vld [vmem:[%s967_s1 + $0x28] sm:$0xff]  }
   0x8   :  { %671 = vmatpush3.bf16.msra.mxu0 %v748_v6  ;;  %v757_v15 = vld [vmem:[%s967_s1 + $0x98] sm:$0xff]   ;;  %v761_v19 = vld [vmem:[%s967_s1 + $0xa0] sm:$0xff]   ;;  %v765_v23 = vld [vmem:[%s967_s1 + $0xa8] sm:$0xff]  }
   0x9   :  { %699 = vmatpush3.bf16.msra.mxu1 %v749_v7  ;;  %672 = vmatprep.subr.bf16.mxu0 %v750_v8  ;;  %v766_v24 = vld [vmem:[%s967_s1 + $0x70] sm:$0xff]   ;;  %v770_v28 = vld [vmem:[%s967_s1 + $0x78] sm:$0xff]   ;;  %v779_v35 = vld [vmem:[%s968_s0 + $0xc] ss:$20 sps:$4 sm:$0xff]  }
   0xa   :  { %700 = vmatprep.subr.bf16.mxu1 %v751_v9  ;;  %v767_v25 = vld [vmem:[%s967_s1 + $0xf0] sm:$0xff]   ;;  %v771_v29 = vld [vmem:[%s967_s1 + $0xf8] sm:$0xff]   ;;  %v780_v36 = vld [vmem:[%s967_s1 + $0x100] sm:$0xff]   ;;  %468 = vmatprep.mubr.bf16.mxu1 %v779_v35 }
   0xb   :  { %v768_v26 = vld [vmem:[%s967_s1 + $0x30] sm:$0xff]   ;;  %v772_v30 = vld [vmem:[%s967_s1 + $0x38] sm:$0xff]   ;;  %v781_v37 = vld [vmem:[%s967_s1 + $0x108] sm:$0xff]  }
   0xc   :  { %673 = vmatpush3.bf16.msra.mxu0 %v752_v10  ;;  %v769_v27 = vld [vmem:[%s967_s1 + $0xb0] sm:$0xff]   ;;  %v773_v31 = vld [vmem:[%s967_s1 + $0xb8] sm:$0xff]   ;;  %v782_v38 = vld [vmem:[%s968_s0 + $0x2c] ss:$20 sps:$4 sm:$0xff]  }
   0xd   :  { %701 = vmatpush3.bf16.msra.mxu1 %v753_v11  ;;  %674 = vmatprep.subr.bf16.mxu0 %v754_v12  ;;  %v774_v32 = vld [vmem:[%s968_s0] ss:$20 sps:$4 sm:$0xff]   ;;  %v776_v33 = vld [vmem:[%s968_s0 + $0x4] ss:$20 sps:$4 sm:$0xff]   ;;  %v777_v34 = vld [vmem:[%s968_s0 + $0x8] ss:$20 sps:$4 sm:$0xff]  }
   0xe   :  { %702 = vmatprep.subr.bf16.mxu1 %v755_v13  ;;  %419 = vmatprep.mubr.bf16.mxu0 %v776_v33  ;;  %v784_v39 = vld [vmem:[%s968_s0 + $0x34] ss:$20 sps:$4 sm:$0xff]   ;;  %v787_v42 = vld [vmem:[%s968_s0 + $0x30] ss:$20 sps:$4 sm:$0xff]   ;;  %v789_v44 = vld [vmem:[%s967_s1 + $0x118] sm:$0xff]  }
   0xf   :  { %v786_v40 = vld [vmem:[%s968_s0 + $0x28] ss:$20 sps:$4 sm:$0xff]   ;;  %v788_v41 = vld [vmem:[%s967_s1 + $0x110] sm:$0xff]   ;;  %v791_v45 = vld [vmem:[%s968_s0 + $0x38] ss:$20 sps:$4 sm:$0xff]  }
  0x10   :  { %675 = vmatpush3.bf16.msra.mxu0 %v756_v14  ;;  %v790_v43 = vld [vmem:[%s968_s0 + $0x10] ss:$20 sps:$4 sm:$0xff]   ;;  %v647_v11 = vld [vmem:[%s969_s2] ss:$0 sm:$0xff] }
  0x11   :  { %703 = vmatpush3.bf16.msra.mxu1 %v757_v15  ;;  %676 = vmatprep.subr.bf16.mxu0 %v758_v16  ;;  %v648_v14 = vld [vmem:[%s970_s3] ss:$0 sm:$0xff] }
  0x12   :  { %704 = vmatprep.subr.bf16.mxu1 %v759_v17 }
  0x14   :  { %677 = vmatpush3.bf16.msra.mxu0 %v760_v18 }
  0x15   :  { %705 = vmatpush3.bf16.msra.mxu1 %v761_v19  ;;  %678 = vmatprep.subr.bf16.mxu0 %v762_v20 }
  0x16   :  { %706 = vmatprep.subr.bf16.mxu1 %v763_v21 }
  0x18   :  { %679 = vmatpush3.bf16.msra.mxu0 %v764_v22 }
  0x19   :  { %707 = vmatpush3.bf16.msra.mxu1 %v765_v23  ;;  %680 = vmatprep.subr.bf16.mxu0 %v766_v24 }
  0x1a   :  { %708 = vmatprep.subr.bf16.mxu1 %v767_v25 }
  0x1c   :  { %681 = vmatpush3.bf16.msra.mxu0 %v768_v26 }
  0x1d   :  { %709 = vmatpush3.bf16.msra.mxu1 %v769_v27  ;;  %682 = vmatprep.subr.bf16.mxu0 %v770_v28 }
  0x1e   :  { %710 = vmatprep.subr.bf16.mxu1 %v771_v29 }
  0x20   :  { %683 = vmatpush3.bf16.msra.mxu0 %v772_v30 }
  0x21   :  { %711 = vmatpush3.bf16.msra.mxu1 %v773_v31  ;;  %730 = vmatprep.subr.bf16.mxu0 %v780_v36 }
  0x23   :  { %420 = vmatmul.mubr.bf16.vlgmr.msra.gmra.mrb[0].mxu0 %v774_v32 }
  0x24   :  { %469 = vmatmul.mubr.bf16.vlgmr.msra.gmra.mrb[0].mxu1 %v777_v34  ;;  %731 = vmatpush3.bf16.msra.mxu0 %v780_v36 }
  0x25   :  { %732 = vmatprep.subr.bf16.mxu0 %v781_v37  ;;  %427 = vmatprep.mubr.bf16.mxu0 %v782_v38 }
  0x26   :  { %476 = vmatprep.mubr.bf16.mxu1 %v784_v39 }
  0x28   :  { %733 = vmatpush3.bf16.msra.mxu0 %v781_v37 }
  0x29   :  { %734 = vmatprep.subr.bf16.mxu0 %v788_v41 }
  0x2b   :  { %428 = vmatmul.mubr.bf16.gmra.mrb[4].mxu0 %v786_v40 }
  0x2c   :  { %477 = vmatmul.mubr.bf16.gmra.mrb[4].mxu1 %v787_v42  ;;  %738 = vmatprep.mubr.msk.bf16.mxu0 %vm380_vm0, %v790_v43 }
  0x2d   :  { %735 = vmatpush3.bf16.msra.mxu0 %v788_v41 }
  0x2e   :  { %736 = vmatprep.subr.bf16.mxu0 %v789_v44 }
  0x31   :  { %737 = vmatpush3.bf16.msra.mxu0 %v789_v44 }
  0x34   :  { %739 = vmatmul.mubr.msk.bf16.vlgmr.msra.gmra.mrb[8].mxu0 %vm380_vm0, %v791_v45 }
  0xf6   :  { %v684_v46 = vpop.f32.mrb[0].mxu0 }
  0xf7   :  { %v712_v47 = vpop.f32.mrb[0].mxu1  ;;  %v685_v48 = vpop.f32.mrb[1].mxu0 }
  0xf8   :  { %v686_v49 = vadd.f32 %v685_v48, %v684_v46  ;;  %v713_v50 = vpop.f32.mrb[1].mxu1  ;;  %v687_v51 = vpop.f32.mrb[2].mxu0 }
  0xf9   :  { %v714_v52 = vadd.f32 %v713_v50, %v712_v47  ;;  %v715_v53 = vpop.f32.mrb[2].mxu1  ;;  %v688_v54 = vpop.f32.mrb[3].mxu0 }
  0xfa   :  { %v689_v55 = vadd.f32 %v688_v54, %v687_v51  ;;  %v716_v56 = vpop.f32.mrb[3].mxu1 }
  0xfb   :  { %v717_v57 = vadd.f32 %v716_v56, %v715_v53  ;;  %v471_v58 = vadd.f32 %v714_v52, %v686_v49 }
  0xfd   :  { %v474_v59 = vadd.f32 %v717_v57, %v689_v55 }
  0xfe   :  { %v690_v60 = vpop.f32.mrb[4].mxu0 }
  0xff   :  { %v718_v61 = vpop.f32.mrb[4].mxu1  ;;  %v691_v62 = vpop.f32.mrb[5].mxu0 }
 0x100   :  { %v692_v63 = vadd.f32 %v691_v62, %v690_v60  ;;  %v719_v0 = vpop.f32.mrb[5].mxu1  ;;  %v693_v1 = vpop.f32.mrb[6].mxu0 }
 0x101   :  { %v720_v2 = vadd.f32 %v719_v0, %v718_v61  ;;  %v721_v3 = vpop.f32.mrb[6].mxu1  ;;  %v694_v4 = vpop.f32.mrb[7].mxu0 }
 0x102   :  { %v695_v5 = vadd.f32 %v694_v4, %v693_v1  ;;  %v722_v6 = vpop.f32.mrb[7].mxu1 }
 0x103   :  { %v723_v7 = vadd.f32 %v722_v6, %v721_v3  ;;  %v479_v8 = vadd.f32 %v720_v2, %v692_v63 }
 0x105   :  { %v482_v9 = vadd.f32 %v723_v7, %v695_v5 }
 0x107   :  { %v740_v10 = vpop.f32.mrb[8].mxu0 }
 0x108   :  { %v528_v12 = vadd.f32 %v740_v10, %v479_v8  ;;  %v519_v13 = vpop.f32.mrb[9].mxu0 }
 0x109   :  { %v520_v15 = vadd.f32 %v519_v13, %v471_v58  ;;  %v741_v16 = vpop.f32.mrb[10].mxu0 }
 0x10a   :  { %v558_v17 = vmul.f32 %v647_v11, %v528_v12  ;;  %v531_v18 = vadd.f32 %v741_v16, %v482_v9  ;;  %v522_v19 = vpop.f32.mrb[11].mxu0 }
 0x10b   :  { %v556_v20 = vmul.f32 %v647_v11, %v520_v15  ;;  %v523_v21 = vadd.f32 %v522_v19, %v474_v59 }
 0x10c   :  { %v569_v22 = vadd.f32 %v648_v14, %v558_v17  ;;  %v559_v23 = vmul.f32 %v647_v11, %v531_v18 }
 0x10d   :  { %v567_v24 = vadd.f32 %v648_v14, %v556_v20  ;;  %v557_v25 = vmul.f32 %v647_v11, %v523_v21 }
 0x10e   :  { %v570_v26 = vadd.f32 %v648_v14, %v559_v23  ;;  %v573_v28 = vmax.f32 %v569_v22, 0.0 }
 0x10f   :  { %v568_v27 = vadd.f32 %v648_v14, %v557_v25  ;;  %v571_v30 = vmax.f32 %v567_v24, 0.0 }
 0x110   :  { %v574_v29 = vmax.f32 %v570_v26, 0.0 }
 0x111   :  { %v572_v31 = vmax.f32 %v568_v27, 0.0 }
 0x112   :  { %v665_v32 = vpack.c.bf16 %v574_v29, %v573_v28 }
 0x113   :  { %v660_v33 = vpack.c.bf16 %v572_v31, %v571_v30 }
 0x114   :  { %667 = vst [vmem:[%s971_s4 + $0x8] sm:$0xff] %v665_v32  }
 0x115   :  { %661 = vst [vmem:[%s971_s4] sm:$0xff] %v660_v33  }

// kernel: wide_resnet_ae_forward.50
= control target key start
LH: loop header
LB: loop body
LE: loop exit
PB: predicated region body
PF: predicated region fallthrough
CT: control target
= control target key end

     0   :  { %vm70_vm0 = vcmask 523264   ;;  %s226_s1 = inlined_call_operand.vmem [shape: bf16[64,128], index: 1, kind: input, shape index: {}]   ;;  %s227_s0 = inlined_call_operand.vmem [shape: bf16[32,64], index: 0, kind: input, shape index: {}]   ;;  %s228_s2 = inlined_call_operand.vmem [shape: f32[32,128], index: 2, kind: output, shape index: {}]  }
   0x1   :  { %v175_v0 = vld [vmem:[%s226_s1] sm:$0xff]   ;;  %v176_v1 = vld [vmem:[%s226_s1 + $0x8] sm:$0xff]   ;;  %v177_v2 = vld [vmem:[%s226_s1 + $0x10] sm:$0xff]  }
   0x2   :  { %163 = vmatprep.subr.bf16.mxu0 %v175_v0  ;;  %v179_v3 = vld [vmem:[%s227_s0] sm:$0xff]   ;;  %v178_v4 = vld [vmem:[%s226_s1 + $0x18] sm:$0xff]   ;;  %v180_v5 = vld [vmem:[%s227_s0 + $0x8] sm:$0xff]  }
   0x3   :  { %164 = vmatpush3.bf16.msra.mxu0 %v175_v0  ;;  %171 = vmatprep.mubr.msk.bf16.mxu0 %vm70_vm0, %v179_v3 }
   0x4   :  { %165 = vmatprep.subr.bf16.mxu0 %v176_v1 }
   0x7   :  { %166 = vmatpush3.bf16.msra.mxu0 %v176_v1 }
   0x8   :  { %167 = vmatprep.subr.bf16.mxu0 %v177_v2 }
   0xb   :  { %168 = vmatpush3.bf16.msra.mxu0 %v177_v2 }
   0xc   :  { %169 = vmatprep.subr.bf16.mxu0 %v178_v4 }
   0xf   :  { %170 = vmatpush3.bf16.msra.mxu0 %v178_v4 }
  0x12   :  { %172 = vmatmul.mubr.msk.bf16.vlgmr.msra.gmra.mrb[0].mxu0 %vm70_vm0, %v180_v5 }
  0xe5   :  { %v173_v6 = vpop.f32.mrb[0].mxu0 }
  0xe6   :  { %143 = vst [vmem:[%s228_s2 + $0x10] sm:$0xff] %v173_v6  ;;  %v111_v7 = vpop.f32.mrb[1].mxu0 }
  0xe7   :  { %141 = vst [vmem:[%s228_s2] sm:$0xff] %v111_v7  ;;  %v174_v8 = vpop.f32.mrb[2].mxu0 }
  0xe8   :  { %144 = vst [vmem:[%s228_s2 + $0x18] sm:$0xff] %v174_v8  ;;  %v114_v9 = vpop.f32.mrb[3].mxu0 }
  0xe9   :  { %142 = vst [vmem:[%s228_s2 + $0x8] sm:$0xff] %v114_v9 }

// kernel: wide_resnet_ae_forward.51
= control target key start
LH: loop header
LB: loop body
LE: loop exit
PB: predicated region body
PF: predicated region fallthrough
CT: control target
= control target key end

     0   :  { %v521_v0 = vmov 0   ;;  %vm211_vm0 = vcmask 130048   ;;  %s721_s1 = inlined_call_operand.vmem [shape: bf16[144,128], index: 1, kind: input, shape index: {}]   ;;  %s722_s0 = inlined_call_operand.vmem [shape: bf16[128,144], index: 0, kind: input, shape index: {}]   ;;  %s723_s2 = inlined_call_operand.vmem [shape: f32[128,128], index: 2, kind: input, shape index: {}]   ;;  %s724_s3 = inlined_call_operand.vmem [shape: f32[128,128], index: 3, kind: output, shape index: {}]  }
   0x1   :  { %236 = vmatprep.subr.bf16.mxu0 %v521_v0  ;;  %469 = vmatprep.subr.bf16.mxu1 %v521_v0  ;;  %v488_v1 = vld [vmem:[%s721_s1] sm:$0xff]   ;;  %v489_v2 = vld [vmem:[%s721_s1 + $0x8] sm:$0xff]   ;;  %v490_v3 = vld [vmem:[%s721_s1 + $0x10] sm:$0xff]  }
   0x2   :  { %237 = vmatpush1.bf16.msra.mxu0 %v488_v1  ;;  %478 = vmatpush1.bf16.msra.mxu1 %v488_v1  ;;  %v491_v4 = vld [vmem:[%s721_s1 + $0x18] sm:$0xff]   ;;  %v499_v5 = vld [vmem:[%s722_s0 + $0x4] ss:$8 sps:$4 sm:$0xff]   ;;  %v494_v9 = vld [vmem:[%s721_s1 + $0x30] sm:$0xff]  }
   0x3   :  { %238 = vmatprep.subr.bf16.mxu0 %v521_v0  ;;  %470 = vmatprep.subr.bf16.mxu1 %v521_v0  ;;  %v502_v6 = vld [vmem:[%s722_s0 + $0x44] ss:$8 sps:$4 sm:$0xff]   ;;  %v495_v10 = vld [vmem:[%s721_s1 + $0x38] sm:$0xff]   ;;  %v497_v12 = vld [vmem:[%s722_s0] ss:$8 sps:$4 sm:$0xff]  }
   0x4   :  { %461 = vmatprep.mubr.msk.bf16.mxu0 %vm211_vm0, %v499_v5  ;;  %465 = vmatprep.mubr.msk.bf16.mxu1 %vm211_vm0, %v502_v6  ;;  %v492_v7 = vld [vmem:[%s721_s1 + $0x20] sm:$0xff]   ;;  %v493_v8 = vld [vmem:[%s721_s1 + $0x28] sm:$0xff]   ;;  %v503_v14 = vld [vmem:[%s722_s0 + $0x14] ss:$8 sps:$4 sm:$0xff]  }
   0x5   :  { %v496_v11 = vld [vmem:[%s721_s1 + $0x40] sm:$0xff]   ;;  %v505_v15 = vld [vmem:[%s722_s0 + $0x54] ss:$8 sps:$4 sm:$0xff]   ;;  %v507_v16 = vld [vmem:[%s722_s0 + $0x10] ss:$8 sps:$4 sm:$0xff]  }
   0x6   :  { %239 = vmatpush1.bf16.msra.mxu0 %v489_v2  ;;  %479 = vmatpush1.bf16.msra.mxu1 %v489_v2  ;;  %v500_v13 = vld [vmem:[%s722_s0 + $0x40] ss:$8 sps:$4 sm:$0xff]   ;;  %v508_v17 = vld [vmem:[%s722_s0 + $0x50] ss:$8 sps:$4 sm:$0xff]   ;;  %v509_v18 = vld [vmem:[%s722_s0 + $0x24] ss:$8 sps:$4 sm:$0xff]  }
   0x7   :  { %240 = vmatprep.subr.bf16.mxu0 %v521_v0  ;;  %471 = vmatprep.subr.bf16.mxu1 %v521_v0  ;;  %v511_v19 = vld [vmem:[%s722_s0 + $0x64] ss:$8 sps:$4 sm:$0xff]   ;;  %v513_v20 = vld [vmem:[%s722_s0 + $0x20] ss:$8 sps:$4 sm:$0xff]   ;;  %v515_v22 = vld [vmem:[%s722_s0 + $0x34] ss:$8 sps:$4 sm:$0xff]  }
   0x8   :  { %v514_v21 = vld [vmem:[%s722_s0 + $0x60] ss:$8 sps:$4 sm:$0xff]   ;;  %v517_v23 = vld [vmem:[%s722_s0 + $0x74] ss:$8 sps:$4 sm:$0xff]   ;;  %v519_v24 = vld [vmem:[%s722_s0 + $0x30] ss:$8 sps:$4 sm:$0xff]  }
   0x9   :  { %v520_v25 = vld [vmem:[%s722_s0 + $0x70] ss:$8 sps:$4 sm:$0xff]   ;;  %v384_v26 = vld [vmem:[%s723_s2] sm:$0xff]  ;;  %v385_v30 = vld [vmem:[%s723_s2 + $0x8] sm:$0xff] }
   0xa   :  { %241 = vmatpush1.bf16.msra.mxu0 %v490_v3  ;;  %480 = vmatpush1.bf16.msra.mxu1 %v490_v3  ;;  %v392_v27 = vld [vmem:[%s723_s2 + $0x40] sm:$0xff]  ;;  %v393_v31 = vld [vmem:[%s723_s2 + $0x48] sm:$0xff]  ;;  %v386_v42 = vld [vmem:[%s723_s2 + $0x10] sm:$0xff] }
   0xb   :  { %242 = vmatprep.subr.bf16.mxu0 %v521_v0  ;;  %472 = vmatprep.subr.bf16.mxu1 %v521_v0  ;;  %v394_v43 = vld [vmem:[%s723_s2 + $0x50] sm:$0xff]  ;;  %v387_v46 = vld [vmem:[%s723_s2 + $0x18] sm:$0xff]  ;;  %v388_v58 = vld [vmem:[%s723_s2 + $0x20] sm:$0xff] }
   0xc   :  { %v395_v47 = vld [vmem:[%s723_s2 + $0x58] sm:$0xff]  ;;  %v396_v59 = vld [vmem:[%s723_s2 + $0x60] sm:$0xff]  ;;  %v389_v62 = vld [vmem:[%s723_s2 + $0x28] sm:$0xff] }
   0xd   :  { %v397_v63 = vld [vmem:[%s723_s2 + $0x68] sm:$0xff] }
   0xe   :  { %243 = vmatpush1.bf16.msra.mxu0 %v491_v4  ;;  %481 = vmatpush1.bf16.msra.mxu1 %v491_v4 }
   0xf   :  { %244 = vmatprep.subr.bf16.mxu0 %v521_v0  ;;  %473 = vmatprep.subr.bf16.mxu1 %v521_v0 }
  0x12   :  { %245 = vmatpush1.bf16.msra.mxu0 %v492_v7  ;;  %482 = vmatpush1.bf16.msra.mxu1 %v492_v7 }
  0x13   :  { %246 = vmatprep.subr.bf16.mxu0 %v521_v0  ;;  %474 = vmatprep.subr.bf16.mxu1 %v521_v0 }
  0x16   :  { %247 = vmatpush1.bf16.msra.mxu0 %v493_v8  ;;  %483 = vmatpush1.bf16.msra.mxu1 %v493_v8 }
  0x17   :  { %248 = vmatprep.subr.bf16.mxu0 %v521_v0  ;;  %475 = vmatprep.subr.bf16.mxu1 %v521_v0 }
  0x1a   :  { %249 = vmatpush1.bf16.msra.mxu0 %v494_v9  ;;  %484 = vmatpush1.bf16.msra.mxu1 %v494_v9 }
  0x1b   :  { %250 = vmatprep.subr.bf16.mxu0 %v521_v0  ;;  %476 = vmatprep.subr.bf16.mxu1 %v521_v0 }
  0x1e   :  { %251 = vmatpush1.bf16.msra.mxu0 %v495_v10  ;;  %485 = vmatpush1.bf16.msra.mxu1 %v495_v10  ;;  %v390_v10 = vld [vmem:[%s723_s2 + $0x30] sm:$0xff] }
  0x1f   :  { %252 = vmatprep.subr.bf16.mxu0 %v521_v0  ;;  %477 = vmatprep.subr.bf16.mxu1 %v521_v0 }
  0x22   :  { %253 = vmatpush1.bf16.msra.mxu0 %v496_v11  ;;  %486 = vmatpush1.bf16.msra.mxu1 %v496_v11  ;;  %v398_v11 = vld [vmem:[%s723_s2 + $0x70] sm:$0xff] }
  0x25   :  { %269 = vmatmul.mubr.bf16.vlgmr.msra.gmra.mrb[0].mxu0 %v497_v12  ;;  %301 = vmatmul.mubr.bf16.vlgmr.msra.gmra.mrb[0].mxu1 %v500_v13 }
  0x26   :  { %462 = vmatprep.mubr.msk.bf16.mxu0 %vm211_vm0, %v503_v14  ;;  %466 = vmatprep.mubr.msk.bf16.mxu1 %vm211_vm0, %v505_v15  ;;  %v391_v14 = vld [vmem:[%s723_s2 + $0x38] sm:$0xff] }
  0x27   :  { %v399_v15 = vld [vmem:[%s723_s2 + $0x78] sm:$0xff] }
  0x2d   :  { %277 = vmatmul.mubr.bf16.gmra.mrb[4].mxu0 %v507_v16  ;;  %309 = vmatmul.mubr.bf16.gmra.mrb[4].mxu1 %v508_v17 }
  0x2e   :  { %463 = vmatprep.mubr.msk.bf16.mxu0 %vm211_vm0, %v509_v18  ;;  %467 = vmatprep.mubr.msk.bf16.mxu1 %vm211_vm0, %v511_v19 }
  0x35   :  { %285 = vmatmul.mubr.bf16.gmra.mrb[8].mxu0 %v513_v20  ;;  %317 = vmatmul.mubr.bf16.gmra.mrb[8].mxu1 %v514_v21 }
  0x36   :  { %464 = vmatprep.mubr.msk.bf16.mxu0 %vm211_vm0, %v515_v22  ;;  %468 = vmatprep.mubr.msk.bf16.mxu1 %vm211_vm0, %v517_v23 }
  0x3d   :  { %293 = vmatmul.mubr.bf16.gmra.mrb[12].mxu0 %v519_v24  ;;  %325 = vmatmul.mubr.bf16.gmra.mrb[12].mxu1 %v520_v25 }
  0xf8   :  { %v270_v28 = vpop.f32.mrb[0].mxu0  ;;  %v302_v29 = vpop.f32.mrb[0].mxu1 }
  0xf9   :  { %v400_v32 = vadd.f32 %v384_v26, %v270_v28  ;;  %v408_v33 = vadd.f32 %v392_v27, %v302_v29  ;;  %v272_v34 = vpop.f32.mrb[1].mxu0  ;;  %v304_v35 = vpop.f32.mrb[1].mxu1 }
  0xfa   :  { %v273_v36 = vpop.f32.mrb[2].mxu0  ;;  %v305_v37 = vpop.f32.mrb[2].mxu1 }
  0xfb   :  { %416 = vst [vmem:[%s724_s3] sm:$0xff] %v400_v32  ;;  %424 = vst [vmem:[%s724_s3 + $0x40] sm:$0xff] %v408_v33  ;;  %v401_v38 = vadd.f32 %v385_v30, %v273_v36  ;;  %v409_v39 = vadd.f32 %v393_v31, %v305_v37  ;;  %v275_v40 = vpop.f32.mrb[3].mxu0  ;;  %v307_v41 = vpop.f32.mrb[3].mxu1 }
  0xfd   :  { %417 = vst [vmem:[%s724_s3 + $0x8] sm:$0xff] %v401_v38  ;;  %425 = vst [vmem:[%s724_s3 + $0x48] sm:$0xff] %v409_v39 }
 0x100   :  { %v278_v44 = vpop.f32.mrb[4].mxu0  ;;  %v310_v45 = vpop.f32.mrb[4].mxu1 }
 0x101   :  { %v402_v48 = vadd.f32 %v386_v42, %v278_v44  ;;  %v410_v49 = vadd.f32 %v394_v43, %v310_v45  ;;  %v280_v50 = vpop.f32.mrb[5].mxu0  ;;  %v312_v51 = vpop.f32.mrb[5].mxu1 }
 0x102   :  { %v281_v52 = vpop.f32.mrb[6].mxu0  ;;  %v313_v53 = vpop.f32.mrb[6].mxu1 }
 0x103   :  { %418 = vst [vmem:[%s724_s3 + $0x10] sm:$0xff] %v402_v48  ;;  %426 = vst [vmem:[%s724_s3 + $0x50] sm:$0xff] %v410_v49  ;;  %v403_v54 = vadd.f32 %v387_v46, %v281_v52  ;;  %v411_v55 = vadd.f32 %v395_v47, %v313_v53  ;;  %v283_v56 = vpop.f32.mrb[7].mxu0  ;;  %v315_v57 = vpop.f32.mrb[7].mxu1 }
 0x105   :  { %419 = vst [vmem:[%s724_s3 + $0x18] sm:$0xff] %v403_v54  ;;  %427 = vst [vmem:[%s724_s3 + $0x58] sm:$0xff] %v411_v55 }
 0x108   :  { %v286_v60 = vpop.f32.mrb[8].mxu0  ;;  %v318_v61 = vpop.f32.mrb[8].mxu1 }
 0x109   :  { %v404_v0 = vadd.f32 %v388_v58, %v286_v60  ;;  %v412_v1 = vadd.f32 %v396_v59, %v318_v61  ;;  %v288_v2 = vpop.f32.mrb[9].mxu0  ;;  %v320_v3 = vpop.f32.mrb[9].mxu1 }
 0x10a   :  { %v289_v4 = vpop.f32.mrb[10].mxu0  ;;  %v321_v5 = vpop.f32.mrb[10].mxu1 }
 0x10b   :  { %420 = vst [vmem:[%s724_s3 + $0x20] sm:$0xff] %v404_v0  ;;  %428 = vst [vmem:[%s724_s3 + $0x60] sm:$0xff] %v412_v1  ;;  %v405_v6 = vadd.f32 %v389_v62, %v289_v4  ;;  %v413_v7 = vadd.f32 %v397_v63, %v321_v5  ;;  %v291_v8 = vpop.f32.mrb[11].mxu0  ;;  %v323_v9 = vpop.f32.mrb[11].mxu1 }
 0x10d   :  { %421 = vst [vmem:[%s724_s3 + $0x28] sm:$0xff] %v405_v6  ;;  %429 = vst [vmem:[%s724_s3 + $0x68] sm:$0xff] %v413_v7 }
 0x110   :  { %v294_v12 = vpop.f32.mrb[12].mxu0  ;;  %v326_v13 = vpop.f32.mrb[12].mxu1 }
 0x111   :  { %v406_v16 = vadd.f32 %v390_v10, %v294_v12  ;;  %v414_v17 = vadd.f32 %v398_v11, %v326_v13  ;;  %v296_v18 = vpop.f32.mrb[13].mxu0  ;;  %v328_v19 = vpop.f32.mrb[13].mxu1 }
 0x112   :  { %v297_v20 = vpop.f32.mrb[14].mxu0  ;;  %v329_v21 = vpop.f32.mrb[14].mxu1 }
 0x113   :  { %422 = vst [vmem:[%s724_s3 + $0x30] sm:$0xff] %v406_v16  ;;  %430 = vst [vmem:[%s724_s3 + $0x70] sm:$0xff] %v414_v17  ;;  %v407_v22 = vadd.f32 %v391_v14, %v297_v20  ;;  %v415_v23 = vadd.f32 %v399_v15, %v329_v21  ;;  %v299_v24 = vpop.f32.mrb[15].mxu0  ;;  %v331_v25 = vpop.f32.mrb[15].mxu1 }
 0x115   :  { %423 = vst [vmem:[%s724_s3 + $0x38] sm:$0xff] %v407_v22  ;;  %431 = vst [vmem:[%s724_s3 + $0x78] sm:$0xff] %v415_v23 }

// kernel: wide_resnet_ae_forward.53
= control target key start
LH: loop header
LB: loop body
LE: loop exit
PB: predicated region body
PF: predicated region fallthrough
CT: control target
= control target key end

     0   :  { %v699_v0 = vmov 0   ;;  %vm214_vm0 = vcmask 130048   ;;  %s874_s1 = inlined_call_operand.vmem [shape: bf16[144,128], index: 1, kind: input, shape index: {}]   ;;  %s875_s0 = inlined_call_operand.vmem [shape: bf16[128,144], index: 0, kind: input, shape index: {}]   ;;  %s876_s2 = inlined_call_operand.vmem [shape: f32[1,128], index: 2, kind: input, shape index: {}]   ;;  %s877_s3 = inlined_call_operand.vmem [shape: f32[1,128], index: 3, kind: input, shape index: {}]   ;;  %s878_s4 = inlined_call_operand.vmem [shape: bf16[128,128], index: 4, kind: output, shape index: {}]  }
   0x1   :  { %239 = vmatprep.subr.bf16.mxu0 %v699_v0  ;;  %647 = vmatprep.subr.bf16.mxu1 %v699_v0  ;;  %v666_v1 = vld [vmem:[%s874_s1] sm:$0xff]   ;;  %v667_v2 = vld [vmem:[%s874_s1 + $0x8] sm:$0xff]   ;;  %v668_v3 = vld [vmem:[%s874_s1 + $0x10] sm:$0xff]  }
   0x2   :  { %240 = vmatpush1.bf16.msra.mxu0 %v666_v1  ;;  %656 = vmatpush1.bf16.msra.mxu1 %v666_v1  ;;  %v669_v4 = vld [vmem:[%s874_s1 + $0x18] sm:$0xff]   ;;  %v677_v5 = vld [vmem:[%s875_s0 + $0x4] ss:$8 sps:$4 sm:$0xff]   ;;  %v672_v9 = vld [vmem:[%s874_s1 + $0x30] sm:$0xff]  }
   0x3   :  { %241 = vmatprep.subr.bf16.mxu0 %v699_v0  ;;  %648 = vmatprep.subr.bf16.mxu1 %v699_v0  ;;  %v680_v6 = vld [vmem:[%s875_s0 + $0x44] ss:$8 sps:$4 sm:$0xff]   ;;  %v673_v10 = vld [vmem:[%s874_s1 + $0x38] sm:$0xff]   ;;  %v675_v12 = vld [vmem:[%s875_s0] ss:$8 sps:$4 sm:$0xff]  }
   0x4   :  { %558 = vmatprep.mubr.msk.bf16.mxu0 %vm214_vm0, %v677_v5  ;;  %562 = vmatprep.mubr.msk.bf16.mxu1 %vm214_vm0, %v680_v6  ;;  %v670_v7 = vld [vmem:[%s874_s1 + $0x20] sm:$0xff]   ;;  %v671_v8 = vld [vmem:[%s874_s1 + $0x28] sm:$0xff]   ;;  %v681_v14 = vld [vmem:[%s875_s0 + $0x14] ss:$8 sps:$4 sm:$0xff]  }
   0x5   :  { %v674_v11 = vld [vmem:[%s874_s1 + $0x40] sm:$0xff]   ;;  %v683_v15 = vld [vmem:[%s875_s0 + $0x54] ss:$8 sps:$4 sm:$0xff]   ;;  %v685_v16 = vld [vmem:[%s875_s0 + $0x10] ss:$8 sps:$4 sm:$0xff]  }
   0x6   :  { %242 = vmatpush1.bf16.msra.mxu0 %v667_v2  ;;  %657 = vmatpush1.bf16.msra.mxu1 %v667_v2  ;;  %v678_v13 = vld [vmem:[%s875_s0 + $0x40] ss:$8 sps:$4 sm:$0xff]   ;;  %v686_v17 = vld [vmem:[%s875_s0 + $0x50] ss:$8 sps:$4 sm:$0xff]   ;;  %v687_v18 = vld [vmem:[%s875_s0 + $0x24] ss:$8 sps:$4 sm:$0xff]  }
   0x7   :  { %243 = vmatprep.subr.bf16.mxu0 %v699_v0  ;;  %649 = vmatprep.subr.bf16.mxu1 %v699_v0  ;;  %v689_v19 = vld [vmem:[%s875_s0 + $0x64] ss:$8 sps:$4 sm:$0xff]   ;;  %v691_v20 = vld [vmem:[%s875_s0 + $0x20] ss:$8 sps:$4 sm:$0xff]   ;;  %v693_v22 = vld [vmem:[%s875_s0 + $0x34] ss:$8 sps:$4 sm:$0xff]  }
   0x8   :  { %v692_v21 = vld [vmem:[%s875_s0 + $0x60] ss:$8 sps:$4 sm:$0xff]   ;;  %v695_v23 = vld [vmem:[%s875_s0 + $0x74] ss:$8 sps:$4 sm:$0xff]   ;;  %v697_v24 = vld [vmem:[%s875_s0 + $0x30] ss:$8 sps:$4 sm:$0xff]  }
   0x9   :  { %v698_v25 = vld [vmem:[%s875_s0 + $0x70] ss:$8 sps:$4 sm:$0xff]   ;;  %v811_v26 = vld [vmem:[%s876_s2] ss:$0 sm:$0xff] }
   0xa   :  { %244 = vmatpush1.bf16.msra.mxu0 %v668_v3  ;;  %658 = vmatpush1.bf16.msra.mxu1 %v668_v3  ;;  %v816_v28 = vld [vmem:[%s877_s3] ss:$0 sm:$0xff] }
   0xb   :  { %245 = vmatprep.subr.bf16.mxu0 %v699_v0  ;;  %650 = vmatprep.subr.bf16.mxu1 %v699_v0 }
   0xe   :  { %246 = vmatpush1.bf16.msra.mxu0 %v669_v4  ;;  %659 = vmatpush1.bf16.msra.mxu1 %v669_v4 }
   0xf   :  { %247 = vmatprep.subr.bf16.mxu0 %v699_v0  ;;  %651 = vmatprep.subr.bf16.mxu1 %v699_v0 }
  0x12   :  { %248 = vmatpush1.bf16.msra.mxu0 %v670_v7  ;;  %660 = vmatpush1.bf16.msra.mxu1 %v670_v7 }
  0x13   :  { %249 = vmatprep.subr.bf16.mxu0 %v699_v0  ;;  %652 = vmatprep.subr.bf16.mxu1 %v699_v0 }
  0x16   :  { %250 = vmatpush1.bf16.msra.mxu0 %v671_v8  ;;  %661 = vmatpush1.bf16.msra.mxu1 %v671_v8 }
  0x17   :  { %251 = vmatprep.subr.bf16.mxu0 %v699_v0  ;;  %653 = vmatprep.subr.bf16.mxu1 %v699_v0 }
  0x1a   :  { %252 = vmatpush1.bf16.msra.mxu0 %v672_v9  ;;  %662 = vmatpush1.bf16.msra.mxu1 %v672_v9 }
  0x1b   :  { %253 = vmatprep.subr.bf16.mxu0 %v699_v0  ;;  %654 = vmatprep.subr.bf16.mxu1 %v699_v0 }
  0x1e   :  { %254 = vmatpush1.bf16.msra.mxu0 %v673_v10  ;;  %663 = vmatpush1.bf16.msra.mxu1 %v673_v10 }
  0x1f   :  { %255 = vmatprep.subr.bf16.mxu0 %v699_v0  ;;  %655 = vmatprep.subr.bf16.mxu1 %v699_v0 }
  0x22   :  { %256 = vmatpush1.bf16.msra.mxu0 %v674_v11  ;;  %664 = vmatpush1.bf16.msra.mxu1 %v674_v11 }
  0x25   :  { %272 = vmatmul.mubr.bf16.vlgmr.msra.gmra.mrb[0].mxu0 %v675_v12  ;;  %304 = vmatmul.mubr.bf16.vlgmr.msra.gmra.mrb[0].mxu1 %v678_v13 }
  0x26   :  { %559 = vmatprep.mubr.msk.bf16.mxu0 %vm214_vm0, %v681_v14  ;;  %563 = vmatprep.mubr.msk.bf16.mxu1 %vm214_vm0, %v683_v15 }
  0x2d   :  { %280 = vmatmul.mubr.bf16.gmra.mrb[4].mxu0 %v685_v16  ;;  %312 = vmatmul.mubr.bf16.gmra.mrb[4].mxu1 %v686_v17 }
  0x2e   :  { %560 = vmatprep.mubr.msk.bf16.mxu0 %vm214_vm0, %v687_v18  ;;  %564 = vmatprep.mubr.msk.bf16.mxu1 %vm214_vm0, %v689_v19 }
  0x35   :  { %288 = vmatmul.mubr.bf16.gmra.mrb[8].mxu0 %v691_v20  ;;  %320 = vmatmul.mubr.bf16.gmra.mrb[8].mxu1 %v692_v21 }
  0x36   :  { %561 = vmatprep.mubr.msk.bf16.mxu0 %vm214_vm0, %v693_v22  ;;  %565 = vmatprep.mubr.msk.bf16.mxu1 %vm214_vm0, %v695_v23 }
  0x3d   :  { %296 = vmatmul.mubr.bf16.gmra.mrb[12].mxu0 %v697_v24  ;;  %328 = vmatmul.mubr.bf16.gmra.mrb[12].mxu1 %v698_v25 }
  0xf8   :  { %v273_v27 = vpop.f32.mrb[0].mxu0  ;;  %v305_v29 = vpop.f32.mrb[0].mxu1 }
  0xf9   :  { %v394_v30 = vmul.f32 %v811_v26, %v273_v27  ;;  %v402_v31 = vmul.f32 %v811_v26, %v305_v29  ;;  %v275_v32 = vpop.f32.mrb[1].mxu0  ;;  %v307_v33 = vpop.f32.mrb[1].mxu1 }
  0xfa   :  { %v276_v34 = vpop.f32.mrb[2].mxu0  ;;  %v308_v35 = vpop.f32.mrb[2].mxu1 }
  0xfb   :  { %v417_v36 = vadd.f32 %v816_v28, %v394_v30  ;;  %v425_v37 = vadd.f32 %v816_v28, %v402_v31  ;;  %v395_v38 = vmul.f32 %v811_v26, %v276_v34  ;;  %v403_v39 = vmul.f32 %v811_v26, %v308_v35  ;;  %v278_v40 = vpop.f32.mrb[3].mxu0  ;;  %v310_v41 = vpop.f32.mrb[3].mxu1 }
  0xfd   :  { %v418_v42 = vadd.f32 %v816_v28, %v395_v38  ;;  %v426_v43 = vadd.f32 %v816_v28, %v403_v39  ;;  %v433_v44 = vmax.f32 %v417_v36, 0.0  ;;  %v441_v45 = vmax.f32 %v425_v37, 0.0 }
  0xff   :  { %v434_v46 = vmax.f32 %v418_v42, 0.0  ;;  %v442_v47 = vmax.f32 %v426_v43, 0.0 }
 0x100   :  { %v281_v48 = vpop.f32.mrb[4].mxu0  ;;  %v313_v49 = vpop.f32.mrb[4].mxu1 }
 0x101   :  { %v603_v50 = vpack.c.bf16 %v434_v46, %v433_v44  ;;  %v623_v51 = vpack.c.bf16 %v442_v47, %v441_v45  ;;  %v396_v52 = vmul.f32 %v811_v26, %v281_v48  ;;  %v404_v53 = vmul.f32 %v811_v26, %v313_v49  ;;  %v283_v54 = vpop.f32.mrb[5].mxu0  ;;  %v315_v55 = vpop.f32.mrb[5].mxu1 }
 0x102   :  { %v284_v56 = vpop.f32.mrb[6].mxu0  ;;  %v316_v57 = vpop.f32.mrb[6].mxu1 }
 0x103   :  { %604 = vst [vmem:[%s878_s4] sm:$0xff] %v603_v50   ;;  %643 = vst [vmem:[%s878_s4 + $0x20] sm:$0xff] %v623_v51   ;;  %v419_v58 = vadd.f32 %v816_v28, %v396_v52  ;;  %v427_v59 = vadd.f32 %v816_v28, %v404_v53  ;;  %v397_v60 = vmul.f32 %v811_v26, %v284_v56  ;;  %v286_v62 = vpop.f32.mrb[7].mxu0  ;;  %v318_v63 = vpop.f32.mrb[7].mxu1 }
 0x104   :  { %v405_v61 = vmul.f32 %v811_v26, %v316_v57 }
 0x105   :  { %v420_v0 = vadd.f32 %v816_v28, %v397_v60  ;;  %v435_v2 = vmax.f32 %v419_v58, 0.0  ;;  %v443_v3 = vmax.f32 %v427_v59, 0.0 }
 0x106   :  { %v428_v1 = vadd.f32 %v816_v28, %v405_v61 }
 0x107   :  { %v436_v4 = vmax.f32 %v420_v0, 0.0 }
 0x108   :  { %v444_v5 = vmax.f32 %v428_v1, 0.0  ;;  %v289_v6 = vpop.f32.mrb[8].mxu0  ;;  %v321_v7 = vpop.f32.mrb[8].mxu1 }
 0x109   :  { %v608_v8 = vpack.c.bf16 %v436_v4, %v435_v2  ;;  %v398_v10 = vmul.f32 %v811_v26, %v289_v6  ;;  %v406_v11 = vmul.f32 %v811_v26, %v321_v7  ;;  %v291_v12 = vpop.f32.mrb[9].mxu0  ;;  %v323_v13 = vpop.f32.mrb[9].mxu1 }
 0x10a   :  { %v628_v9 = vpack.c.bf16 %v444_v5, %v443_v3  ;;  %v292_v14 = vpop.f32.mrb[10].mxu0  ;;  %v324_v15 = vpop.f32.mrb[10].mxu1 }
 0x10b   :  { %640 = vst [vmem:[%s878_s4 + $0x8] sm:$0xff] %v608_v8   ;;  %v421_v16 = vadd.f32 %v816_v28, %v398_v10  ;;  %v429_v17 = vadd.f32 %v816_v28, %v406_v11  ;;  %v399_v18 = vmul.f32 %v811_v26, %v292_v14  ;;  %v407_v19 = vmul.f32 %v811_v26, %v324_v15  ;;  %v294_v20 = vpop.f32.mrb[11].mxu0  ;;  %v326_v21 = vpop.f32.mrb[11].mxu1 }
 0x10c   :  { %644 = vst [vmem:[%s878_s4 + $0x28] sm:$0xff] %v628_v9  }
 0x10d   :  { %v422_v22 = vadd.f32 %v816_v28, %v399_v18  ;;  %v430_v23 = vadd.f32 %v816_v28, %v407_v19  ;;  %v437_v24 = vmax.f32 %v421_v16, 0.0  ;;  %v445_v25 = vmax.f32 %v429_v17, 0.0 }
 0x10f   :  { %v438_v27 = vmax.f32 %v422_v22, 0.0  ;;  %v446_v29 = vmax.f32 %v430_v23, 0.0 }
 0x110   :  { %v297_v30 = vpop.f32.mrb[12].mxu0  ;;  %v329_v31 = vpop.f32.mrb[12].mxu1 }
 0x111   :  { %v613_v32 = vpack.c.bf16 %v438_v27, %v437_v24  ;;  %v633_v33 = vpack.c.bf16 %v446_v29, %v445_v25  ;;  %v400_v34 = vmul.f32 %v811_v26, %v297_v30  ;;  %v408_v35 = vmul.f32 %v811_v26, %v329_v31  ;;  %v299_v36 = vpop.f32.mrb[13].mxu0  ;;  %v331_v37 = vpop.f32.mrb[13].mxu1 }
 0x112   :  { %v300_v38 = vpop.f32.mrb[14].mxu0  ;;  %v332_v39 = vpop.f32.mrb[14].mxu1 }
 0x113   :  { %641 = vst [vmem:[%s878_s4 + $0x10] sm:$0xff] %v613_v32   ;;  %645 = vst [vmem:[%s878_s4 + $0x30] sm:$0xff] %v633_v33   ;;  %v423_v40 = vadd.f32 %v816_v28, %v400_v34  ;;  %v431_v41 = vadd.f32 %v816_v28, %v408_v35  ;;  %v401_v42 = vmul.f32 %v811_v26, %v300_v38  ;;  %v302_v44 = vpop.f32.mrb[15].mxu0  ;;  %v334_v45 = vpop.f32.mrb[15].mxu1 }
 0x114   :  { %v409_v43 = vmul.f32 %v811_v26, %v332_v39 }
 0x115   :  { %v424_v46 = vadd.f32 %v816_v28, %v401_v42  ;;  %v439_v48 = vmax.f32 %v423_v40, 0.0  ;;  %v447_v49 = vmax.f32 %v431_v41, 0.0 }
 0x116   :  { %v432_v47 = vadd.f32 %v816_v28, %v409_v43 }
 0x117   :  { %v440_v50 = vmax.f32 %v424_v46, 0.0 }
 0x118   :  { %v448_v51 = vmax.f32 %v432_v47, 0.0 }
 0x119   :  { %v618_v52 = vpack.c.bf16 %v440_v50, %v439_v48 }
 0x11a   :  { %v638_v53 = vpack.c.bf16 %v448_v51, %v447_v49 }
 0x11b   :  { %642 = vst [vmem:[%s878_s4 + $0x18] sm:$0xff] %v618_v52  }
 0x11c   :  { %646 = vst [vmem:[%s878_s4 + $0x38] sm:$0xff] %v638_v53  }

// kernel: wide_resnet_ae_forward.54
= control target key start
LH: loop header
LB: loop body
LE: loop exit
PB: predicated region body
PF: predicated region fallthrough
CT: control target
= control target key end

     0   :  { %vm112_vm0 = vcmask 130048   ;;  %s458_s1 = inlined_call_operand.vmem [shape: bf16[16,128], index: 1, kind: input, shape index: {}]   ;;  %s459_s0 = inlined_call_operand.vmem [shape: bf16[128,16], index: 0, kind: input, shape index: {}]   ;;  %s460_s2 = inlined_call_operand.vmem [shape: f32[128,128], index: 2, kind: output, shape index: {}]  }
   0x1   :  { %v351_v0 = vld [vmem:[%s458_s1] sm:$0xff]   ;;  %v354_v3 = vld [vmem:[%s459_s0 + $0x8] sm:$0xff]   ;;  %v356_v5 = vld [vmem:[%s459_s0 + $0x10] sm:$0xff]  }
   0x2   :  { %v352_v1 = vld [vmem:[%s459_s0] sm:$0xff]   ;;  %331 = vmatprep.subr.bf16.mxu0 %v351_v0  ;;  %349 = vmatprep.subr.bf16.mxu1 %v351_v0  ;;  %v355_v4 = vld [vmem:[%s459_s0 + $0x28] sm:$0xff]   ;;  %v357_v6 = vld [vmem:[%s459_s0 + $0x30] sm:$0xff]  }
   0x3   :  { %v353_v2 = vld [vmem:[%s459_s0 + $0x20] sm:$0xff]   ;;  %332 = vmatpush3.bf16.msra.mxu0 %v351_v0  ;;  %350 = vmatpush3.bf16.msra.mxu1 %v351_v0  ;;  %v358_v7 = vld [vmem:[%s459_s0 + $0x18] sm:$0xff]  }
   0x4   :  { %333 = vmatprep.mubr.msk.bf16.mxu0 %vm112_vm0, %v352_v1  ;;  %341 = vmatprep.mubr.msk.bf16.mxu1 %vm112_vm0, %v353_v2  ;;  %v359_v8 = vld [vmem:[%s459_s0 + $0x38] sm:$0xff]  }
   0x6   :  { %334 = vmatmul.mubr.msk.bf16.vlgmr.msra.gmra.mrb[0].mxu0 %vm112_vm0, %v354_v3  ;;  %342 = vmatmul.mubr.msk.bf16.vlgmr.msra.gmra.mrb[0].mxu1 %vm112_vm0, %v355_v4 }
   0x7   :  { %337 = vmatprep.mubr.msk.bf16.mxu0 %vm112_vm0, %v356_v5  ;;  %345 = vmatprep.mubr.msk.bf16.mxu1 %vm112_vm0, %v357_v6 }
   0xe   :  { %338 = vmatmul.mubr.msk.bf16.gmra.mrb[4].mxu0 %vm112_vm0, %v358_v7  ;;  %346 = vmatmul.mubr.msk.bf16.gmra.mrb[4].mxu1 %vm112_vm0, %v359_v8 }
  0xd9   :  { %v335_v9 = vpop.f32.mrb[0].mxu0  ;;  %v343_v10 = vpop.f32.mrb[0].mxu1 }
  0xda   :  { %287 = vst [vmem:[%s460_s2 + $0x10] sm:$0xff] %v335_v9  ;;  %295 = vst [vmem:[%s460_s2 + $0x50] sm:$0xff] %v343_v10  ;;  %v171_v11 = vpop.f32.mrb[1].mxu0  ;;  %v203_v12 = vpop.f32.mrb[1].mxu1 }
  0xdb   :  { %285 = vst [vmem:[%s460_s2] sm:$0xff] %v171_v11  ;;  %293 = vst [vmem:[%s460_s2 + $0x40] sm:$0xff] %v203_v12  ;;  %v336_v13 = vpop.f32.mrb[2].mxu0  ;;  %v344_v14 = vpop.f32.mrb[2].mxu1 }
  0xdc   :  { %288 = vst [vmem:[%s460_s2 + $0x18] sm:$0xff] %v336_v13  ;;  %296 = vst [vmem:[%s460_s2 + $0x58] sm:$0xff] %v344_v14  ;;  %v174_v15 = vpop.f32.mrb[3].mxu0  ;;  %v206_v16 = vpop.f32.mrb[3].mxu1 }
  0xdd   :  { %286 = vst [vmem:[%s460_s2 + $0x8] sm:$0xff] %v174_v15  ;;  %294 = vst [vmem:[%s460_s2 + $0x48] sm:$0xff] %v206_v16 }
  0xe1   :  { %v339_v17 = vpop.f32.mrb[4].mxu0  ;;  %v347_v18 = vpop.f32.mrb[4].mxu1 }
  0xe2   :  { %291 = vst [vmem:[%s460_s2 + $0x30] sm:$0xff] %v339_v17  ;;  %299 = vst [vmem:[%s460_s2 + $0x70] sm:$0xff] %v347_v18  ;;  %v187_v19 = vpop.f32.mrb[5].mxu0  ;;  %v219_v20 = vpop.f32.mrb[5].mxu1 }
  0xe3   :  { %289 = vst [vmem:[%s460_s2 + $0x20] sm:$0xff] %v187_v19  ;;  %297 = vst [vmem:[%s460_s2 + $0x60] sm:$0xff] %v219_v20  ;;  %v340_v21 = vpop.f32.mrb[6].mxu0  ;;  %v348_v22 = vpop.f32.mrb[6].mxu1 }
  0xe4   :  { %292 = vst [vmem:[%s460_s2 + $0x38] sm:$0xff] %v340_v21  ;;  %300 = vst [vmem:[%s460_s2 + $0x78] sm:$0xff] %v348_v22  ;;  %v190_v23 = vpop.f32.mrb[7].mxu0  ;;  %v222_v24 = vpop.f32.mrb[7].mxu1 }
  0xe5   :  { %290 = vst [vmem:[%s460_s2 + $0x28] sm:$0xff] %v190_v23  ;;  %298 = vst [vmem:[%s460_s2 + $0x68] sm:$0xff] %v222_v24 }

// kernel: wide_resnet_ae_forward.55
= control target key start
LH: loop header
LB: loop body
LE: loop exit
PB: predicated region body
PF: predicated region fallthrough
CT: control target
= control target key end

     0   :  { %s1523_s12 = smov 0   ;;  %s1525_s13 = smov 0   ;;  %s1729_s0 = inlined_call_operand.vmem [shape: bf16[512,16], index: 0, kind: input, shape index: {}]   ;;  %s1730_s1 = inlined_call_operand.vmem [shape: bf16[16,128], index: 1, kind: input, shape index: {}]   ;;  %s1731_s2 = inlined_call_operand.vmem [shape: f32[512,128], index: 2, kind: input, shape index: {}]   ;;  %s1732_s3 = inlined_call_operand.vmem [shape: f32[512,128], index: 3, kind: output, shape index: {}]  }
   0x1   :  { %s1527_s14 = smov 0  }
   0x2 LB: > { %s32_s15 = sadd.s32 1, %s1497_s13  ;;  %p1183_p0 = scmp.ge.s32.totalorder %s1501_s14, 1  ;;  %s1501_s14 = sphi %s1527_s14, %s13_s14   ;;  %s1497_s13 = sphi %s1525_s13, %s1734_s13   ;;  %s1493_s12 = sphi %s1523_s12, %s1733_s12  }
   0x3   : > { %p34_p1 = scmp.ge.s32.totalorder %s32_s15, 2  ;;  %p196_p2 = scmp.lt.s32.totalorder %s1501_s14, 3 }
   0x5   : > { %s1736_s15 = smov (%p34_p1, %s32_s15), 0  ;;  %p197_p3 = pnand %p1183_p0, %p196_p2 }
   0x6   : > { %v1334_v0 = vld [vmem:[%s1730_s1] sm:$0xff] (!%p197_p3)   ;;  %s1184_s18 = sshll.u32 (!%p197_p3), %s1493_s12, 5  ;;  %vm467_vm0 = vcmask (!%p197_p3), 130048  }
   0x7   : > { %200 = sbr.rel (%p197_p3) target bundleno = 319 (0x13f), region = 32  ;;  %p243_p4 = scmp.lt.s32.totalorder (!%p197_p3), %s1184_s18, 63  ;;  %1274 = vmatprep.subr.bf16.mxu0 (!%p197_p3), %v1334_v0  ;;  %1308 = vmatprep.subr.bf16.mxu1 (!%p197_p3), %v1334_v0 }
   0x8   : > { %1275 = vmatpush3.bf16.msra.mxu0 (!%p197_p3), %v1334_v0  ;;  %1309 = vmatpush3.bf16.msra.mxu1 (!%p197_p3), %v1334_v0 }
   0xe   : > { %s1738_s18 = smov (!%p243_p4, %s1184_s18), 63 }
   0xf   : > { %s1185_s19 = sshll.u32 %s1738_s18, 2  ;;  %s1187_s23 = sshll.u32 %s1738_s18, 3 }
  0x10   : > { %s1550_s22 = scalar_lea.vmem %s1729_s0, %s1185_s19  ;;  %s1590_s26 = scalar_lea.vmem %s1731_s2, %s1187_s23 }
  0x11   : > { %v1335_v1 = vld [vmem:[%s1550_s22] sm:$0xff]   ;;  %v1337_v3 = vld [vmem:[%s1550_s22 + $0x8] sm:$0xff]   ;;  %v1339_v5 = vld [vmem:[%s1550_s22 + $0x10] sm:$0xff]   ;;  %s1649_s29 = scalar_lea.vmem %s1732_s3, %s1187_s23 }
  0x12   : > { %v1336_v2 = vld [vmem:[%s1550_s22 + $0x40] sm:$0xff]   ;;  %1276 = vmatprep.mubr.msk.bf16.mxu0 %vm467_vm0, %v1335_v1  ;;  %v1338_v4 = vld [vmem:[%s1550_s22 + $0x48] sm:$0xff]   ;;  %v1340_v6 = vld [vmem:[%s1550_s22 + $0x50] sm:$0xff]  }
  0x13   : > { %1292 = vmatprep.mubr.msk.bf16.mxu1 %vm467_vm0, %v1336_v2  ;;  %1277 = vmatmul.mubr.msk.bf16.vlgmr.msra.gmra.mrb[0].mxu0 %vm467_vm0, %v1337_v3  ;;  %v1341_v7 = vld [vmem:[%s1550_s22 + $0x18] sm:$0xff]   ;;  %v1343_v9 = vld [vmem:[%s1550_s22 + $0x20] sm:$0xff]   ;;  %v1345_v11 = vld [vmem:[%s1550_s22 + $0x28] sm:$0xff]  }
  0x14   : > { %1293 = vmatmul.mubr.msk.bf16.vlgmr.msra.gmra.mrb[0].mxu1 %vm467_vm0, %v1338_v4  ;;  %1280 = vmatprep.mubr.msk.bf16.mxu0 %vm467_vm0, %v1339_v5  ;;  %v1342_v8 = vld [vmem:[%s1550_s22 + $0x58] sm:$0xff]   ;;  %v1344_v10 = vld [vmem:[%s1550_s22 + $0x60] sm:$0xff]   ;;  %v1346_v12 = vld [vmem:[%s1550_s22 + $0x68] sm:$0xff]  }
  0x15   : > { %1296 = vmatprep.mubr.msk.bf16.mxu1 %vm467_vm0, %v1340_v6  ;;  %v1347_v13 = vld [vmem:[%s1550_s22 + $0x30] sm:$0xff]   ;;  %v1349_v15 = vld [vmem:[%s1550_s22 + $0x38] sm:$0xff]   ;;  %v776_v19 = vld [vmem:[%s1590_s26] sm:$0xff] }
  0x16   : > { %v1348_v14 = vld [vmem:[%s1550_s22 + $0x70] sm:$0xff]   ;;  %v1350_v16 = vld [vmem:[%s1550_s22 + $0x78] sm:$0xff]   ;;  %v792_v21 = vld [vmem:[%s1590_s26 + $0x80] sm:$0xff] }
  0x17   : > { %v778_v17 = vld [vmem:[%s1590_s26 + $0x10] sm:$0xff]  ;;  %v779_v22 = vld [vmem:[%s1590_s26 + $0x18] sm:$0xff]  ;;  %v777_v27 = vld [vmem:[%s1590_s26 + $0x8] sm:$0xff] }
  0x18   : > { %v794_v18 = vld [vmem:[%s1590_s26 + $0x90] sm:$0xff]  ;;  %v795_v26 = vld [vmem:[%s1590_s26 + $0x98] sm:$0xff]  ;;  %v793_v32 = vld [vmem:[%s1590_s26 + $0x88] sm:$0xff] }
  0x19   : > { %v782_v47 = vld [vmem:[%s1590_s26 + $0x30] sm:$0xff]  ;;  %v780_v50 = vld [vmem:[%s1590_s26 + $0x20] sm:$0xff]  ;;  %v783_v54 = vld [vmem:[%s1590_s26 + $0x38] sm:$0xff] }
  0x1a   : > { %v798_v49 = vld [vmem:[%s1590_s26 + $0xb0] sm:$0xff]  ;;  %v796_v53 = vld [vmem:[%s1590_s26 + $0xa0] sm:$0xff]  ;;  %v799_v58 = vld [vmem:[%s1590_s26 + $0xb8] sm:$0xff] }
  0x1b   : > { %1281 = vmatmul.mubr.msk.bf16.gmra.mrb[4].mxu0 %vm467_vm0, %v1341_v7  ;;  %v781_v63 = vld [vmem:[%s1590_s26 + $0x28] sm:$0xff] }
  0x1c   : > { %1297 = vmatmul.mubr.msk.bf16.gmra.mrb[4].mxu1 %vm467_vm0, %v1342_v8  ;;  %1284 = vmatprep.mubr.msk.bf16.mxu0 %vm467_vm0, %v1343_v9  ;;  %v797_v5 = vld [vmem:[%s1590_s26 + $0xa8] sm:$0xff] }
  0x1d   : > { %1300 = vmatprep.mubr.msk.bf16.mxu1 %vm467_vm0, %v1344_v10 }
  0x23   : > { %1285 = vmatmul.mubr.msk.bf16.gmra.mrb[8].mxu0 %vm467_vm0, %v1345_v11 }
  0x24   : > { %1301 = vmatmul.mubr.msk.bf16.gmra.mrb[8].mxu1 %vm467_vm0, %v1346_v12  ;;  %1288 = vmatprep.mubr.msk.bf16.mxu0 %vm467_vm0, %v1347_v13 }
  0x25   : > { %1304 = vmatprep.mubr.msk.bf16.mxu1 %vm467_vm0, %v1348_v14  ;;  %v786_v14 = vld [vmem:[%s1590_s26 + $0x50] sm:$0xff] }
  0x2b   : > { %1289 = vmatmul.mubr.msk.bf16.gmra.mrb[12].mxu0 %vm467_vm0, %v1349_v15 }
  0x2c   : > { %1305 = vmatmul.mubr.msk.bf16.gmra.mrb[12].mxu1 %vm467_vm0, %v1350_v16  ;;  %v802_v16 = vld [vmem:[%s1590_s26 + $0xd0] sm:$0xff] }
  0xe6   : > { %v1278_v20 = vpop.f32.mrb[0].mxu0 }
  0xe7   : > { %v810_v23 = vadd.f32 %v1278_v20, %v778_v17  ;;  %v1294_v24 = vpop.f32.mrb[0].mxu1  ;;  %v550_v25 = vpop.f32.mrb[1].mxu0  ;;  %v784_v17 = vld [vmem:[%s1590_s26 + $0x40] sm:$0xff] }
  0xe8   : > { %v826_v28 = vadd.f32 %v1294_v24, %v794_v18  ;;  %v808_v29 = vadd.f32 %v776_v19, %v550_v25  ;;  %v614_v30 = vpop.f32.mrb[1].mxu1  ;;  %v1279_v31 = vpop.f32.mrb[2].mxu0 }
  0xe9   : > { %v1225_v33 = vmul.f32 -1.442695, %v810_v23  ;;  %v824_v34 = vadd.f32 %v792_v21, %v614_v30  ;;  %v811_v35 = vadd.f32 %v1279_v31, %v779_v22  ;;  %v1295_v36 = vpop.f32.mrb[2].mxu1  ;;  %v553_v37 = vpop.f32.mrb[3].mxu0  ;;  %v800_v21 = vld [vmem:[%s1590_s26 + $0xc0] sm:$0xff] }
  0xea   : > { %v1241_v38 = vmul.f32 -1.442695, %v826_v28  ;;  %v1223_v39 = vmul.f32 -1.442695, %v808_v29  ;;  %v827_v40 = vadd.f32 %v1295_v36, %v795_v26  ;;  %v809_v41 = vadd.f32 %v777_v27, %v553_v37  ;;  %v617_v42 = vpop.f32.mrb[3].mxu1 }
  0xeb   : > { %1351 = vpow2.f32 %v1225_v33  ;;  %v1239_v43 = vmul.f32 -1.442695, %v824_v34  ;;  %v1226_v44 = vmul.f32 -1.442695, %v811_v35  ;;  %v825_v45 = vadd.f32 %v793_v32, %v617_v42  ;;  %v787_v33 = vld [vmem:[%s1590_s26 + $0x58] sm:$0xff] }
  0xec   : > { %1353 = vpow2.f32 %v1241_v38  ;;  %v1242_v46 = vmul.f32 -1.442695, %v827_v40  ;;  %v1224_v48 = vmul.f32 -1.442695, %v809_v41  ;;  %v803_v38 = vld [vmem:[%s1590_s26 + $0xd8] sm:$0xff]  ;;  %v785_v40 = vld [vmem:[%s1590_s26 + $0x48] sm:$0xff] }
  0xed   : > { %1355 = vpow2.f32 %v1223_v39  ;;  %v1240_v51 = vmul.f32 -1.442695, %v825_v45 }
  0xee   : > { %1357 = vpow2.f32 %v1239_v43  ;;  %v1282_v52 = vpop.f32.mrb[4].mxu0 }
  0xef   : > { %1359 = vpow2.f32 %v1226_v44  ;;  %v814_v55 = vadd.f32 %v1282_v52, %v782_v47  ;;  %v1298_v56 = vpop.f32.mrb[4].mxu1  ;;  %v566_v57 = vpop.f32.mrb[5].mxu0  ;;  %v801_v44 = vld [vmem:[%s1590_s26 + $0xc8] sm:$0xff]  ;;  %v790_v52 = vld [vmem:[%s1590_s26 + $0x70] sm:$0xff] }
  0xf0   : > { %1361 = vpow2.f32 %v1242_v46  ;;  %v830_v59 = vadd.f32 %v1298_v56, %v798_v49  ;;  %v812_v60 = vadd.f32 %v780_v50, %v566_v57  ;;  %v630_v61 = vpop.f32.mrb[5].mxu1  ;;  %v1283_v62 = vpop.f32.mrb[6].mxu0  ;;  %v806_v56 = vld [vmem:[%s1590_s26 + $0xf0] sm:$0xff]  ;;  %v788_v57 = vld [vmem:[%s1590_s26 + $0x60] sm:$0xff] }
  0xf1   : > { %1363 = vpow2.f32 %v1224_v48  ;;  %v1229_v0 = vmul.f32 -1.442695, %v814_v55  ;;  %v828_v1 = vadd.f32 %v796_v53, %v630_v61  ;;  %v815_v2 = vadd.f32 %v1283_v62, %v783_v54  ;;  %v1299_v3 = vpop.f32.mrb[6].mxu1  ;;  %v569_v4 = vpop.f32.mrb[7].mxu0  ;;  %v804_v61 = vld [vmem:[%s1590_s26 + $0xe0] sm:$0xff] }
  0xf2   : > { %1365 = vpow2.f32 %v1240_v51  ;;  %v1245_v6 = vmul.f32 -1.442695, %v830_v59  ;;  %v1227_v7 = vmul.f32 -1.442695, %v812_v60  ;;  %v1608_v8 = vadd.f32 %v1299_v3, %v799_v58  ;;  %v633_v9 = vpop.f32.mrb[7].mxu1 }
  0xf3   : > { %1367 = vpow2.f32 %v1229_v0  ;;  %v1243_v10 = vmul.f32 -1.442695, %v828_v1  ;;  %v1230_v11 = vmul.f32 -1.442695, %v815_v2  ;;  %v1610_v12 = vadd.f32 %v781_v63, %v569_v4 }
  0xf4   : > { %1369 = vpow2.f32 %v1245_v6  ;;  %v1612_v13 = vadd.f32 %v797_v5, %v633_v9 }
  0xf5   : > { %v1352_v15 = vpop.eup %1351  ;;  %1371 = vpow2.f32 %v1227_v7 }
  0xf6   : > { %v1354_v18 = vpop.eup %1353  ;;  %v938_v19 = vadd.f32 1.0, %v1352_v15  ;;  %1373 = vpow2.f32 %v1243_v10  ;;  %v1286_v20 = vpop.f32.mrb[8].mxu0  ;;  %v791_v10 = vld [vmem:[%s1590_s26 + $0x78] sm:$0xff] }
  0xf7   : > { %v1356_v22 = vpop.eup %1355  ;;  %v954_v23 = vadd.f32 1.0, %v1354_v18  ;;  %1375 = vpow2.f32 %v1230_v11  ;;  %v1618_v24 = vadd.f32 %v1286_v20, %v786_v14  ;;  %v1302_v25 = vpop.f32.mrb[8].mxu1  ;;  %v807_v11 = vld [vmem:[%s1590_s26 + $0xf8] sm:$0xff]  ;;  %v789_v14 = vld [vmem:[%s1590_s26 + $0x68] sm:$0xff] }
  0xf8   : > { %v582_v26 = vpop.f32.mrb[9].mxu0  ;;  %v1358_v27 = vpop.eup %1357  ;;  %1377 = vrcp.f32 %v938_v19  ;;  %v936_v28 = vadd.f32 1.0, %v1356_v22  ;;  %v1620_v29 = vadd.f32 %v1302_v25, %v802_v16  ;;  %v1228_v25 = vmul.f32 -1.442695, %v1610_v12 }
  0xf9   : > { %v1622_v30 = vadd.f32 %v784_v17, %v582_v26  ;;  %v646_v31 = vpop.f32.mrb[9].mxu1  ;;  %v1287_v32 = vpop.f32.mrb[10].mxu0  ;;  %1379 = vrcp.f32 %v954_v23  ;;  %v952_v35 = vadd.f32 1.0, %v1358_v27  ;;  %v1246_v17 = vmul.f32 -1.442695, %v1608_v8 }
  0xfa   : > { %v1360_v34 = vpop.eup %1359  ;;  %v1625_v36 = vadd.f32 %v800_v21, %v646_v31  ;;  %v1303_v37 = vpop.f32.mrb[10].mxu1  ;;  %1381 = vrcp.f32 %v936_v28  ;;  %v1630_v47 = vadd.f32 %v1287_v32, %v787_v33  ;;  %v805_v21 = vld [vmem:[%s1590_s26 + $0xe8] sm:$0xff]  ;;  %v1244_v28 = vmul.f32 -1.442695, %v1612_v13 }
  0xfb   : > { %v585_v39 = vpop.f32.mrb[11].mxu0  ;;  %v1362_v41 = vpop.eup %1361  ;;  %v939_v42 = vadd.f32 1.0, %v1360_v34  ;;  %1383 = vrcp.f32 %v952_v35  ;;  %v1632_v50 = vadd.f32 %v1303_v37, %v803_v38  ;;  %v1233_v33 = vmul.f32 -1.442695, %v1618_v24 }
  0xfc   : > { %v649_v43 = vpop.f32.mrb[11].mxu1  ;;  %v1364_v45 = vpop.eup %1363  ;;  %v955_v46 = vadd.f32 1.0, %v1362_v41  ;;  %v1634_v51 = vadd.f32 %v785_v40, %v585_v39  ;;  %v1249_v13 = vmul.f32 -1.442695, %v1620_v29  ;;  %v1231_v38 = vmul.f32 -1.442695, %v1622_v30 }
  0xfd   : > { %v1366_v48 = vpop.eup %1365  ;;  %1385 = vrcp.f32 %v939_v42  ;;  %v937_v49 = vadd.f32 1.0, %v1364_v45  ;;  %v1637_v55 = vadd.f32 %v801_v44, %v649_v43  ;;  %v1247_v24 = vmul.f32 -1.442695, %v1625_v36 }
  0xfe   : > { %v1368_v53 = vpop.eup %1367  ;;  %1387 = vrcp.f32 %v955_v46  ;;  %v953_v54 = vadd.f32 1.0, %v1366_v48  ;;  %v1290_v60 = vpop.f32.mrb[12].mxu0  ;;  %v1234_v41 = vmul.f32 -1.442695, %v1630_v47  ;;  %v1250_v29 = vmul.f32 -1.442695, %v1632_v50 }
  0xff   : > { %v1370_v58 = vpop.eup %1369  ;;  %1389 = vrcp.f32 %v937_v49  ;;  %v942_v59 = vadd.f32 1.0, %v1368_v53  ;;  %v1642_v0 = vadd.f32 %v1290_v60, %v790_v52  ;;  %v1306_v1 = vpop.f32.mrb[12].mxu1  ;;  %v1232_v30 = vmul.f32 -1.442695, %v1634_v51 }
 0x100   : > { %v1372_v62 = vpop.eup %1371  ;;  %1391 = vrcp.f32 %v953_v54  ;;  %v958_v63 = vadd.f32 1.0, %v1370_v58  ;;  %v598_v2 = vpop.f32.mrb[13].mxu0  ;;  %v1651_v5 = vadd.f32 %v1306_v1, %v806_v56  ;;  %v1248_v36 = vmul.f32 -1.442695, %v1637_v55 }
 0x101   : > { %v1374_v3 = vpop.eup %1373  ;;  %1393 = vrcp.f32 %v942_v59  ;;  %v940_v4 = vadd.f32 1.0, %v1372_v62  ;;  %v1653_v6 = vadd.f32 %v788_v57, %v598_v2  ;;  %v662_v7 = vpop.f32.mrb[13].mxu1  ;;  %v1237_v46 = vmul.f32 -1.442695, %v1642_v0 }
 0x102   : > { %v1291_v9 = vpop.f32.mrb[14].mxu0  ;;  %v1376_v15 = vpop.eup %1375  ;;  %1395 = vrcp.f32 %v958_v63  ;;  %v956_v16 = vadd.f32 1.0, %v1374_v3  ;;  %v1659_v18 = vadd.f32 %v804_v61, %v662_v7  ;;  %v1253_v48 = vmul.f32 -1.442695, %v1651_v5 }
 0x103   : > { %v1307_v19 = vpop.f32.mrb[14].mxu1  ;;  %v601_v20 = vpop.f32.mrb[15].mxu0  ;;  %1397 = vrcp.f32 %v940_v4  ;;  %v943_v23 = vadd.f32 1.0, %v1376_v15  ;;  %v1665_v8 = vadd.f32 %v1291_v9, %v791_v10  ;;  %v1235_v15 = vmul.f32 -1.442695, %v1653_v6 }
 0x104   : > { %v1378_v22 = vpop.eup %1377  ;;  %v665_v26 = vpop.f32.mrb[15].mxu1  ;;  %1399 = vrcp.f32 %v956_v16  ;;  %v1667_v31 = vadd.f32 %v1307_v19, %v807_v11  ;;  %v1671_v34 = vadd.f32 %v789_v14, %v601_v20  ;;  %v1251_v19 = vmul.f32 -1.442695, %v1659_v18 }
 0x105   : > { %v1380_v27 = vpop.eup %1379  ;;  %1034 = vst [vmem:[%s1649_s29 + $0x10] sm:$0xff] %v1378_v22  ;;  %1401 = vrcp.f32 %v943_v23  ;;  %v1673_v12 = vadd.f32 %v805_v21, %v665_v26  ;;  %v1238_v21 = vmul.f32 -1.442695, %v1665_v8 }
 0x106   : > { %v1382_v32 = vpop.eup %1381  ;;  %1050 = vst [vmem:[%s1649_s29 + $0x90] sm:$0xff] %v1380_v27  ;;  %1403 = vpow2.f32 %v1246_v17  ;;  %v1254_v23 = vmul.f32 -1.442695, %v1667_v31 }
 0x107   : > { %v1384_v35 = vpop.eup %1383  ;;  %1032 = vst [vmem:[%s1649_s29] sm:$0xff] %v1382_v32  ;;  %1405 = vpow2.f32 %v1228_v25  ;;  %v1236_v25 = vmul.f32 -1.442695, %v1671_v34  ;;  %v1252_v26 = vmul.f32 -1.442695, %v1673_v12 }
 0x108   : > { %v1386_v37 = vpop.eup %1385  ;;  %1048 = vst [vmem:[%s1649_s29 + $0x80] sm:$0xff] %v1384_v35  ;;  %1407 = vpow2.f32 %v1244_v28 }
 0x109   : > { %v1388_v39 = vpop.eup %1387  ;;  %1035 = vst [vmem:[%s1649_s29 + $0x18] sm:$0xff] %v1386_v37  ;;  %1409 = vpow2.f32 %v1233_v33 }
 0x10a   : > { %v1390_v40 = vpop.eup %1389  ;;  %1051 = vst [vmem:[%s1649_s29 + $0x98] sm:$0xff] %v1388_v39  ;;  %1411 = vpow2.f32 %v1249_v13 }
 0x10b   : > { %v1392_v42 = vpop.eup %1391  ;;  %1033 = vst [vmem:[%s1649_s29 + $0x8] sm:$0xff] %v1390_v40  ;;  %1413 = vpow2.f32 %v1231_v38 }
 0x10c   : > { %v1394_v43 = vpop.eup %1393  ;;  %1049 = vst [vmem:[%s1649_s29 + $0x88] sm:$0xff] %v1392_v42  ;;  %1415 = vpow2.f32 %v1247_v24 }
 0x10d   : > { %v1396_v44 = vpop.eup %1395  ;;  %1038 = vst [vmem:[%s1649_s29 + $0x30] sm:$0xff] %v1394_v43  ;;  %1417 = vpow2.f32 %v1234_v41 }
 0x10e   : > { %v1398_v45 = vpop.eup %1397  ;;  %1054 = vst [vmem:[%s1649_s29 + $0xb0] sm:$0xff] %v1396_v44  ;;  %1419 = vpow2.f32 %v1250_v29 }
 0x10f   : > { %v1400_v47 = vpop.eup %1399  ;;  %1036 = vst [vmem:[%s1649_s29 + $0x20] sm:$0xff] %v1398_v45  ;;  %1421 = vpow2.f32 %v1232_v30 }
 0x110   : > { %v1402_v49 = vpop.eup %1401  ;;  %1052 = vst [vmem:[%s1649_s29 + $0xa0] sm:$0xff] %v1400_v47  ;;  %1423 = vpow2.f32 %v1248_v36 }
 0x111   : > { %v1404_v50 = vpop.eup %1403  ;;  %1039 = vst [vmem:[%s1649_s29 + $0x38] sm:$0xff] %v1402_v49  ;;  %1425 = vpow2.f32 %v1237_v46 }
 0x112   : > { %v1406_v51 = vpop.eup %1405  ;;  %v959_v52 = vadd.f32 1.0, %v1404_v50  ;;  %1427 = vpow2.f32 %v1253_v48 }
 0x113   : > { %v1408_v53 = vpop.eup %1407  ;;  %v941_v54 = vadd.f32 1.0, %v1406_v51 }
 0x114   : > { %v1410_v55 = vpop.eup %1409  ;;  %1429 = vrcp.f32 %v959_v52  ;;  %v957_v56 = vadd.f32 1.0, %v1408_v53 }
 0x115   : > { %v1412_v57 = vpop.eup %1411  ;;  %1431 = vrcp.f32 %v941_v54  ;;  %v946_v58 = vadd.f32 1.0, %v1410_v55 }
 0x116   : > { %v1414_v59 = vpop.eup %1413  ;;  %1433 = vrcp.f32 %v957_v56  ;;  %v962_v60 = vadd.f32 1.0, %v1412_v57 }
 0x117   : > { %v1416_v61 = vpop.eup %1415  ;;  %1435 = vrcp.f32 %v946_v58  ;;  %v944_v62 = vadd.f32 1.0, %v1414_v59 }
 0x118   : > { %v1418_v63 = vpop.eup %1417  ;;  %1437 = vrcp.f32 %v962_v60  ;;  %v960_v0 = vadd.f32 1.0, %v1416_v61 }
 0x119   : > { %v1420_v1 = vpop.eup %1419  ;;  %1439 = vrcp.f32 %v944_v62  ;;  %v947_v2 = vadd.f32 1.0, %v1418_v63 }
 0x11a   : > { %v1422_v3 = vpop.eup %1421  ;;  %1441 = vrcp.f32 %v960_v0  ;;  %v963_v4 = vadd.f32 1.0, %v1420_v1 }
 0x11b   : > { %v1424_v5 = vpop.eup %1423  ;;  %1443 = vrcp.f32 %v947_v2  ;;  %v945_v7 = vadd.f32 1.0, %v1422_v3 }
 0x11c   : > { %v1426_v9 = vpop.eup %1425  ;;  %1445 = vrcp.f32 %v963_v4  ;;  %v961_v10 = vadd.f32 1.0, %v1424_v5 }
 0x11d   : > { %v1428_v11 = vpop.eup %1427  ;;  %1447 = vrcp.f32 %v945_v7  ;;  %v950_v14 = vadd.f32 1.0, %v1426_v9 }
 0x11e   : > { %v1430_v16 = vpop.eup %1429  ;;  %1449 = vrcp.f32 %v961_v10  ;;  %v966_v17 = vadd.f32 1.0, %v1428_v11 }
 0x11f   : > { %v1432_v20 = vpop.eup %1431  ;;  %1055 = vst [vmem:[%s1649_s29 + $0xb8] sm:$0xff] %v1430_v16  ;;  %1451 = vrcp.f32 %v950_v14 }
 0x120   : > { %v1434_v22 = vpop.eup %1433  ;;  %1037 = vst [vmem:[%s1649_s29 + $0x28] sm:$0xff] %v1432_v20  ;;  %1453 = vrcp.f32 %v966_v17 }
 0x121   : > { %v1436_v6 = vpop.eup %1435  ;;  %1053 = vst [vmem:[%s1649_s29 + $0xa8] sm:$0xff] %v1434_v22  ;;  %1455 = vpow2.f32 %v1235_v15 }
 0x122   : > { %v1438_v18 = vpop.eup %1437  ;;  %1042 = vst [vmem:[%s1649_s29 + $0x50] sm:$0xff] %v1436_v6  ;;  %1457 = vpow2.f32 %v1251_v19 }
 0x123   : > { %v1440_v27 = vpop.eup %1439  ;;  %1058 = vst [vmem:[%s1649_s29 + $0xd0] sm:$0xff] %v1438_v18  ;;  %1459 = vpow2.f32 %v1238_v21 }
 0x124   : > { %v1442_v28 = vpop.eup %1441  ;;  %1040 = vst [vmem:[%s1649_s29 + $0x40] sm:$0xff] %v1440_v27  ;;  %1461 = vpow2.f32 %v1254_v23 }
 0x125   : > { %v1444_v8 = vpop.eup %1443  ;;  %1056 = vst [vmem:[%s1649_s29 + $0xc0] sm:$0xff] %v1442_v28  ;;  %1463 = vpow2.f32 %v1236_v25 }
 0x126   : > { %v1446_v31 = vpop.eup %1445  ;;  %1043 = vst [vmem:[%s1649_s29 + $0x58] sm:$0xff] %v1444_v8  ;;  %1465 = vpow2.f32 %v1252_v26 }
 0x127   : > { %v1448_v32 = vpop.eup %1447  ;;  %1059 = vst [vmem:[%s1649_s29 + $0xd8] sm:$0xff] %v1446_v31 }
 0x128   : > { %v1450_v33 = vpop.eup %1449  ;;  %1041 = vst [vmem:[%s1649_s29 + $0x48] sm:$0xff] %v1448_v32 }
 0x129   : > { %v1452_v34 = vpop.eup %1451  ;;  %1057 = vst [vmem:[%s1649_s29 + $0xc8] sm:$0xff] %v1450_v33 }
 0x12a   : > { %v1454_v12 = vpop.eup %1453  ;;  %1046 = vst [vmem:[%s1649_s29 + $0x70] sm:$0xff] %v1452_v34 }
 0x12b   : > { %v1456_v35 = vpop.eup %1455  ;;  %1062 = vst [vmem:[%s1649_s29 + $0xf0] sm:$0xff] %v1454_v12 }
 0x12c   : > { %v1458_v13 = vpop.eup %1457  ;;  %v948_v37 = vadd.f32 1.0, %v1456_v35 }
 0x12d   : > { %v1460_v38 = vpop.eup %1459  ;;  %v964_v39 = vadd.f32 1.0, %v1458_v13 }
 0x12e   : > { %v1462_v24 = vpop.eup %1461  ;;  %1467 = vrcp.f32 %v948_v37  ;;  %v951_v40 = vadd.f32 1.0, %v1460_v38 }
 0x12f   : > { %v1464_v41 = vpop.eup %1463  ;;  %1469 = vrcp.f32 %v964_v39  ;;  %v967_v42 = vadd.f32 1.0, %v1462_v24 }
 0x130   : > { %v1466_v29 = vpop.eup %1465  ;;  %1471 = vrcp.f32 %v951_v40  ;;  %v949_v43 = vadd.f32 1.0, %v1464_v41 }
 0x131   : > { %1473 = vrcp.f32 %v967_v42  ;;  %v965_v30 = vadd.f32 1.0, %v1466_v29 }
 0x132   : > { %1475 = vrcp.f32 %v949_v43 }
 0x133   : > { %1477 = vrcp.f32 %v965_v30 }
 0x138   : > { %v1468_v44 = vpop.eup %1467 }
 0x139   : > { %v1470_v36 = vpop.eup %1469  ;;  %1044 = vst [vmem:[%s1649_s29 + $0x60] sm:$0xff] %v1468_v44 }
 0x13a   : > { %v1472_v45 = vpop.eup %1471  ;;  %1060 = vst [vmem:[%s1649_s29 + $0xe0] sm:$0xff] %v1470_v36 }
 0x13b   : > { %v1474_v46 = vpop.eup %1473  ;;  %1047 = vst [vmem:[%s1649_s29 + $0x78] sm:$0xff] %v1472_v45 }
 0x13c   : > { %v1476_v47 = vpop.eup %1475  ;;  %1063 = vst [vmem:[%s1649_s29 + $0xf8] sm:$0xff] %v1474_v46 }
 0x13d   : > { %v1478_v48 = vpop.eup %1477  ;;  %1045 = vst [vmem:[%s1649_s29 + $0x68] sm:$0xff] %v1476_v47 }
 0x13e   : > { %1061 = vst [vmem:[%s1649_s29 + $0xe8] sm:$0xff] %v1478_v48 }
 0x13f PF: > { %s13_s14 = sadd.s32 1, %s1501_s14   ;;  %s1733_s12 = smov %s1497_s13 }
 0x140   : > { %p10_p5 = scmp.ge.s32.totalorder %s13_s14, 4   ;;  %s1734_s13 = smov %s1736_s15 }
 0x142   :  { %12 = sbr.rel (!%p10_p5) target bundleno = 2 (0x2), region = 76 }

</bundles_post_ra>
